<compile_context>
chip_gen: v5e
topology: v5e:2x2
jax: 0.10.0
libtpu: 0.0.40
codegen_flags: <defaults>
</compile_context>

<pallas_src>
import functools
import math

import jax
import jax.numpy as jnp
from jax import lax
from jax.experimental import pallas as pl
from jax.experimental.pallas import tpu as pltpu


HP = 128          # lane-aligned per-gate block width used inside the kernel
IN_PAD = 128      # layer-1 input features padded to a full lane tile
SUBLANE = 8       # f32 sublane tile
# Host-side per-gate-block prescale: i/f/o columns carry the 0.5 of
# sigmoid(z) = 0.5*tanh(z/2) + 0.5, so the kernel issues a single tanh over
# the whole 4-gate slab and only a fused 0.5*t + 0.5 on the i/f/o slices.
GATE_PRESCALE = (0.5, 0.5, 1.0, 0.5)      # gate order [i, f, g, o]


# ----------------------------------------------------------------------------
# Fused kernel: LSTM(4->128) -> LSTM(128->64, lane-padded to 128) -> Linear.
# All activations stay in vregs / VMEM scratch; only x and the final
# (T*Bp, 1) result cross the HBM boundary.
# ----------------------------------------------------------------------------
def fused_lstm_kernel(x_ref, w_ih1_ref, w_hh1_ref, b1_ref,
                      w_ih2_ref, w_hh2_ref, b2_ref, fc_w_ref, fc_b_ref,
                      out_ref, gx1_sc, *, T, Bp):
    Hp = HP

    # ---- layer-1 input projection, hoisted out of the recurrence -----------
    # One (T*Bp, IN_PAD) @ (IN_PAD, 4*Hp) MXU call; per-step rows are read
    # back from VMEM off the critical path.
    gx1_sc[...] = (jnp.dot(x_ref[...], w_ih1_ref[...],
                           preferred_element_type=jnp.float32)
                   + b1_ref[...])

    # Broadcasts hoisted out of the unrolled loop (JAX does not CSE
    # broadcast_in_dim).
    b2 = jnp.broadcast_to(b2_ref[...], (Bp, 4 * Hp))
    fc_w = jnp.broadcast_to(fc_w_ref[...], (Bp, Hp))
    fc_b = jnp.broadcast_to(fc_b_ref[...], (Bp, 1))

    def cell(gates, c_prev):
        # i/f/o columns were pre-scaled by 0.5 at pack time, so one tanh over
        # the (Bp, 4*Hp) slab yields tanh(z/2) for i/f/o and tanh(z) for g.
        th = jnp.tanh(gates)
        i = 0.5 * th[:, 0 * Hp:1 * Hp] + 0.5
        f = 0.5 * th[:, 1 * Hp:2 * Hp] + 0.5
        g = th[:, 2 * Hp:3 * Hp]
        o = 0.5 * th[:, 3 * Hp:4 * Hp] + 0.5
        c_new = f * c_prev + i * g
        h_new = o * jnp.tanh(c_new)
        return h_new, c_new

    zeros = jnp.zeros((Bp, Hp), jnp.float32)
    h1, c1 = zeros, zeros          # register-resident recurrent state
    h2, c2 = zeros, zeros

    # Fully unrolled time loop (T is static).  Layer-2 step t depends only on
    # h1[t] and h2[t-1], so the two recurrences interleave at a 1-step skew
    # and layer-2's MXU/EUP/VPU work (incl. its per-step input projection and
    # the FC lane-reduction) fills the bubbles of layer-1's serial chain.
    for t in range(T):
        lo = t * Bp

        # ---- layer 1: only h1 @ W_hh1 sits on the serial dependency chain --
        gates1 = gx1_sc[lo:lo + Bp, :] + jnp.dot(
            h1, w_hh1_ref[...], preferred_element_type=jnp.float32)
        h1, c1 = cell(gates1, c1)

        # ---- layer 2: per-step input projection of the fresh h1 ------------
        gates2 = (jnp.dot(h1, w_ih2_ref[...], preferred_element_type=jnp.float32)
                  + jnp.dot(h2, w_hh2_ref[...], preferred_element_type=jnp.float32)
                  + b2)
        h2, c2 = cell(gates2, c2)

        # ---- fused FC head: elementwise mul + lane reduction ----------------
        z = jnp.sum(h2 * fc_w, axis=-1, keepdims=True) + fc_b
        out_ref[lo:lo + Bp, :] = z.astype(out_ref.dtype)

    # TODO(synk): inter-layer dropout (p=0.2) is identity at inference time.


# ----------------------------------------------------------------------------
# Forward pass (batch_first, eval-mode dropout), one pallas_call total.
# ----------------------------------------------------------------------------
@jax.jit
def lstm_model_forward(packed, x):
    B, T, I = x.shape
    Bp = max(SUBLANE, ((B + SUBLANE - 1) // SUBLANE) * SUBLANE)

    # time-major + pad batch to the f32 sublane tile and features to a full
    # lane tile; flatten to a 2-D time-major slab
    x_tm = jnp.transpose(x, (1, 0, 2)).astype(jnp.float32)        # (T, B, I)
    x_tm = jnp.pad(x_tm, ((0, 0), (0, Bp - B), (0, IN_PAD - I)))  # (T, Bp, IN_PAD)
    x2d = x_tm.reshape(T * Bp, IN_PAD)

    kernel = functools.partial(fused_lstm_kernel, T=T, Bp=Bp)

    out = pl.pallas_call(
        kernel,
        out_shape=jax.ShapeDtypeStruct((T * Bp, 1), jnp.float32),
        in_specs=[pl.BlockSpec(memory_space=pltpu.MemorySpace.VMEM)] * 9,
        out_specs=pl.BlockSpec(memory_space=pltpu.MemorySpace.VMEM),
        scratch_shapes=[
            pltpu.VMEM((T * Bp, 4 * HP), jnp.float32),  # hoisted layer-1 gate inputs
        ],
    )(x2d, packed["w_ih1"], packed["w_hh1"], packed["b1"],
      packed["w_ih2"], packed["w_hh2"], packed["b2"],
      packed["fc_w"], packed["fc_b"])

    # TODO(synk): add a "parallel" batch-tile grid so v7x's second TensorCore
    # does work once the real batch grows past a few hundred rows.
    out = out.reshape(T, Bp)[:, :B]          # drop batch padding -> (T, B)
    return jnp.transpose(out)[:, :, None]    # (B, T, 1), batch_first


# ----------------------------------------------------------------------------
# Parameters: PyTorch-default init (U(-1/sqrt(H), 1/sqrt(H))) kept in raw
# PyTorch layout, then packed/padded into the lane-aligned kernel layout.
# ----------------------------------------------------------------------------
def init_raw_params(key, input_size=4, hidden_sizes=(128, 64), output_size=1):
    raw = {"lstm": []}
    in_size = input_size
    for H in hidden_sizes:
        key, k1, k2, k3, k4 = jax.random.split(key, 5)
        bound = 1.0 / math.sqrt(H)
        w_ih = jax.random.uniform(k1, (4 * H, in_size), jnp.float32, -bound, bound)
        w_hh = jax.random.uniform(k2, (4 * H, H), jnp.float32, -bound, bound)
        b_ih = jax.random.uniform(k3, (4 * H,), jnp.float32, -bound, bound)
        b_hh = jax.random.uniform(k4, (4 * H,), jnp.float32, -bound, bound)
        raw["lstm"].append((w_ih, w_hh, b_ih, b_hh))
        in_size = H
    key, k1, k2 = jax.random.split(key, 3)
    bound = 1.0 / math.sqrt(hidden_sizes[-1])
    raw["fc_w"] = jax.random.uniform(k1, (output_size, hidden_sizes[-1]),
                                     jnp.float32, -bound, bound)
    raw["fc_b"] = jax.random.uniform(k2, (output_size,), jnp.float32, -bound, bound)
    return raw


def pack_params(raw):
    """Pack PyTorch-layout weights into the lane-aligned kernel layout.

    * Each gate block is zero-padded to HP=128 lanes.  The padded lanes
      provably stay 0 through the recurrence (pre-activation 0 -> g=tanh(0)=0,
      c=0, h=0) -- this invariant relies on zero initial state and zero
      padding in biases/weights; keep it if modifying.
    * i/f/o gate columns of W_ih, W_hh and the folded bias are pre-scaled by
      0.5 (host-side, zero runtime cost) so the kernel can use the exact
      identity sigmoid(z) = 0.5*tanh(z/2) + 0.5 with ONE tanh per gate slab.
    """
    def pack_cols(w, H):                      # w: (rows, 4H), gate order [i,f,g,o]
        blocks = []
        for k in range(4):
            g = w[:, k * H:(k + 1) * H] * GATE_PRESCALE[k]
            blocks.append(jnp.pad(g, ((0, 0), (0, HP - H))))
        return jnp.concatenate(blocks, axis=1)

    packed = {}
    for n, (w_ih, w_hh, b_ih, b_hh) in enumerate(raw["lstm"], start=1):
        H = w_hh.shape[1]
        in_size = w_ih.shape[1]
        in_pad = IN_PAD if n == 1 else HP
        w_ih_p = pack_cols(w_ih.T, H)                                        # (in_size, 4*HP)
        packed[f"w_ih{n}"] = jnp.pad(w_ih_p, ((0, in_pad - in_size), (0, 0)))  # (in_pad, 4*HP)
        packed[f"w_hh{n}"] = jnp.pad(pack_cols(w_hh.T, H), ((0, HP - H), (0, 0)))  # (HP, 4*HP)
        packed[f"b{n}"] = pack_cols((b_ih + b_hh)[None, :], H)               # (1, 4*HP)
    h_last = raw["lstm"][-1][1].shape[1]
    packed["fc_w"] = jnp.pad(raw["fc_w"], ((0, 0), (0, HP - h_last)))        # (1, HP)
    packed["fc_b"] = raw["fc_b"].reshape(1, 1)
    return packed


# ----------------------------------------------------------------------------
# Pure-JAX reference (matches PyTorch nn.LSTM / nn.Linear inference).
# ----------------------------------------------------------------------------
def lstm_reference(x, raw):
    h_seq = x.astype(jnp.float32)
    for (w_ih, w_hh, b_ih, b_hh) in raw["lstm"]:
        H = w_hh.shape[1]
        B = h_seq.shape[0]

        def cell(carry, x_t):
            h, c = carry
            gates = x_t @ w_ih.T + h @ w_hh.T + b_ih + b_hh
            i, f, g, o = jnp.split(gates, 4, axis=-1)
            i, f, o = jax.nn.sigmoid(i), jax.nn.sigmoid(f), jax.nn.sigmoid(o)
            g = jnp.tanh(g)
            c = f * c + i * g
            h = o * jnp.tanh(c)
            return (h, c), h

        h0 = jnp.zeros((B, H), jnp.float32)
        c0 = jnp.zeros((B, H), jnp.float32)
        _, ys = lax.scan(cell, (h0, c0), jnp.transpose(h_seq, (1, 0, 2)))
        h_seq = jnp.transpose(ys, (1, 0, 2))
    return h_seq @ raw["fc_w"].T + raw["fc_b"]


if __name__ == "__main__":
    key = jax.random.PRNGKey(0)
    key, pkey, xkey = jax.random.split(key, 3)

    B, T, INPUT = 2, 8, 4
    raw = init_raw_params(pkey, input_size=INPUT, hidden_sizes=(128, 64),
                          output_size=1)
    packed = pack_params(raw)

    x = jax.random.normal(xkey, (B, T, INPUT), jnp.float32)

    out = jax.block_until_ready(lstm_model_forward(packed, x))

    assert out.shape == (B, T, 1), out.shape
    assert out.dtype == jnp.float32

    ref = jax.block_until_ready(lstm_reference(x, raw))
    max_err = float(jnp.max(jnp.abs(out - ref)))
    assert max_err < 1e-4, f"mismatch vs reference: {max_err}"

    print("KERNEL_OK")
</pallas_src>

<mosaic_0001>
module attributes {stable_mosaic.version = 11 : i64} {
  func.func @fused_lstm_kernel(%arg0: memref<64x128xf32, #tpu.memory_space<vmem>>, %arg1: memref<128x512xf32, #tpu.memory_space<vmem>>, %arg2: memref<128x512xf32, #tpu.memory_space<vmem>>, %arg3: memref<1x512xf32, #tpu.memory_space<vmem>>, %arg4: memref<128x512xf32, #tpu.memory_space<vmem>>, %arg5: memref<128x512xf32, #tpu.memory_space<vmem>>, %arg6: memref<1x512xf32, #tpu.memory_space<vmem>>, %arg7: memref<1x128xf32, #tpu.memory_space<vmem>>, %arg8: memref<1x1xf32, #tpu.memory_space<vmem>>, %arg9: memref<64x1xf32, #tpu.memory_space<vmem>>, %arg10: memref<64x512xf32, #tpu.memory_space<vmem>>) attributes {dimension_semantics = [], scalar_prefetch = 0 : i64, scratch_operands = 1 : i64, tpu.core_type = #tpu.core_type<tc>} {
    %c0 = arith.constant 0 : index
    %c0_0 = arith.constant 0 : index
    %0 = vector.load %arg0[%c0, %c0_0] : memref<64x128xf32, #tpu.memory_space<vmem>>, vector<64x128xf32>
    %c0_1 = arith.constant 0 : index
    %c0_2 = arith.constant 0 : index
    %1 = vector.load %arg1[%c0_1, %c0_2] : memref<128x512xf32, #tpu.memory_space<vmem>>, vector<128x512xf32>
    %cst = arith.constant dense<0.000000e+00> : vector<64x512xf32>
    %2 = tpu.matmul %0, %1, %cst {dimension_numbers = #tpu.dot_dimension_numbers<[1], [0], [0], [1], [0, 0, 1, 1], [], []>} : vector<64x128xf32>, vector<128x512xf32>, vector<64x512xf32> -> vector<64x512xf32>
    %c0_3 = arith.constant 0 : index
    %c0_4 = arith.constant 0 : index
    %3 = vector.load %arg3[%c0_3, %c0_4] : memref<1x512xf32, #tpu.memory_space<vmem>>, vector<1x512xf32>
    %4 = vector.broadcast %3 : vector<1x512xf32> to vector<64x512xf32>
    %5 = arith.addf %2, %4 : vector<64x512xf32>
    %c0_5 = arith.constant 0 : index
    %c0_6 = arith.constant 0 : index
    %6 = vector.load %arg10[%c0_5, %c0_6] : memref<64x512xf32, #tpu.memory_space<vmem>>, vector<64x512xf32>
    tpu.vector_store %arg10[%c0_5, %c0_6], %5 {strides = array<i32>} : memref<64x512xf32, #tpu.memory_space<vmem>>, vector<64x512xf32>,
    %c0_7 = arith.constant 0 : index
    %c0_8 = arith.constant 0 : index
    %7 = vector.load %arg6[%c0_7, %c0_8] : memref<1x512xf32, #tpu.memory_space<vmem>>, vector<1x512xf32>
    %8 = vector.shape_cast %7 : vector<1x512xf32> to vector<1x512xf32>
    %9 = vector.broadcast %8 : vector<1x512xf32> to vector<8x512xf32>
    %c0_9 = arith.constant 0 : index
    %c0_10 = arith.constant 0 : index
    %10 = vector.load %arg7[%c0_9, %c0_10] : memref<1x128xf32, #tpu.memory_space<vmem>>, vector<1x128xf32>
    %11 = vector.shape_cast %10 : vector<1x128xf32> to vector<1x128xf32>
    %12 = vector.broadcast %11 : vector<1x128xf32> to vector<8x128xf32>
    %c0_11 = arith.constant 0 : index
    %c0_12 = arith.constant 0 : index
    %13 = vector.load %arg8[%c0_11, %c0_12] : memref<1x1xf32, #tpu.memory_space<vmem>>, vector<1x1xf32>
    %14 = vector.shape_cast %13 : vector<1x1xf32> to vector<1x1xf32>
    %15 = vector.broadcast %14 : vector<1x1xf32> to vector<8x1xf32>
    %cst_13 = arith.constant 0.000000e+00 : f32
    %16 = vector.broadcast %cst_13 : f32 to vector<8x128xf32>
    %c0_14 = arith.constant 0 : index
    %c0_15 = arith.constant 0 : index
    %17 = vector.load %arg10[%c0_14, %c0_15] : memref<64x512xf32, #tpu.memory_space<vmem>>, vector<8x512xf32>
    %c0_16 = arith.constant 0 : index
    %c0_17 = arith.constant 0 : index
    %18 = vector.load %arg2[%c0_16, %c0_17] : memref<128x512xf32, #tpu.memory_space<vmem>>, vector<128x512xf32>
    %cst_18 = arith.constant dense<0.000000e+00> : vector<8x512xf32>
    %19 = tpu.matmul %16, %18, %cst_18 {dimension_numbers = #tpu.dot_dimension_numbers<[1], [0], [0], [1], [0, 0, 1, 1], [], []>} : vector<8x128xf32>, vector<128x512xf32>, vector<8x512xf32> -> vector<8x512xf32>
    %20 = arith.addf %17, %19 : vector<8x512xf32>
    %21 = math.tanh %20 : vector<8x512xf32>
    %22 = vector.extract_strided_slice %21 {offsets = [0, 0], sizes = [8, 128], strides = [1, 1]} : vector<8x512xf32> to vector<8x128xf32>
    %cst_19 = arith.constant 5.000000e-01 : f32
    %23 = vector.broadcast %cst_19 : f32 to vector<8x128xf32>
    %24 = arith.mulf %23, %22 : vector<8x128xf32>
    %cst_20 = arith.constant 5.000000e-01 : f32
    %25 = vector.broadcast %cst_20 : f32 to vector<8x128xf32>
    %26 = arith.addf %24, %25 : vector<8x128xf32>
    %27 = vector.extract_strided_slice %21 {offsets = [0, 128], sizes = [8, 128], strides = [1, 1]} : vector<8x512xf32> to vector<8x128xf32>
    %cst_21 = arith.constant 5.000000e-01 : f32
    %28 = vector.broadcast %cst_21 : f32 to vector<8x128xf32>
    %29 = arith.mulf %28, %27 : vector<8x128xf32>
    %cst_22 = arith.constant 5.000000e-01 : f32
    %30 = vector.broadcast %cst_22 : f32 to vector<8x128xf32>
    %31 = arith.addf %29, %30 : vector<8x128xf32>
    %32 = vector.extract_strided_slice %21 {offsets = [0, 256], sizes = [8, 128], strides = [1, 1]} : vector<8x512xf32> to vector<8x128xf32>
    %33 = vector.extract_strided_slice %21 {offsets = [0, 384], sizes = [8, 128], strides = [1, 1]} : vector<8x512xf32> to vector<8x128xf32>
    %cst_23 = arith.constant 5.000000e-01 : f32
    %34 = vector.broadcast %cst_23 : f32 to vector<8x128xf32>
    %35 = arith.mulf %34, %33 : vector<8x128xf32>
    %cst_24 = arith.constant 5.000000e-01 : f32
    %36 = vector.broadcast %cst_24 : f32 to vector<8x128xf32>
    %37 = arith.addf %35, %36 : vector<8x128xf32>
    %38 = arith.mulf %31, %16 : vector<8x128xf32>
    %39 = arith.mulf %26, %32 : vector<8x128xf32>
    %40 = arith.addf %38, %39 : vector<8x128xf32>
    %41 = math.tanh %40 : vector<8x128xf32>
    %42 = arith.mulf %37, %41 : vector<8x128xf32>
    %c0_25 = arith.constant 0 : index
    %c0_26 = arith.constant 0 : index
    %43 = vector.load %arg4[%c0_25, %c0_26] : memref<128x512xf32, #tpu.memory_space<vmem>>, vector<128x512xf32>
    %cst_27 = arith.constant dense<0.000000e+00> : vector<8x512xf32>
    %44 = tpu.matmul %42, %43, %cst_27 {dimension_numbers = #tpu.dot_dimension_numbers<[1], [0], [0], [1], [0, 0, 1, 1], [], []>} : vector<8x128xf32>, vector<128x512xf32>, vector<8x512xf32> -> vector<8x512xf32>
    %c0_28 = arith.constant 0 : index
    %c0_29 = arith.constant 0 : index
    %45 = vector.load %arg5[%c0_28, %c0_29] : memref<128x512xf32, #tpu.memory_space<vmem>>, vector<128x512xf32>
    %cst_30 = arith.constant dense<0.000000e+00> : vector<8x512xf32>
    %46 = tpu.matmul %16, %45, %cst_30 {dimension_numbers = #tpu.dot_dimension_numbers<[1], [0], [0], [1], [0, 0, 1, 1], [], []>} : vector<8x128xf32>, vector<128x512xf32>, vector<8x512xf32> -> vector<8x512xf32>
    %47 = arith.addf %44, %46 : vector<8x512xf32>
    %48 = arith.addf %47, %9 : vector<8x512xf32>
    %49 = math.tanh %48 : vector<8x512xf32>
    %50 = vector.extract_strided_slice %49 {offsets = [0, 0], sizes = [8, 128], strides = [1, 1]} : vector<8x512xf32> to vector<8x128xf32>
    %cst_31 = arith.constant 5.000000e-01 : f32
    %51 = vector.broadcast %cst_31 : f32 to vector<8x128xf32>
    %52 = arith.mulf %51, %50 : vector<8x128xf32>
    %cst_32 = arith.constant 5.000000e-01 : f32
    %53 = vector.broadcast %cst_32 : f32 to vector<8x128xf32>
    %54 = arith.addf %52, %53 : vector<8x128xf32>
    %55 = vector.extract_strided_slice %49 {offsets = [0, 128], sizes = [8, 128], strides = [1, 1]} : vector<8x512xf32> to vector<8x128xf32>
    %cst_33 = arith.constant 5.000000e-01 : f32
    %56 = vector.broadcast %cst_33 : f32 to vector<8x128xf32>
    %57 = arith.mulf %56, %55 : vector<8x128xf32>
    %cst_34 = arith.constant 5.000000e-01 : f32
    %58 = vector.broadcast %cst_34 : f32 to vector<8x128xf32>
    %59 = arith.addf %57, %58 : vector<8x128xf32>
    %60 = vector.extract_strided_slice %49 {offsets = [0, 256], sizes = [8, 128], strides = [1, 1]} : vector<8x512xf32> to vector<8x128xf32>
    %61 = vector.extract_strided_slice %49 {offsets = [0, 384], sizes = [8, 128], strides = [1, 1]} : vector<8x512xf32> to vector<8x128xf32>
    %cst_35 = arith.constant 5.000000e-01 : f32
    %62 = vector.broadcast %cst_35 : f32 to vector<8x128xf32>
    %63 = arith.mulf %62, %61 : vector<8x128xf32>
    %cst_36 = arith.constant 5.000000e-01 : f32
    %64 = vector.broadcast %cst_36 : f32 to vector<8x128xf32>
    %65 = arith.addf %63, %64 : vector<8x128xf32>
    %66 = arith.mulf %59, %16 : vector<8x128xf32>
    %67 = arith.mulf %54, %60 : vector<8x128xf32>
    %68 = arith.addf %66, %67 : vector<8x128xf32>
    %69 = math.tanh %68 : vector<8x128xf32>
    %70 = arith.mulf %65, %69 : vector<8x128xf32>
    %71 = arith.mulf %70, %12 : vector<8x128xf32>
    %cst_37 = arith.constant dense<0.000000e+00> : vector<8xf32>
    %72 = vector.multi_reduction <add>, %71, %cst_37 [1] : vector<8x128xf32> to vector<8xf32>
    %73 = vector.shape_cast %72 : vector<8xf32> to vector<8x1xf32>
    %74 = arith.addf %73, %15 : vector<8x1xf32>
    %c0_38 = arith.constant 0 : index
    %c0_39 = arith.constant 0 : index
    %75 = vector.load %arg9[%c0_38, %c0_39] : memref<64x1xf32, #tpu.memory_space<vmem>>, vector<8x1xf32>
    tpu.vector_store %arg9[%c0_38, %c0_39], %74 {strides = array<i32>} : memref<64x1xf32, #tpu.memory_space<vmem>>, vector<8x1xf32>,
    %c8 = arith.constant 8 : index
    %c0_40 = arith.constant 0 : index
    %76 = vector.load %arg10[%c8, %c0_40] : memref<64x512xf32, #tpu.memory_space<vmem>>, vector<8x512xf32>
    %c0_41 = arith.constant 0 : index
    %c0_42 = arith.constant 0 : index
    %77 = vector.load %arg2[%c0_41, %c0_42] : memref<128x512xf32, #tpu.memory_space<vmem>>, vector<128x512xf32>
    %cst_43 = arith.constant dense<0.000000e+00> : vector<8x512xf32>
    %78 = tpu.matmul %42, %77, %cst_43 {dimension_numbers = #tpu.dot_dimension_numbers<[1], [0], [0], [1], [0, 0, 1, 1], [], []>} : vector<8x128xf32>, vector<128x512xf32>, vector<8x512xf32> -> vector<8x512xf32>
    %79 = arith.addf %76, %78 : vector<8x512xf32>
    %80 = math.tanh %79 : vector<8x512xf32>
    %81 = vector.extract_strided_slice %80 {offsets = [0, 0], sizes = [8, 128], strides = [1, 1]} : vector<8x512xf32> to vector<8x128xf32>
    %cst_44 = arith.constant 5.000000e-01 : f32
    %82 = vector.broadcast %cst_44 : f32 to vector<8x128xf32>
    %83 = arith.mulf %82, %81 : vector<8x128xf32>
    %cst_45 = arith.constant 5.000000e-01 : f32
    %84 = vector.broadcast %cst_45 : f32 to vector<8x128xf32>
    %85 = arith.addf %83, %84 : vector<8x128xf32>
    %86 = vector.extract_strided_slice %80 {offsets = [0, 128], sizes = [8, 128], strides = [1, 1]} : vector<8x512xf32> to vector<8x128xf32>
    %cst_46 = arith.constant 5.000000e-01 : f32
    %87 = vector.broadcast %cst_46 : f32 to vector<8x128xf32>
    %88 = arith.mulf %87, %86 : vector<8x128xf32>
    %cst_47 = arith.constant 5.000000e-01 : f32
    %89 = vector.broadcast %cst_47 : f32 to vector<8x128xf32>
    %90 = arith.addf %88, %89 : vector<8x128xf32>
    %91 = vector.extract_strided_slice %80 {offsets = [0, 256], sizes = [8, 128], strides = [1, 1]} : vector<8x512xf32> to vector<8x128xf32>
    %92 = vector.extract_strided_slice %80 {offsets = [0, 384], sizes = [8, 128], strides = [1, 1]} : vector<8x512xf32> to vector<8x128xf32>
    %cst_48 = arith.constant 5.000000e-01 : f32
    %93 = vector.broadcast %cst_48 : f32 to vector<8x128xf32>
    %94 = arith.mulf %93, %92 : vector<8x128xf32>
    %cst_49 = arith.constant 5.000000e-01 : f32
    %95 = vector.broadcast %cst_49 : f32 to vector<8x128xf32>
    %96 = arith.addf %94, %95 : vector<8x128xf32>
    %97 = arith.mulf %90, %40 : vector<8x128xf32>
    %98 = arith.mulf %85, %91 : vector<8x128xf32>
    %99 = arith.addf %97, %98 : vector<8x128xf32>
    %100 = math.tanh %99 : vector<8x128xf32>
    %101 = arith.mulf %96, %100 : vector<8x128xf32>
    %c0_50 = arith.constant 0 : index
    %c0_51 = arith.constant 0 : index
    %102 = vector.load %arg4[%c0_50, %c0_51] : memref<128x512xf32, #tpu.memory_space<vmem>>, vector<128x512xf32>
    %cst_52 = arith.constant dense<0.000000e+00> : vector<8x512xf32>
    %103 = tpu.matmul %101, %102, %cst_52 {dimension_numbers = #tpu.dot_dimension_numbers<[1], [0], [0], [1], [0, 0, 1, 1], [], []>} : vector<8x128xf32>, vector<128x512xf32>, vector<8x512xf32> -> vector<8x512xf32>
    %c0_53 = arith.constant 0 : index
    %c0_54 = arith.constant 0 : index
    %104 = vector.load %arg5[%c0_53, %c0_54] : memref<128x512xf32, #tpu.memory_space<vmem>>, vector<128x512xf32>
    %cst_55 = arith.constant dense<0.000000e+00> : vector<8x512xf32>
    %105 = tpu.matmul %70, %104, %cst_55 {dimension_numbers = #tpu.dot_dimension_numbers<[1], [0], [0], [1], [0, 0, 1, 1], [], []>} : vector<8x128xf32>, vector<128x512xf32>, vector<8x512xf32> -> vector<8x512xf32>
    %106 = arith.addf %103, %105 : vector<8x512xf32>
    %107 = arith.addf %106, %9 : vector<8x512xf32>
    %108 = math.tanh %107 : vector<8x512xf32>
    %109 = vector.extract_strided_slice %108 {offsets = [0, 0], sizes = [8, 128], strides = [1, 1]} : vector<8x512xf32> to vector<8x128xf32>
    %cst_56 = arith.constant 5.000000e-01 : f32
    %110 = vector.broadcast %cst_56 : f32 to vector<8x128xf32>
    %111 = arith.mulf %110, %109 : vector<8x128xf32>
    %cst_57 = arith.constant 5.000000e-01 : f32
    %112 = vector.broadcast %cst_57 : f32 to vector<8x128xf32>
    %113 = arith.addf %111, %112 : vector<8x128xf32>
    %114 = vector.extract_strided_slice %108 {offsets = [0, 128], sizes = [8, 128], strides = [1, 1]} : vector<8x512xf32> to vector<8x128xf32>
    %cst_58 = arith.constant 5.000000e-01 : f32
    %115 = vector.broadcast %cst_58 : f32 to vector<8x128xf32>
    %116 = arith.mulf %115, %114 : vector<8x128xf32>
    %cst_59 = arith.constant 5.000000e-01 : f32
    %117 = vector.broadcast %cst_59 : f32 to vector<8x128xf32>
    %118 = arith.addf %116, %117 : vector<8x128xf32>
    %119 = vector.extract_strided_slice %108 {offsets = [0, 256], sizes = [8, 128], strides = [1, 1]} : vector<8x512xf32> to vector<8x128xf32>
    %120 = vector.extract_strided_slice %108 {offsets = [0, 384], sizes = [8, 128], strides = [1, 1]} : vector<8x512xf32> to vector<8x128xf32>
    %cst_60 = arith.constant 5.000000e-01 : f32
    %121 = vector.broadcast %cst_60 : f32 to vector<8x128xf32>
    %122 = arith.mulf %121, %120 : vector<8x128xf32>
    %cst_61 = arith.constant 5.000000e-01 : f32
    %123 = vector.broadcast %cst_61 : f32 to vector<8x128xf32>
    %124 = arith.addf %122, %123 : vector<8x128xf32>
    %125 = arith.mulf %118, %68 : vector<8x128xf32>
    %126 = arith.mulf %113, %119 : vector<8x128xf32>
    %127 = arith.addf %125, %126 : vector<8x128xf32>
    %128 = math.tanh %127 : vector<8x128xf32>
    %129 = arith.mulf %124, %128 : vector<8x128xf32>
    %130 = arith.mulf %129, %12 : vector<8x128xf32>
    %cst_62 = arith.constant dense<0.000000e+00> : vector<8xf32>
    %131 = vector.multi_reduction <add>, %130, %cst_62 [1] : vector<8x128xf32> to vector<8xf32>
    %132 = vector.shape_cast %131 : vector<8xf32> to vector<8x1xf32>
    %133 = arith.addf %132, %15 : vector<8x1xf32>
    %c8_63 = arith.constant 8 : index
    %c0_64 = arith.constant 0 : index
    %134 = vector.load %arg9[%c8_63, %c0_64] : memref<64x1xf32, #tpu.memory_space<vmem>>, vector<8x1xf32>
    tpu.vector_store %arg9[%c8_63, %c0_64], %133 {strides = array<i32>} : memref<64x1xf32, #tpu.memory_space<vmem>>, vector<8x1xf32>,
    %c16 = arith.constant 16 : index
    %c0_65 = arith.constant 0 : index
    %135 = vector.load %arg10[%c16, %c0_65] : memref<64x512xf32, #tpu.memory_space<vmem>>, vector<8x512xf32>
    %c0_66 = arith.constant 0 : index
    %c0_67 = arith.constant 0 : index
    %136 = vector.load %arg2[%c0_66, %c0_67] : memref<128x512xf32, #tpu.memory_space<vmem>>, vector<128x512xf32>
    %cst_68 = arith.constant dense<0.000000e+00> : vector<8x512xf32>
    %137 = tpu.matmul %101, %136, %cst_68 {dimension_numbers = #tpu.dot_dimension_numbers<[1], [0], [0], [1], [0, 0, 1, 1], [], []>} : vector<8x128xf32>, vector<128x512xf32>, vector<8x512xf32> -> vector<8x512xf32>
    %138 = arith.addf %135, %137 : vector<8x512xf32>
    %139 = math.tanh %138 : vector<8x512xf32>
    %140 = vector.extract_strided_slice %139 {offsets = [0, 0], sizes = [8, 128], strides = [1, 1]} : vector<8x512xf32> to vector<8x128xf32>
    %cst_69 = arith.constant 5.000000e-01 : f32
    %141 = vector.broadcast %cst_69 : f32 to vector<8x128xf32>
    %142 = arith.mulf %141, %140 : vector<8x128xf32>
    %cst_70 = arith.constant 5.000000e-01 : f32
    %143 = vector.broadcast %cst_70 : f32 to vector<8x128xf32>
    %144 = arith.addf %142, %143 : vector<8x128xf32>
    %145 = vector.extract_strided_slice %139 {offsets = [0, 128], sizes = [8, 128], strides = [1, 1]} : vector<8x512xf32> to vector<8x128xf32>
    %cst_71 = arith.constant 5.000000e-01 : f32
    %146 = vector.broadcast %cst_71 : f32 to vector<8x128xf32>
    %147 = arith.mulf %146, %145 : vector<8x128xf32>
    %cst_72 = arith.constant 5.000000e-01 : f32
    %148 = vector.broadcast %cst_72 : f32 to vector<8x128xf32>
    %149 = arith.addf %147, %148 : vector<8x128xf32>
    %150 = vector.extract_strided_slice %139 {offsets = [0, 256], sizes = [8, 128], strides = [1, 1]} : vector<8x512xf32> to vector<8x128xf32>
    %151 = vector.extract_strided_slice %139 {offsets = [0, 384], sizes = [8, 128], strides = [1, 1]} : vector<8x512xf32> to vector<8x128xf32>
    %cst_73 = arith.constant 5.000000e-01 : f32
    %152 = vector.broadcast %cst_73 : f32 to vector<8x128xf32>
    %153 = arith.mulf %152, %151 : vector<8x128xf32>
    %cst_74 = arith.constant 5.000000e-01 : f32
    %154 = vector.broadcast %cst_74 : f32 to vector<8x128xf32>
    %155 = arith.addf %153, %154 : vector<8x128xf32>
    %156 = arith.mulf %149, %99 : vector<8x128xf32>
    %157 = arith.mulf %144, %150 : vector<8x128xf32>
    %158 = arith.addf %156, %157 : vector<8x128xf32>
    %159 = math.tanh %158 : vector<8x128xf32>
    %160 = arith.mulf %155, %159 : vector<8x128xf32>
    %c0_75 = arith.constant 0 : index
    %c0_76 = arith.constant 0 : index
    %161 = vector.load %arg4[%c0_75, %c0_76] : memref<128x512xf32, #tpu.memory_space<vmem>>, vector<128x512xf32>
    %cst_77 = arith.constant dense<0.000000e+00> : vector<8x512xf32>
    %162 = tpu.matmul %160, %161, %cst_77 {dimension_numbers = #tpu.dot_dimension_numbers<[1], [0], [0], [1], [0, 0, 1, 1], [], []>} : vector<8x128xf32>, vector<128x512xf32>, vector<8x512xf32> -> vector<8x512xf32>
    %c0_78 = arith.constant 0 : index
    %c0_79 = arith.constant 0 : index
    %163 = vector.load %arg5[%c0_78, %c0_79] : memref<128x512xf32, #tpu.memory_space<vmem>>, vector<128x512xf32>
    %cst_80 = arith.constant dense<0.000000e+00> : vector<8x512xf32>
    %164 = tpu.matmul %129, %163, %cst_80 {dimension_numbers = #tpu.dot_dimension_numbers<[1], [0], [0], [1], [0, 0, 1, 1], [], []>} : vector<8x128xf32>, vector<128x512xf32>, vector<8x512xf32> -> vector<8x512xf32>
    %165 = arith.addf %162, %164 : vector<8x512xf32>
    %166 = arith.addf %165, %9 : vector<8x512xf32>
    %167 = math.tanh %166 : vector<8x512xf32>
    %168 = vector.extract_strided_slice %167 {offsets = [0, 0], sizes = [8, 128], strides = [1, 1]} : vector<8x512xf32> to vector<8x128xf32>
    %cst_81 = arith.constant 5.000000e-01 : f32
    %169 = vector.broadcast %cst_81 : f32 to vector<8x128xf32>
    %170 = arith.mulf %169, %168 : vector<8x128xf32>
    %cst_82 = arith.constant 5.000000e-01 : f32
    %171 = vector.broadcast %cst_82 : f32 to vector<8x128xf32>
    %172 = arith.addf %170, %171 : vector<8x128xf32>
    %173 = vector.extract_strided_slice %167 {offsets = [0, 128], sizes = [8, 128], strides = [1, 1]} : vector<8x512xf32> to vector<8x128xf32>
    %cst_83 = arith.constant 5.000000e-01 : f32
    %174 = vector.broadcast %cst_83 : f32 to vector<8x128xf32>
    %175 = arith.mulf %174, %173 : vector<8x128xf32>
    %cst_84 = arith.constant 5.000000e-01 : f32
    %176 = vector.broadcast %cst_84 : f32 to vector<8x128xf32>
    %177 = arith.addf %175, %176 : vector<8x128xf32>
    %178 = vector.extract_strided_slice %167 {offsets = [0, 256], sizes = [8, 128], strides = [1, 1]} : vector<8x512xf32> to vector<8x128xf32>
    %179 = vector.extract_strided_slice %167 {offsets = [0, 384], sizes = [8, 128], strides = [1, 1]} : vector<8x512xf32> to vector<8x128xf32>
    %cst_85 = arith.constant 5.000000e-01 : f32
    %180 = vector.broadcast %cst_85 : f32 to vector<8x128xf32>
    %181 = arith.mulf %180, %179 : vector<8x128xf32>
    %cst_86 = arith.constant 5.000000e-01 : f32
    %182 = vector.broadcast %cst_86 : f32 to vector<8x128xf32>
    %183 = arith.addf %181, %182 : vector<8x128xf32>
    %184 = arith.mulf %177, %127 : vector<8x128xf32>
    %185 = arith.mulf %172, %178 : vector<8x128xf32>
    %186 = arith.addf %184, %185 : vector<8x128xf32>
    %187 = math.tanh %186 : vector<8x128xf32>
    %188 = arith.mulf %183, %187 : vector<8x128xf32>
    %189 = arith.mulf %188, %12 : vector<8x128xf32>
    %cst_87 = arith.constant dense<0.000000e+00> : vector<8xf32>
    %190 = vector.multi_reduction <add>, %189, %cst_87 [1] : vector<8x128xf32> to vector<8xf32>
    %191 = vector.shape_cast %190 : vector<8xf32> to vector<8x1xf32>
    %192 = arith.addf %191, %15 : vector<8x1xf32>
    %c16_88 = arith.constant 16 : index
    %c0_89 = arith.constant 0 : index
    %193 = vector.load %arg9[%c16_88, %c0_89] : memref<64x1xf32, #tpu.memory_space<vmem>>, vector<8x1xf32>
    tpu.vector_store %arg9[%c16_88, %c0_89], %192 {strides = array<i32>} : memref<64x1xf32, #tpu.memory_space<vmem>>, vector<8x1xf32>,
    %c24 = arith.constant 24 : index
    %c0_90 = arith.constant 0 : index
    %194 = vector.load %arg10[%c24, %c0_90] : memref<64x512xf32, #tpu.memory_space<vmem>>, vector<8x512xf32>
    %c0_91 = arith.constant 0 : index
    %c0_92 = arith.constant 0 : index
    %195 = vector.load %arg2[%c0_91, %c0_92] : memref<128x512xf32, #tpu.memory_space<vmem>>, vector<128x512xf32>
    %cst_93 = arith.constant dense<0.000000e+00> : vector<8x512xf32>
    %196 = tpu.matmul %160, %195, %cst_93 {dimension_numbers = #tpu.dot_dimension_numbers<[1], [0], [0], [1], [0, 0, 1, 1], [], []>} : vector<8x128xf32>, vector<128x512xf32>, vector<8x512xf32> -> vector<8x512xf32>
    %197 = arith.addf %194, %196 : vector<8x512xf32>
    %198 = math.tanh %197 : vector<8x512xf32>
    %199 = vector.extract_strided_slice %198 {offsets = [0, 0], sizes = [8, 128], strides = [1, 1]} : vector<8x512xf32> to vector<8x128xf32>
    %cst_94 = arith.constant 5.000000e-01 : f32
    %200 = vector.broadcast %cst_94 : f32 to vector<8x128xf32>
    %201 = arith.mulf %200, %199 : vector<8x128xf32>
    %cst_95 = arith.constant 5.000000e-01 : f32
    %202 = vector.broadcast %cst_95 : f32 to vector<8x128xf32>
    %203 = arith.addf %201, %202 : vector<8x128xf32>
    %204 = vector.extract_strided_slice %198 {offsets = [0, 128], sizes = [8, 128], strides = [1, 1]} : vector<8x512xf32> to vector<8x128xf32>
    %cst_96 = arith.constant 5.000000e-01 : f32
    %205 = vector.broadcast %cst_96 : f32 to vector<8x128xf32>
    %206 = arith.mulf %205, %204 : vector<8x128xf32>
    %cst_97 = arith.constant 5.000000e-01 : f32
    %207 = vector.broadcast %cst_97 : f32 to vector<8x128xf32>
    %208 = arith.addf %206, %207 : vector<8x128xf32>
    %209 = vector.extract_strided_slice %198 {offsets = [0, 256], sizes = [8, 128], strides = [1, 1]} : vector<8x512xf32> to vector<8x128xf32>
    %210 = vector.extract_strided_slice %198 {offsets = [0, 384], sizes = [8, 128], strides = [1, 1]} : vector<8x512xf32> to vector<8x128xf32>
    %cst_98 = arith.constant 5.000000e-01 : f32
    %211 = vector.broadcast %cst_98 : f32 to vector<8x128xf32>
    %212 = arith.mulf %211, %210 : vector<8x128xf32>
    %cst_99 = arith.constant 5.000000e-01 : f32
    %213 = vector.broadcast %cst_99 : f32 to vector<8x128xf32>
    %214 = arith.addf %212, %213 : vector<8x128xf32>
    %215 = arith.mulf %208, %158 : vector<8x128xf32>
    %216 = arith.mulf %203, %209 : vector<8x128xf32>
    %217 = arith.addf %215, %216 : vector<8x128xf32>
    %218 = math.tanh %217 : vector<8x128xf32>
    %219 = arith.mulf %214, %218 : vector<8x128xf32>
    %c0_100 = arith.constant 0 : index
    %c0_101 = arith.constant 0 : index
    %220 = vector.load %arg4[%c0_100, %c0_101] : memref<128x512xf32, #tpu.memory_space<vmem>>, vector<128x512xf32>
    %cst_102 = arith.constant dense<0.000000e+00> : vector<8x512xf32>
    %221 = tpu.matmul %219, %220, %cst_102 {dimension_numbers = #tpu.dot_dimension_numbers<[1], [0], [0], [1], [0, 0, 1, 1], [], []>} : vector<8x128xf32>, vector<128x512xf32>, vector<8x512xf32> -> vector<8x512xf32>
    %c0_103 = arith.constant 0 : index
    %c0_104 = arith.constant 0 : index
    %222 = vector.load %arg5[%c0_103, %c0_104] : memref<128x512xf32, #tpu.memory_space<vmem>>, vector<128x512xf32>
    %cst_105 = arith.constant dense<0.000000e+00> : vector<8x512xf32>
    %223 = tpu.matmul %188, %222, %cst_105 {dimension_numbers = #tpu.dot_dimension_numbers<[1], [0], [0], [1], [0, 0, 1, 1], [], []>} : vector<8x128xf32>, vector<128x512xf32>, vector<8x512xf32> -> vector<8x512xf32>
    %224 = arith.addf %221, %223 : vector<8x512xf32>
    %225 = arith.addf %224, %9 : vector<8x512xf32>
    %226 = math.tanh %225 : vector<8x512xf32>
    %227 = vector.extract_strided_slice %226 {offsets = [0, 0], sizes = [8, 128], strides = [1, 1]} : vector<8x512xf32> to vector<8x128xf32>
    %cst_106 = arith.constant 5.000000e-01 : f32
    %228 = vector.broadcast %cst_106 : f32 to vector<8x128xf32>
    %229 = arith.mulf %228, %227 : vector<8x128xf32>
    %cst_107 = arith.constant 5.000000e-01 : f32
    %230 = vector.broadcast %cst_107 : f32 to vector<8x128xf32>
    %231 = arith.addf %229, %230 : vector<8x128xf32>
    %232 = vector.extract_strided_slice %226 {offsets = [0, 128], sizes = [8, 128], strides = [1, 1]} : vector<8x512xf32> to vector<8x128xf32>
    %cst_108 = arith.constant 5.000000e-01 : f32
    %233 = vector.broadcast %cst_108 : f32 to vector<8x128xf32>
    %234 = arith.mulf %233, %232 : vector<8x128xf32>
    %cst_109 = arith.constant 5.000000e-01 : f32
    %235 = vector.broadcast %cst_109 : f32 to vector<8x128xf32>
    %236 = arith.addf %234, %235 : vector<8x128xf32>
    %237 = vector.extract_strided_slice %226 {offsets = [0, 256], sizes = [8, 128], strides = [1, 1]} : vector<8x512xf32> to vector<8x128xf32>
    %238 = vector.extract_strided_slice %226 {offsets = [0, 384], sizes = [8, 128], strides = [1, 1]} : vector<8x512xf32> to vector<8x128xf32>
    %cst_110 = arith.constant 5.000000e-01 : f32
    %239 = vector.broadcast %cst_110 : f32 to vector<8x128xf32>
    %240 = arith.mulf %239, %238 : vector<8x128xf32>
    %cst_111 = arith.constant 5.000000e-01 : f32
    %241 = vector.broadcast %cst_111 : f32 to vector<8x128xf32>
    %242 = arith.addf %240, %241 : vector<8x128xf32>
    %243 = arith.mulf %236, %186 : vector<8x128xf32>
    %244 = arith.mulf %231, %237 : vector<8x128xf32>
    %245 = arith.addf %243, %244 : vector<8x128xf32>
    %246 = math.tanh %245 : vector<8x128xf32>
    %247 = arith.mulf %242, %246 : vector<8x128xf32>
    %248 = arith.mulf %247, %12 : vector<8x128xf32>
    %cst_112 = arith.constant dense<0.000000e+00> : vector<8xf32>
    %249 = vector.multi_reduction <add>, %248, %cst_112 [1] : vector<8x128xf32> to vector<8xf32>
    %250 = vector.shape_cast %249 : vector<8xf32> to vector<8x1xf32>
    %251 = arith.addf %250, %15 : vector<8x1xf32>
    %c24_113 = arith.constant 24 : index
    %c0_114 = arith.constant 0 : index
    %252 = vector.load %arg9[%c24_113, %c0_114] : memref<64x1xf32, #tpu.memory_space<vmem>>, vector<8x1xf32>
    tpu.vector_store %arg9[%c24_113, %c0_114], %251 {strides = array<i32>} : memref<64x1xf32, #tpu.memory_space<vmem>>, vector<8x1xf32>,
    %c32 = arith.constant 32 : index
    %c0_115 = arith.constant 0 : index
    %253 = vector.load %arg10[%c32, %c0_115] : memref<64x512xf32, #tpu.memory_space<vmem>>, vector<8x512xf32>
    %c0_116 = arith.constant 0 : index
    %c0_117 = arith.constant 0 : index
    %254 = vector.load %arg2[%c0_116, %c0_117] : memref<128x512xf32, #tpu.memory_space<vmem>>, vector<128x512xf32>
    %cst_118 = arith.constant dense<0.000000e+00> : vector<8x512xf32>
    %255 = tpu.matmul %219, %254, %cst_118 {dimension_numbers = #tpu.dot_dimension_numbers<[1], [0], [0], [1], [0, 0, 1, 1], [], []>} : vector<8x128xf32>, vector<128x512xf32>, vector<8x512xf32> -> vector<8x512xf32>
    %256 = arith.addf %253, %255 : vector<8x512xf32>
    %257 = math.tanh %256 : vector<8x512xf32>
    %258 = vector.extract_strided_slice %257 {offsets = [0, 0], sizes = [8, 128], strides = [1, 1]} : vector<8x512xf32> to vector<8x128xf32>
    %cst_119 = arith.constant 5.000000e-01 : f32
    %259 = vector.broadcast %cst_119 : f32 to vector<8x128xf32>
    %260 = arith.mulf %259, %258 : vector<8x128xf32>
    %cst_120 = arith.constant 5.000000e-01 : f32
    %261 = vector.broadcast %cst_120 : f32 to vector<8x128xf32>
    %262 = arith.addf %260, %261 : vector<8x128xf32>
    %263 = vector.extract_strided_slice %257 {offsets = [0, 128], sizes = [8, 128], strides = [1, 1]} : vector<8x512xf32> to vector<8x128xf32>
    %cst_121 = arith.constant 5.000000e-01 : f32
    %264 = vector.broadcast %cst_121 : f32 to vector<8x128xf32>
    %265 = arith.mulf %264, %263 : vector<8x128xf32>
    %cst_122 = arith.constant 5.000000e-01 : f32
    %266 = vector.broadcast %cst_122 : f32 to vector<8x128xf32>
    %267 = arith.addf %265, %266 : vector<8x128xf32>
    %268 = vector.extract_strided_slice %257 {offsets = [0, 256], sizes = [8, 128], strides = [1, 1]} : vector<8x512xf32> to vector<8x128xf32>
    %269 = vector.extract_strided_slice %257 {offsets = [0, 384], sizes = [8, 128], strides = [1, 1]} : vector<8x512xf32> to vector<8x128xf32>
    %cst_123 = arith.constant 5.000000e-01 : f32
    %270 = vector.broadcast %cst_123 : f32 to vector<8x128xf32>
    %271 = arith.mulf %270, %269 : vector<8x128xf32>
    %cst_124 = arith.constant 5.000000e-01 : f32
    %272 = vector.broadcast %cst_124 : f32 to vector<8x128xf32>
    %273 = arith.addf %271, %272 : vector<8x128xf32>
    %274 = arith.mulf %267, %217 : vector<8x128xf32>
    %275 = arith.mulf %262, %268 : vector<8x128xf32>
    %276 = arith.addf %274, %275 : vector<8x128xf32>
    %277 = math.tanh %276 : vector<8x128xf32>
    %278 = arith.mulf %273, %277 : vector<8x128xf32>
    %c0_125 = arith.constant 0 : index
    %c0_126 = arith.constant 0 : index
    %279 = vector.load %arg4[%c0_125, %c0_126] : memref<128x512xf32, #tpu.memory_space<vmem>>, vector<128x512xf32>
    %cst_127 = arith.constant dense<0.000000e+00> : vector<8x512xf32>
    %280 = tpu.matmul %278, %279, %cst_127 {dimension_numbers = #tpu.dot_dimension_numbers<[1], [0], [0], [1], [0, 0, 1, 1], [], []>} : vector<8x128xf32>, vector<128x512xf32>, vector<8x512xf32> -> vector<8x512xf32>
    %c0_128 = arith.constant 0 : index
    %c0_129 = arith.constant 0 : index
    %281 = vector.load %arg5[%c0_128, %c0_129] : memref<128x512xf32, #tpu.memory_space<vmem>>, vector<128x512xf32>
    %cst_130 = arith.constant dense<0.000000e+00> : vector<8x512xf32>
    %282 = tpu.matmul %247, %281, %cst_130 {dimension_numbers = #tpu.dot_dimension_numbers<[1], [0], [0], [1], [0, 0, 1, 1], [], []>} : vector<8x128xf32>, vector<128x512xf32>, vector<8x512xf32> -> vector<8x512xf32>
    %283 = arith.addf %280, %282 : vector<8x512xf32>
    %284 = arith.addf %283, %9 : vector<8x512xf32>
    %285 = math.tanh %284 : vector<8x512xf32>
    %286 = vector.extract_strided_slice %285 {offsets = [0, 0], sizes = [8, 128], strides = [1, 1]} : vector<8x512xf32> to vector<8x128xf32>
    %cst_131 = arith.constant 5.000000e-01 : f32
    %287 = vector.broadcast %cst_131 : f32 to vector<8x128xf32>
    %288 = arith.mulf %287, %286 : vector<8x128xf32>
    %cst_132 = arith.constant 5.000000e-01 : f32
    %289 = vector.broadcast %cst_132 : f32 to vector<8x128xf32>
    %290 = arith.addf %288, %289 : vector<8x128xf32>
    %291 = vector.extract_strided_slice %285 {offsets = [0, 128], sizes = [8, 128], strides = [1, 1]} : vector<8x512xf32> to vector<8x128xf32>
    %cst_133 = arith.constant 5.000000e-01 : f32
    %292 = vector.broadcast %cst_133 : f32 to vector<8x128xf32>
    %293 = arith.mulf %292, %291 : vector<8x128xf32>
    %cst_134 = arith.constant 5.000000e-01 : f32
    %294 = vector.broadcast %cst_134 : f32 to vector<8x128xf32>
    %295 = arith.addf %293, %294 : vector<8x128xf32>
    %296 = vector.extract_strided_slice %285 {offsets = [0, 256], sizes = [8, 128], strides = [1, 1]} : vector<8x512xf32> to vector<8x128xf32>
    %297 = vector.extract_strided_slice %285 {offsets = [0, 384], sizes = [8, 128], strides = [1, 1]} : vector<8x512xf32> to vector<8x128xf32>
    %cst_135 = arith.constant 5.000000e-01 : f32
    %298 = vector.broadcast %cst_135 : f32 to vector<8x128xf32>
    %299 = arith.mulf %298, %297 : vector<8x128xf32>
    %cst_136 = arith.constant 5.000000e-01 : f32
    %300 = vector.broadcast %cst_136 : f32 to vector<8x128xf32>
    %301 = arith.addf %299, %300 : vector<8x128xf32>
    %302 = arith.mulf %295, %245 : vector<8x128xf32>
    %303 = arith.mulf %290, %296 : vector<8x128xf32>
    %304 = arith.addf %302, %303 : vector<8x128xf32>
    %305 = math.tanh %304 : vector<8x128xf32>
    %306 = arith.mulf %301, %305 : vector<8x128xf32>
    %307 = arith.mulf %306, %12 : vector<8x128xf32>
    %cst_137 = arith.constant dense<0.000000e+00> : vector<8xf32>
    %308 = vector.multi_reduction <add>, %307, %cst_137 [1] : vector<8x128xf32> to vector<8xf32>
    %309 = vector.shape_cast %308 : vector<8xf32> to vector<8x1xf32>
    %310 = arith.addf %309, %15 : vector<8x1xf32>
    %c32_138 = arith.constant 32 : index
    %c0_139 = arith.constant 0 : index
    %311 = vector.load %arg9[%c32_138, %c0_139] : memref<64x1xf32, #tpu.memory_space<vmem>>, vector<8x1xf32>
    tpu.vector_store %arg9[%c32_138, %c0_139], %310 {strides = array<i32>} : memref<64x1xf32, #tpu.memory_space<vmem>>, vector<8x1xf32>,
    %c40 = arith.constant 40 : index
    %c0_140 = arith.constant 0 : index
    %312 = vector.load %arg10[%c40, %c0_140] : memref<64x512xf32, #tpu.memory_space<vmem>>, vector<8x512xf32>
    %c0_141 = arith.constant 0 : index
    %c0_142 = arith.constant 0 : index
    %313 = vector.load %arg2[%c0_141, %c0_142] : memref<128x512xf32, #tpu.memory_space<vmem>>, vector<128x512xf32>
    %cst_143 = arith.constant dense<0.000000e+00> : vector<8x512xf32>
    %314 = tpu.matmul %278, %313, %cst_143 {dimension_numbers = #tpu.dot_dimension_numbers<[1], [0], [0], [1], [0, 0, 1, 1], [], []>} : vector<8x128xf32>, vector<128x512xf32>, vector<8x512xf32> -> vector<8x512xf32>
    %315 = arith.addf %312, %314 : vector<8x512xf32>
    %316 = math.tanh %315 : vector<8x512xf32>
    %317 = vector.extract_strided_slice %316 {offsets = [0, 0], sizes = [8, 128], strides = [1, 1]} : vector<8x512xf32> to vector<8x128xf32>
    %cst_144 = arith.constant 5.000000e-01 : f32
    %318 = vector.broadcast %cst_144 : f32 to vector<8x128xf32>
    %319 = arith.mulf %318, %317 : vector<8x128xf32>
    %cst_145 = arith.constant 5.000000e-01 : f32
    %320 = vector.broadcast %cst_145 : f32 to vector<8x128xf32>
    %321 = arith.addf %319, %320 : vector<8x128xf32>
    %322 = vector.extract_strided_slice %316 {offsets = [0, 128], sizes = [8, 128], strides = [1, 1]} : vector<8x512xf32> to vector<8x128xf32>
    %cst_146 = arith.constant 5.000000e-01 : f32
    %323 = vector.broadcast %cst_146 : f32 to vector<8x128xf32>
    %324 = arith.mulf %323, %322 : vector<8x128xf32>
    %cst_147 = arith.constant 5.000000e-01 : f32
    %325 = vector.broadcast %cst_147 : f32 to vector<8x128xf32>
    %326 = arith.addf %324, %325 : vector<8x128xf32>
    %327 = vector.extract_strided_slice %316 {offsets = [0, 256], sizes = [8, 128], strides = [1, 1]} : vector<8x512xf32> to vector<8x128xf32>
    %328 = vector.extract_strided_slice %316 {offsets = [0, 384], sizes = [8, 128], strides = [1, 1]} : vector<8x512xf32> to vector<8x128xf32>
    %cst_148 = arith.constant 5.000000e-01 : f32
    %329 = vector.broadcast %cst_148 : f32 to vector<8x128xf32>
    %330 = arith.mulf %329, %328 : vector<8x128xf32>
    %cst_149 = arith.constant 5.000000e-01 : f32
    %331 = vector.broadcast %cst_149 : f32 to vector<8x128xf32>
    %332 = arith.addf %330, %331 : vector<8x128xf32>
    %333 = arith.mulf %326, %276 : vector<8x128xf32>
    %334 = arith.mulf %321, %327 : vector<8x128xf32>
    %335 = arith.addf %333, %334 : vector<8x128xf32>
    %336 = math.tanh %335 : vector<8x128xf32>
    %337 = arith.mulf %332, %336 : vector<8x128xf32>
    %c0_150 = arith.constant 0 : index
    %c0_151 = arith.constant 0 : index
    %338 = vector.load %arg4[%c0_150, %c0_151] : memref<128x512xf32, #tpu.memory_space<vmem>>, vector<128x512xf32>
    %cst_152 = arith.constant dense<0.000000e+00> : vector<8x512xf32>
    %339 = tpu.matmul %337, %338, %cst_152 {dimension_numbers = #tpu.dot_dimension_numbers<[1], [0], [0], [1], [0, 0, 1, 1], [], []>} : vector<8x128xf32>, vector<128x512xf32>, vector<8x512xf32> -> vector<8x512xf32>
    %c0_153 = arith.constant 0 : index
    %c0_154 = arith.constant 0 : index
    %340 = vector.load %arg5[%c0_153, %c0_154] : memref<128x512xf32, #tpu.memory_space<vmem>>, vector<128x512xf32>
    %cst_155 = arith.constant dense<0.000000e+00> : vector<8x512xf32>
    %341 = tpu.matmul %306, %340, %cst_155 {dimension_numbers = #tpu.dot_dimension_numbers<[1], [0], [0], [1], [0, 0, 1, 1], [], []>} : vector<8x128xf32>, vector<128x512xf32>, vector<8x512xf32> -> vector<8x512xf32>
    %342 = arith.addf %339, %341 : vector<8x512xf32>
    %343 = arith.addf %342, %9 : vector<8x512xf32>
    %344 = math.tanh %343 : vector<8x512xf32>
    %345 = vector.extract_strided_slice %344 {offsets = [0, 0], sizes = [8, 128], strides = [1, 1]} : vector<8x512xf32> to vector<8x128xf32>
    %cst_156 = arith.constant 5.000000e-01 : f32
    %346 = vector.broadcast %cst_156 : f32 to vector<8x128xf32>
    %347 = arith.mulf %346, %345 : vector<8x128xf32>
    %cst_157 = arith.constant 5.000000e-01 : f32
    %348 = vector.broadcast %cst_157 : f32 to vector<8x128xf32>
    %349 = arith.addf %347, %348 : vector<8x128xf32>
    %350 = vector.extract_strided_slice %344 {offsets = [0, 128], sizes = [8, 128], strides = [1, 1]} : vector<8x512xf32> to vector<8x128xf32>
    %cst_158 = arith.constant 5.000000e-01 : f32
    %351 = vector.broadcast %cst_158 : f32 to vector<8x128xf32>
    %352 = arith.mulf %351, %350 : vector<8x128xf32>
    %cst_159 = arith.constant 5.000000e-01 : f32
    %353 = vector.broadcast %cst_159 : f32 to vector<8x128xf32>
    %354 = arith.addf %352, %353 : vector<8x128xf32>
    %355 = vector.extract_strided_slice %344 {offsets = [0, 256], sizes = [8, 128], strides = [1, 1]} : vector<8x512xf32> to vector<8x128xf32>
    %356 = vector.extract_strided_slice %344 {offsets = [0, 384], sizes = [8, 128], strides = [1, 1]} : vector<8x512xf32> to vector<8x128xf32>
    %cst_160 = arith.constant 5.000000e-01 : f32
    %357 = vector.broadcast %cst_160 : f32 to vector<8x128xf32>
    %358 = arith.mulf %357, %356 : vector<8x128xf32>
    %cst_161 = arith.constant 5.000000e-01 : f32
    %359 = vector.broadcast %cst_161 : f32 to vector<8x128xf32>
    %360 = arith.addf %358, %359 : vector<8x128xf32>
    %361 = arith.mulf %354, %304 : vector<8x128xf32>
    %362 = arith.mulf %349, %355 : vector<8x128xf32>
    %363 = arith.addf %361, %362 : vector<8x128xf32>
    %364 = math.tanh %363 : vector<8x128xf32>
    %365 = arith.mulf %360, %364 : vector<8x128xf32>
    %366 = arith.mulf %365, %12 : vector<8x128xf32>
    %cst_162 = arith.constant dense<0.000000e+00> : vector<8xf32>
    %367 = vector.multi_reduction <add>, %366, %cst_162 [1] : vector<8x128xf32> to vector<8xf32>
    %368 = vector.shape_cast %367 : vector<8xf32> to vector<8x1xf32>
    %369 = arith.addf %368, %15 : vector<8x1xf32>
    %c40_163 = arith.constant 40 : index
    %c0_164 = arith.constant 0 : index
    %370 = vector.load %arg9[%c40_163, %c0_164] : memref<64x1xf32, #tpu.memory_space<vmem>>, vector<8x1xf32>
    tpu.vector_store %arg9[%c40_163, %c0_164], %369 {strides = array<i32>} : memref<64x1xf32, #tpu.memory_space<vmem>>, vector<8x1xf32>,
    %c48 = arith.constant 48 : index
    %c0_165 = arith.constant 0 : index
    %371 = vector.load %arg10[%c48, %c0_165] : memref<64x512xf32, #tpu.memory_space<vmem>>, vector<8x512xf32>
    %c0_166 = arith.constant 0 : index
    %c0_167 = arith.constant 0 : index
    %372 = vector.load %arg2[%c0_166, %c0_167] : memref<128x512xf32, #tpu.memory_space<vmem>>, vector<128x512xf32>
    %cst_168 = arith.constant dense<0.000000e+00> : vector<8x512xf32>
    %373 = tpu.matmul %337, %372, %cst_168 {dimension_numbers = #tpu.dot_dimension_numbers<[1], [0], [0], [1], [0, 0, 1, 1], [], []>} : vector<8x128xf32>, vector<128x512xf32>, vector<8x512xf32> -> vector<8x512xf32>
    %374 = arith.addf %371, %373 : vector<8x512xf32>
    %375 = math.tanh %374 : vector<8x512xf32>
    %376 = vector.extract_strided_slice %375 {offsets = [0, 0], sizes = [8, 128], strides = [1, 1]} : vector<8x512xf32> to vector<8x128xf32>
    %cst_169 = arith.constant 5.000000e-01 : f32
    %377 = vector.broadcast %cst_169 : f32 to vector<8x128xf32>
    %378 = arith.mulf %377, %376 : vector<8x128xf32>
    %cst_170 = arith.constant 5.000000e-01 : f32
    %379 = vector.broadcast %cst_170 : f32 to vector<8x128xf32>
    %380 = arith.addf %378, %379 : vector<8x128xf32>
    %381 = vector.extract_strided_slice %375 {offsets = [0, 128], sizes = [8, 128], strides = [1, 1]} : vector<8x512xf32> to vector<8x128xf32>
    %cst_171 = arith.constant 5.000000e-01 : f32
    %382 = vector.broadcast %cst_171 : f32 to vector<8x128xf32>
    %383 = arith.mulf %382, %381 : vector<8x128xf32>
    %cst_172 = arith.constant 5.000000e-01 : f32
    %384 = vector.broadcast %cst_172 : f32 to vector<8x128xf32>
    %385 = arith.addf %383, %384 : vector<8x128xf32>
    %386 = vector.extract_strided_slice %375 {offsets = [0, 256], sizes = [8, 128], strides = [1, 1]} : vector<8x512xf32> to vector<8x128xf32>
    %387 = vector.extract_strided_slice %375 {offsets = [0, 384], sizes = [8, 128], strides = [1, 1]} : vector<8x512xf32> to vector<8x128xf32>
    %cst_173 = arith.constant 5.000000e-01 : f32
    %388 = vector.broadcast %cst_173 : f32 to vector<8x128xf32>
    %389 = arith.mulf %388, %387 : vector<8x128xf32>
    %cst_174 = arith.constant 5.000000e-01 : f32
    %390 = vector.broadcast %cst_174 : f32 to vector<8x128xf32>
    %391 = arith.addf %389, %390 : vector<8x128xf32>
    %392 = arith.mulf %385, %335 : vector<8x128xf32>
    %393 = arith.mulf %380, %386 : vector<8x128xf32>
    %394 = arith.addf %392, %393 : vector<8x128xf32>
    %395 = math.tanh %394 : vector<8x128xf32>
    %396 = arith.mulf %391, %395 : vector<8x128xf32>
    %c0_175 = arith.constant 0 : index
    %c0_176 = arith.constant 0 : index
    %397 = vector.load %arg4[%c0_175, %c0_176] : memref<128x512xf32, #tpu.memory_space<vmem>>, vector<128x512xf32>
    %cst_177 = arith.constant dense<0.000000e+00> : vector<8x512xf32>
    %398 = tpu.matmul %396, %397, %cst_177 {dimension_numbers = #tpu.dot_dimension_numbers<[1], [0], [0], [1], [0, 0, 1, 1], [], []>} : vector<8x128xf32>, vector<128x512xf32>, vector<8x512xf32> -> vector<8x512xf32>
    %c0_178 = arith.constant 0 : index
    %c0_179 = arith.constant 0 : index
    %399 = vector.load %arg5[%c0_178, %c0_179] : memref<128x512xf32, #tpu.memory_space<vmem>>, vector<128x512xf32>
    %cst_180 = arith.constant dense<0.000000e+00> : vector<8x512xf32>
    %400 = tpu.matmul %365, %399, %cst_180 {dimension_numbers = #tpu.dot_dimension_numbers<[1], [0], [0], [1], [0, 0, 1, 1], [], []>} : vector<8x128xf32>, vector<128x512xf32>, vector<8x512xf32> -> vector<8x512xf32>
    %401 = arith.addf %398, %400 : vector<8x512xf32>
    %402 = arith.addf %401, %9 : vector<8x512xf32>
    %403 = math.tanh %402 : vector<8x512xf32>
    %404 = vector.extract_strided_slice %403 {offsets = [0, 0], sizes = [8, 128], strides = [1, 1]} : vector<8x512xf32> to vector<8x128xf32>
    %cst_181 = arith.constant 5.000000e-01 : f32
    %405 = vector.broadcast %cst_181 : f32 to vector<8x128xf32>
    %406 = arith.mulf %405, %404 : vector<8x128xf32>
    %cst_182 = arith.constant 5.000000e-01 : f32
    %407 = vector.broadcast %cst_182 : f32 to vector<8x128xf32>
    %408 = arith.addf %406, %407 : vector<8x128xf32>
    %409 = vector.extract_strided_slice %403 {offsets = [0, 128], sizes = [8, 128], strides = [1, 1]} : vector<8x512xf32> to vector<8x128xf32>
    %cst_183 = arith.constant 5.000000e-01 : f32
    %410 = vector.broadcast %cst_183 : f32 to vector<8x128xf32>
    %411 = arith.mulf %410, %409 : vector<8x128xf32>
    %cst_184 = arith.constant 5.000000e-01 : f32
    %412 = vector.broadcast %cst_184 : f32 to vector<8x128xf32>
    %413 = arith.addf %411, %412 : vector<8x128xf32>
    %414 = vector.extract_strided_slice %403 {offsets = [0, 256], sizes = [8, 128], strides = [1, 1]} : vector<8x512xf32> to vector<8x128xf32>
    %415 = vector.extract_strided_slice %403 {offsets = [0, 384], sizes = [8, 128], strides = [1, 1]} : vector<8x512xf32> to vector<8x128xf32>
    %cst_185 = arith.constant 5.000000e-01 : f32
    %416 = vector.broadcast %cst_185 : f32 to vector<8x128xf32>
    %417 = arith.mulf %416, %415 : vector<8x128xf32>
    %cst_186 = arith.constant 5.000000e-01 : f32
    %418 = vector.broadcast %cst_186 : f32 to vector<8x128xf32>
    %419 = arith.addf %417, %418 : vector<8x128xf32>
    %420 = arith.mulf %413, %363 : vector<8x128xf32>
    %421 = arith.mulf %408, %414 : vector<8x128xf32>
    %422 = arith.addf %420, %421 : vector<8x128xf32>
    %423 = math.tanh %422 : vector<8x128xf32>
    %424 = arith.mulf %419, %423 : vector<8x128xf32>
    %425 = arith.mulf %424, %12 : vector<8x128xf32>
    %cst_187 = arith.constant dense<0.000000e+00> : vector<8xf32>
    %426 = vector.multi_reduction <add>, %425, %cst_187 [1] : vector<8x128xf32> to vector<8xf32>
    %427 = vector.shape_cast %426 : vector<8xf32> to vector<8x1xf32>
    %428 = arith.addf %427, %15 : vector<8x1xf32>
    %c48_188 = arith.constant 48 : index
    %c0_189 = arith.constant 0 : index
    %429 = vector.load %arg9[%c48_188, %c0_189] : memref<64x1xf32, #tpu.memory_space<vmem>>, vector<8x1xf32>
    tpu.vector_store %arg9[%c48_188, %c0_189], %428 {strides = array<i32>} : memref<64x1xf32, #tpu.memory_space<vmem>>, vector<8x1xf32>,
    %c56 = arith.constant 56 : index
    %c0_190 = arith.constant 0 : index
    %430 = vector.load %arg10[%c56, %c0_190] : memref<64x512xf32, #tpu.memory_space<vmem>>, vector<8x512xf32>
    %c0_191 = arith.constant 0 : index
    %c0_192 = arith.constant 0 : index
    %431 = vector.load %arg2[%c0_191, %c0_192] : memref<128x512xf32, #tpu.memory_space<vmem>>, vector<128x512xf32>
    %cst_193 = arith.constant dense<0.000000e+00> : vector<8x512xf32>
    %432 = tpu.matmul %396, %431, %cst_193 {dimension_numbers = #tpu.dot_dimension_numbers<[1], [0], [0], [1], [0, 0, 1, 1], [], []>} : vector<8x128xf32>, vector<128x512xf32>, vector<8x512xf32> -> vector<8x512xf32>
    %433 = arith.addf %430, %432 : vector<8x512xf32>
    %434 = math.tanh %433 : vector<8x512xf32>
    %435 = vector.extract_strided_slice %434 {offsets = [0, 0], sizes = [8, 128], strides = [1, 1]} : vector<8x512xf32> to vector<8x128xf32>
    %cst_194 = arith.constant 5.000000e-01 : f32
    %436 = vector.broadcast %cst_194 : f32 to vector<8x128xf32>
    %437 = arith.mulf %436, %435 : vector<8x128xf32>
    %cst_195 = arith.constant 5.000000e-01 : f32
    %438 = vector.broadcast %cst_195 : f32 to vector<8x128xf32>
    %439 = arith.addf %437, %438 : vector<8x128xf32>
    %440 = vector.extract_strided_slice %434 {offsets = [0, 128], sizes = [8, 128], strides = [1, 1]} : vector<8x512xf32> to vector<8x128xf32>
    %cst_196 = arith.constant 5.000000e-01 : f32
    %441 = vector.broadcast %cst_196 : f32 to vector<8x128xf32>
    %442 = arith.mulf %441, %440 : vector<8x128xf32>
    %cst_197 = arith.constant 5.000000e-01 : f32
    %443 = vector.broadcast %cst_197 : f32 to vector<8x128xf32>
    %444 = arith.addf %442, %443 : vector<8x128xf32>
    %445 = vector.extract_strided_slice %434 {offsets = [0, 256], sizes = [8, 128], strides = [1, 1]} : vector<8x512xf32> to vector<8x128xf32>
    %446 = vector.extract_strided_slice %434 {offsets = [0, 384], sizes = [8, 128], strides = [1, 1]} : vector<8x512xf32> to vector<8x128xf32>
    %cst_198 = arith.constant 5.000000e-01 : f32
    %447 = vector.broadcast %cst_198 : f32 to vector<8x128xf32>
    %448 = arith.mulf %447, %446 : vector<8x128xf32>
    %cst_199 = arith.constant 5.000000e-01 : f32
    %449 = vector.broadcast %cst_199 : f32 to vector<8x128xf32>
    %450 = arith.addf %448, %449 : vector<8x128xf32>
    %451 = arith.mulf %444, %394 : vector<8x128xf32>
    %452 = arith.mulf %439, %445 : vector<8x128xf32>
    %453 = arith.addf %451, %452 : vector<8x128xf32>
    %454 = math.tanh %453 : vector<8x128xf32>
    %455 = arith.mulf %450, %454 : vector<8x128xf32>
    %c0_200 = arith.constant 0 : index
    %c0_201 = arith.constant 0 : index
    %456 = vector.load %arg4[%c0_200, %c0_201] : memref<128x512xf32, #tpu.memory_space<vmem>>, vector<128x512xf32>
    %cst_202 = arith.constant dense<0.000000e+00> : vector<8x512xf32>
    %457 = tpu.matmul %455, %456, %cst_202 {dimension_numbers = #tpu.dot_dimension_numbers<[1], [0], [0], [1], [0, 0, 1, 1], [], []>} : vector<8x128xf32>, vector<128x512xf32>, vector<8x512xf32> -> vector<8x512xf32>
    %c0_203 = arith.constant 0 : index
    %c0_204 = arith.constant 0 : index
    %458 = vector.load %arg5[%c0_203, %c0_204] : memref<128x512xf32, #tpu.memory_space<vmem>>, vector<128x512xf32>
    %cst_205 = arith.constant dense<0.000000e+00> : vector<8x512xf32>
    %459 = tpu.matmul %424, %458, %cst_205 {dimension_numbers = #tpu.dot_dimension_numbers<[1], [0], [0], [1], [0, 0, 1, 1], [], []>} : vector<8x128xf32>, vector<128x512xf32>, vector<8x512xf32> -> vector<8x512xf32>
    %460 = arith.addf %457, %459 : vector<8x512xf32>
    %461 = arith.addf %460, %9 : vector<8x512xf32>
    %462 = math.tanh %461 : vector<8x512xf32>
    %463 = vector.extract_strided_slice %462 {offsets = [0, 0], sizes = [8, 128], strides = [1, 1]} : vector<8x512xf32> to vector<8x128xf32>
    %cst_206 = arith.constant 5.000000e-01 : f32
    %464 = vector.broadcast %cst_206 : f32 to vector<8x128xf32>
    %465 = arith.mulf %464, %463 : vector<8x128xf32>
    %cst_207 = arith.constant 5.000000e-01 : f32
    %466 = vector.broadcast %cst_207 : f32 to vector<8x128xf32>
    %467 = arith.addf %465, %466 : vector<8x128xf32>
    %468 = vector.extract_strided_slice %462 {offsets = [0, 128], sizes = [8, 128], strides = [1, 1]} : vector<8x512xf32> to vector<8x128xf32>
    %cst_208 = arith.constant 5.000000e-01 : f32
    %469 = vector.broadcast %cst_208 : f32 to vector<8x128xf32>
    %470 = arith.mulf %469, %468 : vector<8x128xf32>
    %cst_209 = arith.constant 5.000000e-01 : f32
    %471 = vector.broadcast %cst_209 : f32 to vector<8x128xf32>
    %472 = arith.addf %470, %471 : vector<8x128xf32>
    %473 = vector.extract_strided_slice %462 {offsets = [0, 256], sizes = [8, 128], strides = [1, 1]} : vector<8x512xf32> to vector<8x128xf32>
    %474 = vector.extract_strided_slice %462 {offsets = [0, 384], sizes = [8, 128], strides = [1, 1]} : vector<8x512xf32> to vector<8x128xf32>
    %cst_210 = arith.constant 5.000000e-01 : f32
    %475 = vector.broadcast %cst_210 : f32 to vector<8x128xf32>
    %476 = arith.mulf %475, %474 : vector<8x128xf32>
    %cst_211 = arith.constant 5.000000e-01 : f32
    %477 = vector.broadcast %cst_211 : f32 to vector<8x128xf32>
    %478 = arith.addf %476, %477 : vector<8x128xf32>
    %479 = arith.mulf %472, %422 : vector<8x128xf32>
    %480 = arith.mulf %467, %473 : vector<8x128xf32>
    %481 = arith.addf %479, %480 : vector<8x128xf32>
    %482 = math.tanh %481 : vector<8x128xf32>
    %483 = arith.mulf %478, %482 : vector<8x128xf32>
    %484 = arith.mulf %483, %12 : vector<8x128xf32>
    %cst_212 = arith.constant dense<0.000000e+00> : vector<8xf32>
    %485 = vector.multi_reduction <add>, %484, %cst_212 [1] : vector<8x128xf32> to vector<8xf32>
    %486 = vector.shape_cast %485 : vector<8xf32> to vector<8x1xf32>
    %487 = arith.addf %486, %15 : vector<8x1xf32>
    %c56_213 = arith.constant 56 : index
    %c0_214 = arith.constant 0 : index
    %488 = vector.load %arg9[%c56_213, %c0_214] : memref<64x1xf32, #tpu.memory_space<vmem>>, vector<8x1xf32>
    tpu.vector_store %arg9[%c56_213, %c0_214], %487 {strides = array<i32>} : memref<64x1xf32, #tpu.memory_space<vmem>>, vector<8x1xf32>,
    return
  }
}

</mosaic_0001>

<bundles_post_ra>
// kernel: lstm_model_forward.1
= control target key start
LH: loop header
LB: loop body
LE: loop exit
PB: predicated region body
PF: predicated region fallthrough
CT: control target
= control target key end

     0   :  { %s7963_s0 = inlined_call_operand.vmem [shape: f32[64,128], index: 0, kind: input, shape index: {}]   ;;  %s7964_s1 = inlined_call_operand.hbm [shape: f32[128,512], index: 1, kind: input, shape index: {}]   ;;  %s7965_s2 = inlined_call_operand.hbm [shape: f32[128,512], index: 2, kind: input, shape index: {}]   ;;  %s7966_s3 = inlined_call_operand.vmem [shape: f32[1,512], index: 3, kind: input, shape index: {}]   ;;  %s7967_s4 = inlined_call_operand.hbm [shape: f32[128,512], index: 4, kind: input, shape index: {}]   ;;  %s7968_s5 = inlined_call_operand.hbm [shape: f32[128,512], index: 5, kind: input, shape index: {}]   ;;  %s7969_s6 = inlined_call_operand.vmem [shape: f32[1,512], index: 6, kind: input, shape index: {}]   ;;  %s7970_s7 = inlined_call_operand.vmem [shape: f32[1,128], index: 7, kind: input, shape index: {}]   ;;  %s7971_s8 = inlined_call_operand.<no memory space> [shape: f32[1,1], index: 8, kind: input, shape index: {}]   ;;  %s7972_s9 = inlined_call_operand.vmem [shape: f32[64,1], index: 9, kind: output, shape index: {}]  }
   0x1   :  { %v14_v0 = vstv %s7971_s8 }
   0x2   :  { %15 = vst [vmem:[#allocation3] sm:$0x1] %v14_v0 }
   0x3   :  { %16 = vsyncpa [#allocation5], 0 }
   0x4   :  { %17 = vsyncpa [#allocation7], 0 }
   0x5   :  { %18 = vsyncpa [#allocation10], 0  ;;  %s38_s13 = sshll.u32 %s7965_s2, 4  ;;  %s4509_s14 = smov [#allocation6]   ;;  %s39_s13 = int_to_ptr.hbm [resolvable:$true] %s38_s13 }
   0x6   :  { %s40_s15 = sshll.u32 %s4509_s14, 4  ;;  %s25_s18 = sshll.u32 %s7964_s1, 4  ;;  %s41_s15 = int_to_ptr.vmem [resolvable:$true] %s40_s15  ;;  %s26_s18 = int_to_ptr.hbm [resolvable:$true] %s25_s18 }
   0x7   :  { %s4510_s19 = smov 512   ;;  %s4511_s20 = smov 32  }
   0x8   :  { %46 = dma.hbm_to_vmem [thread:$0]  %s39_s13, 8192, %s41_s15, [#allocation7], %s4510_s19, %s4510_s19, %s4511_s20  }
   0x9   :  { %s4512_s8 = smov [#allocation4]   ;;  %s53_s24 = sshll.u32 %s7967_s4, 4  ;;  %s54_s24 = int_to_ptr.hbm [resolvable:$true] %s53_s24 }
   0xa   :  { %s27_s21 = sshll.u32 %s4512_s8, 4  ;;  %s66_s26 = sshll.u32 %s7968_s5, 4  ;;  %s28_s21 = int_to_ptr.vmem [resolvable:$true] %s27_s21  ;;  %s67_s26 = int_to_ptr.hbm [resolvable:$true] %s66_s26 }
   0xb   :  { %33 = dma.hbm_to_vmem [thread:$0]  %s26_s18, 8192, %s28_s21, [#allocation5], %s4510_s19, %s4510_s19, %s4511_s20  }
   0xc   :  { %s4513_s27 = smov [#allocation8]   ;;  %s4514_s1 = smov [#allocation9]  }
   0xd   :  { %s55_s28 = sshll.u32 %s4513_s27, 4  ;;  %s68_s29 = sshll.u32 %s4514_s1, 4  ;;  %s56_s28 = int_to_ptr.vmem [resolvable:$true] %s55_s28  ;;  %s69_s29 = int_to_ptr.vmem [resolvable:$true] %s68_s29 }
   0xe   :  { %61 = dma.hbm_to_vmem [thread:$0]  %s54_s24, 8192, %s56_s28, [#allocation7], %s4510_s19, %s4510_s19, %s4511_s20  }
   0xf   :  { %74 = dma.hbm_to_vmem [thread:$0]  %s67_s26, 8192, %s69_s29, [#allocation10], %s4510_s19, %s4510_s19, %s4511_s20  }
  0x10   :  { %4503 = dma.done.wait [#allocation5], 8192  }
  0x11   :  { %4504 = vsyncadd [#allocation5], 4294959104 }
  0x12   :  { %4505 = dma.done.wait [#allocation7], 16384  }
  0x13   :  { %4506 = vsyncadd [#allocation7], 4294950912 }
  0x14   :  { %4507 = dma.done.wait [#allocation10], 8192  }
  0x15   :  { %4508 = vsyncadd [#allocation10], 4294959104  ;;  %v165_v1 = vld [vmem:[#allocation4 + $0x1e0] sm:$0xff]  ;;  %v166_v2 = vld [vmem:[#allocation4 + $0x1e8] sm:$0xff]  ;;  %vm871_vm0 = vcmask 7168  }
  0x16   :  { %v167_v3 = vld [vmem:[#allocation4 + $0x1f0] sm:$0xff]  ;;  %179 = vmatpush.msra.mxu0 %v165_v1  ;;  %220 = vmatpush.msra.mxu1 %v166_v2  ;;  %v168_v4 = vld [vmem:[#allocation4 + $0x1f8] sm:$0xff]  ;;  %v161_v5 = vld [vmem:[#allocation4 + $0x1c0] sm:$0xff] }
  0x17   :  { %v162_v6 = vld [vmem:[#allocation4 + $0x1c8] sm:$0xff]  ;;  %261 = vmatpush.msra.mxu2 %v167_v3  ;;  %302 = vmatpush.msra.mxu3 %v168_v4  ;;  %v163_v7 = vld [vmem:[#allocation4 + $0x1d0] sm:$0xff]  ;;  %v164_v8 = vld [vmem:[#allocation4 + $0x1d8] sm:$0xff] }
  0x18   :  { %v157_v9 = vld [vmem:[#allocation4 + $0x1a0] sm:$0xff]  ;;  %180 = vmatpush.msra.mxu0 %v161_v5  ;;  %221 = vmatpush.msra.mxu1 %v162_v6  ;;  %v158_v10 = vld [vmem:[#allocation4 + $0x1a8] sm:$0xff]  ;;  %v159_v11 = vld [vmem:[#allocation4 + $0x1b0] sm:$0xff] }
  0x19   :  { %v160_v12 = vld [vmem:[#allocation4 + $0x1b8] sm:$0xff]  ;;  %262 = vmatpush.msra.mxu2 %v163_v7  ;;  %303 = vmatpush.msra.mxu3 %v164_v8  ;;  %v153_v13 = vld [vmem:[#allocation4 + $0x180] sm:$0xff]  ;;  %v154_v14 = vld [vmem:[#allocation4 + $0x188] sm:$0xff] }
  0x1a   :  { %181 = vmatpush.msra.mxu0 %v157_v9  ;;  %222 = vmatpush.msra.mxu1 %v158_v10  ;;  %v155_v15 = vld [vmem:[#allocation4 + $0x190] sm:$0xff]  ;;  %v156_v16 = vld [vmem:[#allocation4 + $0x198] sm:$0xff]  ;;  %v149_v17 = vld [vmem:[#allocation4 + $0x160] sm:$0xff] }
  0x1b   :  { %263 = vmatpush.msra.mxu2 %v159_v11  ;;  %304 = vmatpush.msra.mxu3 %v160_v12  ;;  %v150_v18 = vld [vmem:[#allocation4 + $0x168] sm:$0xff]  ;;  %v151_v19 = vld [vmem:[#allocation4 + $0x170] sm:$0xff]  ;;  %v152_v20 = vld [vmem:[#allocation4 + $0x178] sm:$0xff] }
  0x1c   :  { %182 = vmatpush.msra.mxu0 %v153_v13  ;;  %223 = vmatpush.msra.mxu1 %v154_v14  ;;  %v145_v21 = vld [vmem:[#allocation4 + $0x140] sm:$0xff]  ;;  %v146_v22 = vld [vmem:[#allocation4 + $0x148] sm:$0xff]  ;;  %v147_v23 = vld [vmem:[#allocation4 + $0x150] sm:$0xff] }
  0x1d   :  { %264 = vmatpush.msra.mxu2 %v155_v15  ;;  %305 = vmatpush.msra.mxu3 %v156_v16  ;;  %v148_v24 = vld [vmem:[#allocation4 + $0x158] sm:$0xff]  ;;  %v141_v25 = vld [vmem:[#allocation4 + $0x120] sm:$0xff]  ;;  %v142_v26 = vld [vmem:[#allocation4 + $0x128] sm:$0xff] }
  0x1e   :  { %183 = vmatpush.msra.mxu0 %v149_v17  ;;  %224 = vmatpush.msra.mxu1 %v150_v18  ;;  %v143_v27 = vld [vmem:[#allocation4 + $0x130] sm:$0xff]  ;;  %v144_v28 = vld [vmem:[#allocation4 + $0x138] sm:$0xff]  ;;  %v137_v29 = vld [vmem:[#allocation4 + $0x100] sm:$0xff] }
  0x1f   :  { %265 = vmatpush.msra.mxu2 %v151_v19  ;;  %306 = vmatpush.msra.mxu3 %v152_v20  ;;  %v138_v30 = vld [vmem:[#allocation4 + $0x108] sm:$0xff]  ;;  %v139_v31 = vld [vmem:[#allocation4 + $0x110] sm:$0xff]  ;;  %v140_v32 = vld [vmem:[#allocation4 + $0x118] sm:$0xff] }
  0x20   :  { %184 = vmatpush.msra.mxu0 %v145_v21  ;;  %225 = vmatpush.msra.mxu1 %v146_v22  ;;  %v133_v33 = vld [vmem:[#allocation4 + $0xe0] sm:$0xff]  ;;  %v134_v34 = vld [vmem:[#allocation4 + $0xe8] sm:$0xff]  ;;  %v135_v35 = vld [vmem:[#allocation4 + $0xf0] sm:$0xff] }
  0x21   :  { %266 = vmatpush.msra.mxu2 %v147_v23  ;;  %307 = vmatpush.msra.mxu3 %v148_v24  ;;  %v136_v36 = vld [vmem:[#allocation4 + $0xf8] sm:$0xff]  ;;  %v129_v37 = vld [vmem:[#allocation4 + $0xc0] sm:$0xff]  ;;  %v130_v38 = vld [vmem:[#allocation4 + $0xc8] sm:$0xff] }
  0x22   :  { %185 = vmatpush.msra.mxu0 %v141_v25  ;;  %226 = vmatpush.msra.mxu1 %v142_v26  ;;  %v131_v39 = vld [vmem:[#allocation4 + $0xd0] sm:$0xff]  ;;  %v132_v40 = vld [vmem:[#allocation4 + $0xd8] sm:$0xff]  ;;  %v125_v41 = vld [vmem:[#allocation4 + $0xa0] sm:$0xff] }
  0x23   :  { %267 = vmatpush.msra.mxu2 %v143_v27  ;;  %308 = vmatpush.msra.mxu3 %v144_v28  ;;  %v126_v42 = vld [vmem:[#allocation4 + $0xa8] sm:$0xff]  ;;  %v127_v43 = vld [vmem:[#allocation4 + $0xb0] sm:$0xff]  ;;  %v128_v44 = vld [vmem:[#allocation4 + $0xb8] sm:$0xff] }
  0x24   :  { %186 = vmatpush.msra.mxu0 %v137_v29  ;;  %227 = vmatpush.msra.mxu1 %v138_v30  ;;  %v121_v45 = vld [vmem:[#allocation4 + $0x80] sm:$0xff]  ;;  %v122_v46 = vld [vmem:[#allocation4 + $0x88] sm:$0xff]  ;;  %v123_v47 = vld [vmem:[#allocation4 + $0x90] sm:$0xff] }
  0x25   :  { %268 = vmatpush.msra.mxu2 %v139_v31  ;;  %309 = vmatpush.msra.mxu3 %v140_v32  ;;  %v124_v48 = vld [vmem:[#allocation4 + $0x98] sm:$0xff]  ;;  %v117_v49 = vld [vmem:[#allocation4 + $0x60] sm:$0xff]  ;;  %v118_v50 = vld [vmem:[#allocation4 + $0x68] sm:$0xff] }
  0x26   :  { %187 = vmatpush.msra.mxu0 %v133_v33  ;;  %228 = vmatpush.msra.mxu1 %v134_v34  ;;  %v119_v51 = vld [vmem:[#allocation4 + $0x70] sm:$0xff]  ;;  %v120_v52 = vld [vmem:[#allocation4 + $0x78] sm:$0xff]  ;;  %v113_v53 = vld [vmem:[#allocation4 + $0x40] sm:$0xff] }
  0x27   :  { %269 = vmatpush.msra.mxu2 %v135_v35  ;;  %310 = vmatpush.msra.mxu3 %v136_v36  ;;  %v114_v54 = vld [vmem:[#allocation4 + $0x48] sm:$0xff]  ;;  %v115_v55 = vld [vmem:[#allocation4 + $0x50] sm:$0xff]  ;;  %v116_v56 = vld [vmem:[#allocation4 + $0x58] sm:$0xff] }
  0x28   :  { %188 = vmatpush.msra.mxu0 %v129_v37  ;;  %229 = vmatpush.msra.mxu1 %v130_v38  ;;  %v109_v57 = vld [vmem:[#allocation4 + $0x20] sm:$0xff]  ;;  %v110_v58 = vld [vmem:[#allocation4 + $0x28] sm:$0xff]  ;;  %v111_v59 = vld [vmem:[#allocation4 + $0x30] sm:$0xff] }
  0x29   :  { %270 = vmatpush.msra.mxu2 %v131_v39  ;;  %311 = vmatpush.msra.mxu3 %v132_v40  ;;  %v112_v60 = vld [vmem:[#allocation4 + $0x38] sm:$0xff]  ;;  %v105_v61 = vld [vmem:[#allocation4] sm:$0xff]  ;;  %v106_v62 = vld [vmem:[#allocation4 + $0x8] sm:$0xff] }
  0x2a   :  { %189 = vmatpush.msra.mxu0 %v125_v41  ;;  %230 = vmatpush.msra.mxu1 %v126_v42  ;;  %v107_v63 = vld [vmem:[#allocation4 + $0x10] sm:$0xff]  ;;  %v108_v0 = vld [vmem:[#allocation4 + $0x18] sm:$0xff]  ;;  %v457_v3 = vld [vmem:[#allocation6 + $0x1e0] sm:$0xff] }
  0x2b   :  { %271 = vmatpush.msra.mxu2 %v127_v43  ;;  %312 = vmatpush.msra.mxu3 %v128_v44  ;;  %v97_v1 = vld [vmem:[%s7963_s0] sm:$0xff]  ;;  %v459_v2 = vld [vmem:[#allocation6 + $0x1f0] sm:$0xff]  ;;  %v458_v4 = vld [vmem:[#allocation6 + $0x1e8] sm:$0xff] }
  0x2c   :  { %190 = vmatpush.msra.mxu0 %v121_v45  ;;  %231 = vmatpush.msra.mxu1 %v122_v46  ;;  %v460_v5 = vld [vmem:[#allocation6 + $0x1f8] sm:$0xff]  ;;  %v455_v6 = vld [vmem:[#allocation6 + $0x1d0] sm:$0xff]  ;;  %v453_v7 = vld [vmem:[#allocation6 + $0x1c0] sm:$0xff] }
  0x2d   :  { %272 = vmatpush.msra.mxu2 %v123_v47  ;;  %313 = vmatpush.msra.mxu3 %v124_v48  ;;  %v454_v8 = vld [vmem:[#allocation6 + $0x1c8] sm:$0xff]  ;;  %v4584_v9 = vld [vmem:[#allocation6 + $0x1d8] sm:$0xff]  ;;  %v451_v10 = vld [vmem:[#allocation6 + $0x1b0] sm:$0xff] }
  0x2e   :  { %191 = vmatpush.msra.mxu0 %v117_v49  ;;  %232 = vmatpush.msra.mxu1 %v118_v50  ;;  %v449_v11 = vld [vmem:[#allocation6 + $0x1a0] sm:$0xff]  ;;  %v450_v12 = vld [vmem:[#allocation6 + $0x1a8] sm:$0xff]  ;;  %v4586_v13 = vld [vmem:[#allocation6 + $0x1b8] sm:$0xff] }
  0x2f   :  { %273 = vmatpush.msra.mxu2 %v119_v51  ;;  %314 = vmatpush.msra.mxu3 %v120_v52  ;;  %v98_v14 = vld [vmem:[%s7963_s0 + $0x8] sm:$0xff]  ;;  %v447_v15 = vld [vmem:[#allocation6 + $0x190] sm:$0xff]  ;;  %v4593_v18 = vld [vmem:[#allocation6 + $0x198] sm:$0xff] }
  0x30   :  { %192 = vmatpush.msra.mxu0 %v113_v53  ;;  %233 = vmatpush.msra.mxu1 %v114_v54  ;;  %v445_v16 = vld [vmem:[#allocation6 + $0x180] sm:$0xff]  ;;  %v446_v17 = vld [vmem:[#allocation6 + $0x188] sm:$0xff]  ;;  %v443_v19 = vld [vmem:[#allocation6 + $0x170] sm:$0xff] }
  0x31   :  { %274 = vmatpush.msra.mxu2 %v115_v55  ;;  %315 = vmatpush.msra.mxu3 %v116_v56  ;;  %v4595_v20 = vld [vmem:[#allocation6 + $0x160] sm:$0xff]  ;;  %v4597_v21 = vld [vmem:[#allocation6 + $0x168] sm:$0xff]  ;;  %v4599_v22 = vld [vmem:[#allocation6 + $0x178] sm:$0xff] }
  0x32   :  { %193 = vmatpush.msra.mxu0 %v109_v57  ;;  %234 = vmatpush.msra.mxu1 %v110_v58  ;;  %v439_v23 = vld [vmem:[#allocation6 + $0x150] sm:$0xff]  ;;  %v4602_v24 = vld [vmem:[#allocation6 + $0x140] sm:$0xff]  ;;  %v4605_v25 = vld [vmem:[#allocation6 + $0x148] sm:$0xff] }
  0x33   :  { %275 = vmatpush.msra.mxu2 %v111_v59  ;;  %316 = vmatpush.msra.mxu3 %v112_v60  ;;  %v4607_v26 = vld [vmem:[#allocation6 + $0x158] sm:$0xff]  ;;  %v99_v27 = vld [vmem:[%s7963_s0 + $0x10] sm:$0xff]  ;;  %v4618_v29 = vld [vmem:[#allocation6 + $0x120] sm:$0xff] }
  0x34   :  { %194 = vmatpush.msra.mxu0 %v105_v61  ;;  %235 = vmatpush.msra.mxu1 %v106_v62  ;;  %v4616_v28 = vld [vmem:[#allocation6 + $0x130] sm:$0xff]  ;;  %v4621_v30 = vld [vmem:[#allocation6 + $0x128] sm:$0xff]  ;;  %v4623_v31 = vld [vmem:[#allocation6 + $0x138] sm:$0xff] }
  0x35   :  { %276 = vmatpush.msra.mxu2 %v107_v63  ;;  %317 = vmatpush.msra.mxu3 %v108_v0  ;;  %v4625_v32 = vld [vmem:[#allocation6 + $0x110] sm:$0xff]  ;;  %v4627_v33 = vld [vmem:[#allocation6 + $0x100] sm:$0xff]  ;;  %v4631_v34 = vld [vmem:[#allocation6 + $0x108] sm:$0xff] }
  0x36   :  { %195 = vmatmul.f32.vlgmr.msra.gmra.mxu0 %v97_v1  ;;  %236 = vmatmul.f32.vlgmr.msra.gmra.mxu1 %v97_v1  ;;  %v4633_v35 = vld [vmem:[#allocation6 + $0x118] sm:$0xff]  ;;  %v4637_v36 = vld [vmem:[#allocation6 + $0xf0] sm:$0xff]  ;;  %v4639_v37 = vld [vmem:[#allocation6 + $0xe0] sm:$0xff] }
  0x37   :  { %277 = vmatmul.f32.vlgmr.msra.gmra.mxu2 %v97_v1  ;;  %318 = vmatmul.f32.vlgmr.msra.gmra.mxu3 %v97_v1  ;;  %v4643_v38 = vld [vmem:[#allocation6 + $0xe8] sm:$0xff]  ;;  %v4645_v39 = vld [vmem:[#allocation6 + $0xf8] sm:$0xff]  ;;  %v4655_v41 = vld [vmem:[#allocation6 + $0xd0] sm:$0xff] }
  0x38   :  { %501 = vmatpush.msrb.mxu2 %v459_v2  ;;  %461 = vmatpush.msrb.mxu0 %v457_v3  ;;  %v100_v40 = vld [vmem:[%s7963_s0 + $0x18] sm:$0xff]  ;;  %v4657_v42 = vld [vmem:[#allocation6 + $0xc0] sm:$0xff]  ;;  %v4660_v43 = vld [vmem:[#allocation6 + $0xc8] sm:$0xff] }
  0x39   :  { %481 = vmatpush.msrb.mxu1 %v458_v4  ;;  %521 = vmatpush.msrb.mxu3 %v460_v5  ;;  %v4662_v44 = vld [vmem:[#allocation6 + $0xd8] sm:$0xff]  ;;  %v4664_v45 = vld [vmem:[#allocation6 + $0xb0] sm:$0xff]  ;;  %v4666_v46 = vld [vmem:[#allocation6 + $0xa0] sm:$0xff] }
  0x3a   :  { %502 = vmatpush.msrb.mxu2 %v455_v6  ;;  %462 = vmatpush.msrb.mxu0 %v453_v7  ;;  %v4670_v47 = vld [vmem:[#allocation6 + $0xa8] sm:$0xff]  ;;  %v4672_v48 = vld [vmem:[#allocation6 + $0xb8] sm:$0xff]  ;;  %v4676_v49 = vld [vmem:[#allocation6 + $0x90] sm:$0xff] }
  0x3b   :  { %482 = vmatpush.msrb.mxu1 %v454_v8  ;;  %522 = vmatpush.msrb.mxu3 %v4584_v9  ;;  %v4678_v50 = vld [vmem:[#allocation6 + $0x80] sm:$0xff]  ;;  %v4682_v51 = vld [vmem:[#allocation6 + $0x88] sm:$0xff]  ;;  %v4684_v52 = vld [vmem:[#allocation6 + $0x98] sm:$0xff] }
  0x3c   :  { %503 = vmatpush.msrb.mxu2 %v451_v10  ;;  %463 = vmatpush.msrb.mxu0 %v449_v11  ;;  %v101_v53 = vld [vmem:[%s7963_s0 + $0x20] sm:$0xff]  ;;  %v4694_v54 = vld [vmem:[#allocation6 + $0x70] sm:$0xff]  ;;  %v4699_v56 = vld [vmem:[#allocation6 + $0x68] sm:$0xff]  ;;  %v7973_v10 = vmov 0.0  }
  0x3d   :  { %483 = vmatpush.msrb.mxu1 %v450_v12  ;;  %523 = vmatpush.msrb.mxu3 %v4586_v13  ;;  %v4696_v55 = vld [vmem:[#allocation6 + $0x60] sm:$0xff]  ;;  %v4701_v57 = vld [vmem:[#allocation6 + $0x78] sm:$0xff]  ;;  %v4703_v58 = vld [vmem:[#allocation6 + $0x50] sm:$0xff] }
  0x3e   :  { %198 = vmatmul.f32.gmra.mxu0 %v98_v14  ;;  %239 = vmatmul.f32.gmra.mxu1 %v98_v14  ;;  %v4705_v59 = vld [vmem:[#allocation6 + $0x40] sm:$0xff]  ;;  %v4709_v60 = vld [vmem:[#allocation6 + $0x48] sm:$0xff]  ;;  %v4711_v61 = vld [vmem:[#allocation6 + $0x58] sm:$0xff] }
  0x3f   :  { %280 = vmatmul.f32.gmra.mxu2 %v98_v14  ;;  %321 = vmatmul.f32.gmra.mxu3 %v98_v14  ;;  %v4715_v62 = vld [vmem:[#allocation6 + $0x30] sm:$0xff]  ;;  %v4717_v63 = vld [vmem:[#allocation6 + $0x20] sm:$0xff]  ;;  %v4721_v0 = vld [vmem:[#allocation6 + $0x28] sm:$0xff] }
  0x40   :  { %504 = vmatpush.msrb.mxu2 %v447_v15  ;;  %464 = vmatpush.msrb.mxu0 %v445_v16  ;;  %v4723_v1 = vld [vmem:[#allocation6 + $0x38] sm:$0xff]  ;;  %v102_v2 = vld [vmem:[%s7963_s0 + $0x28] sm:$0xff]  ;;  %v4733_v3 = vld [vmem:[#allocation6 + $0x10] sm:$0xff] }
  0x41   :  { %484 = vmatpush.msrb.mxu1 %v446_v17  ;;  %524 = vmatpush.msrb.mxu3 %v4593_v18  ;;  %8547 = vst [vmem:[#allocation14_spill] sm:$0xff] %v4733_v3  ;;  %v4736_v4 = vld [vmem:[#allocation6] sm:$0xff]  ;;  %v4738_v5 = vld [vmem:[#allocation6 + $0x8] sm:$0xff]  ;;  %v4740_v6 = vld [vmem:[#allocation6 + $0x18] sm:$0xff] }
  0x42   :  { %505 = vmatpush.msrb.mxu2 %v443_v19  ;;  %465 = vmatpush.msrb.mxu0 %v4595_v20  ;;  %8548 = vst [vmem:[#allocation15_spill] sm:$0xff] %v4740_v6  ;;  %v103_v7 = vld [vmem:[%s7963_s0 + $0x30] sm:$0xff]  ;;  %v104_v8 = vld [vmem:[%s7963_s0 + $0x38] sm:$0xff]  ;;  %v4756_v11 = vld [vmem:[#allocation9 + $0x1e0] sm:$0xff] }
  0x43   :  { %485 = vmatpush.msrb.mxu1 %v4597_v21  ;;  %525 = vmatpush.msrb.mxu3 %v4599_v22  ;;  %8549 = vst [vmem:[#allocation16_spill] sm:$0xff] %v4756_v11  ;;  %v4758_v12 = vld [vmem:[#allocation9 + $0x1e8] sm:$0xff]  ;;  %v4760_v14 = vld [vmem:[#allocation9 + $0x1f0] sm:$0xff]  ;;  %v4764_v15 = vld [vmem:[#allocation9 + $0x1f8] sm:$0xff] }
  0x44   :  { %506 = vmatpush.msrb.mxu2 %v439_v23  ;;  %466 = vmatpush.msrb.mxu0 %v4602_v24  ;;  %8550 = vst [vmem:[#allocation17_spill] sm:$0xff] %v4758_v12  ;;  %v4766_v16 = vld [vmem:[#allocation9 + $0x1c0] sm:$0xff]  ;;  %v4768_v17 = vld [vmem:[#allocation9 + $0x1c8] sm:$0xff]  ;;  %v4772_v19 = vld [vmem:[#allocation9 + $0x1d0] sm:$0xff] }
  0x45   :  { %486 = vmatpush.msrb.mxu1 %v4605_v25  ;;  %526 = vmatpush.msrb.mxu3 %v4607_v26  ;;  %8551 = vst [vmem:[#allocation18_spill] sm:$0xff] %v4760_v14  ;;  %v4774_v23 = vld [vmem:[#allocation9 + $0x1d8] sm:$0xff] }
  0x46   :  { %201 = vmatmul.f32.gmra.mxu0 %v99_v27  ;;  %242 = vmatmul.f32.gmra.mxu1 %v99_v27  ;;  %8552 = vst [vmem:[#allocation19_spill] sm:$0xff] %v4764_v15 }
  0x47   :  { %283 = vmatmul.f32.gmra.mxu2 %v99_v27  ;;  %324 = vmatmul.f32.gmra.mxu3 %v99_v27  ;;  %8553 = vst [vmem:[#allocation20_spill] sm:$0xff] %v4766_v16  ;;  %v4776_v27 = vld [vmem:[#allocation9 + $0x1a0] sm:$0xff] }
  0x48   :  { %507 = vmatpush.msrb.mxu2 %v4616_v28  ;;  %467 = vmatpush.msrb.mxu0 %v4618_v29  ;;  %8554 = vst [vmem:[#allocation21_spill] sm:$0xff] %v4768_v17 }
  0x49   :  { %487 = vmatpush.msrb.mxu1 %v4621_v30  ;;  %527 = vmatpush.msrb.mxu3 %v4623_v31  ;;  %8555 = vst [vmem:[#allocation22_spill] sm:$0xff] %v4772_v19 }
  0x4a   :  { %508 = vmatpush.msrb.mxu2 %v4625_v32  ;;  %468 = vmatpush.msrb.mxu0 %v4627_v33  ;;  %8556 = vst [vmem:[#allocation23_spill] sm:$0xff] %v4774_v23 }
  0x4b   :  { %488 = vmatpush.msrb.mxu1 %v4631_v34  ;;  %528 = vmatpush.msrb.mxu3 %v4633_v35  ;;  %8557 = vst [vmem:[#allocation24_spill] sm:$0xff] %v4776_v27 }
  0x4c   :  { %509 = vmatpush.msrb.mxu2 %v4637_v36  ;;  %469 = vmatpush.msrb.mxu0 %v4639_v37 }
  0x4d   :  { %489 = vmatpush.msrb.mxu1 %v4643_v38  ;;  %529 = vmatpush.msrb.mxu3 %v4645_v39 }
  0x4e   :  { %204 = vmatmul.f32.gmra.mxu0 %v100_v40  ;;  %245 = vmatmul.f32.gmra.mxu1 %v100_v40 }
  0x4f   :  { %286 = vmatmul.f32.gmra.mxu2 %v100_v40  ;;  %327 = vmatmul.f32.gmra.mxu3 %v100_v40  ;;  %v4780_v40 = vld [vmem:[#allocation9 + $0x1a8] sm:$0xff] }
  0x50   :  { %510 = vmatpush.msrb.mxu2 %v4655_v41  ;;  %470 = vmatpush.msrb.mxu0 %v4657_v42  ;;  %8558 = vst [vmem:[#allocation25_spill] sm:$0xff] %v4780_v40 }
  0x51   :  { %490 = vmatpush.msrb.mxu1 %v4660_v43  ;;  %530 = vmatpush.msrb.mxu3 %v4662_v44 }
  0x52   :  { %511 = vmatpush.msrb.mxu2 %v4664_v45  ;;  %471 = vmatpush.msrb.mxu0 %v4666_v46 }
  0x53   :  { %491 = vmatpush.msrb.mxu1 %v4670_v47  ;;  %531 = vmatpush.msrb.mxu3 %v4672_v48 }
  0x54   :  { %512 = vmatpush.msrb.mxu2 %v4676_v49  ;;  %472 = vmatpush.msrb.mxu0 %v4678_v50 }
  0x55   :  { %492 = vmatpush.msrb.mxu1 %v4682_v51  ;;  %532 = vmatpush.msrb.mxu3 %v4684_v52 }
  0x56   :  { %207 = vmatmul.f32.gmra.mxu0 %v101_v53  ;;  %248 = vmatmul.f32.gmra.mxu1 %v101_v53 }
  0x57   :  { %289 = vmatmul.f32.gmra.mxu2 %v101_v53  ;;  %330 = vmatmul.f32.gmra.mxu3 %v101_v53  ;;  %v4782_v53 = vld [vmem:[#allocation9 + $0x1b0] sm:$0xff] }
  0x58   :  { %513 = vmatpush.msrb.mxu2 %v4694_v54  ;;  %473 = vmatpush.msrb.mxu0 %v4696_v55  ;;  %8559 = vst [vmem:[#allocation26_spill] sm:$0xff] %v4782_v53 }
  0x59   :  { %493 = vmatpush.msrb.mxu1 %v4699_v56  ;;  %533 = vmatpush.msrb.mxu3 %v4701_v57 }
  0x5a   :  { %514 = vmatpush.msrb.mxu2 %v4703_v58  ;;  %474 = vmatpush.msrb.mxu0 %v4705_v59 }
  0x5b   :  { %494 = vmatpush.msrb.mxu1 %v4709_v60  ;;  %534 = vmatpush.msrb.mxu3 %v4711_v61 }
  0x5c   :  { %515 = vmatpush.msrb.mxu2 %v4715_v62  ;;  %475 = vmatpush.msrb.mxu0 %v4717_v63 }
  0x5d   :  { %495 = vmatpush.msrb.mxu1 %v4721_v0  ;;  %535 = vmatpush.msrb.mxu3 %v4723_v1 }
  0x5e   :  { %210 = vmatmul.f32.gmra.mxu0 %v102_v2  ;;  %251 = vmatmul.f32.gmra.mxu1 %v102_v2 }
  0x5f   :  { %292 = vmatmul.f32.gmra.mxu2 %v102_v2  ;;  %333 = vmatmul.f32.gmra.mxu3 %v102_v2  ;;  %v4784_v2 = vld [vmem:[#allocation9 + $0x1b8] sm:$0xff] }
  0x60   :  { %516 = vmatpush.msrb.mxu2 %v4733_v3  ;;  %476 = vmatpush.msrb.mxu0 %v4736_v4  ;;  %8560 = vst [vmem:[#allocation27_spill] sm:$0xff] %v4784_v2 }
  0x61   :  { %496 = vmatpush.msrb.mxu1 %v4738_v5  ;;  %536 = vmatpush.msrb.mxu3 %v4740_v6 }
  0x62   :  { %688 = vmatpush.msra.mxu0 %v4756_v11  ;;  %728 = vmatpush.msra.mxu2 %v4760_v14  ;;  %v4974_v11 = vld [vmem:[#allocation8 + $0x1d0] sm:$0xff] }
  0x63   :  { %708 = vmatpush.msra.mxu1 %v4758_v12  ;;  %748 = vmatpush.msra.mxu3 %v4764_v15  ;;  %v4932_v15 = vld [vmem:[#allocation9 + $0x38] sm:$0xff]  ;;  %8621 = vst [vmem:[#allocation88_spill] sm:$0xff] %v4974_v11 }
  0x64   :  { %689 = vmatpush.msra.mxu0 %v4766_v16  ;;  %729 = vmatpush.msra.mxu2 %v4772_v19  ;;  %v4800_v19 = vld [vmem:[#allocation9 + $0x198] sm:$0xff]  ;;  %v4924_v16 = vld [vmem:[#allocation9 + $0x20] sm:$0xff]  ;;  %8608 = vst [vmem:[#allocation75_spill] sm:$0xff] %v4932_v15 }
  0x65   :  { %709 = vmatpush.msra.mxu1 %v4768_v17  ;;  %749 = vmatpush.msra.mxu3 %v4774_v23  ;;  %8564 = vst [vmem:[#allocation31_spill] sm:$0xff] %v4800_v19  ;;  %v4824_v23 = vld [vmem:[#allocation9 + $0x120] sm:$0xff]  ;;  %v4832_v17 = vld [vmem:[#allocation9 + $0x138] sm:$0xff] }
  0x66   :  { %213 = vmatmul.f32.gmra.mxu0 %v103_v7  ;;  %254 = vmatmul.f32.gmra.mxu1 %v103_v7  ;;  %8573 = vst [vmem:[#allocation40_spill] sm:$0xff] %v4824_v23  ;;  %v4966_v12 = vld [vmem:[#allocation8 + $0x1f8] sm:$0xff] }
  0x67   :  { %295 = vmatmul.f32.gmra.mxu2 %v103_v7  ;;  %336 = vmatmul.f32.gmra.mxu3 %v103_v7  ;;  %v4792_v7 = vld [vmem:[#allocation9 + $0x180] sm:$0xff]  ;;  %8576 = vst [vmem:[#allocation43_spill] sm:$0xff] %v4832_v17 }
  0x68   :  { %690 = vmatpush.msra.mxu0 %v4776_v27  ;;  %710 = vmatpush.msra.mxu1 %v4780_v40  ;;  %8561 = vst [vmem:[#allocation28_spill] sm:$0xff] %v4792_v7  ;;  %v4804_v40 = vld [vmem:[#allocation9 + $0x160] sm:$0xff]  ;;  %v4812_v27 = vld [vmem:[#allocation9 + $0x178] sm:$0xff] }
  0x69   :  { %730 = vmatpush.msra.mxu2 %v4782_v53  ;;  %750 = vmatpush.msra.mxu3 %v4784_v2  ;;  %8565 = vst [vmem:[#allocation32_spill] sm:$0xff] %v4804_v40  ;;  %v4806_v53 = vld [vmem:[#allocation9 + $0x168] sm:$0xff]  ;;  %v4808_v2 = vld [vmem:[#allocation9 + $0x170] sm:$0xff] }
  0x6a   :  { %691 = vmatpush.msra.mxu0 %v4792_v7  ;;  %8566 = vst [vmem:[#allocation33_spill] sm:$0xff] %v4806_v53  ;;  %v4814_v7 = vld [vmem:[#allocation9 + $0x140] sm:$0xff] }
  0x6b   :  { %751 = vmatpush.msra.mxu3 %v4800_v19  ;;  %8567 = vst [vmem:[#allocation34_spill] sm:$0xff] %v4808_v2  ;;  %v4820_v19 = vld [vmem:[#allocation9 + $0x150] sm:$0xff] }
  0x6c   :  { %692 = vmatpush.msra.mxu0 %v4804_v40  ;;  %8568 = vst [vmem:[#allocation35_spill] sm:$0xff] %v4812_v27  ;;  %v4830_v40 = vld [vmem:[#allocation9 + $0x130] sm:$0xff] }
  0x6d   :  { %8569 = vst [vmem:[#allocation36_spill] sm:$0xff] %v4814_v7  ;;  %752 = vmatpush.msra.mxu3 %v4812_v27  ;;  %v4844_v27 = vld [vmem:[#allocation9 + $0x110] sm:$0xff] }
  0x6e   :  { %216 = vmatmul.f32.gmra.mxu0 %v104_v8  ;;  %257 = vmatmul.f32.gmra.mxu1 %v104_v8  ;;  %8571 = vst [vmem:[#allocation38_spill] sm:$0xff] %v4820_v19 }
  0x6f   :  { %298 = vmatmul.f32.gmra.mxu2 %v104_v8  ;;  %339 = vmatmul.f32.gmra.mxu3 %v104_v8  ;;  %v4794_v8 = vld [vmem:[#allocation9 + $0x188] sm:$0xff]  ;;  %8575 = vst [vmem:[#allocation42_spill] sm:$0xff] %v4830_v40 }
  0x70   :  { %8562 = vst [vmem:[#allocation29_spill] sm:$0xff] %v4794_v8  ;;  %711 = vmatpush.msra.mxu1 %v4794_v8  ;;  %v4816_v8 = vld [vmem:[#allocation9 + $0x148] sm:$0xff]  ;;  %693 = vmatpush.msra.mxu0 %v4814_v7  ;;  %v4840_v7 = vld [vmem:[#allocation9 + $0x100] sm:$0xff] }
  0x71   :  { %8570 = vst [vmem:[#allocation37_spill] sm:$0xff] %v4816_v8 }
  0x72   :  { %712 = vmatpush.msra.mxu1 %v4806_v53  ;;  %v4828_v53 = vld [vmem:[#allocation9 + $0x128] sm:$0xff]  ;;  %694 = vmatpush.msra.mxu0 %v4824_v23  ;;  %8577 = vst [vmem:[#allocation44_spill] sm:$0xff] %v4840_v7  ;;  %v4860_v23 = vld [vmem:[#allocation9 + $0xf8] sm:$0xff] }
  0x73   :  { %8574 = vst [vmem:[#allocation41_spill] sm:$0xff] %v4828_v53 }
  0x74   :  { %713 = vmatpush.msra.mxu1 %v4816_v8  ;;  %v4842_v8 = vld [vmem:[#allocation9 + $0x108] sm:$0xff]  ;;  %8579 = vst [vmem:[#allocation46_spill] sm:$0xff] %v4844_v27  ;;  %695 = vmatpush.msra.mxu0 %v4840_v7  ;;  %v4862_v7 = vld [vmem:[#allocation9 + $0xc0] sm:$0xff] }
  0x75   :  { %8578 = vst [vmem:[#allocation45_spill] sm:$0xff] %v4842_v8 }
  0x76   :  { %477 = vmatmul.f32.vlgmr.msrb.gmra.mxu0 %v7973_v10  ;;  %497 = vmatmul.f32.vlgmr.msrb.gmra.mxu1 %v7973_v10  ;;  %8584 = vst [vmem:[#allocation51_spill] sm:$0xff] %v4860_v23 }
  0x77   :  { %517 = vmatmul.f32.vlgmr.msrb.gmra.mxu2 %v7973_v10  ;;  %537 = vmatmul.f32.vlgmr.msrb.gmra.mxu3 %v7973_v10  ;;  %v4796_v10 = vld [vmem:[#allocation9 + $0x190] sm:$0xff]  ;;  %8585 = vst [vmem:[#allocation52_spill] sm:$0xff] %v4862_v7 }
  0x78   :  { %8563 = vst [vmem:[#allocation30_spill] sm:$0xff] %v4796_v10  ;;  %731 = vmatpush.msra.mxu2 %v4796_v10  ;;  %v4822_v10 = vld [vmem:[#allocation9 + $0x158] sm:$0xff]  ;;  %714 = vmatpush.msra.mxu1 %v4828_v53  ;;  %v4852_v53 = vld [vmem:[#allocation9 + $0xe0] sm:$0xff] }
  0x79   :  { %8572 = vst [vmem:[#allocation39_spill] sm:$0xff] %v4822_v10  ;;  %753 = vmatpush.msra.mxu3 %v4822_v10  ;;  %696 = vmatpush.msra.mxu0 %v4852_v53  ;;  %v4872_v10 = vld [vmem:[#allocation9 + $0xa0] sm:$0xff] }
  0x7a   :  { %732 = vmatpush.msra.mxu2 %v4808_v2  ;;  %715 = vmatpush.msra.mxu1 %v4842_v8  ;;  %8581 = vst [vmem:[#allocation48_spill] sm:$0xff] %v4852_v53  ;;  %v4864_v8 = vld [vmem:[#allocation9 + $0xc8] sm:$0xff]  ;;  %v4878_v53 = vld [vmem:[#allocation9 + $0xb0] sm:$0xff]  ;;  %v4880_v2 = vld [vmem:[#allocation9 + $0xb8] sm:$0xff] }
  0x7b   :  { %754 = vmatpush.msra.mxu3 %v4832_v17  ;;  %v4856_v17 = vld [vmem:[#allocation9 + $0xf0] sm:$0xff]  ;;  %8586 = vst [vmem:[#allocation53_spill] sm:$0xff] %v4864_v8  ;;  %697 = vmatpush.msra.mxu0 %v4862_v7  ;;  %v4888_v7 = vld [vmem:[#allocation9 + $0x80] sm:$0xff] }
  0x7c   :  { %733 = vmatpush.msra.mxu2 %v4820_v19  ;;  %v4848_v19 = vld [vmem:[#allocation9 + $0x118] sm:$0xff]  ;;  %8583 = vst [vmem:[#allocation50_spill] sm:$0xff] %v4856_v17 }
  0x7d   :  { %8580 = vst [vmem:[#allocation47_spill] sm:$0xff] %v4848_v19  ;;  %755 = vmatpush.msra.mxu3 %v4848_v19  ;;  %v4868_v19 = vld [vmem:[#allocation9 + $0xd0] sm:$0xff]  ;;  %698 = vmatpush.msra.mxu0 %v4872_v10 }
  0x7e   :  { %734 = vmatpush.msra.mxu2 %v4830_v40  ;;  %v4854_v40 = vld [vmem:[#allocation9 + $0xe8] sm:$0xff]  ;;  %8587 = vst [vmem:[#allocation54_spill] sm:$0xff] %v4868_v19 }
  0x7f   :  { %8582 = vst [vmem:[#allocation49_spill] sm:$0xff] %v4854_v40  ;;  %716 = vmatpush.msra.mxu1 %v4854_v40  ;;  %756 = vmatpush.msra.mxu3 %v4860_v23  ;;  %v4876_v40 = vld [vmem:[#allocation9 + $0xa8] sm:$0xff]  ;;  %v4892_v23 = vld [vmem:[#allocation9 + $0x90] sm:$0xff] }
  0x80   :  { %735 = vmatpush.msra.mxu2 %v4844_v27  ;;  %v4870_v27 = vld [vmem:[#allocation9 + $0xd8] sm:$0xff]  ;;  %8589 = vst [vmem:[#allocation56_spill] sm:$0xff] %v4872_v10  ;;  %699 = vmatpush.msra.mxu0 %v4888_v7 }
  0x81   :  { %8588 = vst [vmem:[#allocation55_spill] sm:$0xff] %v4870_v27  ;;  %717 = vmatpush.msra.mxu1 %v4864_v8  ;;  %757 = vmatpush.msra.mxu3 %v4870_v27  ;;  %v4890_v8 = vld [vmem:[#allocation9 + $0x88] sm:$0xff] }
  0x82   :  { %736 = vmatpush.msra.mxu2 %v4856_v17  ;;  %8590 = vst [vmem:[#allocation57_spill] sm:$0xff] %v4876_v40  ;;  %v4916_v17 = vld [vmem:[#allocation9 + $0x48] sm:$0xff] }
  0x83   :  { %8591 = vst [vmem:[#allocation58_spill] sm:$0xff] %v4878_v53  ;;  %718 = vmatpush.msra.mxu1 %v4876_v40  ;;  %758 = vmatpush.msra.mxu3 %v4880_v2  ;;  %v4908_v40 = vld [vmem:[#allocation9 + $0x70] sm:$0xff] }
  0x84   :  { %8592 = vst [vmem:[#allocation59_spill] sm:$0xff] %v4880_v2  ;;  %737 = vmatpush.msra.mxu2 %v4868_v19  ;;  %v4896_v19 = vld [vmem:[#allocation9 + $0x98] sm:$0xff]  ;;  %v4904_v2 = vld [vmem:[#allocation9 + $0x60] sm:$0xff] }
  0x85   :  { %8593 = vst [vmem:[#allocation60_spill] sm:$0xff] %v4888_v7  ;;  %719 = vmatpush.msra.mxu1 %v4890_v8  ;;  %759 = vmatpush.msra.mxu3 %v4896_v19  ;;  %v4914_v7 = vld [vmem:[#allocation9 + $0x40] sm:$0xff] }
  0x86   :  { %738 = vmatpush.msra.mxu2 %v4878_v53  ;;  %8594 = vst [vmem:[#allocation61_spill] sm:$0xff] %v4890_v8  ;;  %v4906_v53 = vld [vmem:[#allocation9 + $0x68] sm:$0xff]  ;;  %700 = vmatpush.msra.mxu0 %v4904_v2  ;;  %v4912_v8 = vld [vmem:[#allocation9 + $0x78] sm:$0xff] }
  0x87   :  { %8595 = vst [vmem:[#allocation62_spill] sm:$0xff] %v4892_v23  ;;  %720 = vmatpush.msra.mxu1 %v4906_v53  ;;  %760 = vmatpush.msra.mxu3 %v4912_v8 }
  0x88   :  { %8596 = vst [vmem:[#allocation63_spill] sm:$0xff] %v4896_v19  ;;  %739 = vmatpush.msra.mxu2 %v4892_v23  ;;  %v4920_v19 = vld [vmem:[#allocation9 + $0x50] sm:$0xff]  ;;  %v4922_v23 = vld [vmem:[#allocation9 + $0x58] sm:$0xff]  ;;  %701 = vmatpush.msra.mxu0 %v4914_v7 }
  0x89   :  { %8597 = vst [vmem:[#allocation64_spill] sm:$0xff] %v4904_v2  ;;  %721 = vmatpush.msra.mxu1 %v4916_v17  ;;  %v4930_v2 = vld [vmem:[#allocation9 + $0x30] sm:$0xff]  ;;  %761 = vmatpush.msra.mxu3 %v4922_v23 }
  0x8a   :  { %8598 = vst [vmem:[#allocation65_spill] sm:$0xff] %v4906_v53  ;;  %740 = vmatpush.msra.mxu2 %v4908_v40  ;;  %v4928_v53 = vld [vmem:[#allocation9 + $0x28] sm:$0xff]  ;;  %702 = vmatpush.msra.mxu0 %v4924_v16 }
  0x8b   :  { %8599 = vst [vmem:[#allocation66_spill] sm:$0xff] %v4908_v40  ;;  %722 = vmatpush.msra.mxu1 %v4928_v53  ;;  %762 = vmatpush.msra.mxu3 %v4932_v15 }
  0x8c   :  { %8600 = vst [vmem:[#allocation67_spill] sm:$0xff] %v4912_v8  ;;  %741 = vmatpush.msra.mxu2 %v4920_v19  ;;  %v4944_v8 = vld [vmem:[#allocation9 + $0x10] sm:$0xff] }
  0x8d   :  { %8601 = vst [vmem:[#allocation68_spill] sm:$0xff] %v4914_v7  ;;  %v4940_v7 = vld [vmem:[#allocation9] sm:$0xff] }
  0x8e   :  { %8602 = vst [vmem:[#allocation69_spill] sm:$0xff] %v4916_v17  ;;  %742 = vmatpush.msra.mxu2 %v4930_v2  ;;  %v4942_v17 = vld [vmem:[#allocation9 + $0x8] sm:$0xff]  ;;  %703 = vmatpush.msra.mxu0 %v4940_v7 }
  0x8f   :  { %8603 = vst [vmem:[#allocation70_spill] sm:$0xff] %v4920_v19  ;;  %723 = vmatpush.msra.mxu1 %v4942_v17  ;;  %v4964_v19 = vld [vmem:[#allocation8 + $0x1f0] sm:$0xff] }
  0x90   :  { %8604 = vst [vmem:[#allocation71_spill] sm:$0xff] %v4922_v23  ;;  %743 = vmatpush.msra.mxu2 %v4944_v8 }
  0x91   :  { %8605 = vst [vmem:[#allocation72_spill] sm:$0xff] %v4924_v16  ;;  %v4952_v16 = vld [vmem:[#allocation9 + $0x18] sm:$0xff] }
  0x92   :  { %8606 = vst [vmem:[#allocation73_spill] sm:$0xff] %v4928_v53  ;;  %v4954_v53 = vld [vmem:[#allocation8 + $0x1e0] sm:$0xff]  ;;  %763 = vmatpush.msra.mxu3 %v4952_v16  ;;  %808 = vmatpush.msrb.mxu2 %v4964_v19 }
  0x93   :  { %8607 = vst [vmem:[#allocation74_spill] sm:$0xff] %v4930_v2  ;;  %v4956_v2 = vld [vmem:[#allocation8 + $0x1e8] sm:$0xff]  ;;  %768 = vmatpush.msrb.mxu0 %v4954_v53 }
  0x94   :  { %8609 = vst [vmem:[#allocation76_spill] sm:$0xff] %v4940_v7  ;;  %788 = vmatpush.msrb.mxu1 %v4956_v2  ;;  %v4972_v7 = vld [vmem:[#allocation8 + $0x1c8] sm:$0xff]  ;;  %828 = vmatpush.msrb.mxu3 %v4966_v12 }
  0x95   :  { %8610 = vst [vmem:[#allocation77_spill] sm:$0xff] %v4942_v17  ;;  %v4970_v17 = vld [vmem:[#allocation8 + $0x1c0] sm:$0xff]  ;;  %809 = vmatpush.msrb.mxu2 %v4974_v11 }
  0x96   :  { %8611 = vst [vmem:[#allocation78_spill] sm:$0xff] %v4944_v8  ;;  %769 = vmatpush.msrb.mxu0 %v4970_v17  ;;  %789 = vmatpush.msrb.mxu1 %v4972_v7  ;;  %v4998_v8 = vld [vmem:[#allocation8 + $0x190] sm:$0xff] }
  0x97   :  { %8612 = vst [vmem:[#allocation79_spill] sm:$0xff] %v4952_v16  ;;  %v4982_v16 = vld [vmem:[#allocation8 + $0x1a8] sm:$0xff] }
  0x98   :  { %8613 = vst [vmem:[#allocation80_spill] sm:$0xff] %v4954_v53  ;;  %v4988_v53 = vld [vmem:[#allocation8 + $0x1b8] sm:$0xff]  ;;  %790 = vmatpush.msrb.mxu1 %v4982_v16 }
  0x99   :  { %8614 = vst [vmem:[#allocation81_spill] sm:$0xff] %v4956_v2  ;;  %v4986_v2 = vld [vmem:[#allocation8 + $0x1b0] sm:$0xff] }
  0x9a   :  { %8617 = vst [vmem:[#allocation84_spill] sm:$0xff] %v4964_v19  ;;  %v4992_v19 = vld [vmem:[#allocation8 + $0x180] sm:$0xff]  ;;  %810 = vmatpush.msrb.mxu2 %v4986_v2 }
  0x9b   :  { %8618 = vst [vmem:[#allocation85_spill] sm:$0xff] %v4966_v12  ;;  %v4994_v12 = vld [vmem:[#allocation8 + $0x188] sm:$0xff] }
  0x9c   :  { %8619 = vst [vmem:[#allocation86_spill] sm:$0xff] %v4970_v17  ;;  %v5000_v17 = vld [vmem:[#allocation8 + $0x198] sm:$0xff]  ;;  %791 = vmatpush.msrb.mxu1 %v4994_v12  ;;  %811 = vmatpush.msrb.mxu2 %v4998_v8 }
  0x9d   :  { %8620 = vst [vmem:[#allocation87_spill] sm:$0xff] %v4972_v7 }
  0x9e   :  { %8624 = vst [vmem:[#allocation91_spill] sm:$0xff] %v4982_v16  ;;  %v5014_v16 = vld [vmem:[#allocation8 + $0x170] sm:$0xff] }
  0x9f   :  { %8625 = vst [vmem:[#allocation92_spill] sm:$0xff] %v4986_v2  ;;  %812 = vmatpush.msrb.mxu2 %v5014_v16 }
  0xa0   :  { %8626 = vst [vmem:[#allocation93_spill] sm:$0xff] %v4988_v53 }
  0xa1   :  { %8627 = vst [vmem:[#allocation94_spill] sm:$0xff] %v4992_v19 }
  0xa2   :  { %8628 = vst [vmem:[#allocation95_spill] sm:$0xff] %v4994_v12  ;;  %v5028_v12 = vld [vmem:[#allocation8 + $0x148] sm:$0xff] }
  0xa3   :  { %8629 = vst [vmem:[#allocation96_spill] sm:$0xff] %v4998_v8  ;;  %v5054_v8 = vld [vmem:[#allocation8 + $0x110] sm:$0xff] }
  0xa4   :  { %8630 = vst [vmem:[#allocation97_spill] sm:$0xff] %v5000_v17 }
  0xa5   :  { %8635 = vst [vmem:[#allocation102_spill] sm:$0xff] %v5014_v16  ;;  %v5048_v16 = vld [vmem:[#allocation8 + $0x100] sm:$0xff] }
  0xa6   :  { %8640 = vst [vmem:[#allocation107_spill] sm:$0xff] %v5028_v12 }
  0xa7   :  { %8647 = vst [vmem:[#allocation114_spill] sm:$0xff] %v5048_v16 }
  0xa8   :  { %8649 = vst [vmem:[#allocation116_spill] sm:$0xff] %v5054_v8 }
  0xb3   :  { %v4898_v27 = vpop.f32.mrf.mxu0  ;;  %v4900_v10 = vpop.f32.mrf.mxu1 }
  0xba   :  { %v4946_v40 = vpop.f32.mrf.mxu2  ;;  %v4948_v14 = vpop.f32.mrf.mxu3 }
  0xbb   :  { %v4958_v15 = vpop.f32.mrf.mxu0  ;;  %v4960_v23 = vpop.f32.mrf.mxu1 }
  0xbc   :  { %8615 = vst [vmem:[#allocation82_spill] sm:$0xff] %v4958_v15  ;;  %v4980_v15 = vld [vmem:[#allocation8 + $0x1a0] sm:$0xff] }
  0xbd   :  { %8616 = vst [vmem:[#allocation83_spill] sm:$0xff] %v4960_v23  ;;  %v4978_v23 = vld [vmem:[#allocation8 + $0x1d8] sm:$0xff]  ;;  %770 = vmatpush.msrb.mxu0 %v4980_v15 }
  0xbe   :  { %8622 = vst [vmem:[#allocation89_spill] sm:$0xff] %v4978_v23  ;;  %829 = vmatpush.msrb.mxu3 %v4978_v23  ;;  %v5010_v23 = vld [vmem:[#allocation8 + $0x160] sm:$0xff] }
  0xbf   :  { %8623 = vst [vmem:[#allocation90_spill] sm:$0xff] %v4980_v15  ;;  %771 = vmatpush.msrb.mxu0 %v4992_v19  ;;  %v5012_v15 = vld [vmem:[#allocation8 + $0x168] sm:$0xff]  ;;  %v5030_v19 = vld [vmem:[#allocation8 + $0x150] sm:$0xff] }
  0xc0   :  { %830 = vmatpush.msrb.mxu3 %v4988_v53  ;;  %8633 = vst [vmem:[#allocation100_spill] sm:$0xff] %v5010_v23  ;;  %792 = vmatpush.msrb.mxu1 %v5012_v15 }
  0xc1   :  { %8634 = vst [vmem:[#allocation101_spill] sm:$0xff] %v5012_v15  ;;  %772 = vmatpush.msrb.mxu0 %v5010_v23  ;;  %v5042_v15 = vld [vmem:[#allocation8 + $0x130] sm:$0xff]  ;;  %v5044_v23 = vld [vmem:[#allocation8 + $0x138] sm:$0xff]  ;;  %813 = vmatpush.msrb.mxu2 %v5030_v19 }
  0xc2   :  { %v5004_v7 = vpop.f32.mrf.mxu2  ;;  %v5006_v11 = vpop.f32.mrf.mxu3  ;;  %831 = vmatpush.msrb.mxu3 %v5000_v17  ;;  %8641 = vst [vmem:[#allocation108_spill] sm:$0xff] %v5030_v19  ;;  %v5038_v17 = vld [vmem:[#allocation8 + $0x128] sm:$0xff]  ;;  %793 = vmatpush.msrb.mxu1 %v5028_v12 }
  0xc3   :  { %8631 = vst [vmem:[#allocation98_spill] sm:$0xff] %v5004_v7  ;;  %v5016_v6 = vpop.f32.mrf.mxu0  ;;  %v5018_v3 = vpop.f32.mrf.mxu1  ;;  %v5022_v7 = vld [vmem:[#allocation8 + $0x178] sm:$0xff]  ;;  %814 = vmatpush.msrb.mxu2 %v5042_v15 }
  0xc4   :  { %8632 = vst [vmem:[#allocation99_spill] sm:$0xff] %v5006_v11  ;;  %v5026_v11 = vld [vmem:[#allocation8 + $0x140] sm:$0xff]  ;;  %832 = vmatpush.msrb.mxu3 %v5022_v7  ;;  %794 = vmatpush.msrb.mxu1 %v5038_v17 }
  0xc5   :  { %8636 = vst [vmem:[#allocation103_spill] sm:$0xff] %v5016_v6  ;;  %v5036_v6 = vld [vmem:[#allocation8 + $0x120] sm:$0xff]  ;;  %773 = vmatpush.msrb.mxu0 %v5026_v11  ;;  %815 = vmatpush.msrb.mxu2 %v5054_v8  ;;  %v5110_v8 = vld [vmem:[#allocation8 + $0x90] sm:$0xff] }
  0xc6   :  { %8637 = vst [vmem:[#allocation104_spill] sm:$0xff] %v5018_v3  ;;  %v5034_v3 = vld [vmem:[#allocation8 + $0x158] sm:$0xff] }
  0xc7   :  { %8638 = vst [vmem:[#allocation105_spill] sm:$0xff] %v5022_v7  ;;  %833 = vmatpush.msrb.mxu3 %v5034_v3  ;;  %v5050_v7 = vld [vmem:[#allocation8 + $0x108] sm:$0xff]  ;;  %774 = vmatpush.msrb.mxu0 %v5036_v6 }
  0xc8   :  { %8639 = vst [vmem:[#allocation106_spill] sm:$0xff] %v5026_v11  ;;  %v5056_v11 = vld [vmem:[#allocation8 + $0x118] sm:$0xff]  ;;  %795 = vmatpush.msrb.mxu1 %v5050_v7 }
  0xc9   :  { %8642 = vst [vmem:[#allocation109_spill] sm:$0xff] %v5034_v3  ;;  %834 = vmatpush.msrb.mxu3 %v5044_v23  ;;  %775 = vmatpush.msrb.mxu0 %v5048_v16  ;;  %v5066_v3 = vld [vmem:[#allocation8 + $0xe0] sm:$0xff]  ;;  %v5086_v16 = vld [vmem:[#allocation8 + $0xd0] sm:$0xff] }
  0xca   :  { %8643 = vst [vmem:[#allocation110_spill] sm:$0xff] %v5036_v6  ;;  %v5060_v12 = vpop.f32.mrf.mxu2  ;;  %v5062_v19 = vpop.f32.mrf.mxu3  ;;  %v5068_v6 = vld [vmem:[#allocation8 + $0xe8] sm:$0xff] }
  0xcb   :  { %8644 = vst [vmem:[#allocation111_spill] sm:$0xff] %v5038_v17  ;;  %v5070_v17 = vld [vmem:[#allocation8 + $0xf0] sm:$0xff]  ;;  %v5072_v53 = vpop.f32.mrf.mxu0  ;;  %v5074_v2 = vpop.f32.mrf.mxu1  ;;  %835 = vmatpush.msrb.mxu3 %v5056_v11  ;;  %776 = vmatpush.msrb.mxu0 %v5066_v3 }
  0xcc   :  { %8645 = vst [vmem:[#allocation112_spill] sm:$0xff] %v5042_v15  ;;  %796 = vmatpush.msrb.mxu1 %v5068_v6  ;;  %816 = vmatpush.msrb.mxu2 %v5070_v17 }
  0xcd   :  { %8646 = vst [vmem:[#allocation113_spill] sm:$0xff] %v5044_v23 }
  0xce   :  { %8648 = vst [vmem:[#allocation115_spill] sm:$0xff] %v5050_v7  ;;  %v5084_v7 = vld [vmem:[#allocation8 + $0xc8] sm:$0xff]  ;;  %817 = vmatpush.msrb.mxu2 %v5086_v16 }
  0xcf   :  { %8650 = vst [vmem:[#allocation117_spill] sm:$0xff] %v5056_v11  ;;  %v5094_v11 = vld [vmem:[#allocation8 + $0xa8] sm:$0xff]  ;;  %797 = vmatpush.msrb.mxu1 %v5084_v7 }
  0xd0   :  { %8651 = vst [vmem:[#allocation118_spill] sm:$0xff] %v5060_v12  ;;  %v5078_v12 = vld [vmem:[#allocation8 + $0xf8] sm:$0xff] }
  0xd1   :  { %8652 = vst [vmem:[#allocation119_spill] sm:$0xff] %v5062_v19  ;;  %v5082_v19 = vld [vmem:[#allocation8 + $0xc0] sm:$0xff]  ;;  %836 = vmatpush.msrb.mxu3 %v5078_v12  ;;  %798 = vmatpush.msrb.mxu1 %v5094_v11 }
  0xd2   :  { %8653 = vst [vmem:[#allocation120_spill] sm:$0xff] %v5066_v3  ;;  %777 = vmatpush.msrb.mxu0 %v5082_v19  ;;  %v5100_v3 = vld [vmem:[#allocation8 + $0xb8] sm:$0xff] }
  0xd3   :  { %8654 = vst [vmem:[#allocation121_spill] sm:$0xff] %v5068_v6  ;;  %v5098_v6 = vld [vmem:[#allocation8 + $0xb0] sm:$0xff]  ;;  %v5128_v23 = vpop.f32.mrf.mxu0  ;;  %v5130_v15 = vpop.f32.mrf.mxu1 }
  0xd4   :  { %8655 = vst [vmem:[#allocation122_spill] sm:$0xff] %v5070_v17  ;;  %v5104_v17 = vld [vmem:[#allocation8 + $0x80] sm:$0xff]  ;;  %818 = vmatpush.msrb.mxu2 %v5098_v6 }
  0xd5   :  { %8656 = vst [vmem:[#allocation123_spill] sm:$0xff] %v5072_v53  ;;  %v5092_v53 = vld [vmem:[#allocation8 + $0xa0] sm:$0xff] }
  0xd6   :  { %8657 = vst [vmem:[#allocation124_spill] sm:$0xff] %v5074_v2  ;;  %v5090_v2 = vld [vmem:[#allocation8 + $0xd8] sm:$0xff]  ;;  %778 = vmatpush.msrb.mxu0 %v5092_v53  ;;  %819 = vmatpush.msrb.mxu2 %v5110_v8 }
  0xd7   :  { %8658 = vst [vmem:[#allocation125_spill] sm:$0xff] %v5078_v12  ;;  %837 = vmatpush.msrb.mxu3 %v5090_v2  ;;  %v5106_v12 = vld [vmem:[#allocation8 + $0x88] sm:$0xff] }
  0xd8   :  { %8659 = vst [vmem:[#allocation126_spill] sm:$0xff] %v5082_v19  ;;  %v5112_v19 = vld [vmem:[#allocation8 + $0x98] sm:$0xff]  ;;  %779 = vmatpush.msrb.mxu0 %v5104_v17  ;;  %799 = vmatpush.msrb.mxu1 %v5106_v12 }
  0xd9   :  { %8660 = vst [vmem:[#allocation127_spill] sm:$0xff] %v5084_v7  ;;  %838 = vmatpush.msrb.mxu3 %v5100_v3  ;;  %v5116_v7 = vpop.f32.mrf.mxu2 }
  0xda   :  { %8661 = vst [vmem:[#allocation128_spill] sm:$0xff] %v5086_v16  ;;  %v5118_v16 = vpop.f32.mrf.mxu3 }
  0xdb   :  { %8662 = vst [vmem:[#allocation129_spill] sm:$0xff] %v5090_v2  ;;  %v5122_v2 = vld [vmem:[#allocation8 + $0x60] sm:$0xff]  ;;  %839 = vmatpush.msrb.mxu3 %v5112_v19 }
  0xdc   :  { %8663 = vst [vmem:[#allocation130_spill] sm:$0xff] %v5092_v53  ;;  %v5124_v53 = vld [vmem:[#allocation8 + $0x68] sm:$0xff]  ;;  %780 = vmatpush.msrb.mxu0 %v5122_v2 }
  0xdd   :  { %8664 = vst [vmem:[#allocation131_spill] sm:$0xff] %v5094_v11  ;;  %v5126_v11 = vld [vmem:[#allocation8 + $0x70] sm:$0xff]  ;;  %800 = vmatpush.msrb.mxu1 %v5124_v53 }
  0xde   :  { %8665 = vst [vmem:[#allocation132_spill] sm:$0xff] %v5104_v17  ;;  %v5142_v17 = vld [vmem:[#allocation8 + $0x50] sm:$0xff]  ;;  %820 = vmatpush.msrb.mxu2 %v5126_v11 }
  0xdf   :  { %8666 = vst [vmem:[#allocation133_spill] sm:$0xff] %v5106_v12  ;;  %v5140_v12 = vld [vmem:[#allocation8 + $0x48] sm:$0xff] }
  0xe0   :  { %8667 = vst [vmem:[#allocation134_spill] sm:$0xff] %v5110_v8  ;;  %801 = vmatpush.msrb.mxu1 %v5140_v12  ;;  %821 = vmatpush.msrb.mxu2 %v5142_v17  ;;  %v8695_v8 = vmov 0.0  }
  0xe1   :  { %8668 = vst [vmem:[#allocation135_spill] sm:$0xff] %v5112_v19  ;;  %v5158_v19 = vld [vmem:[#allocation8 + $0x38] sm:$0xff]  ;;  %704 = vmatmul.f32.vlgmr.msra.gmra.mxu0 %v8695_v8  ;;  %724 = vmatmul.f32.vlgmr.msra.gmra.mxu1 %v8695_v8 }
  0xe2   :  { %8669 = vst [vmem:[#allocation136_spill] sm:$0xff] %v5116_v7  ;;  %v5134_v7 = vld [vmem:[#allocation8 + $0x78] sm:$0xff]  ;;  %744 = vmatmul.f32.vlgmr.msra.gmra.mxu2 %v8695_v8  ;;  %764 = vmatmul.f32.vlgmr.msra.gmra.mxu3 %v8695_v8  ;;  %v5212_v8 = vld [vmem:[#allocation6 + $0x1b0] sm:$0xff] }
  0xe3   :  { %8670 = vst [vmem:[#allocation137_spill] sm:$0xff] %v5118_v16  ;;  %v5138_v16 = vld [vmem:[#allocation8 + $0x40] sm:$0xff]  ;;  %840 = vmatpush.msrb.mxu3 %v5134_v7 }
  0xe4   :  { %8671 = vst [vmem:[#allocation138_spill] sm:$0xff] %v5122_v2  ;;  %781 = vmatpush.msrb.mxu0 %v5138_v16  ;;  %v5152_v2 = vld [vmem:[#allocation8 + $0x28] sm:$0xff] }
  0xe5   :  { %8672 = vst [vmem:[#allocation139_spill] sm:$0xff] %v5124_v53  ;;  %v5154_v53 = vld [vmem:[#allocation8 + $0x30] sm:$0xff]  ;;  %802 = vmatpush.msrb.mxu1 %v5152_v2 }
  0xe6   :  { %8673 = vst [vmem:[#allocation140_spill] sm:$0xff] %v5126_v11  ;;  %822 = vmatpush.msrb.mxu2 %v5154_v53  ;;  %v5170_v11 = vld [vmem:[#allocation8 + $0x18] sm:$0xff] }
  0xe7   :  { %8674 = vst [vmem:[#allocation141_spill] sm:$0xff] %v5128_v23  ;;  %v5150_v23 = vld [vmem:[#allocation8 + $0x20] sm:$0xff] }
  0xe8   :  { %8675 = vst [vmem:[#allocation142_spill] sm:$0xff] %v5130_v15  ;;  %v5146_v15 = vld [vmem:[#allocation8 + $0x58] sm:$0xff]  ;;  %782 = vmatpush.msrb.mxu0 %v5150_v23 }
  0xe9   :  { %8676 = vst [vmem:[#allocation143_spill] sm:$0xff] %v5134_v7  ;;  %841 = vmatpush.msrb.mxu3 %v5146_v15  ;;  %v5162_v7 = vld [vmem:[#allocation8] sm:$0xff] }
  0xea   :  { %8677 = vst [vmem:[#allocation144_spill] sm:$0xff] %v5138_v16  ;;  %v5164_v16 = vld [vmem:[#allocation8 + $0x8] sm:$0xff]  ;;  %783 = vmatpush.msrb.mxu0 %v5162_v7 }
  0xeb   :  { %8678 = vst [vmem:[#allocation145_spill] sm:$0xff] %v5140_v12  ;;  %v5166_v12 = vld [vmem:[#allocation8 + $0x10] sm:$0xff]  ;;  %842 = vmatpush.msrb.mxu3 %v5158_v19  ;;  %803 = vmatpush.msrb.mxu1 %v5164_v16 }
  0xec   :  { %8679 = vst [vmem:[#allocation146_spill] sm:$0xff] %v5142_v17  ;;  %v5172_v17 = vpop.f32.mrf.mxu2  ;;  %823 = vmatpush.msrb.mxu2 %v5166_v12 }
  0xed   :  { %8680 = vst [vmem:[#allocation147_spill] sm:$0xff] %v5146_v15  ;;  %v5174_v15 = vpop.f32.mrf.mxu3  ;;  %843 = vmatpush.msrb.mxu3 %v5170_v11 }
  0xee   :  { %8681 = vst [vmem:[#allocation148_spill] sm:$0xff] %v5150_v23  ;;  %v5180_v23 = vpop.f32.mrf.mxu1 }
  0xef   :  { %8682 = vst [vmem:[#allocation149_spill] sm:$0xff] %v5152_v2  ;;  %v5178_v2 = vpop.f32.mrf.mxu0 }
  0xf0   :  { %8683 = vst [vmem:[#allocation150_spill] sm:$0xff] %v5154_v53  ;;  %v5184_v53 = vld [vmem:[#allocation6 + $0x1e0] sm:$0xff] }
  0xf1   :  { %8684 = vst [vmem:[#allocation151_spill] sm:$0xff] %v5158_v19  ;;  %v5186_v19 = vld [vmem:[#allocation6 + $0x1e8] sm:$0xff]  ;;  %941 = vmatpush.msra.mxu0 %v5184_v53 }
  0xf2   :  { %8685 = vst [vmem:[#allocation152_spill] sm:$0xff] %v5162_v7  ;;  %961 = vmatpush.msra.mxu1 %v5186_v19 }
  0xf3   :  { %8686 = vst [vmem:[#allocation153_spill] sm:$0xff] %v5164_v16  ;;  %v5208_v16 = vld [vmem:[#allocation6 + $0x1a8] sm:$0xff] }
  0xf4   :  { %8687 = vst [vmem:[#allocation154_spill] sm:$0xff] %v5166_v12  ;;  %v5206_v12 = vld [vmem:[#allocation6 + $0x1a0] sm:$0xff] }
  0xf5   :  { %8688 = vst [vmem:[#allocation155_spill] sm:$0xff] %v5170_v11  ;;  %v5202_v11 = vld [vmem:[#allocation6 + $0x1d0] sm:$0xff] }
  0xf6   :  { %8689 = vst [vmem:[#allocation156_spill] sm:$0xff] %v5172_v17  ;;  %v5192_v17 = vld [vmem:[#allocation6 + $0x1f8] sm:$0xff]  ;;  %v5230_v7 = vpop.f32.mrf.mxu1 }
  0xf7   :  { %8690 = vst [vmem:[#allocation157_spill] sm:$0xff] %v5174_v15  ;;  %v5190_v15 = vld [vmem:[#allocation6 + $0x1f0] sm:$0xff]  ;;  %1001 = vmatpush.msra.mxu3 %v5192_v17 }
  0xf8   :  { %8691 = vst [vmem:[#allocation158_spill] sm:$0xff] %v5178_v2  ;;  %v5198_v2 = vld [vmem:[#allocation6 + $0x1c8] sm:$0xff]  ;;  %981 = vmatpush.msra.mxu2 %v5190_v15 }
  0xf9   :  { %8692 = vst [vmem:[#allocation159_spill] sm:$0xff] %v5180_v23  ;;  %v5196_v23 = vld [vmem:[#allocation6 + $0x1c0] sm:$0xff]  ;;  %962 = vmatpush.msra.mxu1 %v5198_v2  ;;  %1002 = vmatpush.msra.mxu3 %v4584_v9  ;;  %v5236_v9 = vld [vmem:[#allocation6 + $0x170] sm:$0xff] }
  0xfa   :  { %8693 = vst [vmem:[#allocation160_spill] sm:$0xff] %v5184_v53  ;;  %942 = vmatpush.msra.mxu0 %v5196_v23  ;;  %982 = vmatpush.msra.mxu2 %v5202_v11  ;;  %v5218_v53 = vld [vmem:[#allocation6 + $0x188] sm:$0xff] }
  0xfb   :  { %8694 = vst [vmem:[#allocation161_spill] sm:$0xff] %v5186_v19  ;;  %v5216_v19 = vld [vmem:[#allocation6 + $0x180] sm:$0xff]  ;;  %963 = vmatpush.msra.mxu1 %v5208_v16  ;;  %1003 = vmatpush.msra.mxu3 %v4586_v13 }
  0xfc   :  { %8696 = vst [vmem:[#allocation162_spill] sm:$0xff] %v5190_v15  ;;  %v5220_v15 = vpop.f32.mrf.mxu2  ;;  %943 = vmatpush.msra.mxu0 %v5206_v12  ;;  %983 = vmatpush.msra.mxu2 %v5212_v8 }
  0xfd   :  { %8697 = vst [vmem:[#allocation163_spill] sm:$0xff] %v5192_v17  ;;  %v5222_v17 = vpop.f32.mrf.mxu3  ;;  %964 = vmatpush.msra.mxu1 %v5218_v53  ;;  %1004 = vmatpush.msra.mxu3 %v4593_v18 }
  0xfe   :  { %8698 = vst [vmem:[#allocation164_spill] sm:$0xff] %v5196_v23  ;;  %v5226_v23 = vld [vmem:[#allocation6 + $0x190] sm:$0xff]  ;;  %944 = vmatpush.msra.mxu0 %v5216_v19 }
  0xff   :  { %8699 = vst [vmem:[#allocation165_spill] sm:$0xff] %v5198_v2  ;;  %v5228_v2 = vpop.f32.mrf.mxu0  ;;  %984 = vmatpush.msra.mxu2 %v5226_v23  ;;  %965 = vmatpush.msra.mxu1 %v4597_v21 }
 0x100   :  { %8700 = vst [vmem:[#allocation166_spill] sm:$0xff] %v5220_v15  ;;  %945 = vmatpush.msra.mxu0 %v4595_v20  ;;  %1005 = vmatpush.msra.mxu3 %v4599_v22  ;;  %v169_v20 = vld [vmem:[%s7966_s3] sm:$0xf]  ;;  %v5261_v22 = vpop.f32.mrf.mxu1  ;;  %v5661_v15 = vld [vmem:[#allocation9 + $0x1f0] sm:$0xff] }
 0x101   :  { %8701 = vst [vmem:[#allocation167_spill] sm:$0xff] %v5222_v17  ;;  %985 = vmatpush.msra.mxu2 %v5236_v9  ;;  %966 = vmatpush.msra.mxu1 %v4605_v25  ;;  %v5271_v25 = vperm.slane %v169_v20, 1  ;;  %v5659_v17 = vld [vmem:[#allocation9 + $0x1e8] sm:$0xff] }
 0x102   :  { %8702 = vst [vmem:[#allocation168_spill] sm:$0xff] %v5228_v2  ;;  %v5242_v2 = vld [vmem:[#allocation6 + $0x150] sm:$0xff]  ;;  %946 = vmatpush.msra.mxu0 %v4602_v24  ;;  %1006 = vmatpush.msra.mxu3 %v4607_v26  ;;  %v5269_v24 = vperm.slane %v169_v20, 0 }
 0x103   :  { %8703 = vst [vmem:[#allocation169_spill] sm:$0xff] %v5230_v7  ;;  %986 = vmatpush.msra.mxu2 %v5242_v2  ;;  %967 = vmatpush.msra.mxu1 %v4621_v30  ;;  %v5655_v7 = vld [vmem:[#allocation9 + $0x1e0] sm:$0xff] }
 0x104   :  { %v5250_v13 = vpop.f32.mrf.mxu2  ;;  %947 = vmatpush.msra.mxu0 %v4618_v29  ;;  %8707 = vst [vmem:[#allocation173_spill] sm:$0xff] %v5261_v22  ;;  %1007 = vmatpush.msra.mxu3 %v4623_v31  ;;  %v197_v26 = vadd.f32 %v4898_v27, %v5269_v24  ;;  %v8723_v27 = vld [vmem:[#allocation24_spill] sm:$0xff]  ;;  %v5639_v22 = vld [vmem:[#allocation6] sm:$0xff] }
 0x105   :  { %8704 = vst [vmem:[#allocation170_spill] sm:$0xff] %v5250_v13  ;;  %v5252_v18 = vpop.f32.mrf.mxu3  ;;  %987 = vmatpush.msra.mxu2 %v4616_v28  ;;  %968 = vmatpush.msra.mxu1 %v4631_v34  ;;  %v238_v28 = vadd.f32 %v4900_v10, %v5271_v25  ;;  %v8721_v10 = vld [vmem:[#allocation22_spill] sm:$0xff]  ;;  %v5649_v13 = vld [vmem:[#allocation6 + $0x18] sm:$0xff] }
 0x106   :  { %8705 = vst [vmem:[#allocation171_spill] sm:$0xff] %v5252_v18  ;;  %948 = vmatpush.msra.mxu0 %v4627_v33  ;;  %1008 = vmatpush.msra.mxu3 %v4633_v35  ;;  %v5295_v35 = vperm.slane %v169_v20, 2  ;;  %v5645_v18 = vld [vmem:[#allocation6 + $0x10] sm:$0xff] }
 0x107   :  { %v5259_v21 = vpop.f32.mrf.mxu0  ;;  %988 = vmatpush.msra.mxu2 %v4625_v32  ;;  %8708 = vst [vmem:[#allocation174_spill] sm:$0xff] %v5271_v25  ;;  %969 = vmatpush.msra.mxu1 %v4643_v38 }
 0x108   :  { %8706 = vst [vmem:[#allocation172_spill] sm:$0xff] %v5259_v21  ;;  %949 = vmatpush.msra.mxu0 %v4639_v37  ;;  %1009 = vmatpush.msra.mxu3 %v4645_v39  ;;  %v498_v32 = vpop.f32.mrf.mxu1  ;;  %v279_v37 = vadd.f32 %v4946_v40, %v5295_v35  ;;  %v8724_v40 = vld [vmem:[#allocation25_spill] sm:$0xff]  ;;  %v5643_v21 = vld [vmem:[#allocation6 + $0x8] sm:$0xff] }
 0x109   :  { %989 = vmatpush.msra.mxu2 %v4637_v36  ;;  %970 = vmatpush.msra.mxu1 %v4660_v43  ;;  %v542_v34 = vadd.f32 %v498_v32, %v238_v28  ;;  %8711 = vst [vmem:[#allocation177_spill] sm:$0xff] %v5295_v35  ;;  %v5299_v36 = vperm.slane %v169_v20, 3  ;;  %v8725_v20 = vld [vmem:[#allocation26_spill] sm:$0xff]  ;;  %v8727_v28 = vld [vmem:[#allocation28_spill] sm:$0xff] }
 0x10a   :  { %950 = vmatpush.msra.mxu0 %v4657_v42  ;;  %1010 = vmatpush.msra.mxu3 %v4662_v44  ;;  %v8729_v32 = vld [vmem:[#allocation30_spill] sm:$0xff]  ;;  %8862 = vst [vmem:[#allocation25_spill] sm:$0xff] %v5639_v22 }
 0x10b   :  { %990 = vmatpush.msra.mxu2 %v4655_v41  ;;  %971 = vmatpush.msra.mxu1 %v4670_v47  ;;  %8712 = vst [vmem:[#allocation178_spill] sm:$0xff] %v5299_v36  ;;  %v320_v38 = vadd.f32 %v4948_v14, %v5299_v36  ;;  %v8714_v47 = vld [vmem:[#allocation15_spill] sm:$0xff] }
 0x10c   :  { %v5285_v29 = vpop.f32.mrf.mxu2  ;;  %951 = vmatpush.msra.mxu0 %v4666_v46  ;;  %1011 = vmatpush.msra.mxu3 %v4672_v48  ;;  %v8713_v46 = vld [vmem:[#allocation14_spill] sm:$0xff]  ;;  %v8722_v14 = vld [vmem:[#allocation23_spill] sm:$0xff]  ;;  %8863 = vst [vmem:[#allocation26_spill] sm:$0xff] %v5643_v21 }
 0x10d   :  { %8709 = vst [vmem:[#allocation175_spill] sm:$0xff] %v5285_v29  ;;  %v5287_v30 = vpop.f32.mrf.mxu3  ;;  %991 = vmatpush.msra.mxu2 %v4664_v45  ;;  %972 = vmatpush.msra.mxu1 %v4682_v51  ;;  %v5637_v29 = vld [vmem:[#allocation6 + $0x38] sm:$0xff] }
 0x10e   :  { %8710 = vst [vmem:[#allocation176_spill] sm:$0xff] %v5287_v30  ;;  %952 = vmatpush.msra.mxu0 %v4678_v50  ;;  %1012 = vmatpush.msra.mxu3 %v4684_v52  ;;  %v5633_v30 = vld [vmem:[#allocation6 + $0x30] sm:$0xff] }
 0x10f   :  { %v478_v31 = vpop.f32.mrf.mxu0  ;;  %992 = vmatpush.msra.mxu2 %v4676_v49  ;;  %973 = vmatpush.msra.mxu1 %v4699_v56  ;;  %8860 = vst [vmem:[#allocation23_spill] sm:$0xff] %v5633_v30 }
 0x110   :  { %v541_v33 = vadd.f32 %v478_v31, %v197_v26  ;;  %953 = vmatpush.msra.mxu0 %v4696_v55  ;;  %1013 = vmatpush.msra.mxu3 %v4701_v57  ;;  %v8726_v26 = vld [vmem:[#allocation27_spill] sm:$0xff]  ;;  %v8728_v31 = vld [vmem:[#allocation29_spill] sm:$0xff]  ;;  %8861 = vst [vmem:[#allocation24_spill] sm:$0xff] %v5637_v29 }
 0x111   :  { %993 = vmatpush.msra.mxu2 %v4694_v54  ;;  %974 = vmatpush.msra.mxu1 %v4709_v60  ;;  %8864 = vst [vmem:[#allocation27_spill] sm:$0xff] %v5645_v18 }
 0x112   :  { %4242 = vtanh.f32 %v541_v33  ;;  %954 = vmatpush.msra.mxu0 %v4705_v59  ;;  %1014 = vmatpush.msra.mxu3 %v4711_v61  ;;  %v8730_v33 = vld [vmem:[#allocation31_spill] sm:$0xff]  ;;  %8865 = vst [vmem:[#allocation28_spill] sm:$0xff] %v5649_v13 }
 0x113   :  { %4244 = vtanh.f32 %v542_v34  ;;  %994 = vmatpush.msra.mxu2 %v4703_v58  ;;  %975 = vmatpush.msra.mxu1 %v4721_v0  ;;  %v8717_v0 = vld [vmem:[#allocation18_spill] sm:$0xff]  ;;  %v8731_v34 = vld [vmem:[#allocation32_spill] sm:$0xff]  ;;  %8866 = vst [vmem:[#allocation29_spill] sm:$0xff] %v5655_v7 }
 0x114   :  { %v518_v39 = vpop.f32.mrf.mxu2  ;;  %955 = vmatpush.msra.mxu0 %v4717_v63  ;;  %1015 = vmatpush.msra.mxu3 %v4723_v1  ;;  %v8716_v63 = vld [vmem:[#allocation17_spill] sm:$0xff]  ;;  %v8718_v1 = vld [vmem:[#allocation19_spill] sm:$0xff]  ;;  %8867 = vst [vmem:[#allocation30_spill] sm:$0xff] %v5659_v17 }
 0x115   :  { %v538_v41 = vpop.f32.mrf.mxu3  ;;  %v543_v42 = vadd.f32 %v518_v39, %v279_v37  ;;  %995 = vmatpush.msra.mxu2 %v4715_v62  ;;  %976 = vmatpush.msra.mxu1 %v4738_v5  ;;  %v8715_v62 = vld [vmem:[#allocation16_spill] sm:$0xff]  ;;  %v8720_v5 = vld [vmem:[#allocation21_spill] sm:$0xff]  ;;  %v8734_v39 = vld [vmem:[#allocation35_spill] sm:$0xff]  ;;  %8868 = vst [vmem:[#allocation31_spill] sm:$0xff] %v5661_v15 }
 0x116   :  { %v544_v44 = vadd.f32 %v538_v41, %v320_v38  ;;  %956 = vmatpush.msra.mxu0 %v4736_v4  ;;  %1016 = vmatpush.msra.mxu3 %v8714_v47  ;;  %v8719_v4 = vld [vmem:[#allocation20_spill] sm:$0xff]  ;;  %v8732_v37 = vld [vmem:[#allocation33_spill] sm:$0xff]  ;;  %v8733_v38 = vld [vmem:[#allocation34_spill] sm:$0xff] }
 0x117   :  { %4246 = vtanh.f32 %v543_v42  ;;  %996 = vmatpush.msra.mxu2 %v8713_v46  ;;  %v8735_v41 = vld [vmem:[#allocation36_spill] sm:$0xff]  ;;  %v8736_v42 = vld [vmem:[#allocation37_spill] sm:$0xff]  ;;  %v8741_v47 = vld [vmem:[#allocation42_spill] sm:$0xff] }
 0x118   :  { %v4243_v43 = vpop.eup %4242  ;;  %4248 = vtanh.f32 %v544_v44  ;;  %v8738_v44 = vld [vmem:[#allocation39_spill] sm:$0xff]  ;;  %v8740_v46 = vld [vmem:[#allocation41_spill] sm:$0xff] }
 0x119   :  { %v4245_v45 = vpop.eup %4244  ;;  %v549_v48 = vmul.f32 0.5, %v4243_v43  ;;  %v8737_v43 = vld [vmem:[#allocation38_spill] sm:$0xff] }
 0x11a   :  { %v551_v49 = vmul.f32 0.5, %v4245_v45  ;;  %v8739_v45 = vld [vmem:[#allocation40_spill] sm:$0xff] }
 0x11b   :  { %v550_v51 = vadd.f32 0.5, %v549_v48  ;;  %v8742_v48 = vld [vmem:[#allocation43_spill] sm:$0xff] }
 0x11c   :  { %v552_v50 = vadd.f32 0.5, %v551_v49  ;;  %v8743_v49 = vld [vmem:[#allocation44_spill] sm:$0xff] }
 0x11d   :  { %v4247_v52 = vpop.eup %4246 }
 0x11e   :  { %v555_v54 = vmul.f32 0.0, %v552_v50  ;;  %v556_v55 = vmul.f32 %v4247_v52, %v550_v51  ;;  %v4249_v56 = vpop.eup %4248  ;;  %v8744_v50 = vld [vmem:[#allocation45_spill] sm:$0xff]  ;;  %v8745_v51 = vld [vmem:[#allocation46_spill] sm:$0xff]  ;;  %v8746_v52 = vld [vmem:[#allocation47_spill] sm:$0xff] }
 0x11f   :  { %v553_v58 = vmul.f32 0.5, %v4249_v56  ;;  %v8749_v56 = vld [vmem:[#allocation50_spill] sm:$0xff] }
 0x120   :  { %v5321_v57 = vadd.f32 %v556_v55, %v555_v54  ;;  %v8747_v54 = vld [vmem:[#allocation48_spill] sm:$0xff]  ;;  %v8748_v55 = vld [vmem:[#allocation49_spill] sm:$0xff] }
 0x121   :  { %v554_v59 = vadd.f32 0.5, %v553_v58  ;;  %v8750_v58 = vld [vmem:[#allocation51_spill] sm:$0xff] }
 0x122   :  { %4250 = vtanh.f32 %v5321_v57 }
 0x128   :  { %v4251_v60 = vpop.eup %4250 }
 0x129   :  { %v559_v61 = vmul.f32 %v4251_v60, %v554_v59  ;;  %v8751_v59 = vld [vmem:[#allocation52_spill] sm:$0xff]  ;;  %v8752_v60 = vld [vmem:[#allocation53_spill] sm:$0xff] }
 0x12b   :  { %784 = vmatmul.f32.vlgmr.msrb.gmra.mxu0 %v559_v61  ;;  %804 = vmatmul.f32.vlgmr.msrb.gmra.mxu1 %v559_v61 }
 0x12c   :  { %824 = vmatmul.f32.vlgmr.msrb.gmra.mxu2 %v559_v61  ;;  %844 = vmatmul.f32.vlgmr.msrb.gmra.mxu3 %v559_v61 }
 0x12d   :  { %1168 = vmatpush.msrb.mxu0 %v8715_v62  ;;  %1188 = vmatpush.msrb.mxu1 %v8716_v63  ;;  %v8754_v62 = vld [vmem:[#allocation55_spill] sm:$0xff]  ;;  %v8755_v63 = vld [vmem:[#allocation56_spill] sm:$0xff] }
 0x12e   :  { %1208 = vmatpush.msrb.mxu2 %v8717_v0  ;;  %1228 = vmatpush.msrb.mxu3 %v8718_v1  ;;  %v8756_v0 = vld [vmem:[#allocation57_spill] sm:$0xff]  ;;  %v8757_v1 = vld [vmem:[#allocation58_spill] sm:$0xff] }
 0x12f   :  { %1169 = vmatpush.msrb.mxu0 %v8719_v4  ;;  %1189 = vmatpush.msrb.mxu1 %v8720_v5  ;;  %v8758_v4 = vld [vmem:[#allocation59_spill] sm:$0xff]  ;;  %v8759_v5 = vld [vmem:[#allocation60_spill] sm:$0xff] }
 0x130   :  { %1209 = vmatpush.msrb.mxu2 %v8721_v10  ;;  %1229 = vmatpush.msrb.mxu3 %v8722_v14  ;;  %v8760_v10 = vld [vmem:[#allocation61_spill] sm:$0xff]  ;;  %v8761_v14 = vld [vmem:[#allocation62_spill] sm:$0xff] }
 0x131   :  { %1170 = vmatpush.msrb.mxu0 %v8723_v27  ;;  %1190 = vmatpush.msrb.mxu1 %v8724_v40  ;;  %v8762_v27 = vld [vmem:[#allocation63_spill] sm:$0xff]  ;;  %v8763_v40 = vld [vmem:[#allocation64_spill] sm:$0xff] }
 0x132   :  { %1210 = vmatpush.msrb.mxu2 %v8725_v20  ;;  %1230 = vmatpush.msrb.mxu3 %v8726_v26  ;;  %v8764_v20 = vld [vmem:[#allocation65_spill] sm:$0xff]  ;;  %v8765_v26 = vld [vmem:[#allocation66_spill] sm:$0xff] }
 0x133   :  { %957 = vmatmul.f32.vlgmr.msra.gmra.mxu0 %v559_v61  ;;  %977 = vmatmul.f32.vlgmr.msra.gmra.mxu1 %v559_v61 }
 0x134   :  { %997 = vmatmul.f32.vlgmr.msra.gmra.mxu2 %v559_v61  ;;  %1017 = vmatmul.f32.vlgmr.msra.gmra.mxu3 %v559_v61  ;;  %v8753_v61 = vld [vmem:[#allocation54_spill] sm:$0xff] }
 0x135   :  { %1171 = vmatpush.msrb.mxu0 %v8727_v28  ;;  %1191 = vmatpush.msrb.mxu1 %v8728_v31  ;;  %v8766_v28 = vld [vmem:[#allocation67_spill] sm:$0xff]  ;;  %v8767_v31 = vld [vmem:[#allocation68_spill] sm:$0xff] }
 0x136   :  { %1211 = vmatpush.msrb.mxu2 %v8729_v32  ;;  %1231 = vmatpush.msrb.mxu3 %v8730_v33  ;;  %v8768_v32 = vld [vmem:[#allocation69_spill] sm:$0xff]  ;;  %v8769_v33 = vld [vmem:[#allocation70_spill] sm:$0xff] }
 0x137   :  { %1172 = vmatpush.msrb.mxu0 %v8731_v34  ;;  %1192 = vmatpush.msrb.mxu1 %v8732_v37  ;;  %v8770_v34 = vld [vmem:[#allocation71_spill] sm:$0xff]  ;;  %v8771_v37 = vld [vmem:[#allocation72_spill] sm:$0xff] }
 0x138   :  { %1212 = vmatpush.msrb.mxu2 %v8733_v38  ;;  %1232 = vmatpush.msrb.mxu3 %v8734_v39  ;;  %v8772_v38 = vld [vmem:[#allocation73_spill] sm:$0xff]  ;;  %v8773_v39 = vld [vmem:[#allocation74_spill] sm:$0xff] }
 0x139   :  { %1173 = vmatpush.msrb.mxu0 %v8735_v41  ;;  %1193 = vmatpush.msrb.mxu1 %v8736_v42  ;;  %v8774_v41 = vld [vmem:[#allocation75_spill] sm:$0xff]  ;;  %v8775_v42 = vld [vmem:[#allocation76_spill] sm:$0xff] }
 0x13a   :  { %1213 = vmatpush.msrb.mxu2 %v8737_v43  ;;  %1233 = vmatpush.msrb.mxu3 %v8738_v44  ;;  %v8776_v43 = vld [vmem:[#allocation77_spill] sm:$0xff]  ;;  %v8777_v44 = vld [vmem:[#allocation78_spill] sm:$0xff] }
 0x13b   :  { %1174 = vmatpush.msrb.mxu0 %v8739_v45  ;;  %1194 = vmatpush.msrb.mxu1 %v8740_v46  ;;  %v8778_v45 = vld [vmem:[#allocation79_spill] sm:$0xff]  ;;  %v8779_v46 = vld [vmem:[#allocation80_spill] sm:$0xff] }
 0x13c   :  { %1214 = vmatpush.msrb.mxu2 %v8741_v47  ;;  %1234 = vmatpush.msrb.mxu3 %v8742_v48  ;;  %v8780_v47 = vld [vmem:[#allocation81_spill] sm:$0xff]  ;;  %v8781_v48 = vld [vmem:[#allocation84_spill] sm:$0xff] }
 0x13d   :  { %1175 = vmatpush.msrb.mxu0 %v8743_v49  ;;  %1195 = vmatpush.msrb.mxu1 %v8744_v50  ;;  %v8782_v49 = vld [vmem:[#allocation85_spill] sm:$0xff]  ;;  %v8783_v50 = vld [vmem:[#allocation86_spill] sm:$0xff] }
 0x13e   :  { %1215 = vmatpush.msrb.mxu2 %v8745_v51  ;;  %1235 = vmatpush.msrb.mxu3 %v8746_v52  ;;  %v8784_v51 = vld [vmem:[#allocation87_spill] sm:$0xff]  ;;  %v8785_v52 = vld [vmem:[#allocation88_spill] sm:$0xff] }
 0x13f   :  { %1176 = vmatpush.msrb.mxu0 %v8747_v54  ;;  %1196 = vmatpush.msrb.mxu1 %v8748_v55  ;;  %v8786_v54 = vld [vmem:[#allocation89_spill] sm:$0xff]  ;;  %v8787_v55 = vld [vmem:[#allocation90_spill] sm:$0xff] }
 0x140   :  { %1216 = vmatpush.msrb.mxu2 %v8749_v56  ;;  %1236 = vmatpush.msrb.mxu3 %v8750_v58  ;;  %v8788_v56 = vld [vmem:[#allocation91_spill] sm:$0xff]  ;;  %v8789_v58 = vld [vmem:[#allocation92_spill] sm:$0xff] }
 0x141   :  { %1177 = vmatpush.msrb.mxu0 %v8751_v59  ;;  %1197 = vmatpush.msrb.mxu1 %v8752_v60  ;;  %v8790_v59 = vld [vmem:[#allocation93_spill] sm:$0xff]  ;;  %v8791_v60 = vld [vmem:[#allocation94_spill] sm:$0xff] }
 0x142   :  { %1217 = vmatpush.msrb.mxu2 %v8753_v61  ;;  %1237 = vmatpush.msrb.mxu3 %v8754_v62  ;;  %v8792_v61 = vld [vmem:[#allocation95_spill] sm:$0xff]  ;;  %v8793_v62 = vld [vmem:[#allocation96_spill] sm:$0xff] }
 0x143   :  { %1178 = vmatpush.msrb.mxu0 %v8755_v63  ;;  %1198 = vmatpush.msrb.mxu1 %v8756_v0  ;;  %v8794_v63 = vld [vmem:[#allocation97_spill] sm:$0xff]  ;;  %v8795_v0 = vld [vmem:[#allocation100_spill] sm:$0xff] }
 0x144   :  { %1218 = vmatpush.msrb.mxu2 %v8757_v1  ;;  %1238 = vmatpush.msrb.mxu3 %v8758_v4  ;;  %v8796_v1 = vld [vmem:[#allocation101_spill] sm:$0xff]  ;;  %v8797_v4 = vld [vmem:[#allocation102_spill] sm:$0xff] }
 0x145   :  { %1179 = vmatpush.msrb.mxu0 %v8759_v5  ;;  %1199 = vmatpush.msrb.mxu1 %v8760_v10  ;;  %v8798_v5 = vld [vmem:[#allocation105_spill] sm:$0xff]  ;;  %v8799_v10 = vld [vmem:[#allocation106_spill] sm:$0xff] }
 0x146   :  { %1219 = vmatpush.msrb.mxu2 %v8761_v14  ;;  %1239 = vmatpush.msrb.mxu3 %v8762_v27  ;;  %v8800_v14 = vld [vmem:[#allocation107_spill] sm:$0xff]  ;;  %v8801_v27 = vld [vmem:[#allocation108_spill] sm:$0xff] }
 0x147   :  { %1180 = vmatpush.msrb.mxu0 %v8763_v40  ;;  %1200 = vmatpush.msrb.mxu1 %v8764_v20  ;;  %v8802_v40 = vld [vmem:[#allocation109_spill] sm:$0xff]  ;;  %v8803_v20 = vld [vmem:[#allocation110_spill] sm:$0xff] }
 0x148   :  { %1220 = vmatpush.msrb.mxu2 %v8765_v26  ;;  %1240 = vmatpush.msrb.mxu3 %v8766_v28  ;;  %v8804_v26 = vld [vmem:[#allocation111_spill] sm:$0xff]  ;;  %v8805_v28 = vld [vmem:[#allocation112_spill] sm:$0xff] }
 0x149   :  { %1181 = vmatpush.msrb.mxu0 %v8767_v31  ;;  %1201 = vmatpush.msrb.mxu1 %v8768_v32  ;;  %v8806_v31 = vld [vmem:[#allocation113_spill] sm:$0xff]  ;;  %v8807_v32 = vld [vmem:[#allocation114_spill] sm:$0xff] }
 0x14a   :  { %1221 = vmatpush.msrb.mxu2 %v8769_v33  ;;  %1241 = vmatpush.msrb.mxu3 %v8770_v34  ;;  %v8808_v33 = vld [vmem:[#allocation115_spill] sm:$0xff]  ;;  %v8809_v34 = vld [vmem:[#allocation116_spill] sm:$0xff] }
 0x14b   :  { %1182 = vmatpush.msrb.mxu0 %v8771_v37  ;;  %1202 = vmatpush.msrb.mxu1 %v8772_v38  ;;  %v8810_v37 = vld [vmem:[#allocation117_spill] sm:$0xff]  ;;  %v8811_v38 = vld [vmem:[#allocation120_spill] sm:$0xff] }
 0x14c   :  { %1222 = vmatpush.msrb.mxu2 %v8773_v39  ;;  %1242 = vmatpush.msrb.mxu3 %v8774_v41  ;;  %v8812_v39 = vld [vmem:[#allocation121_spill] sm:$0xff]  ;;  %v8813_v41 = vld [vmem:[#allocation122_spill] sm:$0xff] }
 0x14d   :  { %1183 = vmatpush.msrb.mxu0 %v8775_v42  ;;  %1203 = vmatpush.msrb.mxu1 %v8776_v43  ;;  %v8814_v42 = vld [vmem:[#allocation125_spill] sm:$0xff]  ;;  %v8815_v43 = vld [vmem:[#allocation126_spill] sm:$0xff] }
 0x14e   :  { %1223 = vmatpush.msrb.mxu2 %v8777_v44  ;;  %1243 = vmatpush.msrb.mxu3 %v8778_v45  ;;  %v8816_v44 = vld [vmem:[#allocation127_spill] sm:$0xff]  ;;  %v8817_v45 = vld [vmem:[#allocation128_spill] sm:$0xff] }
 0x14f   :  { %1248 = vmatpush.msra.mxu0 %v8779_v46  ;;  %1268 = vmatpush.msra.mxu1 %v8780_v47  ;;  %v8818_v46 = vld [vmem:[#allocation129_spill] sm:$0xff]  ;;  %v8819_v47 = vld [vmem:[#allocation130_spill] sm:$0xff] }
 0x150   :  { %1288 = vmatpush.msra.mxu2 %v8781_v48  ;;  %1308 = vmatpush.msra.mxu3 %v8782_v49  ;;  %v8820_v48 = vld [vmem:[#allocation131_spill] sm:$0xff]  ;;  %v8821_v49 = vld [vmem:[#allocation132_spill] sm:$0xff] }
 0x151   :  { %1249 = vmatpush.msra.mxu0 %v8783_v50  ;;  %1269 = vmatpush.msra.mxu1 %v8784_v51  ;;  %v8822_v50 = vld [vmem:[#allocation133_spill] sm:$0xff]  ;;  %v8823_v51 = vld [vmem:[#allocation134_spill] sm:$0xff] }
 0x152   :  { %1289 = vmatpush.msra.mxu2 %v8785_v52  ;;  %1309 = vmatpush.msra.mxu3 %v8786_v54  ;;  %v8824_v52 = vld [vmem:[#allocation135_spill] sm:$0xff]  ;;  %v8825_v54 = vld [vmem:[#allocation138_spill] sm:$0xff] }
 0x153   :  { %1250 = vmatpush.msra.mxu0 %v8787_v55  ;;  %1270 = vmatpush.msra.mxu1 %v8788_v56  ;;  %v8826_v55 = vld [vmem:[#allocation139_spill] sm:$0xff]  ;;  %v8827_v56 = vld [vmem:[#allocation140_spill] sm:$0xff] }
 0x154   :  { %1290 = vmatpush.msra.mxu2 %v8789_v58  ;;  %1310 = vmatpush.msra.mxu3 %v8790_v59  ;;  %v8828_v58 = vld [vmem:[#allocation143_spill] sm:$0xff]  ;;  %v8829_v59 = vld [vmem:[#allocation144_spill] sm:$0xff] }
 0x155   :  { %1251 = vmatpush.msra.mxu0 %v8791_v60  ;;  %1271 = vmatpush.msra.mxu1 %v8792_v61  ;;  %v8832_v60 = vld [vmem:[#allocation147_spill] sm:$0xff]  ;;  %v8833_v61 = vld [vmem:[#allocation148_spill] sm:$0xff] }
 0x156   :  { %1291 = vmatpush.msra.mxu2 %v8793_v62  ;;  %1311 = vmatpush.msra.mxu3 %v8794_v63  ;;  %v8834_v62 = vld [vmem:[#allocation149_spill] sm:$0xff]  ;;  %v8835_v63 = vld [vmem:[#allocation150_spill] sm:$0xff] }
 0x157   :  { %1252 = vmatpush.msra.mxu0 %v8795_v0  ;;  %1272 = vmatpush.msra.mxu1 %v8796_v1  ;;  %v8836_v0 = vld [vmem:[#allocation151_spill] sm:$0xff]  ;;  %v8837_v1 = vld [vmem:[#allocation152_spill] sm:$0xff] }
 0x158   :  { %1292 = vmatpush.msra.mxu2 %v8797_v4  ;;  %1312 = vmatpush.msra.mxu3 %v8798_v5  ;;  %v8838_v4 = vld [vmem:[#allocation153_spill] sm:$0xff]  ;;  %v8839_v5 = vld [vmem:[#allocation154_spill] sm:$0xff] }
 0x159   :  { %1253 = vmatpush.msra.mxu0 %v8799_v10  ;;  %1273 = vmatpush.msra.mxu1 %v8800_v14  ;;  %v8840_v10 = vld [vmem:[#allocation155_spill] sm:$0xff] }
 0x15a   :  { %1293 = vmatpush.msra.mxu2 %v8801_v27  ;;  %1313 = vmatpush.msra.mxu3 %v8802_v40  ;;  %v375_v40 = vld [vmem:[%s7969_s6] sm:$0xf] }
 0x15b   :  { %1254 = vmatpush.msra.mxu0 %v8803_v20  ;;  %1274 = vmatpush.msra.mxu1 %v8804_v26 }
 0x15c   :  { %1294 = vmatpush.msra.mxu2 %v8805_v28  ;;  %1314 = vmatpush.msra.mxu3 %v8806_v31  ;;  %v5455_v28 = vperm.slane %v375_v40, 0  ;;  %v5457_v31 = vperm.slane %v375_v40, 1 }
 0x15d   :  { %1255 = vmatpush.msra.mxu0 %v8807_v32  ;;  %1275 = vmatpush.msra.mxu1 %v8808_v33 }
 0x15e   :  { %1295 = vmatpush.msra.mxu2 %v8809_v34  ;;  %1315 = vmatpush.msra.mxu3 %v8810_v37  ;;  %v705_v14 = vpop.f32.mrf.mxu0  ;;  %v725_v27 = vpop.f32.mrf.mxu1  ;;  %8841 = vst [vmem:[#allocation14_spill] sm:$0xff] %v5455_v28 }
 0x15f   :  { %1256 = vmatpush.msra.mxu0 %v8811_v38  ;;  %1276 = vmatpush.msra.mxu1 %v8812_v39  ;;  %8842 = vst [vmem:[#allocation15_spill] sm:$0xff] %v5457_v31 }
 0x160   :  { %1296 = vmatpush.msra.mxu2 %v8813_v41  ;;  %1316 = vmatpush.msra.mxu3 %v8814_v42  ;;  %v5461_v41 = vperm.slane %v375_v40, 2  ;;  %v8843_v42 = vld [vmem:[#allocation82_spill] sm:$0xff] }
 0x161   :  { %1257 = vmatpush.msra.mxu0 %v8815_v43  ;;  %1277 = vmatpush.msra.mxu1 %v8816_v44  ;;  %v200_v43 = vadd.f32 %v8843_v42, %v5269_v24 }
 0x162   :  { %1297 = vmatpush.msra.mxu2 %v8817_v45  ;;  %1317 = vmatpush.msra.mxu3 %v8818_v46  ;;  %v5465_v45 = vperm.slane %v375_v40, 3 }
 0x163   :  { %1258 = vmatpush.msra.mxu0 %v8819_v47  ;;  %1278 = vmatpush.msra.mxu1 %v8820_v48  ;;  %v8844_v47 = vld [vmem:[#allocation83_spill] sm:$0xff] }
 0x164   :  { %1298 = vmatpush.msra.mxu2 %v5098_v6  ;;  %1318 = vmatpush.msra.mxu3 %v5100_v3  ;;  %v8830_v6 = vld [vmem:[#allocation145_spill] sm:$0xff]  ;;  %v8831_v3 = vld [vmem:[#allocation146_spill] sm:$0xff]  ;;  %v241_v48 = vadd.f32 %v8844_v47, %v5271_v25 }
 0x165   :  { %1259 = vmatpush.msra.mxu0 %v8821_v49  ;;  %1279 = vmatpush.msra.mxu1 %v8822_v50  ;;  %v745_v20 = vpop.f32.mrf.mxu2  ;;  %v765_v26 = vpop.f32.mrf.mxu3 }
 0x166   :  { %1299 = vmatpush.msra.mxu2 %v8823_v51  ;;  %1319 = vmatpush.msra.mxu3 %v8824_v52 }
 0x167   :  { %1260 = vmatpush.msra.mxu0 %v8825_v54  ;;  %1280 = vmatpush.msra.mxu1 %v8826_v55 }
 0x168   :  { %1300 = vmatpush.msra.mxu2 %v8827_v56  ;;  %1320 = vmatpush.msra.mxu3 %v8828_v58 }
 0x169   :  { %1261 = vmatpush.msra.mxu0 %v8829_v59  ;;  %1281 = vmatpush.msra.mxu1 %v8830_v6 }
 0x16a   :  { %1301 = vmatpush.msra.mxu2 %v8831_v3  ;;  %1321 = vmatpush.msra.mxu3 %v8832_v60 }
 0x16b   :  { %1262 = vmatpush.msra.mxu0 %v8833_v61  ;;  %1282 = vmatpush.msra.mxu1 %v8834_v62  ;;  %v8845_v61 = vld [vmem:[#allocation98_spill] sm:$0xff] }
 0x16c   :  { %1302 = vmatpush.msra.mxu2 %v8835_v63  ;;  %1322 = vmatpush.msra.mxu3 %v8836_v0  ;;  %v282_v62 = vadd.f32 %v8845_v61, %v5295_v35  ;;  %v8851_v61 = vld [vmem:[#allocation164_spill] sm:$0xff] }
 0x16d   :  { %1263 = vmatpush.msra.mxu0 %v8837_v1  ;;  %1283 = vmatpush.msra.mxu1 %v8838_v4 }
 0x16e   :  { %1303 = vmatpush.msra.mxu2 %v8839_v5  ;;  %1323 = vmatpush.msra.mxu3 %v8840_v10 }
 0x1a8   :  { %v785_v32 = vpop.f32.mrf.mxu0  ;;  %v805_v33 = vpop.f32.mrf.mxu1 }
 0x1a9   :  { %v786_v34 = vadd.f32 %v785_v32, %v705_v14  ;;  %v806_v37 = vadd.f32 %v805_v33, %v725_v27  ;;  %v8846_v27 = vld [vmem:[#allocation99_spill] sm:$0xff] }
 0x1aa   :  { %v323_v40 = vadd.f32 %v8846_v27, %v5299_v36  ;;  %v5541_v27 = vld [vmem:[#allocation6 + $0x138] sm:$0xff] }
 0x1ab   :  { %v848_v38 = vadd.f32 %v786_v34, %v5455_v28  ;;  %v849_v39 = vadd.f32 %v806_v37, %v5457_v31 }
 0x1ad   :  { %4252 = vtanh.f32 %v848_v38 }
 0x1ae   :  { %4254 = vtanh.f32 %v849_v39 }
 0x1af   :  { %v825_v44 = vpop.f32.mrf.mxu2  ;;  %v845_v46 = vpop.f32.mrf.mxu3 }
 0x1b0   :  { %v826_v49 = vadd.f32 %v825_v44, %v745_v20  ;;  %v846_v50 = vadd.f32 %v845_v46, %v765_v26  ;;  %v958_v51 = vpop.f32.mrf.mxu0  ;;  %v978_v52 = vpop.f32.mrf.mxu1 }
 0x1b1   :  { %v1021_v54 = vadd.f32 %v958_v51, %v200_v43  ;;  %v1022_v56 = vadd.f32 %v978_v52, %v241_v48 }
 0x1b2   :  { %v850_v55 = vadd.f32 %v826_v49, %v5461_v41  ;;  %v851_v59 = vadd.f32 %v846_v50, %v5465_v45 }
 0x1b3   :  { %v4253_v58 = vpop.eup %4252  ;;  %4256 = vtanh.f32 %v1021_v54  ;;  %v5484_v54 = vld [vmem:[%s7970_s7] ss:$0 sm:$0xff] }
 0x1b4   :  { %v4255_v6 = vpop.eup %4254  ;;  %4258 = vtanh.f32 %v850_v55  ;;  %v856_v3 = vmul.f32 0.5, %v4253_v58  ;;  %v8848_v58 = vld [vmem:[#allocation161_spill] sm:$0xff] }
 0x1b5   :  { %v858_v60 = vmul.f32 0.5, %v4255_v6  ;;  %4260 = vtanh.f32 %v1022_v56  ;;  %v8847_v56 = vld [vmem:[#allocation160_spill] sm:$0xff] }
 0x1b6   :  { %4262 = vtanh.f32 %v851_v59  ;;  %v857_v5 = vadd.f32 0.5, %v856_v3  ;;  %v5489_v59 = vld [vmem:[#allocation6 + $0x1d8] sm:$0xff]  ;;  %v8849_v3 = vld [vmem:[#allocation162_spill] sm:$0xff] }
 0x1b7   :  { %v859_v63 = vadd.f32 0.5, %v858_v60  ;;  %v998_v0 = vpop.f32.mrf.mxu2  ;;  %v1018_v14 = vpop.f32.mrf.mxu3  ;;  %v8850_v60 = vld [vmem:[#allocation163_spill] sm:$0xff] }
 0x1b8   :  { %v1023_v1 = vadd.f32 %v998_v0, %v282_v62  ;;  %v1024_v39 = vadd.f32 %v1018_v14, %v323_v40  ;;  %v8852_v62 = vld [vmem:[#allocation165_spill] sm:$0xff]  ;;  %v5537_v14 = vld [vmem:[#allocation6 + $0x130] sm:$0xff]  ;;  %v5543_v40 = vld [vmem:[#allocation6 + $0x100] sm:$0xff] }
 0x1b9   :  { %v4257_v4 = vpop.eup %4256  ;;  %v862_v20 = vmul.f32 0.0, %v859_v63  ;;  %v5498_v0 = vld [vmem:[#allocation6 + $0x1b8] sm:$0xff] }
 0x1ba   :  { %v4259_v10 = vpop.eup %4258  ;;  %4264 = vtanh.f32 %v1023_v1  ;;  %v1029_v32 = vmul.f32 0.5, %v4257_v4  ;;  %v5503_v4 = vld [vmem:[#allocation6 + $0x198] sm:$0xff] }
 0x1bb   :  { %v863_v26 = vmul.f32 %v4259_v10, %v857_v5  ;;  %v4261_v33 = vpop.eup %4260  ;;  %v5535_v10 = vld [vmem:[#allocation6 + $0x128] sm:$0xff] }
 0x1bc   :  { %v4263_v34 = vpop.eup %4262  ;;  %v1031_v38 = vmul.f32 0.5, %v4261_v33  ;;  %v1030_v42 = vadd.f32 0.5, %v1029_v32  ;;  %v5555_v32 = vld [vmem:[#allocation6 + $0xe0] sm:$0xff]  ;;  %v5561_v33 = vld [vmem:[#allocation6 + $0xf0] sm:$0xff] }
 0x1bd   :  { %v5475_v37 = vadd.f32 %v863_v26, %v862_v20  ;;  %v860_v46 = vmul.f32 0.5, %v4263_v34  ;;  %v5549_v20 = vld [vmem:[#allocation6 + $0x110] sm:$0xff]  ;;  %v5553_v26 = vld [vmem:[#allocation6 + $0x118] sm:$0xff] }
 0x1be   :  { %v1032_v43 = vadd.f32 0.5, %v1031_v38  ;;  %v5565_v34 = vld [vmem:[#allocation6 + $0xf8] sm:$0xff]  ;;  %v5567_v38 = vld [vmem:[#allocation6 + $0xc0] sm:$0xff] }
 0x1bf   :  { %4266 = vtanh.f32 %v5475_v37  ;;  %v861_v50 = vadd.f32 0.5, %v860_v46  ;;  %v5583_v46 = vld [vmem:[#allocation6 + $0xa8] sm:$0xff] }
 0x1c0   :  { %v4265_v44 = vpop.eup %4264  ;;  %v1035_v47 = vmul.f32 %v1032_v43, %v5321_v57  ;;  %4268 = vtanh.f32 %v1024_v39  ;;  %v5571_v39 = vld [vmem:[#allocation6 + $0xc8] sm:$0xff]  ;;  %v5577_v43 = vld [vmem:[#allocation6 + $0xd8] sm:$0xff] }
 0x1c1   :  { %v1036_v48 = vmul.f32 %v4265_v44, %v1030_v42  ;;  %v5573_v42 = vld [vmem:[#allocation6 + $0xd0] sm:$0xff]  ;;  %v5579_v44 = vld [vmem:[#allocation6 + $0xa0] sm:$0xff] }
 0x1c3   :  { %v5479_v49 = vadd.f32 %v1036_v48, %v1035_v47  ;;  %v5585_v47 = vld [vmem:[#allocation6 + $0xb0] sm:$0xff]  ;;  %v5589_v48 = vld [vmem:[#allocation6 + $0xb8] sm:$0xff] }
 0x1c5   :  { %v4267_v51 = vpop.eup %4266  ;;  %4270 = vtanh.f32 %v5479_v49 }
 0x1c6   :  { %v866_v52 = vmul.f32 %v4267_v51, %v861_v50  ;;  %v4269_v55 = vpop.eup %4268  ;;  %v5591_v50 = vld [vmem:[#allocation6 + $0x80] sm:$0xff]  ;;  %v5595_v51 = vld [vmem:[#allocation6 + $0x88] sm:$0xff] }
 0x1c7   :  { %v1033_v57 = vmul.f32 0.5, %v4269_v55  ;;  %v5601_v55 = vld [vmem:[#allocation6 + $0x98] sm:$0xff] }
 0x1c8   :  { %1184 = vmatmul.f32.vlgmr.msrb.gmra.mxu0 %v866_v52  ;;  %1204 = vmatmul.f32.vlgmr.msrb.gmra.mxu1 %v866_v52  ;;  %v867_v6 = vmul.f32 %v5484_v54, %v866_v52 }
 0x1c9   :  { %1224 = vmatmul.f32.vlgmr.msrb.gmra.mxu2 %v866_v52  ;;  %1244 = vmatmul.f32.vlgmr.msrb.gmra.mxu3 %v866_v52  ;;  %v1034_v1 = vadd.f32 0.5, %v1033_v57  ;;  %v5597_v52 = vld [vmem:[#allocation6 + $0x90] sm:$0xff]  ;;  %v5603_v57 = vld [vmem:[#allocation6 + $0x60] sm:$0xff] }
 0x1ca   :  { %1420 = vmatpush.msrb.mxu0 %v8847_v56  ;;  %1440 = vmatpush.msrb.mxu1 %v8848_v58  ;;  %v5607_v56 = vld [vmem:[#allocation6 + $0x68] sm:$0xff]  ;;  %v5609_v58 = vld [vmem:[#allocation6 + $0x70] sm:$0xff] }
 0x1cb   :  { %1460 = vmatpush.msrb.mxu2 %v8849_v3  ;;  %1480 = vmatpush.msrb.mxu3 %v8850_v60  ;;  %v4271_v63 = vpop.eup %4270  ;;  %v5615_v3 = vld [vmem:[#allocation6 + $0x40] sm:$0xff]  ;;  %v5619_v60 = vld [vmem:[#allocation6 + $0x48] sm:$0xff] }
 0x1cc   :  { %1421 = vmatpush.msrb.mxu0 %v8851_v61  ;;  %1441 = vmatpush.msrb.mxu1 %v8852_v62  ;;  %v5505_v5 = vmul.f32 %v4271_v63, %v1034_v1  ;;  %8854 = vst [vmem:[#allocation17_spill] sm:$0xff] %v5615_v3  ;;  %v5621_v61 = vld [vmem:[#allocation6 + $0x50] sm:$0xff]  ;;  %v5625_v62 = vld [vmem:[#allocation6 + $0x58] sm:$0xff]  ;;  %v5627_v63 = vld [vmem:[#allocation6 + $0x20] sm:$0xff] }
 0x1cd   :  { %1461 = vmatpush.msrb.mxu2 %v5202_v11  ;;  %1481 = vmatpush.msrb.mxu3 %v5489_v59  ;;  %v5511_v11 = vld [vmem:[#allocation6 + $0x160] sm:$0xff]  ;;  %8855 = vst [vmem:[#allocation18_spill] sm:$0xff] %v5619_v60  ;;  %v5631_v1 = vld [vmem:[#allocation6 + $0x28] sm:$0xff] }
 0x1ce   :  { %868 = vadd.xlane.f32.xlu0 %v867_v6  ;;  %1422 = vmatpush.msrb.mxu0 %v5206_v12  ;;  %v5515_v12 = vld [vmem:[#allocation6 + $0x168] sm:$0xff]  ;;  %v5613_v6 = vld [vmem:[#allocation6 + $0x78] sm:$0xff]  ;;  %8856 = vst [vmem:[#allocation19_spill] sm:$0xff] %v5621_v61 }
 0x1cf   :  { %1442 = vmatpush.msrb.mxu1 %v5208_v16  ;;  %1462 = vmatpush.msrb.mxu2 %v5212_v8  ;;  %v5519_v16 = vld [vmem:[#allocation6 + $0x178] sm:$0xff]  ;;  %v5521_v8 = vld [vmem:[#allocation6 + $0x140] sm:$0xff]  ;;  %8853 = vst [vmem:[#allocation16_spill] sm:$0xff] %v5613_v6 }
 0x1d0   :  { %1482 = vmatpush.msrb.mxu3 %v5498_v0  ;;  %1423 = vmatpush.msrb.mxu0 %v5216_v19  ;;  %v5525_v19 = vld [vmem:[#allocation6 + $0x148] sm:$0xff]  ;;  %8857 = vst [vmem:[#allocation20_spill] sm:$0xff] %v5625_v62 }
 0x1d1   :  { %1443 = vmatpush.msrb.mxu1 %v5218_v53  ;;  %1463 = vmatpush.msrb.mxu2 %v5226_v23  ;;  %v5529_v23 = vld [vmem:[#allocation6 + $0x158] sm:$0xff]  ;;  %v5531_v53 = vld [vmem:[#allocation6 + $0x120] sm:$0xff]  ;;  %8858 = vst [vmem:[#allocation21_spill] sm:$0xff] %v5627_v63 }
 0x1d2   :  { %1483 = vmatpush.msrb.mxu3 %v5503_v4  ;;  %1264 = vmatmul.f32.vlgmr.msra.gmra.mxu0 %v5505_v5  ;;  %8859 = vst [vmem:[#allocation22_spill] sm:$0xff] %v5631_v1 }
 0x1d3   :  { %1284 = vmatmul.f32.vlgmr.msra.gmra.mxu1 %v5505_v5  ;;  %1304 = vmatmul.f32.vlgmr.msra.gmra.mxu2 %v5505_v5 }
 0x1d4   :  { %1324 = vmatmul.f32.vlgmr.msra.gmra.mxu3 %v5505_v5  ;;  %1424 = vmatpush.msrb.mxu0 %v5511_v11 }
 0x1d5   :  { %1444 = vmatpush.msrb.mxu1 %v5515_v12  ;;  %1464 = vmatpush.msrb.mxu2 %v5236_v9  ;;  %v5547_v9 = vld [vmem:[#allocation6 + $0x108] sm:$0xff] }
 0x1d6   :  { %1484 = vmatpush.msrb.mxu3 %v5519_v16  ;;  %1425 = vmatpush.msrb.mxu0 %v5521_v8 }
 0x1d7   :  { %1445 = vmatpush.msrb.mxu1 %v5525_v19  ;;  %1465 = vmatpush.msrb.mxu2 %v5242_v2  ;;  %v5559_v2 = vld [vmem:[#allocation6 + $0xe8] sm:$0xff] }
 0x1d8   :  { %1485 = vmatpush.msrb.mxu3 %v5529_v23  ;;  %1426 = vmatpush.msrb.mxu0 %v5531_v53 }
 0x1d9   :  { %1446 = vmatpush.msrb.mxu1 %v5535_v10  ;;  %1466 = vmatpush.msrb.mxu2 %v5537_v14 }
 0x1da   :  { %1486 = vmatpush.msrb.mxu3 %v5541_v27  ;;  %1427 = vmatpush.msrb.mxu0 %v5543_v40 }
 0x1db   :  { %1447 = vmatpush.msrb.mxu1 %v5547_v9  ;;  %1467 = vmatpush.msrb.mxu2 %v5549_v20 }
 0x1dc   :  { %1487 = vmatpush.msrb.mxu3 %v5553_v26  ;;  %1428 = vmatpush.msrb.mxu0 %v5555_v32 }
 0x1dd   :  { %1448 = vmatpush.msrb.mxu1 %v5559_v2  ;;  %1468 = vmatpush.msrb.mxu2 %v5561_v33 }
 0x1de   :  { %1488 = vmatpush.msrb.mxu3 %v5565_v34  ;;  %1429 = vmatpush.msrb.mxu0 %v5567_v38 }
 0x1df   :  { %1449 = vmatpush.msrb.mxu1 %v5571_v39  ;;  %1469 = vmatpush.msrb.mxu2 %v5573_v42 }
 0x1e0   :  { %1489 = vmatpush.msrb.mxu3 %v5577_v43  ;;  %1430 = vmatpush.msrb.mxu0 %v5579_v44 }
 0x1e1   :  { %1450 = vmatpush.msrb.mxu1 %v5583_v46  ;;  %1470 = vmatpush.msrb.mxu2 %v5585_v47 }
 0x1e2   :  { %1490 = vmatpush.msrb.mxu3 %v5589_v48  ;;  %1431 = vmatpush.msrb.mxu0 %v5591_v50 }
 0x1e3   :  { %1451 = vmatpush.msrb.mxu1 %v5595_v51  ;;  %1471 = vmatpush.msrb.mxu2 %v5597_v52 }
 0x1e4   :  { %1491 = vmatpush.msrb.mxu3 %v5601_v55  ;;  %1432 = vmatpush.msrb.mxu0 %v5603_v57 }
 0x1e5   :  { %1452 = vmatpush.msrb.mxu1 %v5607_v56  ;;  %1472 = vmatpush.msrb.mxu2 %v5609_v58 }
 0x1e6   :  { %1492 = vmatpush.msrb.mxu3 %v5613_v6  ;;  %1433 = vmatpush.msrb.mxu0 %v5615_v3  ;;  %v6041_v6 = vld [vmem:[#allocation8 + $0x10] sm:$0xff] }
 0x1e7   :  { %1453 = vmatpush.msrb.mxu1 %v5619_v60  ;;  %1473 = vmatpush.msrb.mxu2 %v5621_v61  ;;  %v6029_v61 = vld [vmem:[#allocation8 + $0x30] sm:$0xff]  ;;  %8992 = vst [vmem:[#allocation182_spill] sm:$0xff] %v6041_v6 }
 0x1e8   :  { %1493 = vmatpush.msrb.mxu3 %v5625_v62  ;;  %1434 = vmatpush.msrb.mxu0 %v5627_v63  ;;  %v6017_v62 = vld [vmem:[#allocation8 + $0x50] sm:$0xff]  ;;  %8988 = vst [vmem:[#allocation165_spill] sm:$0xff] %v6029_v61 }
 0x1e9   :  { %1454 = vmatpush.msrb.mxu1 %v5631_v1  ;;  %1474 = vmatpush.msrb.mxu2 %v5633_v30  ;;  %v5679_v30 = vld [vmem:[#allocation9 + $0x1a0] sm:$0xff]  ;;  %v5683_v1 = vld [vmem:[#allocation9 + $0x1a8] sm:$0xff] }
 0x1ea   :  { %1494 = vmatpush.msrb.mxu3 %v5637_v29  ;;  %1435 = vmatpush.msrb.mxu0 %v5639_v22  ;;  %v5665_v29 = vld [vmem:[#allocation9 + $0x1f8] sm:$0xff]  ;;  %v5667_v22 = vld [vmem:[#allocation9 + $0x1c0] sm:$0xff]  ;;  %8874 = vst [vmem:[#allocation37_spill] sm:$0xff] %v5679_v30 }
 0x1eb   :  { %1455 = vmatpush.msrb.mxu1 %v5643_v21  ;;  %1475 = vmatpush.msrb.mxu2 %v5645_v18  ;;  %8869 = vst [vmem:[#allocation32_spill] sm:$0xff] %v5665_v29  ;;  %v5671_v18 = vld [vmem:[#allocation9 + $0x1c8] sm:$0xff]  ;;  %v5677_v21 = vld [vmem:[#allocation9 + $0x1d8] sm:$0xff] }
 0x1ec   :  { %1495 = vmatpush.msrb.mxu3 %v5649_v13  ;;  %1436 = vmatmul.f32.vlgmr.msrb.gmra.mxu0 %v5505_v5  ;;  %8870 = vst [vmem:[#allocation33_spill] sm:$0xff] %v5667_v22  ;;  %v5673_v13 = vld [vmem:[#allocation9 + $0x1d0] sm:$0xff] }
 0x1ed   :  { %1456 = vmatmul.f32.vlgmr.msrb.gmra.mxu1 %v5505_v5  ;;  %1476 = vmatmul.f32.vlgmr.msrb.gmra.mxu2 %v5505_v5  ;;  %8871 = vst [vmem:[#allocation34_spill] sm:$0xff] %v5671_v18 }
 0x1ee   :  { %1496 = vmatmul.f32.vlgmr.msrb.gmra.mxu3 %v5505_v5  ;;  %1647 = vmatpush.msra.mxu0 %v5655_v7  ;;  %8872 = vst [vmem:[#allocation35_spill] sm:$0xff] %v5673_v13  ;;  %v5685_v5 = vld [vmem:[#allocation9 + $0x1b0] sm:$0xff]  ;;  %v5689_v7 = vld [vmem:[#allocation9 + $0x1b8] sm:$0xff] }
 0x1ef   :  { %1667 = vmatpush.msra.mxu1 %v5659_v17  ;;  %1687 = vmatpush.msra.mxu2 %v5661_v15  ;;  %8873 = vst [vmem:[#allocation36_spill] sm:$0xff] %v5677_v21  ;;  %v5691_v17 = vld [vmem:[#allocation9 + $0x180] sm:$0xff]  ;;  %v5695_v15 = vld [vmem:[#allocation9 + $0x188] sm:$0xff] }
 0x1f0   :  { %1707 = vmatpush.msra.mxu3 %v5665_v29  ;;  %1648 = vmatpush.msra.mxu0 %v5667_v22  ;;  %8875 = vst [vmem:[#allocation38_spill] sm:$0xff] %v5683_v1  ;;  %v5697_v29 = vld [vmem:[#allocation9 + $0x190] sm:$0xff]  ;;  %v5701_v22 = vld [vmem:[#allocation9 + $0x198] sm:$0xff] }
 0x1f1   :  { %8876 = vst [vmem:[#allocation39_spill] sm:$0xff] %v5685_v5  ;;  %1668 = vmatpush.msra.mxu1 %v5671_v18  ;;  %1688 = vmatpush.msra.mxu2 %v5673_v13  ;;  %v5703_v18 = vld [vmem:[#allocation9 + $0x160] sm:$0xff]  ;;  %v5707_v13 = vld [vmem:[#allocation9 + $0x168] sm:$0xff] }
 0x1f2   :  { %8877 = vst [vmem:[#allocation40_spill] sm:$0xff] %v5689_v7  ;;  %1708 = vmatpush.msra.mxu3 %v5677_v21  ;;  %1649 = vmatpush.msra.mxu0 %v5679_v30  ;;  %v5709_v21 = vld [vmem:[#allocation9 + $0x170] sm:$0xff]  ;;  %v5713_v30 = vld [vmem:[#allocation9 + $0x178] sm:$0xff] }
 0x1f3   :  { %8878 = vst [vmem:[#allocation41_spill] sm:$0xff] %v5691_v17  ;;  %1669 = vmatpush.msra.mxu1 %v5683_v1  ;;  %1689 = vmatpush.msra.mxu2 %v5685_v5  ;;  %v5715_v1 = vld [vmem:[#allocation9 + $0x140] sm:$0xff]  ;;  %v5719_v5 = vld [vmem:[#allocation9 + $0x148] sm:$0xff] }
 0x1f4   :  { %8879 = vst [vmem:[#allocation42_spill] sm:$0xff] %v5695_v15  ;;  %1709 = vmatpush.msra.mxu3 %v5689_v7  ;;  %1650 = vmatpush.msra.mxu0 %v5691_v17  ;;  %v5721_v7 = vld [vmem:[#allocation9 + $0x150] sm:$0xff]  ;;  %v5725_v17 = vld [vmem:[#allocation9 + $0x158] sm:$0xff] }
 0x1f5   :  { %8880 = vst [vmem:[#allocation43_spill] sm:$0xff] %v5697_v29  ;;  %1670 = vmatpush.msra.mxu1 %v5695_v15  ;;  %1690 = vmatpush.msra.mxu2 %v5697_v29  ;;  %v5727_v15 = vld [vmem:[#allocation9 + $0x120] sm:$0xff]  ;;  %v5731_v29 = vld [vmem:[#allocation9 + $0x128] sm:$0xff] }
 0x1f6   :  { %8881 = vst [vmem:[#allocation44_spill] sm:$0xff] %v5701_v22  ;;  %1710 = vmatpush.msra.mxu3 %v5701_v22  ;;  %1651 = vmatpush.msra.mxu0 %v5703_v18  ;;  %v5733_v22 = vld [vmem:[#allocation9 + $0x130] sm:$0xff] }
 0x1f7   :  { %8882 = vst [vmem:[#allocation45_spill] sm:$0xff] %v5703_v18  ;;  %1671 = vmatpush.msra.mxu1 %v5707_v13  ;;  %1691 = vmatpush.msra.mxu2 %v5709_v21  ;;  %v5737_v18 = vld [vmem:[#allocation9 + $0x138] sm:$0xff] }
 0x1f8   :  { %8883 = vst [vmem:[#allocation46_spill] sm:$0xff] %v5707_v13  ;;  %1711 = vmatpush.msra.mxu3 %v5713_v30  ;;  %1652 = vmatpush.msra.mxu0 %v5715_v1  ;;  %v5739_v13 = vld [vmem:[#allocation9 + $0x100] sm:$0xff] }
 0x1f9   :  { %8884 = vst [vmem:[#allocation47_spill] sm:$0xff] %v5709_v21  ;;  %1672 = vmatpush.msra.mxu1 %v5719_v5  ;;  %1692 = vmatpush.msra.mxu2 %v5721_v7  ;;  %v5743_v21 = vld [vmem:[#allocation9 + $0x108] sm:$0xff] }
 0x1fa   :  { %8885 = vst [vmem:[#allocation48_spill] sm:$0xff] %v5713_v30  ;;  %1712 = vmatpush.msra.mxu3 %v5725_v17  ;;  %1653 = vmatpush.msra.mxu0 %v5727_v15  ;;  %v5745_v30 = vld [vmem:[#allocation9 + $0x110] sm:$0xff] }
 0x1fb   :  { %8886 = vst [vmem:[#allocation49_spill] sm:$0xff] %v5715_v1  ;;  %1673 = vmatpush.msra.mxu1 %v5731_v29  ;;  %1693 = vmatpush.msra.mxu2 %v5733_v22  ;;  %v5749_v1 = vld [vmem:[#allocation9 + $0x118] sm:$0xff] }
 0x1fc   :  { %8887 = vst [vmem:[#allocation50_spill] sm:$0xff] %v5719_v5  ;;  %1713 = vmatpush.msra.mxu3 %v5737_v18  ;;  %1654 = vmatpush.msra.mxu0 %v5739_v13  ;;  %v5800_v5 = vld [vmem:[#allocation9 + $0x60] sm:$0xff] }
 0x1fd   :  { %8888 = vst [vmem:[#allocation51_spill] sm:$0xff] %v5721_v7  ;;  %1674 = vmatpush.msra.mxu1 %v5743_v21  ;;  %1694 = vmatpush.msra.mxu2 %v5745_v30  ;;  %v5760_v7 = vld [vmem:[#allocation9 + $0xf0] sm:$0xff] }
 0x1fe   :  { %8889 = vst [vmem:[#allocation52_spill] sm:$0xff] %v5725_v17  ;;  %1714 = vmatpush.msra.mxu3 %v5749_v1  ;;  %v5758_v17 = vld [vmem:[#allocation9 + $0xe8] sm:$0xff] }
 0x1ff   :  { %8890 = vst [vmem:[#allocation53_spill] sm:$0xff] %v5727_v15  ;;  %v5756_v15 = vld [vmem:[#allocation9 + $0xe0] sm:$0xff]  ;;  %1675 = vmatpush.msra.mxu1 %v5758_v17  ;;  %1695 = vmatpush.msra.mxu2 %v5760_v7 }
 0x200   :  { %8891 = vst [vmem:[#allocation54_spill] sm:$0xff] %v5731_v29  ;;  %1655 = vmatpush.msra.mxu0 %v5756_v15  ;;  %v5784_v29 = vld [vmem:[#allocation9 + $0xb8] sm:$0xff] }
 0x201   :  { %8892 = vst [vmem:[#allocation55_spill] sm:$0xff] %v5733_v22  ;;  %v5764_v22 = vld [vmem:[#allocation9 + $0xf8] sm:$0xff] }
 0x202   :  { %8893 = vst [vmem:[#allocation56_spill] sm:$0xff] %v5737_v18  ;;  %v5766_v18 = vld [vmem:[#allocation9 + $0xc0] sm:$0xff]  ;;  %1715 = vmatpush.msra.mxu3 %v5764_v22 }
 0x203   :  { %8894 = vst [vmem:[#allocation57_spill] sm:$0xff] %v5739_v13  ;;  %v5768_v13 = vld [vmem:[#allocation9 + $0xc8] sm:$0xff]  ;;  %1656 = vmatpush.msra.mxu0 %v5766_v18 }
 0x204   :  { %8895 = vst [vmem:[#allocation58_spill] sm:$0xff] %v5743_v21  ;;  %v5776_v21 = vld [vmem:[#allocation9 + $0xa0] sm:$0xff]  ;;  %1676 = vmatpush.msra.mxu1 %v5768_v13 }
 0x205   :  { %8896 = vst [vmem:[#allocation59_spill] sm:$0xff] %v5745_v30  ;;  %v5774_v30 = vld [vmem:[#allocation9 + $0xd8] sm:$0xff]  ;;  %1657 = vmatpush.msra.mxu0 %v5776_v21 }
 0x206   :  { %8897 = vst [vmem:[#allocation60_spill] sm:$0xff] %v5749_v1  ;;  %v5772_v1 = vld [vmem:[#allocation9 + $0xd0] sm:$0xff]  ;;  %1716 = vmatpush.msra.mxu3 %v5774_v30 }
 0x207   :  { %8898 = vst [vmem:[#allocation61_spill] sm:$0xff] %v5756_v15  ;;  %v5782_v15 = vld [vmem:[#allocation9 + $0xb0] sm:$0xff]  ;;  %1696 = vmatpush.msra.mxu2 %v5772_v1 }
 0x208   :  { %8899 = vst [vmem:[#allocation62_spill] sm:$0xff] %v5758_v17  ;;  %v5780_v17 = vld [vmem:[#allocation9 + $0xa8] sm:$0xff]  ;;  %1717 = vmatpush.msra.mxu3 %v5784_v29 }
 0x209   :  { %8900 = vst [vmem:[#allocation63_spill] sm:$0xff] %v5760_v7  ;;  %v5790_v7 = vld [vmem:[#allocation9 + $0x88] sm:$0xff]  ;;  %1677 = vmatpush.msra.mxu1 %v5780_v17  ;;  %1697 = vmatpush.msra.mxu2 %v5782_v15 }
 0x20a   :  { %8901 = vst [vmem:[#allocation64_spill] sm:$0xff] %v5764_v22  ;;  %v5788_v22 = vld [vmem:[#allocation9 + $0x80] sm:$0xff] }
 0x20b   :  { %8902 = vst [vmem:[#allocation65_spill] sm:$0xff] %v5766_v18  ;;  %v5794_v18 = vld [vmem:[#allocation9 + $0x90] sm:$0xff]  ;;  %1658 = vmatpush.msra.mxu0 %v5788_v22  ;;  %1678 = vmatpush.msra.mxu1 %v5790_v7 }
 0x20c   :  { %8903 = vst [vmem:[#allocation66_spill] sm:$0xff] %v5768_v13  ;;  %v5796_v13 = vld [vmem:[#allocation9 + $0x98] sm:$0xff]  ;;  %1698 = vmatpush.msra.mxu2 %v5794_v18 }
 0x20d   :  { %8904 = vst [vmem:[#allocation67_spill] sm:$0xff] %v5772_v1  ;;  %v5802_v1 = vld [vmem:[#allocation9 + $0x68] sm:$0xff]  ;;  %1718 = vmatpush.msra.mxu3 %v5796_v13  ;;  %1659 = vmatpush.msra.mxu0 %v5800_v5 }
 0x20e   :  { %8905 = vst [vmem:[#allocation68_spill] sm:$0xff] %v5774_v30  ;;  %v5806_v30 = vld [vmem:[#allocation9 + $0x70] sm:$0xff]  ;;  %1679 = vmatpush.msra.mxu1 %v5802_v1 }
 0x20f   :  { %8906 = vst [vmem:[#allocation69_spill] sm:$0xff] %v5776_v21  ;;  %v5808_v21 = vld [vmem:[#allocation9 + $0x78] sm:$0xff]  ;;  %1699 = vmatpush.msra.mxu2 %v5806_v30 }
 0x210   :  { %8907 = vst [vmem:[#allocation70_spill] sm:$0xff] %v5780_v17  ;;  %v5812_v17 = vld [vmem:[#allocation9 + $0x40] sm:$0xff]  ;;  %1719 = vmatpush.msra.mxu3 %v5808_v21 }
 0x211   :  { %8908 = vst [vmem:[#allocation71_spill] sm:$0xff] %v5782_v15  ;;  %v5814_v15 = vld [vmem:[#allocation9 + $0x48] sm:$0xff]  ;;  %1660 = vmatpush.msra.mxu0 %v5812_v17 }
 0x212   :  { %8909 = vst [vmem:[#allocation72_spill] sm:$0xff] %v5784_v29  ;;  %v5818_v29 = vld [vmem:[#allocation9 + $0x50] sm:$0xff]  ;;  %1680 = vmatpush.msra.mxu1 %v5814_v15 }
 0x213   :  { %8910 = vst [vmem:[#allocation73_spill] sm:$0xff] %v5788_v22  ;;  %v5820_v22 = vld [vmem:[#allocation9 + $0x58] sm:$0xff]  ;;  %1700 = vmatpush.msra.mxu2 %v5818_v29 }
 0x214   :  { %8911 = vst [vmem:[#allocation74_spill] sm:$0xff] %v5790_v7  ;;  %v5824_v7 = vld [vmem:[#allocation9 + $0x20] sm:$0xff]  ;;  %1720 = vmatpush.msra.mxu3 %v5820_v22 }
 0x215   :  { %8912 = vst [vmem:[#allocation75_spill] sm:$0xff] %v5794_v18  ;;  %v5826_v18 = vld [vmem:[#allocation9 + $0x28] sm:$0xff]  ;;  %1661 = vmatpush.msra.mxu0 %v5824_v7 }
 0x216   :  { %8913 = vst [vmem:[#allocation76_spill] sm:$0xff] %v5796_v13  ;;  %v5830_v13 = vld [vmem:[#allocation9 + $0x30] sm:$0xff]  ;;  %1681 = vmatpush.msra.mxu1 %v5826_v18 }
 0x217   :  { %8914 = vst [vmem:[#allocation77_spill] sm:$0xff] %v5800_v5  ;;  %v5832_v5 = vld [vmem:[#allocation9 + $0x38] sm:$0xff]  ;;  %1701 = vmatpush.msra.mxu2 %v5830_v13 }
 0x218   :  { %8915 = vst [vmem:[#allocation78_spill] sm:$0xff] %v5802_v1  ;;  %v5836_v1 = vld [vmem:[#allocation9] sm:$0xff]  ;;  %1721 = vmatpush.msra.mxu3 %v5832_v5 }
 0x219   :  { %8916 = vst [vmem:[#allocation79_spill] sm:$0xff] %v5806_v30  ;;  %v5838_v30 = vld [vmem:[#allocation9 + $0x8] sm:$0xff]  ;;  %1662 = vmatpush.msra.mxu0 %v5836_v1 }
 0x21a   :  { %8917 = vst [vmem:[#allocation80_spill] sm:$0xff] %v5808_v21  ;;  %v5842_v21 = vld [vmem:[#allocation9 + $0x10] sm:$0xff]  ;;  %1682 = vmatpush.msra.mxu1 %v5838_v30 }
 0x21b   :  { %8918 = vst [vmem:[#allocation81_spill] sm:$0xff] %v5812_v17  ;;  %v5844_v17 = vld [vmem:[#allocation9 + $0x18] sm:$0xff]  ;;  %1702 = vmatpush.msra.mxu2 %v5842_v21 }
 0x21c   :  { %8919 = vst [vmem:[#allocation84_spill] sm:$0xff] %v5814_v15  ;;  %v5854_v15 = vld [vmem:[#allocation8 + $0x1f0] sm:$0xff]  ;;  %1722 = vmatpush.msra.mxu3 %v5844_v17 }
 0x21d   :  { %8920 = vst [vmem:[#allocation85_spill] sm:$0xff] %v5818_v29  ;;  %v5852_v29 = vld [vmem:[#allocation8 + $0x1e8] sm:$0xff]  ;;  %1767 = vmatpush.msrb.mxu2 %v5854_v15 }
 0x21e   :  { %8921 = vst [vmem:[#allocation86_spill] sm:$0xff] %v5820_v22  ;;  %v5850_v22 = vld [vmem:[#allocation8 + $0x1e0] sm:$0xff]  ;;  %1747 = vmatpush.msrb.mxu1 %v5852_v29 }
 0x21f   :  { %8922 = vst [vmem:[#allocation87_spill] sm:$0xff] %v5824_v7  ;;  %1727 = vmatpush.msrb.mxu0 %v5850_v22  ;;  %v5932_v7 = vld [vmem:[#allocation8 + $0x138] sm:$0xff] }
 0x220   :  { %8923 = vst [vmem:[#allocation88_spill] sm:$0xff] %v5826_v18  ;;  %v5858_v18 = vld [vmem:[#allocation8 + $0x1f8] sm:$0xff] }
 0x221   :  { %8924 = vst [vmem:[#allocation89_spill] sm:$0xff] %v5830_v13  ;;  %1787 = vmatpush.msrb.mxu3 %v5858_v18  ;;  %v5870_v13 = vld [vmem:[#allocation8 + $0x1d8] sm:$0xff] }
 0x222   :  { %8925 = vst [vmem:[#allocation90_spill] sm:$0xff] %v5832_v5  ;;  %v5862_v5 = vld [vmem:[#allocation8 + $0x1c0] sm:$0xff] }
 0x223   :  { %8926 = vst [vmem:[#allocation91_spill] sm:$0xff] %v5836_v1  ;;  %v5864_v1 = vld [vmem:[#allocation8 + $0x1c8] sm:$0xff]  ;;  %1728 = vmatpush.msrb.mxu0 %v5862_v5  ;;  %1788 = vmatpush.msrb.mxu3 %v5870_v13 }
 0x224   :  { %8927 = vst [vmem:[#allocation92_spill] sm:$0xff] %v5838_v30  ;;  %v5866_v30 = vld [vmem:[#allocation8 + $0x1d0] sm:$0xff]  ;;  %1748 = vmatpush.msrb.mxu1 %v5864_v1 }
 0x225   :  { %8928 = vst [vmem:[#allocation93_spill] sm:$0xff] %v5842_v21  ;;  %1768 = vmatpush.msrb.mxu2 %v5866_v30  ;;  %v5882_v21 = vld [vmem:[#allocation8 + $0x1b8] sm:$0xff] }
 0x226   :  { %8929 = vst [vmem:[#allocation94_spill] sm:$0xff] %v5844_v17  ;;  %v5874_v17 = vld [vmem:[#allocation8 + $0x1a0] sm:$0xff]  ;;  %1789 = vmatpush.msrb.mxu3 %v5882_v21 }
 0x227   :  { %8930 = vst [vmem:[#allocation95_spill] sm:$0xff] %v5850_v22  ;;  %v5876_v22 = vld [vmem:[#allocation8 + $0x1a8] sm:$0xff]  ;;  %1729 = vmatpush.msrb.mxu0 %v5874_v17 }
 0x228   :  { %8931 = vst [vmem:[#allocation96_spill] sm:$0xff] %v5852_v29  ;;  %v5878_v29 = vld [vmem:[#allocation8 + $0x1b0] sm:$0xff]  ;;  %1749 = vmatpush.msrb.mxu1 %v5876_v22 }
 0x229   :  { %8932 = vst [vmem:[#allocation97_spill] sm:$0xff] %v5854_v15  ;;  %1769 = vmatpush.msrb.mxu2 %v5878_v29  ;;  %v5894_v15 = vld [vmem:[#allocation8 + $0x198] sm:$0xff] }
 0x22a   :  { %8933 = vst [vmem:[#allocation100_spill] sm:$0xff] %v5858_v18  ;;  %v5886_v18 = vld [vmem:[#allocation8 + $0x180] sm:$0xff]  ;;  %1790 = vmatpush.msrb.mxu3 %v5894_v15 }
 0x22b   :  { %8934 = vst [vmem:[#allocation101_spill] sm:$0xff] %v5862_v5  ;;  %v5888_v5 = vld [vmem:[#allocation8 + $0x188] sm:$0xff]  ;;  %1730 = vmatpush.msrb.mxu0 %v5886_v18 }
 0x22c   :  { %8935 = vst [vmem:[#allocation102_spill] sm:$0xff] %v5864_v1  ;;  %v5890_v1 = vld [vmem:[#allocation8 + $0x190] sm:$0xff]  ;;  %1750 = vmatpush.msrb.mxu1 %v5888_v5 }
 0x22d   :  { %8936 = vst [vmem:[#allocation105_spill] sm:$0xff] %v5866_v30  ;;  %1770 = vmatpush.msrb.mxu2 %v5890_v1  ;;  %v5906_v30 = vld [vmem:[#allocation8 + $0x178] sm:$0xff] }
 0x22e   :  { %8937 = vst [vmem:[#allocation106_spill] sm:$0xff] %v5870_v13  ;;  %v5898_v13 = vld [vmem:[#allocation8 + $0x160] sm:$0xff]  ;;  %1791 = vmatpush.msrb.mxu3 %v5906_v30 }
 0x22f   :  { %8938 = vst [vmem:[#allocation107_spill] sm:$0xff] %v5874_v17  ;;  %v5900_v17 = vld [vmem:[#allocation8 + $0x168] sm:$0xff]  ;;  %1731 = vmatpush.msrb.mxu0 %v5898_v13 }
 0x230   :  { %8939 = vst [vmem:[#allocation108_spill] sm:$0xff] %v5876_v22  ;;  %v5902_v22 = vld [vmem:[#allocation8 + $0x170] sm:$0xff]  ;;  %1751 = vmatpush.msrb.mxu1 %v5900_v17 }
 0x231   :  { %8940 = vst [vmem:[#allocation109_spill] sm:$0xff] %v5878_v29  ;;  %v5916_v29 = vld [vmem:[#allocation3] ss:$0 sm:$0xff]  ;;  %1771 = vmatpush.msrb.mxu2 %v5902_v22 }
 0x232   :  { %8941 = vst [vmem:[#allocation110_spill] sm:$0xff] %v5882_v21  ;;  %v5910_v21 = vld [vmem:[#allocation8 + $0x140] sm:$0xff] }
 0x233   :  { %8942 = vst [vmem:[#allocation111_spill] sm:$0xff] %v5886_v18  ;;  %v5912_v18 = vld [vmem:[#allocation8 + $0x148] sm:$0xff]  ;;  %1732 = vmatpush.msrb.mxu0 %v5910_v21 }
 0x234   :  { %8943 = vst [vmem:[#allocation112_spill] sm:$0xff] %v5888_v5  ;;  %v5914_v5 = vld [vmem:[#allocation8 + $0x150] sm:$0xff]  ;;  %1752 = vmatpush.msrb.mxu1 %v5912_v18 }
 0x235   :  { %8944 = vst [vmem:[#allocation113_spill] sm:$0xff] %v5890_v1  ;;  %v5920_v1 = vld [vmem:[#allocation8 + $0x158] sm:$0xff]  ;;  %1772 = vmatpush.msrb.mxu2 %v5914_v5 }
 0x236   :  { %8945 = vst [vmem:[#allocation114_spill] sm:$0xff] %v5894_v15  ;;  %v5928_v15 = vld [vmem:[#allocation8 + $0x130] sm:$0xff]  ;;  %1792 = vmatpush.msrb.mxu3 %v5920_v1 }
 0x237   :  { %8946 = vst [vmem:[#allocation115_spill] sm:$0xff] %v5898_v13  ;;  %v5924_v13 = vld [vmem:[#allocation8 + $0x120] sm:$0xff]  ;;  %1773 = vmatpush.msrb.mxu2 %v5928_v15 }
 0x238   :  { %8947 = vst [vmem:[#allocation116_spill] sm:$0xff] %v5900_v17  ;;  %v5926_v17 = vld [vmem:[#allocation8 + $0x128] sm:$0xff]  ;;  %1733 = vmatpush.msrb.mxu0 %v5924_v13  ;;  %1793 = vmatpush.msrb.mxu3 %v5932_v7 }
 0x239   :  { %8948 = vst [vmem:[#allocation117_spill] sm:$0xff] %v5902_v22  ;;  %1753 = vmatpush.msrb.mxu1 %v5926_v17  ;;  %v5940_v22 = vld [vmem:[#allocation8 + $0x110] sm:$0xff] }
 0x23a   :  { %8949 = vst [vmem:[#allocation120_spill] sm:$0xff] %v5906_v30  ;;  %1774 = vmatpush.msrb.mxu2 %v5940_v22 }
 0x23b   :  { %8950 = vst [vmem:[#allocation121_spill] sm:$0xff] %v5910_v21  ;;  %v5936_v21 = vld [vmem:[#allocation8 + $0x100] sm:$0xff] }
 0x23c   :  { %8951 = vst [vmem:[#allocation122_spill] sm:$0xff] %v5912_v18  ;;  %v5938_v18 = vld [vmem:[#allocation8 + $0x108] sm:$0xff]  ;;  %1734 = vmatpush.msrb.mxu0 %v5936_v21 }
 0x23d   :  { %8952 = vst [vmem:[#allocation125_spill] sm:$0xff] %v5914_v5  ;;  %1754 = vmatpush.msrb.mxu1 %v5938_v18  ;;  %v5953_v5 = vld [vmem:[#allocation8 + $0xf0] sm:$0xff] }
 0x23e   :  { %8953 = vst [vmem:[#allocation126_spill] sm:$0xff] %v5916_v29  ;;  %1775 = vmatpush.msrb.mxu2 %v5953_v5 }
 0x23f   :  { %8954 = vst [vmem:[#allocation127_spill] sm:$0xff] %v5920_v1  ;;  %v5945_v1 = vld [vmem:[#allocation8 + $0x118] sm:$0xff] }
 0x240   :  { %8955 = vst [vmem:[#allocation128_spill] sm:$0xff] %v5924_v13  ;;  %v5949_v13 = vld [vmem:[#allocation8 + $0xe0] sm:$0xff]  ;;  %1794 = vmatpush.msrb.mxu3 %v5945_v1 }
 0x241   :  { %8956 = vst [vmem:[#allocation129_spill] sm:$0xff] %v5926_v17  ;;  %v869_v30 = vpop.xlane.xlu0 %868  ;;  %v5951_v17 = vld [vmem:[#allocation8 + $0xe8] sm:$0xff]  ;;  %1735 = vmatpush.msrb.mxu0 %v5949_v13 }
 0x242   :  { %8957 = vst [vmem:[#allocation130_spill] sm:$0xff] %v5928_v15  ;;  %v870_v63 = vadd.f32 %v5916_v29, %v869_v30  ;;  %v5961_v30 = vld [vmem:[#allocation8 + $0xf8] sm:$0xff]  ;;  %1755 = vmatpush.msrb.mxu1 %v5951_v17 }
 0x243   :  { %8958 = vst [vmem:[#allocation131_spill] sm:$0xff] %v5932_v7  ;;  %v5969_v7 = vld [vmem:[#allocation8 + $0xd0] sm:$0xff]  ;;  %1795 = vmatpush.msrb.mxu3 %v5961_v30 }
 0x244   :  { %8959 = vst [vmem:[#allocation132_spill] sm:$0xff] %v5936_v21  ;;  %v5967_v21 = vld [vmem:[#allocation8 + $0xc8] sm:$0xff]  ;;  %1776 = vmatpush.msrb.mxu2 %v5969_v7 }
 0x245   :  { %8960 = vst [vmem:[#allocation133_spill] sm:$0xff] %v5938_v18  ;;  %v1185_v29 = vpop.f32.mrf.mxu0  ;;  %v5965_v18 = vld [vmem:[#allocation8 + $0xc0] sm:$0xff]  ;;  %v1205_v15 = vpop.f32.mrf.mxu1  ;;  %1756 = vmatpush.msrb.mxu1 %v5967_v21 }
 0x246   :  { %8961 = vst [vmem:[#allocation134_spill] sm:$0xff] %v5940_v22  ;;  %1736 = vmatpush.msrb.mxu0 %v5965_v18  ;;  %v5985_v22 = vld [vmem:[#allocation8 + $0xb8] sm:$0xff] }
 0x247   :  { %8962 = vst [vmem:[#allocation135_spill] sm:$0xff] %v5945_v1  ;;  %v5981_v1 = vld [vmem:[#allocation8 + $0xb0] sm:$0xff] }
 0x248   :  { %8963 = vst [vmem:[#allocation138_spill] sm:$0xff] %v5949_v13  ;;  %v5977_v13 = vld [vmem:[#allocation8 + $0xa0] sm:$0xff]  ;;  %1777 = vmatpush.msrb.mxu2 %v5981_v1 }
 0x249   :  { %8964 = vst [vmem:[#allocation139_spill] sm:$0xff] %v5951_v17  ;;  %v5979_v17 = vld [vmem:[#allocation8 + $0xa8] sm:$0xff]  ;;  %1737 = vmatpush.msrb.mxu0 %v5977_v13 }
 0x24a   :  { %8965 = vst [vmem:[#allocation140_spill] sm:$0xff] %v5953_v5  ;;  %1757 = vmatpush.msrb.mxu1 %v5979_v17  ;;  %v5997_v5 = vld [vmem:[#allocation8 + $0x98] sm:$0xff] }
 0x24b   :  { %872 = vst.msk [vmem:[%s7972_s9] sm:$0xff] %vm871_vm0, %v870_v63  ;;  %v5973_v63 = vld [vmem:[#allocation8 + $0xd8] sm:$0xff] }
 0x24c   :  { %8966 = vst [vmem:[#allocation143_spill] sm:$0xff] %v5961_v30  ;;  %1796 = vmatpush.msrb.mxu3 %v5973_v63  ;;  %v5989_v30 = vld [vmem:[#allocation8 + $0x80] sm:$0xff] }
 0x24d   :  { %8967 = vst [vmem:[#allocation144_spill] sm:$0xff] %v5965_v18  ;;  %v5991_v18 = vld [vmem:[#allocation8 + $0x88] sm:$0xff]  ;;  %1738 = vmatpush.msrb.mxu0 %v5989_v30 }
 0x24e   :  { %8968 = vst [vmem:[#allocation145_spill] sm:$0xff] %v5967_v21  ;;  %v5993_v21 = vld [vmem:[#allocation8 + $0x90] sm:$0xff]  ;;  %1797 = vmatpush.msrb.mxu3 %v5985_v22  ;;  %1758 = vmatpush.msrb.mxu1 %v5991_v18 }
 0x24f   :  { %8969 = vst [vmem:[#allocation146_spill] sm:$0xff] %v5969_v7  ;;  %v1225_v7 = vpop.f32.mrf.mxu2  ;;  %1778 = vmatpush.msrb.mxu2 %v5993_v21 }
 0x250   :  { %8970 = vst [vmem:[#allocation147_spill] sm:$0xff] %v5973_v63  ;;  %v6001_v63 = vld [vmem:[#allocation8 + $0x60] sm:$0xff]  ;;  %1798 = vmatpush.msrb.mxu3 %v5997_v5  ;;  %v1285_v3 = vpop.f32.mrf.mxu1 }
 0x251   :  { %8971 = vst [vmem:[#allocation148_spill] sm:$0xff] %v5977_v13  ;;  %v6003_v13 = vld [vmem:[#allocation8 + $0x68] sm:$0xff]  ;;  %1739 = vmatpush.msrb.mxu0 %v6001_v63 }
 0x252   :  { %8972 = vst [vmem:[#allocation149_spill] sm:$0xff] %v5979_v17  ;;  %v6005_v17 = vld [vmem:[#allocation8 + $0x70] sm:$0xff]  ;;  %1759 = vmatpush.msrb.mxu1 %v6003_v13 }
 0x253   :  { %8973 = vst [vmem:[#allocation150_spill] sm:$0xff] %v5981_v1  ;;  %v6009_v1 = vld [vmem:[#allocation8 + $0x78] sm:$0xff]  ;;  %1779 = vmatpush.msrb.mxu2 %v6005_v17 }
 0x254   :  { %8974 = vst [vmem:[#allocation151_spill] sm:$0xff] %v5985_v22  ;;  %v1245_v22 = vpop.f32.mrf.mxu3  ;;  %1799 = vmatpush.msrb.mxu3 %v6009_v1 }
 0x255   :  { %8975 = vst [vmem:[#allocation152_spill] sm:$0xff] %v5989_v30  ;;  %v6013_v30 = vld [vmem:[#allocation8 + $0x40] sm:$0xff]  ;;  %1780 = vmatpush.msrb.mxu2 %v6017_v62 }
 0x256   :  { %8976 = vst [vmem:[#allocation153_spill] sm:$0xff] %v5991_v18  ;;  %v6015_v18 = vld [vmem:[#allocation8 + $0x48] sm:$0xff]  ;;  %1740 = vmatpush.msrb.mxu0 %v6013_v30 }
 0x257   :  { %8977 = vst [vmem:[#allocation154_spill] sm:$0xff] %v5993_v21  ;;  %v6021_v21 = vld [vmem:[#allocation8 + $0x58] sm:$0xff]  ;;  %1760 = vmatpush.msrb.mxu1 %v6015_v18  ;;  %1781 = vmatpush.msrb.mxu2 %v6029_v61 }
 0x258   :  { %8978 = vst [vmem:[#allocation155_spill] sm:$0xff] %v5997_v5  ;;  %v1265_v5 = vpop.f32.mrf.mxu0  ;;  %1800 = vmatpush.msrb.mxu3 %v6021_v21 }
 0x259   :  { %8979 = vst [vmem:[#allocation82_spill] sm:$0xff] %v6001_v63  ;;  %v6025_v63 = vld [vmem:[#allocation8 + $0x20] sm:$0xff]  ;;  %v1266_v60 = vadd.f32 %v1265_v5, %v1185_v29  ;;  %v6046_v5 = vld [vmem:[#allocation8 + $0x18] sm:$0xff]  ;;  %1782 = vmatpush.msrb.mxu2 %v6041_v6 }
 0x25a   :  { %8980 = vst [vmem:[#allocation83_spill] sm:$0xff] %v6003_v13  ;;  %v6027_v13 = vld [vmem:[#allocation8 + $0x28] sm:$0xff]  ;;  %1741 = vmatpush.msrb.mxu0 %v6025_v63 }
 0x25b   :  { %8981 = vst [vmem:[#allocation98_spill] sm:$0xff] %v6005_v17  ;;  %v1286_v17 = vadd.f32 %v1285_v3, %v1205_v15  ;;  %1761 = vmatpush.msrb.mxu1 %v6027_v13  ;;  %v1328_v29 = vadd.f32 %v1266_v60, %v5455_v28  ;;  %v1305_v3 = vpop.f32.mrf.mxu2 }
 0x25c   :  { %8982 = vst [vmem:[#allocation99_spill] sm:$0xff] %v6009_v1  ;;  %v6033_v1 = vld [vmem:[#allocation8 + $0x38] sm:$0xff]  ;;  %v1306_v60 = vadd.f32 %v1305_v3, %v1225_v7  ;;  %v1325_v28 = vpop.f32.mrf.mxu3 }
 0x25d   :  { %8983 = vst [vmem:[#allocation160_spill] sm:$0xff] %v6013_v30  ;;  %v6039_v30 = vld [vmem:[#allocation8 + $0x8] sm:$0xff]  ;;  %1801 = vmatpush.msrb.mxu3 %v6033_v1  ;;  %v1329_v15 = vadd.f32 %v1286_v17, %v5457_v31  ;;  %4272 = vtanh.f32 %v1328_v29  ;;  %v1326_v61 = vadd.f32 %v1325_v28, %v1245_v22 }
 0x25e   :  { %8984 = vst [vmem:[#allocation161_spill] sm:$0xff] %v6015_v18  ;;  %v6037_v18 = vld [vmem:[#allocation8] sm:$0xff]  ;;  %1762 = vmatpush.msrb.mxu1 %v6039_v30  ;;  %v8994_v28 = vld [vmem:[#allocation103_spill] sm:$0xff] }
 0x25f   :  { %8985 = vst [vmem:[#allocation162_spill] sm:$0xff] %v6021_v21  ;;  %1742 = vmatpush.msrb.mxu0 %v6037_v18  ;;  %1802 = vmatpush.msrb.mxu3 %v6046_v5  ;;  %4274 = vtanh.f32 %v1329_v15 }
 0x260   :  { %8986 = vst [vmem:[#allocation163_spill] sm:$0xff] %v6025_v63  ;;  %v1331_v63 = vadd.f32 %v1326_v61, %v5465_v45  ;;  %v203_v61 = vadd.f32 %v8994_v28, %v5269_v24 }
 0x261   :  { %8987 = vst [vmem:[#allocation164_spill] sm:$0xff] %v6027_v13 }
 0x262   :  { %8989 = vst [vmem:[#allocation179_spill] sm:$0xff] %v6033_v1  ;;  %v1330_v1 = vadd.f32 %v1306_v60, %v5461_v41 }
 0x263   :  { %8990 = vst [vmem:[#allocation180_spill] sm:$0xff] %v6037_v18  ;;  %v4273_v13 = vpop.eup %4272 }
 0x264   :  { %8991 = vst [vmem:[#allocation181_spill] sm:$0xff] %v6039_v30  ;;  %4276 = vtanh.f32 %v1330_v1  ;;  %v1336_v31 = vmul.f32 0.5, %v4273_v13  ;;  %v8995_v1 = vld [vmem:[#allocation104_spill] sm:$0xff] }
 0x265   :  { %8993 = vst [vmem:[#allocation183_spill] sm:$0xff] %v6046_v5  ;;  %v4275_v17 = vpop.eup %4274  ;;  %4278 = vtanh.f32 %v1331_v63  ;;  %v244_v13 = vadd.f32 %v8995_v1, %v5271_v25  ;;  %v6075_v1 = vld [vmem:[#allocation6 + $0x1c0] sm:$0xff] }
 0x266   :  { %v1338_v18 = vmul.f32 0.5, %v4275_v17  ;;  %v1337_v29 = vadd.f32 0.5, %v1336_v31 }
 0x268   :  { %v1339_v30 = vadd.f32 0.5, %v1338_v18 }
 0x269   :  { %v1437_v3 = vpop.f32.mrf.mxu0 }
 0x26a   :  { %v4277_v6 = vpop.eup %4276  ;;  %v1342_v5 = vmul.f32 %v1339_v30, %v5475_v37  ;;  %v1500_v18 = vadd.f32 %v1437_v3, %v203_v61  ;;  %v1457_v63 = vpop.f32.mrf.mxu1  ;;  %v6065_v30 = vld [vmem:[#allocation6 + $0x1e8] sm:$0xff] }
 0x26b   :  { %v1343_v15 = vmul.f32 %v4277_v6, %v1337_v29  ;;  %v4279_v21 = vpop.eup %4278  ;;  %v1501_v60 = vadd.f32 %v1457_v63, %v244_v13  ;;  %v6063_v6 = vld [vmem:[#allocation6 + $0x1e0] sm:$0xff]  ;;  %8996 = vst [vmem:[#allocation103_spill] sm:$0xff] %v6065_v30  ;;  %v6069_v29 = vld [vmem:[#allocation6 + $0x1f0] sm:$0xff]  ;;  %v6077_v13 = vld [vmem:[#allocation6 + $0x1c8] sm:$0xff] }
 0x26c   :  { %v1340_v22 = vmul.f32 0.5, %v4279_v21  ;;  %v8997_v21 = vld [vmem:[#allocation118_spill] sm:$0xff]  ;;  %v6081_v63 = vld [vmem:[#allocation6 + $0x1d0] sm:$0xff] }
 0x26d   :  { %v6056_v7 = vadd.f32 %v1343_v15, %v1342_v5  ;;  %v285_v5 = vadd.f32 %v8997_v21, %v5295_v35  ;;  %v6071_v15 = vld [vmem:[#allocation6 + $0x1f8] sm:$0xff]  ;;  %v6086_v21 = vld [vmem:[#allocation6 + $0x1a0] sm:$0xff] }
 0x26e   :  { %v1341_v31 = vadd.f32 0.5, %v1340_v22  ;;  %v8998_v22 = vld [vmem:[#allocation119_spill] sm:$0xff] }
 0x26f   :  { %4280 = vtanh.f32 %v6056_v7  ;;  %v326_v28 = vadd.f32 %v8998_v22, %v5299_v36 }
 0x270   :  { %4282 = vtanh.f32 %v1500_v18  ;;  %v1477_v61 = vpop.f32.mrf.mxu2 }
 0x271   :  { %4284 = vtanh.f32 %v1501_v60  ;;  %v1502_v3 = vadd.f32 %v1477_v61, %v285_v5  ;;  %v1497_v18 = vpop.f32.mrf.mxu3  ;;  %v6090_v5 = vld [vmem:[#allocation6 + $0x1a8] sm:$0xff]  ;;  %v6092_v61 = vld [vmem:[#allocation6 + $0x1b0] sm:$0xff] }
 0x273   :  { %4286 = vtanh.f32 %v1502_v3  ;;  %v6101_v3 = vld [vmem:[#allocation6 + $0x190] sm:$0xff] }
 0x275   :  { %v4281_v17 = vpop.eup %4280 }
 0x276   :  { %v1346_v37 = vmul.f32 %v4281_v17, %v1341_v31  ;;  %v4283_v60 = vpop.eup %4282  ;;  %v1503_v17 = vadd.f32 %v1497_v18, %v326_v28  ;;  %v6099_v28 = vld [vmem:[#allocation6 + $0x188] sm:$0xff] }
 0x277   :  { %v4285_v22 = vpop.eup %4284 }
 0x278   :  { %1663 = vmatmul.f32.vlgmr.msra.gmra.mxu0 %v1346_v37  ;;  %1683 = vmatmul.f32.vlgmr.msra.gmra.mxu1 %v1346_v37  ;;  %v1347_v31 = vmul.f32 %v5484_v54, %v1346_v37  ;;  %v1510_v54 = vmul.f32 0.5, %v4285_v22  ;;  %4288 = vtanh.f32 %v1503_v17  ;;  %v6113_v17 = vld [vmem:[#allocation6 + $0x150] sm:$0xff] }
 0x279   :  { %1703 = vmatmul.f32.vlgmr.msra.gmra.mxu2 %v1346_v37  ;;  %1723 = vmatmul.f32.vlgmr.msra.gmra.mxu3 %v1346_v37  ;;  %v6096_v37 = vld [vmem:[#allocation6 + $0x180] sm:$0xff] }
 0x27a   :  { %1899 = vmatpush.msra.mxu0 %v6063_v6  ;;  %1919 = vmatpush.msra.mxu1 %v6065_v30  ;;  %v1508_v30 = vmul.f32 0.5, %v4283_v60  ;;  %v1511_v18 = vadd.f32 0.5, %v1510_v54 }
 0x27b   :  { %1939 = vmatpush.msra.mxu2 %v6069_v29  ;;  %1959 = vmatpush.msra.mxu3 %v6071_v15 }
 0x27c   :  { %1900 = vmatpush.msra.mxu0 %v6075_v1  ;;  %1920 = vmatpush.msra.mxu1 %v6077_v13  ;;  %v1509_v60 = vadd.f32 0.5, %v1508_v30  ;;  %v1514_v22 = vmul.f32 %v1511_v18, %v5479_v49  ;;  %v9030_v18 = vld [vmem:[#allocation47_spill] sm:$0xff] }
 0x27d   :  { %1940 = vmatpush.msra.mxu2 %v6081_v63  ;;  %1960 = vmatpush.msra.mxu3 %v5489_v59  ;;  %v6107_v59 = vld [vmem:[#allocation6 + $0x170] sm:$0xff] }
 0x27e   :  { %1348 = vadd.xlane.f32.xlu0 %v1347_v31  ;;  %1901 = vmatpush.msra.mxu0 %v6086_v21  ;;  %v4287_v31 = vpop.eup %4286 }
 0x27f   :  { %1921 = vmatpush.msra.mxu1 %v6090_v5  ;;  %1941 = vmatpush.msra.mxu2 %v6092_v61  ;;  %v1515_v54 = vmul.f32 %v4287_v31, %v1509_v60  ;;  %v9031_v60 = vld [vmem:[#allocation48_spill] sm:$0xff]  ;;  %v9032_v31 = vld [vmem:[#allocation49_spill] sm:$0xff] }
 0x280   :  { %1961 = vmatpush.msra.mxu3 %v5498_v0  ;;  %1902 = vmatpush.msra.mxu0 %v6096_v37  ;;  %v4289_v0 = vpop.eup %4288 }
 0x281   :  { %1922 = vmatpush.msra.mxu1 %v6099_v28  ;;  %1942 = vmatpush.msra.mxu2 %v6101_v3  ;;  %v6120_v30 = vadd.f32 %v1515_v54, %v1514_v22  ;;  %v1512_v49 = vmul.f32 0.5, %v4289_v0  ;;  %v9033_v22 = vld [vmem:[#allocation50_spill] sm:$0xff]  ;;  %v9034_v54 = vld [vmem:[#allocation51_spill] sm:$0xff]  ;;  %v9035_v0 = vld [vmem:[#allocation52_spill] sm:$0xff] }
 0x282   :  { %1962 = vmatpush.msra.mxu3 %v5503_v4  ;;  %1903 = vmatpush.msra.mxu0 %v5511_v11 }
 0x283   :  { %1923 = vmatpush.msra.mxu1 %v5515_v12  ;;  %1943 = vmatpush.msra.mxu2 %v6107_v59  ;;  %4290 = vtanh.f32 %v6120_v30  ;;  %v1513_v4 = vadd.f32 0.5, %v1512_v49  ;;  %v9036_v49 = vld [vmem:[#allocation53_spill] sm:$0xff] }
 0x284   :  { %1963 = vmatpush.msra.mxu3 %v5519_v16  ;;  %1904 = vmatpush.msra.mxu0 %v5521_v8  ;;  %v8999_v16 = vld [vmem:[#allocation16_spill] sm:$0xff]  ;;  %v9000_v8 = vld [vmem:[#allocation17_spill] sm:$0xff] }
 0x285   :  { %1924 = vmatpush.msra.mxu1 %v5525_v19  ;;  %1944 = vmatpush.msra.mxu2 %v6113_v17  ;;  %v9001_v19 = vld [vmem:[#allocation18_spill] sm:$0xff] }
 0x286   :  { %1964 = vmatpush.msra.mxu3 %v5529_v23  ;;  %1905 = vmatpush.msra.mxu0 %v5531_v53  ;;  %v9002_v23 = vld [vmem:[#allocation19_spill] sm:$0xff]  ;;  %v9003_v53 = vld [vmem:[#allocation20_spill] sm:$0xff] }
 0x287   :  { %1925 = vmatpush.msra.mxu1 %v5535_v10  ;;  %1945 = vmatpush.msra.mxu2 %v5537_v14  ;;  %v9004_v10 = vld [vmem:[#allocation21_spill] sm:$0xff]  ;;  %v9005_v14 = vld [vmem:[#allocation22_spill] sm:$0xff] }
 0x288   :  { %1965 = vmatpush.msra.mxu3 %v5541_v27  ;;  %1906 = vmatpush.msra.mxu0 %v5543_v40  ;;  %v9006_v27 = vld [vmem:[#allocation23_spill] sm:$0xff]  ;;  %v9007_v40 = vld [vmem:[#allocation24_spill] sm:$0xff] }
 0x289   :  { %1926 = vmatpush.msra.mxu1 %v5547_v9  ;;  %1946 = vmatpush.msra.mxu2 %v5549_v20  ;;  %v4291_v11 = vpop.eup %4290  ;;  %v9008_v9 = vld [vmem:[#allocation25_spill] sm:$0xff]  ;;  %v9009_v20 = vld [vmem:[#allocation26_spill] sm:$0xff] }
 0x28a   :  { %1966 = vmatpush.msra.mxu3 %v5553_v26  ;;  %1907 = vmatpush.msra.mxu0 %v5555_v32  ;;  %v1518_v12 = vmul.f32 %v4291_v11, %v1513_v4  ;;  %v9010_v26 = vld [vmem:[#allocation27_spill] sm:$0xff]  ;;  %v9011_v32 = vld [vmem:[#allocation28_spill] sm:$0xff]  ;;  %v9037_v4 = vld [vmem:[#allocation54_spill] sm:$0xff] }
 0x28b   :  { %1927 = vmatpush.msra.mxu1 %v5559_v2  ;;  %1947 = vmatpush.msra.mxu2 %v5561_v33  ;;  %v9012_v2 = vld [vmem:[#allocation29_spill] sm:$0xff]  ;;  %v9013_v33 = vld [vmem:[#allocation30_spill] sm:$0xff]  ;;  %v9038_v11 = vld [vmem:[#allocation55_spill] sm:$0xff] }
 0x28c   :  { %1967 = vmatpush.msra.mxu3 %v5565_v34  ;;  %1908 = vmatpush.msra.mxu0 %v5567_v38  ;;  %v9014_v34 = vld [vmem:[#allocation31_spill] sm:$0xff]  ;;  %v9015_v38 = vld [vmem:[#allocation32_spill] sm:$0xff] }
 0x28d   :  { %1928 = vmatpush.msra.mxu1 %v5571_v39  ;;  %1948 = vmatpush.msra.mxu2 %v5573_v42  ;;  %v9016_v39 = vld [vmem:[#allocation33_spill] sm:$0xff]  ;;  %v9017_v42 = vld [vmem:[#allocation34_spill] sm:$0xff] }
 0x28e   :  { %1968 = vmatpush.msra.mxu3 %v5577_v43  ;;  %1909 = vmatpush.msra.mxu0 %v5579_v44  ;;  %v9018_v43 = vld [vmem:[#allocation35_spill] sm:$0xff]  ;;  %v9019_v44 = vld [vmem:[#allocation36_spill] sm:$0xff] }
 0x28f   :  { %1929 = vmatpush.msra.mxu1 %v5583_v46  ;;  %1949 = vmatpush.msra.mxu2 %v5585_v47  ;;  %v9020_v46 = vld [vmem:[#allocation37_spill] sm:$0xff]  ;;  %v9021_v47 = vld [vmem:[#allocation38_spill] sm:$0xff] }
 0x290   :  { %1969 = vmatpush.msra.mxu3 %v5589_v48  ;;  %1743 = vmatmul.f32.vlgmr.msrb.gmra.mxu0 %v1518_v12  ;;  %v9022_v48 = vld [vmem:[#allocation39_spill] sm:$0xff] }
 0x291   :  { %1763 = vmatmul.f32.vlgmr.msrb.gmra.mxu1 %v1518_v12  ;;  %1783 = vmatmul.f32.vlgmr.msrb.gmra.mxu2 %v1518_v12 }
 0x292   :  { %1803 = vmatmul.f32.vlgmr.msrb.gmra.mxu3 %v1518_v12  ;;  %1910 = vmatpush.msra.mxu0 %v5591_v50  ;;  %v9023_v50 = vld [vmem:[#allocation40_spill] sm:$0xff] }
 0x293   :  { %1930 = vmatpush.msra.mxu1 %v5595_v51  ;;  %1950 = vmatpush.msra.mxu2 %v5597_v52  ;;  %v9024_v51 = vld [vmem:[#allocation41_spill] sm:$0xff]  ;;  %v9025_v52 = vld [vmem:[#allocation42_spill] sm:$0xff] }
 0x294   :  { %1970 = vmatpush.msra.mxu3 %v5601_v55  ;;  %1911 = vmatpush.msra.mxu0 %v5603_v57  ;;  %v9026_v55 = vld [vmem:[#allocation43_spill] sm:$0xff]  ;;  %v9027_v57 = vld [vmem:[#allocation44_spill] sm:$0xff] }
 0x295   :  { %1931 = vmatpush.msra.mxu1 %v5607_v56  ;;  %1951 = vmatpush.msra.mxu2 %v5609_v58  ;;  %v9028_v56 = vld [vmem:[#allocation45_spill] sm:$0xff]  ;;  %v9029_v58 = vld [vmem:[#allocation46_spill] sm:$0xff] }
 0x296   :  { %1971 = vmatpush.msra.mxu3 %v8999_v16  ;;  %1912 = vmatpush.msra.mxu0 %v9000_v8  ;;  %v9040_v16 = vld [vmem:[#allocation57_spill] sm:$0xff]  ;;  %v9041_v8 = vld [vmem:[#allocation58_spill] sm:$0xff] }
 0x297   :  { %1932 = vmatpush.msra.mxu1 %v9001_v19  ;;  %1952 = vmatpush.msra.mxu2 %v9002_v23  ;;  %v9042_v19 = vld [vmem:[#allocation59_spill] sm:$0xff]  ;;  %v9043_v23 = vld [vmem:[#allocation60_spill] sm:$0xff] }
 0x298   :  { %1972 = vmatpush.msra.mxu3 %v9003_v53  ;;  %1913 = vmatpush.msra.mxu0 %v9004_v10  ;;  %v9044_v53 = vld [vmem:[#allocation61_spill] sm:$0xff]  ;;  %v9045_v10 = vld [vmem:[#allocation62_spill] sm:$0xff] }
 0x299   :  { %1933 = vmatpush.msra.mxu1 %v9005_v14  ;;  %1953 = vmatpush.msra.mxu2 %v9006_v27  ;;  %v9046_v14 = vld [vmem:[#allocation63_spill] sm:$0xff]  ;;  %v9047_v27 = vld [vmem:[#allocation64_spill] sm:$0xff] }
 0x29a   :  { %1973 = vmatpush.msra.mxu3 %v9007_v40  ;;  %1914 = vmatpush.msra.mxu0 %v9008_v9  ;;  %v9048_v40 = vld [vmem:[#allocation65_spill] sm:$0xff]  ;;  %v9049_v9 = vld [vmem:[#allocation66_spill] sm:$0xff] }
 0x29b   :  { %1934 = vmatpush.msra.mxu1 %v9009_v20  ;;  %1954 = vmatpush.msra.mxu2 %v9010_v26  ;;  %v9050_v20 = vld [vmem:[#allocation67_spill] sm:$0xff]  ;;  %v9051_v26 = vld [vmem:[#allocation68_spill] sm:$0xff] }
 0x29c   :  { %1974 = vmatpush.msra.mxu3 %v9011_v32  ;;  %1915 = vmatmul.f32.vlgmr.msra.gmra.mxu0 %v1518_v12  ;;  %v9052_v32 = vld [vmem:[#allocation69_spill] sm:$0xff] }
 0x29d   :  { %1935 = vmatmul.f32.vlgmr.msra.gmra.mxu1 %v1518_v12  ;;  %1955 = vmatmul.f32.vlgmr.msra.gmra.mxu2 %v1518_v12 }
 0x29e   :  { %1975 = vmatmul.f32.vlgmr.msra.gmra.mxu3 %v1518_v12  ;;  %2126 = vmatpush.msrb.mxu0 %v9012_v2  ;;  %v9039_v12 = vld [vmem:[#allocation56_spill] sm:$0xff]  ;;  %v9053_v2 = vld [vmem:[#allocation70_spill] sm:$0xff] }
 0x29f   :  { %2146 = vmatpush.msrb.mxu1 %v9013_v33  ;;  %2166 = vmatpush.msrb.mxu2 %v9014_v34  ;;  %v9054_v33 = vld [vmem:[#allocation71_spill] sm:$0xff]  ;;  %v9055_v34 = vld [vmem:[#allocation72_spill] sm:$0xff] }
 0x2a0   :  { %2186 = vmatpush.msrb.mxu3 %v9015_v38  ;;  %2127 = vmatpush.msrb.mxu0 %v9016_v39  ;;  %v9056_v38 = vld [vmem:[#allocation73_spill] sm:$0xff]  ;;  %v9057_v39 = vld [vmem:[#allocation74_spill] sm:$0xff] }
 0x2a1   :  { %2147 = vmatpush.msrb.mxu1 %v9017_v42  ;;  %2167 = vmatpush.msrb.mxu2 %v9018_v43  ;;  %v9058_v42 = vld [vmem:[#allocation75_spill] sm:$0xff]  ;;  %v9059_v43 = vld [vmem:[#allocation76_spill] sm:$0xff] }
 0x2a2   :  { %2187 = vmatpush.msrb.mxu3 %v9019_v44  ;;  %2128 = vmatpush.msrb.mxu0 %v9020_v46  ;;  %v9060_v44 = vld [vmem:[#allocation77_spill] sm:$0xff]  ;;  %v9061_v46 = vld [vmem:[#allocation78_spill] sm:$0xff] }
 0x2a3   :  { %2148 = vmatpush.msrb.mxu1 %v9021_v47  ;;  %2168 = vmatpush.msrb.mxu2 %v9022_v48  ;;  %v9062_v47 = vld [vmem:[#allocation79_spill] sm:$0xff]  ;;  %v9063_v48 = vld [vmem:[#allocation80_spill] sm:$0xff] }
 0x2a4   :  { %2188 = vmatpush.msrb.mxu3 %v9023_v50  ;;  %2129 = vmatpush.msrb.mxu0 %v9024_v51  ;;  %v9064_v50 = vld [vmem:[#allocation81_spill] sm:$0xff]  ;;  %v9065_v51 = vld [vmem:[#allocation84_spill] sm:$0xff] }
 0x2a5   :  { %2149 = vmatpush.msrb.mxu1 %v9025_v52  ;;  %2169 = vmatpush.msrb.mxu2 %v9026_v55  ;;  %v9066_v52 = vld [vmem:[#allocation85_spill] sm:$0xff]  ;;  %v9067_v55 = vld [vmem:[#allocation86_spill] sm:$0xff] }
 0x2a6   :  { %2189 = vmatpush.msrb.mxu3 %v9027_v57  ;;  %2130 = vmatpush.msrb.mxu0 %v9028_v56  ;;  %v9068_v57 = vld [vmem:[#allocation87_spill] sm:$0xff]  ;;  %v9069_v56 = vld [vmem:[#allocation88_spill] sm:$0xff] }
 0x2a7   :  { %2150 = vmatpush.msrb.mxu1 %v9029_v58  ;;  %2170 = vmatpush.msrb.mxu2 %v9030_v18  ;;  %v9070_v58 = vld [vmem:[#allocation89_spill] sm:$0xff]  ;;  %v9071_v18 = vld [vmem:[#allocation90_spill] sm:$0xff] }
 0x2a8   :  { %2190 = vmatpush.msrb.mxu3 %v9031_v60  ;;  %2131 = vmatpush.msrb.mxu0 %v9032_v31  ;;  %v9072_v60 = vld [vmem:[#allocation91_spill] sm:$0xff]  ;;  %v9073_v31 = vld [vmem:[#allocation92_spill] sm:$0xff] }
 0x2a9   :  { %2151 = vmatpush.msrb.mxu1 %v9033_v22  ;;  %2171 = vmatpush.msrb.mxu2 %v9034_v54  ;;  %v9074_v22 = vld [vmem:[#allocation93_spill] sm:$0xff]  ;;  %v9075_v54 = vld [vmem:[#allocation94_spill] sm:$0xff] }
 0x2aa   :  { %2191 = vmatpush.msrb.mxu3 %v9035_v0  ;;  %2132 = vmatpush.msrb.mxu0 %v9036_v49  ;;  %v9076_v0 = vld [vmem:[#allocation95_spill] sm:$0xff]  ;;  %v9077_v49 = vld [vmem:[#allocation96_spill] sm:$0xff] }
 0x2ab   :  { %2152 = vmatpush.msrb.mxu1 %v9037_v4  ;;  %2172 = vmatpush.msrb.mxu2 %v9038_v11  ;;  %v9078_v4 = vld [vmem:[#allocation97_spill] sm:$0xff]  ;;  %v9079_v11 = vld [vmem:[#allocation100_spill] sm:$0xff] }
 0x2ac   :  { %2192 = vmatpush.msrb.mxu3 %v9039_v12  ;;  %2133 = vmatpush.msrb.mxu0 %v9040_v16  ;;  %v9080_v12 = vld [vmem:[#allocation101_spill] sm:$0xff]  ;;  %v9081_v16 = vld [vmem:[#allocation102_spill] sm:$0xff] }
 0x2ad   :  { %2153 = vmatpush.msrb.mxu1 %v9041_v8  ;;  %2173 = vmatpush.msrb.mxu2 %v9042_v19  ;;  %v9082_v8 = vld [vmem:[#allocation105_spill] sm:$0xff]  ;;  %v9083_v19 = vld [vmem:[#allocation106_spill] sm:$0xff] }
 0x2ae   :  { %2193 = vmatpush.msrb.mxu3 %v9043_v23  ;;  %2134 = vmatpush.msrb.mxu0 %v9044_v53  ;;  %v9084_v23 = vld [vmem:[#allocation107_spill] sm:$0xff]  ;;  %v9085_v53 = vld [vmem:[#allocation108_spill] sm:$0xff] }
 0x2af   :  { %2154 = vmatpush.msrb.mxu1 %v9045_v10  ;;  %2174 = vmatpush.msrb.mxu2 %v9046_v14  ;;  %v9086_v10 = vld [vmem:[#allocation109_spill] sm:$0xff]  ;;  %v9087_v14 = vld [vmem:[#allocation110_spill] sm:$0xff] }
 0x2b0   :  { %2194 = vmatpush.msrb.mxu3 %v9047_v27  ;;  %2135 = vmatpush.msrb.mxu0 %v9048_v40  ;;  %v9088_v27 = vld [vmem:[#allocation111_spill] sm:$0xff]  ;;  %v9089_v40 = vld [vmem:[#allocation112_spill] sm:$0xff] }
 0x2b1   :  { %2155 = vmatpush.msrb.mxu1 %v9049_v9  ;;  %2175 = vmatpush.msrb.mxu2 %v9050_v20  ;;  %v9090_v9 = vld [vmem:[#allocation113_spill] sm:$0xff]  ;;  %v9091_v20 = vld [vmem:[#allocation114_spill] sm:$0xff] }
 0x2b2   :  { %2195 = vmatpush.msrb.mxu3 %v9051_v26  ;;  %2136 = vmatpush.msrb.mxu0 %v9052_v32  ;;  %v9092_v26 = vld [vmem:[#allocation115_spill] sm:$0xff]  ;;  %v9093_v32 = vld [vmem:[#allocation116_spill] sm:$0xff] }
 0x2b3   :  { %2156 = vmatpush.msrb.mxu1 %v9053_v2  ;;  %2176 = vmatpush.msrb.mxu2 %v9054_v33  ;;  %v9094_v2 = vld [vmem:[#allocation117_spill] sm:$0xff]  ;;  %v9095_v33 = vld [vmem:[#allocation120_spill] sm:$0xff] }
 0x2b4   :  { %2196 = vmatpush.msrb.mxu3 %v9055_v34  ;;  %2137 = vmatpush.msrb.mxu0 %v9056_v38  ;;  %v9096_v34 = vld [vmem:[#allocation121_spill] sm:$0xff]  ;;  %v9097_v38 = vld [vmem:[#allocation122_spill] sm:$0xff] }
 0x2b5   :  { %2157 = vmatpush.msrb.mxu1 %v9057_v39  ;;  %2177 = vmatpush.msrb.mxu2 %v9058_v42  ;;  %v9098_v39 = vld [vmem:[#allocation125_spill] sm:$0xff]  ;;  %v9099_v42 = vld [vmem:[#allocation127_spill] sm:$0xff] }
 0x2b6   :  { %2197 = vmatpush.msrb.mxu3 %v9059_v43  ;;  %2138 = vmatpush.msrb.mxu0 %v9060_v44  ;;  %v9100_v43 = vld [vmem:[#allocation128_spill] sm:$0xff]  ;;  %v9101_v44 = vld [vmem:[#allocation129_spill] sm:$0xff] }
 0x2b7   :  { %2158 = vmatpush.msrb.mxu1 %v9061_v46  ;;  %2178 = vmatpush.msrb.mxu2 %v9062_v47  ;;  %v9102_v46 = vld [vmem:[#allocation130_spill] sm:$0xff]  ;;  %v9103_v47 = vld [vmem:[#allocation131_spill] sm:$0xff] }
 0x2b8   :  { %2198 = vmatpush.msrb.mxu3 %v9063_v48  ;;  %2139 = vmatpush.msrb.mxu0 %v9064_v50  ;;  %v9104_v48 = vld [vmem:[#allocation132_spill] sm:$0xff]  ;;  %v9105_v50 = vld [vmem:[#allocation133_spill] sm:$0xff] }
 0x2b9   :  { %2159 = vmatpush.msrb.mxu1 %v9065_v51  ;;  %2179 = vmatpush.msrb.mxu2 %v9066_v52  ;;  %v9106_v51 = vld [vmem:[#allocation134_spill] sm:$0xff]  ;;  %v9107_v52 = vld [vmem:[#allocation135_spill] sm:$0xff] }
 0x2ba   :  { %2199 = vmatpush.msrb.mxu3 %v9067_v55  ;;  %2140 = vmatpush.msrb.mxu0 %v9068_v57  ;;  %v9108_v55 = vld [vmem:[#allocation138_spill] sm:$0xff]  ;;  %v9109_v57 = vld [vmem:[#allocation139_spill] sm:$0xff] }
 0x2bb   :  { %2160 = vmatpush.msrb.mxu1 %v9069_v56  ;;  %2180 = vmatpush.msrb.mxu2 %v9070_v58  ;;  %v9110_v56 = vld [vmem:[#allocation140_spill] sm:$0xff]  ;;  %v9111_v58 = vld [vmem:[#allocation143_spill] sm:$0xff] }
 0x2bc   :  { %2200 = vmatpush.msrb.mxu3 %v9071_v18  ;;  %2141 = vmatpush.msrb.mxu0 %v9072_v60  ;;  %v9112_v18 = vld [vmem:[#allocation144_spill] sm:$0xff]  ;;  %v9113_v60 = vld [vmem:[#allocation145_spill] sm:$0xff] }
 0x2bd   :  { %2161 = vmatpush.msrb.mxu1 %v9073_v31  ;;  %2181 = vmatpush.msrb.mxu2 %v9074_v22  ;;  %v9114_v31 = vld [vmem:[#allocation146_spill] sm:$0xff]  ;;  %v9115_v22 = vld [vmem:[#allocation147_spill] sm:$0xff] }
 0x2be   :  { %2201 = vmatpush.msrb.mxu3 %v9075_v54  ;;  %2206 = vmatpush.msra.mxu0 %v9076_v0  ;;  %v9116_v54 = vld [vmem:[#allocation148_spill] sm:$0xff]  ;;  %v9117_v0 = vld [vmem:[#allocation149_spill] sm:$0xff] }
 0x2bf   :  { %2226 = vmatpush.msra.mxu1 %v9077_v49  ;;  %2246 = vmatpush.msra.mxu2 %v9078_v4  ;;  %v9118_v49 = vld [vmem:[#allocation150_spill] sm:$0xff]  ;;  %v9119_v4 = vld [vmem:[#allocation151_spill] sm:$0xff] }
 0x2c0   :  { %2266 = vmatpush.msra.mxu3 %v9079_v11  ;;  %2207 = vmatpush.msra.mxu0 %v9080_v12  ;;  %v9120_v11 = vld [vmem:[#allocation152_spill] sm:$0xff]  ;;  %v9121_v12 = vld [vmem:[#allocation153_spill] sm:$0xff] }
 0x2c1   :  { %2227 = vmatpush.msra.mxu1 %v9081_v16  ;;  %2247 = vmatpush.msra.mxu2 %v9082_v8  ;;  %v9122_v16 = vld [vmem:[#allocation154_spill] sm:$0xff]  ;;  %v9123_v8 = vld [vmem:[#allocation155_spill] sm:$0xff] }
 0x2c2   :  { %2267 = vmatpush.msra.mxu3 %v9083_v19  ;;  %2208 = vmatpush.msra.mxu0 %v9084_v23  ;;  %v9124_v19 = vld [vmem:[#allocation82_spill] sm:$0xff]  ;;  %v9125_v23 = vld [vmem:[#allocation83_spill] sm:$0xff] }
 0x2c3   :  { %2228 = vmatpush.msra.mxu1 %v9085_v53  ;;  %2248 = vmatpush.msra.mxu2 %v9086_v10  ;;  %v9126_v53 = vld [vmem:[#allocation98_spill] sm:$0xff]  ;;  %v9127_v10 = vld [vmem:[#allocation99_spill] sm:$0xff] }
 0x2c4   :  { %2268 = vmatpush.msra.mxu3 %v9087_v14  ;;  %2209 = vmatpush.msra.mxu0 %v9088_v27  ;;  %v9128_v14 = vld [vmem:[#allocation160_spill] sm:$0xff]  ;;  %v9129_v27 = vld [vmem:[#allocation161_spill] sm:$0xff] }
 0x2c5   :  { %2229 = vmatpush.msra.mxu1 %v9089_v40  ;;  %2249 = vmatpush.msra.mxu2 %v9090_v9  ;;  %v9130_v40 = vld [vmem:[#allocation162_spill] sm:$0xff]  ;;  %v9131_v9 = vld [vmem:[#allocation163_spill] sm:$0xff] }
 0x2c6   :  { %2269 = vmatpush.msra.mxu3 %v9091_v20  ;;  %2210 = vmatpush.msra.mxu0 %v9092_v26  ;;  %v9132_v20 = vld [vmem:[#allocation164_spill] sm:$0xff]  ;;  %v9133_v26 = vld [vmem:[#allocation165_spill] sm:$0xff] }
 0x2c7   :  { %2230 = vmatpush.msra.mxu1 %v9093_v32  ;;  %2250 = vmatpush.msra.mxu2 %v9094_v2  ;;  %v9134_v32 = vld [vmem:[#allocation179_spill] sm:$0xff]  ;;  %v9135_v2 = vld [vmem:[#allocation180_spill] sm:$0xff] }
 0x2c8   :  { %2270 = vmatpush.msra.mxu3 %v9095_v33  ;;  %2211 = vmatpush.msra.mxu0 %v9096_v34  ;;  %v9136_v33 = vld [vmem:[#allocation181_spill] sm:$0xff]  ;;  %v9137_v34 = vld [vmem:[#allocation182_spill] sm:$0xff] }
 0x2c9   :  { %2231 = vmatpush.msra.mxu1 %v9097_v38  ;;  %2251 = vmatpush.msra.mxu2 %v9098_v39  ;;  %v9138_v38 = vld [vmem:[#allocation183_spill] sm:$0xff] }
 0x2ca   :  { %2271 = vmatpush.msra.mxu3 %v9099_v42  ;;  %2212 = vmatpush.msra.mxu0 %v9100_v43 }
 0x2cb   :  { %2232 = vmatpush.msra.mxu1 %v9101_v44  ;;  %2252 = vmatpush.msra.mxu2 %v9102_v46 }
 0x2cc   :  { %2272 = vmatpush.msra.mxu3 %v9103_v47  ;;  %2213 = vmatpush.msra.mxu0 %v9104_v48 }
 0x2cd   :  { %2233 = vmatpush.msra.mxu1 %v9105_v50  ;;  %2253 = vmatpush.msra.mxu2 %v9106_v51 }
 0x2ce   :  { %2273 = vmatpush.msra.mxu3 %v9107_v52  ;;  %2214 = vmatpush.msra.mxu0 %v9108_v55  ;;  %v9140_v55 = vld [vmem:[#allocation14_spill] sm:$0xff] }
 0x2cf   :  { %2234 = vmatpush.msra.mxu1 %v9109_v57  ;;  %2254 = vmatpush.msra.mxu2 %v9110_v56  ;;  %v9141_v56 = vld [vmem:[#allocation15_spill] sm:$0xff] }
 0x2d0   :  { %2274 = vmatpush.msra.mxu3 %v9111_v58  ;;  %2215 = vmatpush.msra.mxu0 %v9112_v18 }
 0x2d1   :  { %2235 = vmatpush.msra.mxu1 %v9113_v60  ;;  %2255 = vmatpush.msra.mxu2 %v9114_v31 }
 0x2d2   :  { %2275 = vmatpush.msra.mxu3 %v9115_v22  ;;  %2216 = vmatpush.msra.mxu0 %v9116_v54 }
 0x2d3   :  { %2236 = vmatpush.msra.mxu1 %v9117_v0  ;;  %2256 = vmatpush.msra.mxu2 %v9118_v49  ;;  %v9142_v49 = vld [vmem:[#allocation123_spill] sm:$0xff] }
 0x2d4   :  { %2276 = vmatpush.msra.mxu3 %v9119_v4  ;;  %2217 = vmatpush.msra.mxu0 %v9120_v11  ;;  %v206_v4 = vadd.f32 %v9142_v49, %v5269_v24 }
 0x2d5   :  { %2237 = vmatpush.msra.mxu1 %v9121_v12  ;;  %2257 = vmatpush.msra.mxu2 %v9122_v16  ;;  %v9143_v16 = vld [vmem:[#allocation124_spill] sm:$0xff] }
 0x2d6   :  { %2277 = vmatpush.msra.mxu3 %v9123_v8  ;;  %2218 = vmatpush.msra.mxu0 %v9124_v19  ;;  %v247_v8 = vadd.f32 %v9143_v16, %v5271_v25 }
 0x2d7   :  { %2238 = vmatpush.msra.mxu1 %v9125_v23  ;;  %2258 = vmatpush.msra.mxu2 %v9126_v53 }
 0x2d8   :  { %2278 = vmatpush.msra.mxu3 %v9127_v10  ;;  %2219 = vmatpush.msra.mxu0 %v9128_v14 }
 0x2d9   :  { %2239 = vmatpush.msra.mxu1 %v9129_v27  ;;  %2259 = vmatpush.msra.mxu2 %v6017_v62  ;;  %v9139_v62 = vld [vmem:[#allocation126_spill] sm:$0xff] }
 0x2da   :  { %2279 = vmatpush.msra.mxu3 %v9130_v40  ;;  %2220 = vmatpush.msra.mxu0 %v9131_v9 }
 0x2db   :  { %2240 = vmatpush.msra.mxu1 %v9132_v20  ;;  %2260 = vmatpush.msra.mxu2 %v9133_v26  ;;  %v9144_v26 = vld [vmem:[#allocation136_spill] sm:$0xff] }
 0x2dc   :  { %2280 = vmatpush.msra.mxu3 %v9134_v32  ;;  %2221 = vmatpush.msra.mxu0 %v9135_v2  ;;  %v288_v32 = vadd.f32 %v9144_v26, %v5295_v35  ;;  %v9145_v2 = vld [vmem:[#allocation137_spill] sm:$0xff]  ;;  %v6408_v26 = vld [vmem:[#allocation6 + $0xc8] sm:$0xff] }
 0x2dd   :  { %2241 = vmatpush.msra.mxu1 %v9136_v33  ;;  %2261 = vmatpush.msra.mxu2 %v9137_v34  ;;  %v329_v33 = vadd.f32 %v9145_v2, %v5299_v36  ;;  %v6414_v2 = vld [vmem:[#allocation6 + $0xd8] sm:$0xff] }
 0x2de   :  { %2281 = vmatpush.msra.mxu3 %v9138_v38 }
 0x2f1   :  { %v1349_v39 = vpop.xlane.xlu0 %1348 }
 0x2f2   :  { %v1350_v42 = vadd.f32 %v9139_v62, %v1349_v39 }
 0x2f4   :  { %1351 = vst.msk [vmem:[%s7972_s9 + $0x8] sm:$0xff] %vm871_vm0, %v1350_v42 }
 0x2f5   :  { %v1664_v43 = vpop.f32.mrf.mxu0  ;;  %v1684_v44 = vpop.f32.mrf.mxu1 }
 0x2fc   :  { %v1704_v46 = vpop.f32.mrf.mxu2  ;;  %v1724_v47 = vpop.f32.mrf.mxu3 }
 0x30d   :  { %v1744_v48 = vpop.f32.mrf.mxu0 }
 0x30e   :  { %v1745_v50 = vadd.f32 %v1744_v48, %v1664_v43  ;;  %v1764_v51 = vpop.f32.mrf.mxu1 }
 0x30f   :  { %v1765_v52 = vadd.f32 %v1764_v51, %v1684_v44 }
 0x310   :  { %v1807_v57 = vadd.f32 %v1745_v50, %v9140_v55 }
 0x311   :  { %v1808_v58 = vadd.f32 %v1765_v52, %v9141_v56 }
 0x312   :  { %4292 = vtanh.f32 %v1807_v57 }
 0x313   :  { %4294 = vtanh.f32 %v1808_v58 }
 0x314   :  { %v1784_v18 = vpop.f32.mrf.mxu2 }
 0x315   :  { %v1785_v60 = vadd.f32 %v1784_v18, %v1704_v46  ;;  %v1804_v31 = vpop.f32.mrf.mxu3 }
 0x316   :  { %v1805_v22 = vadd.f32 %v1804_v31, %v1724_v47 }
 0x317   :  { %v1809_v54 = vadd.f32 %v1785_v60, %v5461_v41 }
 0x318   :  { %v4293_v0 = vpop.eup %4292  ;;  %v1810_v11 = vadd.f32 %v1805_v22, %v5465_v45 }
 0x319   :  { %v4295_v12 = vpop.eup %4294  ;;  %4296 = vtanh.f32 %v1809_v54  ;;  %v1916_v19 = vpop.f32.mrf.mxu0  ;;  %v1815_v23 = vmul.f32 0.5, %v4293_v0 }
 0x31a   :  { %v1817_v53 = vmul.f32 0.5, %v4295_v12  ;;  %v1979_v10 = vadd.f32 %v1916_v19, %v206_v4  ;;  %v1936_v14 = vpop.f32.mrf.mxu1  ;;  %4298 = vtanh.f32 %v1810_v11  ;;  %v9146_v11 = vld [vmem:[#allocation103_spill] sm:$0xff]  ;;  %v6321_v12 = vld [vmem:[#allocation6 + $0x1d8] sm:$0xff] }
 0x31b   :  { %v1980_v27 = vadd.f32 %v1936_v14, %v247_v8  ;;  %v1816_v9 = vadd.f32 0.5, %v1815_v23  ;;  %v6378_v23 = vld [vmem:[#allocation6 + $0x138] sm:$0xff] }
 0x31c   :  { %v1818_v40 = vadd.f32 0.5, %v1817_v53  ;;  %4300 = vtanh.f32 %v1979_v10  ;;  %v6380_v53 = vld [vmem:[#allocation6 + $0x100] sm:$0xff]  ;;  %v6386_v10 = vld [vmem:[#allocation6 + $0x110] sm:$0xff]  ;;  %v6390_v14 = vld [vmem:[#allocation6 + $0x118] sm:$0xff] }
 0x31d   :  { %4302 = vtanh.f32 %v1980_v27  ;;  %v6392_v27 = vld [vmem:[#allocation6 + $0xe0] sm:$0xff] }
 0x31e   :  { %v1821_v34 = vmul.f32 %v1818_v40, %v6056_v7  ;;  %v6398_v40 = vld [vmem:[#allocation6 + $0xf0] sm:$0xff] }
 0x31f   :  { %v4297_v20 = vpop.eup %4296 }
 0x320   :  { %v1822_v38 = vmul.f32 %v4297_v20, %v1816_v9  ;;  %v1956_v39 = vpop.f32.mrf.mxu2  ;;  %v4299_v62 = vpop.eup %4298  ;;  %v6402_v9 = vld [vmem:[#allocation6 + $0xf8] sm:$0xff]  ;;  %v6404_v20 = vld [vmem:[#allocation6 + $0xc0] sm:$0xff] }
 0x321   :  { %v1981_v42 = vadd.f32 %v1956_v39, %v288_v32  ;;  %v1976_v43 = vpop.f32.mrf.mxu3  ;;  %v1819_v52 = vmul.f32 0.5, %v4299_v62  ;;  %v6410_v32 = vld [vmem:[#allocation6 + $0xd0] sm:$0xff]  ;;  %v6426_v39 = vld [vmem:[#allocation6 + $0xb8] sm:$0xff]  ;;  %v6428_v62 = vld [vmem:[#allocation6 + $0x80] sm:$0xff] }
 0x322   :  { %v4301_v44 = vpop.eup %4300  ;;  %v6312_v46 = vadd.f32 %v1822_v38, %v1821_v34  ;;  %v1982_v47 = vadd.f32 %v1976_v43, %v329_v33  ;;  %v6416_v33 = vld [vmem:[#allocation6 + $0xa0] sm:$0xff]  ;;  %v6420_v34 = vld [vmem:[#allocation6 + $0xa8] sm:$0xff]  ;;  %v6422_v38 = vld [vmem:[#allocation6 + $0xb0] sm:$0xff] }
 0x323   :  { %v4303_v48 = vpop.eup %4302  ;;  %4304 = vtanh.f32 %v1981_v42  ;;  %v1987_v50 = vmul.f32 0.5, %v4301_v44  ;;  %v1820_v18 = vadd.f32 0.5, %v1819_v52  ;;  %v6432_v42 = vld [vmem:[#allocation6 + $0x88] sm:$0xff]  ;;  %v6434_v43 = vld [vmem:[#allocation6 + $0x90] sm:$0xff]  ;;  %v6438_v44 = vld [vmem:[#allocation6 + $0x98] sm:$0xff] }
 0x324   :  { %4306 = vtanh.f32 %v6312_v46  ;;  %v1989_v51 = vmul.f32 0.5, %v4303_v48  ;;  %v6444_v48 = vld [vmem:[#allocation6 + $0x68] sm:$0xff]  ;;  %v6452_v52 = vld [vmem:[#allocation6 + $0x40] sm:$0xff] }
 0x325   :  { %4308 = vtanh.f32 %v1982_v47  ;;  %v1988_v58 = vadd.f32 0.5, %v1987_v50  ;;  %v6440_v47 = vld [vmem:[#allocation6 + $0x60] sm:$0xff]  ;;  %v6446_v50 = vld [vmem:[#allocation6 + $0x70] sm:$0xff]  ;;  %9148 = vst [vmem:[#allocation118_spill] sm:$0xff] %v6452_v52 }
 0x326   :  { %v1990_v57 = vadd.f32 0.5, %v1989_v51  ;;  %v6450_v51 = vld [vmem:[#allocation6 + $0x78] sm:$0xff] }
 0x327   :  { %9147 = vst [vmem:[#allocation104_spill] sm:$0xff] %v6450_v51 }
 0x328   :  { %v1993_v31 = vmul.f32 %v1990_v57, %v6120_v30  ;;  %v6326_v30 = vld [vmem:[%s7970_s7] ss:$0 sm:$0xff]  ;;  %v6456_v57 = vld [vmem:[#allocation6 + $0x48] sm:$0xff] }
 0x329   :  { %v4305_v7 = vpop.eup %4304  ;;  %9149 = vst [vmem:[#allocation119_spill] sm:$0xff] %v6456_v57 }
 0x32a   :  { %v4307_v60 = vpop.eup %4306  ;;  %v1994_v22 = vmul.f32 %v4305_v7, %v1988_v58  ;;  %v6458_v58 = vld [vmem:[#allocation6 + $0x50] sm:$0xff]  ;;  %v6462_v7 = vld [vmem:[#allocation6 + $0x58] sm:$0xff] }
 0x32b   :  { %v1825_v54 = vmul.f32 %v4307_v60, %v1820_v18  ;;  %v4309_v0 = vpop.eup %4308  ;;  %9150 = vst [vmem:[#allocation16_spill] sm:$0xff] %v6458_v58  ;;  %v6464_v18 = vld [vmem:[#allocation6 + $0x20] sm:$0xff]  ;;  %v6468_v60 = vld [vmem:[#allocation6 + $0x28] sm:$0xff] }
 0x32c   :  { %v6316_v49 = vadd.f32 %v1994_v22, %v1993_v31  ;;  %v1991_v4 = vmul.f32 0.5, %v4309_v0  ;;  %9151 = vst [vmem:[#allocation17_spill] sm:$0xff] %v6462_v7  ;;  %v6470_v31 = vld [vmem:[#allocation6 + $0x30] sm:$0xff]  ;;  %v6474_v22 = vld [vmem:[#allocation6 + $0x38] sm:$0xff]  ;;  %v6480_v0 = vld [vmem:[#allocation6 + $0x8] sm:$0xff] }
 0x32d   :  { %2142 = vmatmul.f32.vlgmr.msrb.gmra.mxu0 %v1825_v54  ;;  %2162 = vmatmul.f32.vlgmr.msrb.gmra.mxu1 %v1825_v54  ;;  %v1826_v16 = vmul.f32 %v6326_v30, %v1825_v54  ;;  %9152 = vst [vmem:[#allocation18_spill] sm:$0xff] %v6464_v18 }
 0x32e   :  { %4310 = vtanh.f32 %v6316_v49  ;;  %2182 = vmatmul.f32.vlgmr.msrb.gmra.mxu2 %v1825_v54  ;;  %2202 = vmatmul.f32.vlgmr.msrb.gmra.mxu3 %v1825_v54  ;;  %v1992_v8 = vadd.f32 0.5, %v1991_v4  ;;  %9153 = vst [vmem:[#allocation19_spill] sm:$0xff] %v6468_v60  ;;  %v6476_v54 = vld [vmem:[#allocation6] sm:$0xff]  ;;  %v6482_v4 = vld [vmem:[#allocation6 + $0x10] sm:$0xff] }
 0x32f   :  { %2378 = vmatpush.msrb.mxu0 %v6063_v6  ;;  %2398 = vmatpush.msrb.mxu1 %v9146_v11  ;;  %v6335_v6 = vld [vmem:[#allocation6 + $0x1b8] sm:$0xff]  ;;  %9154 = vst [vmem:[#allocation20_spill] sm:$0xff] %v6470_v31 }
 0x330   :  { %2418 = vmatpush.msrb.mxu2 %v6069_v29  ;;  %2438 = vmatpush.msrb.mxu3 %v6071_v15  ;;  %v6340_v29 = vld [vmem:[#allocation6 + $0x198] sm:$0xff]  ;;  %9155 = vst [vmem:[#allocation21_spill] sm:$0xff] %v6474_v22 }
 0x331   :  { %2379 = vmatpush.msrb.mxu0 %v6075_v1  ;;  %2399 = vmatpush.msrb.mxu1 %v6077_v13  ;;  %v6348_v1 = vld [vmem:[#allocation6 + $0x160] sm:$0xff]  ;;  %v6352_v13 = vld [vmem:[#allocation6 + $0x168] sm:$0xff]  ;;  %9156 = vst [vmem:[#allocation22_spill] sm:$0xff] %v6476_v54  ;;  %v6486_v11 = vld [vmem:[#allocation6 + $0x18] sm:$0xff] }
 0x332   :  { %2419 = vmatpush.msrb.mxu2 %v6081_v63  ;;  %2439 = vmatpush.msrb.mxu3 %v6321_v12  ;;  %v6356_v63 = vld [vmem:[#allocation6 + $0x178] sm:$0xff]  ;;  %9157 = vst [vmem:[#allocation23_spill] sm:$0xff] %v6480_v0 }
 0x333   :  { %1827 = vadd.xlane.f32.xlu1 %v1826_v16  ;;  %2380 = vmatpush.msrb.mxu0 %v6086_v21  ;;  %v6358_v21 = vld [vmem:[#allocation6 + $0x140] sm:$0xff]  ;;  %9158 = vst [vmem:[#allocation24_spill] sm:$0xff] %v6482_v4 }
 0x334   :  { %v4311_v19 = vpop.eup %4310  ;;  %2400 = vmatpush.msrb.mxu1 %v6090_v5  ;;  %2420 = vmatpush.msrb.mxu2 %v6092_v61  ;;  %v6362_v5 = vld [vmem:[#allocation6 + $0x148] sm:$0xff]  ;;  %v6366_v61 = vld [vmem:[#allocation6 + $0x158] sm:$0xff]  ;;  %9159 = vst [vmem:[#allocation25_spill] sm:$0xff] %v6486_v11  ;;  %v6492_v16 = vld [vmem:[#allocation9 + $0x1e0] sm:$0xff] }
 0x335   :  { %v6342_v15 = vmul.f32 %v4311_v19, %v1992_v8  ;;  %2440 = vmatpush.msrb.mxu3 %v6335_v6  ;;  %2381 = vmatpush.msrb.mxu0 %v6096_v37  ;;  %v6368_v37 = vld [vmem:[#allocation6 + $0x120] sm:$0xff]  ;;  %9160 = vst [vmem:[#allocation26_spill] sm:$0xff] %v6492_v16  ;;  %v6496_v8 = vld [vmem:[#allocation9 + $0x1e8] sm:$0xff]  ;;  %v6498_v19 = vld [vmem:[#allocation9 + $0x1f0] sm:$0xff] }
 0x336   :  { %2401 = vmatpush.msrb.mxu1 %v6099_v28  ;;  %2421 = vmatpush.msrb.mxu2 %v6101_v3  ;;  %v6372_v28 = vld [vmem:[#allocation6 + $0x128] sm:$0xff]  ;;  %v6374_v3 = vld [vmem:[#allocation6 + $0x130] sm:$0xff]  ;;  %9161 = vst [vmem:[#allocation27_spill] sm:$0xff] %v6496_v8 }
 0x337   :  { %2441 = vmatpush.msrb.mxu3 %v6340_v29  ;;  %2222 = vmatmul.f32.vlgmr.msra.gmra.mxu0 %v6342_v15  ;;  %9162 = vst [vmem:[#allocation28_spill] sm:$0xff] %v6498_v19 }
 0x338   :  { %2242 = vmatmul.f32.vlgmr.msra.gmra.mxu1 %v6342_v15  ;;  %2262 = vmatmul.f32.vlgmr.msra.gmra.mxu2 %v6342_v15 }
 0x339   :  { %2282 = vmatmul.f32.vlgmr.msra.gmra.mxu3 %v6342_v15  ;;  %2382 = vmatpush.msrb.mxu0 %v6348_v1 }
 0x33a   :  { %2402 = vmatpush.msrb.mxu1 %v6352_v13  ;;  %2422 = vmatpush.msrb.mxu2 %v6107_v59  ;;  %v6384_v59 = vld [vmem:[#allocation6 + $0x108] sm:$0xff] }
 0x33b   :  { %2442 = vmatpush.msrb.mxu3 %v6356_v63  ;;  %2383 = vmatpush.msrb.mxu0 %v6358_v21 }
 0x33c   :  { %2403 = vmatpush.msrb.mxu1 %v6362_v5  ;;  %2423 = vmatpush.msrb.mxu2 %v6113_v17  ;;  %v6396_v17 = vld [vmem:[#allocation6 + $0xe8] sm:$0xff] }
 0x33d   :  { %2443 = vmatpush.msrb.mxu3 %v6366_v61  ;;  %2384 = vmatpush.msrb.mxu0 %v6368_v37 }
 0x33e   :  { %2404 = vmatpush.msrb.mxu1 %v6372_v28  ;;  %2424 = vmatpush.msrb.mxu2 %v6374_v3 }
 0x33f   :  { %2444 = vmatpush.msrb.mxu3 %v6378_v23  ;;  %2385 = vmatpush.msrb.mxu0 %v6380_v53 }
 0x340   :  { %2405 = vmatpush.msrb.mxu1 %v6384_v59  ;;  %2425 = vmatpush.msrb.mxu2 %v6386_v10 }
 0x341   :  { %2445 = vmatpush.msrb.mxu3 %v6390_v14  ;;  %2386 = vmatpush.msrb.mxu0 %v6392_v27 }
 0x342   :  { %2406 = vmatpush.msrb.mxu1 %v6396_v17  ;;  %2426 = vmatpush.msrb.mxu2 %v6398_v40 }
 0x343   :  { %2446 = vmatpush.msrb.mxu3 %v6402_v9  ;;  %2387 = vmatpush.msrb.mxu0 %v6404_v20 }
 0x344   :  { %2407 = vmatpush.msrb.mxu1 %v6408_v26  ;;  %2427 = vmatpush.msrb.mxu2 %v6410_v32 }
 0x345   :  { %2447 = vmatpush.msrb.mxu3 %v6414_v2  ;;  %2388 = vmatpush.msrb.mxu0 %v6416_v33 }
 0x346   :  { %2408 = vmatpush.msrb.mxu1 %v6420_v34  ;;  %2428 = vmatpush.msrb.mxu2 %v6422_v38 }
 0x347   :  { %2448 = vmatpush.msrb.mxu3 %v6426_v39  ;;  %2389 = vmatpush.msrb.mxu0 %v6428_v62 }
 0x348   :  { %2409 = vmatpush.msrb.mxu1 %v6432_v42  ;;  %2429 = vmatpush.msrb.mxu2 %v6434_v43 }
 0x349   :  { %2449 = vmatpush.msrb.mxu3 %v6438_v44  ;;  %2390 = vmatpush.msrb.mxu0 %v6440_v47 }
 0x34a   :  { %2410 = vmatpush.msrb.mxu1 %v6444_v48  ;;  %2430 = vmatpush.msrb.mxu2 %v6446_v50 }
 0x34b   :  { %2450 = vmatpush.msrb.mxu3 %v6450_v51  ;;  %2391 = vmatpush.msrb.mxu0 %v6452_v52  ;;  %v6878_v51 = vld [vmem:[#allocation8 + $0x10] sm:$0xff] }
 0x34c   :  { %2411 = vmatpush.msrb.mxu1 %v6456_v57  ;;  %2431 = vmatpush.msrb.mxu2 %v6458_v58  ;;  %v6866_v58 = vld [vmem:[#allocation8 + $0x30] sm:$0xff]  ;;  %9286 = vst [vmem:[#allocation180_spill] sm:$0xff] %v6878_v51 }
 0x34d   :  { %2451 = vmatpush.msrb.mxu3 %v6462_v7  ;;  %2392 = vmatpush.msrb.mxu0 %v6464_v18  ;;  %v6854_v7 = vld [vmem:[#allocation8 + $0x50] sm:$0xff]  ;;  %9282 = vst [vmem:[#allocation163_spill] sm:$0xff] %v6866_v58 }
 0x34e   :  { %2412 = vmatpush.msrb.mxu1 %v6468_v60  ;;  %2432 = vmatpush.msrb.mxu2 %v6470_v31  ;;  %v6516_v31 = vld [vmem:[#allocation9 + $0x1a0] sm:$0xff]  ;;  %v6520_v60 = vld [vmem:[#allocation9 + $0x1a8] sm:$0xff] }
 0x34f   :  { %2452 = vmatpush.msrb.mxu3 %v6474_v22  ;;  %2393 = vmatpush.msrb.mxu0 %v6476_v54  ;;  %v6502_v22 = vld [vmem:[#allocation9 + $0x1f8] sm:$0xff]  ;;  %v6504_v54 = vld [vmem:[#allocation9 + $0x1c0] sm:$0xff]  ;;  %9168 = vst [vmem:[#allocation34_spill] sm:$0xff] %v6516_v31 }
 0x350   :  { %2413 = vmatpush.msrb.mxu1 %v6480_v0  ;;  %2433 = vmatpush.msrb.mxu2 %v6482_v4  ;;  %9163 = vst [vmem:[#allocation29_spill] sm:$0xff] %v6502_v22  ;;  %v6508_v4 = vld [vmem:[#allocation9 + $0x1c8] sm:$0xff]  ;;  %v6514_v0 = vld [vmem:[#allocation9 + $0x1d8] sm:$0xff] }
 0x351   :  { %2453 = vmatpush.msrb.mxu3 %v6486_v11  ;;  %2394 = vmatmul.f32.vlgmr.msrb.gmra.mxu0 %v6342_v15  ;;  %9164 = vst [vmem:[#allocation30_spill] sm:$0xff] %v6504_v54  ;;  %v6510_v11 = vld [vmem:[#allocation9 + $0x1d0] sm:$0xff] }
 0x352   :  { %2414 = vmatmul.f32.vlgmr.msrb.gmra.mxu1 %v6342_v15  ;;  %2434 = vmatmul.f32.vlgmr.msrb.gmra.mxu2 %v6342_v15  ;;  %9165 = vst [vmem:[#allocation31_spill] sm:$0xff] %v6508_v4 }
 0x353   :  { %2454 = vmatmul.f32.vlgmr.msrb.gmra.mxu3 %v6342_v15  ;;  %2605 = vmatpush.msra.mxu0 %v6492_v16  ;;  %9166 = vst [vmem:[#allocation32_spill] sm:$0xff] %v6510_v11  ;;  %v6522_v15 = vld [vmem:[#allocation9 + $0x1b0] sm:$0xff]  ;;  %v6526_v16 = vld [vmem:[#allocation9 + $0x1b8] sm:$0xff] }
 0x354   :  { %2625 = vmatpush.msra.mxu1 %v6496_v8  ;;  %2645 = vmatpush.msra.mxu2 %v6498_v19  ;;  %9167 = vst [vmem:[#allocation33_spill] sm:$0xff] %v6514_v0  ;;  %v6528_v8 = vld [vmem:[#allocation9 + $0x180] sm:$0xff]  ;;  %v6532_v19 = vld [vmem:[#allocation9 + $0x188] sm:$0xff] }
 0x355   :  { %2665 = vmatpush.msra.mxu3 %v6502_v22  ;;  %2606 = vmatpush.msra.mxu0 %v6504_v54  ;;  %9169 = vst [vmem:[#allocation35_spill] sm:$0xff] %v6520_v60  ;;  %v6534_v22 = vld [vmem:[#allocation9 + $0x190] sm:$0xff]  ;;  %v6538_v54 = vld [vmem:[#allocation9 + $0x198] sm:$0xff] }
 0x356   :  { %9170 = vst [vmem:[#allocation36_spill] sm:$0xff] %v6522_v15  ;;  %2626 = vmatpush.msra.mxu1 %v6508_v4  ;;  %2646 = vmatpush.msra.mxu2 %v6510_v11  ;;  %v6540_v4 = vld [vmem:[#allocation9 + $0x160] sm:$0xff]  ;;  %v6544_v11 = vld [vmem:[#allocation9 + $0x168] sm:$0xff] }
 0x357   :  { %9171 = vst [vmem:[#allocation37_spill] sm:$0xff] %v6526_v16  ;;  %2666 = vmatpush.msra.mxu3 %v6514_v0  ;;  %2607 = vmatpush.msra.mxu0 %v6516_v31  ;;  %v6546_v0 = vld [vmem:[#allocation9 + $0x170] sm:$0xff]  ;;  %v6550_v31 = vld [vmem:[#allocation9 + $0x178] sm:$0xff] }
 0x358   :  { %9172 = vst [vmem:[#allocation38_spill] sm:$0xff] %v6528_v8  ;;  %2627 = vmatpush.msra.mxu1 %v6520_v60  ;;  %2647 = vmatpush.msra.mxu2 %v6522_v15  ;;  %v6552_v60 = vld [vmem:[#allocation9 + $0x140] sm:$0xff]  ;;  %v6556_v15 = vld [vmem:[#allocation9 + $0x148] sm:$0xff] }
 0x359   :  { %9173 = vst [vmem:[#allocation39_spill] sm:$0xff] %v6532_v19  ;;  %2667 = vmatpush.msra.mxu3 %v6526_v16  ;;  %2608 = vmatpush.msra.mxu0 %v6528_v8  ;;  %v6558_v16 = vld [vmem:[#allocation9 + $0x150] sm:$0xff]  ;;  %v6562_v8 = vld [vmem:[#allocation9 + $0x158] sm:$0xff] }
 0x35a   :  { %9174 = vst [vmem:[#allocation40_spill] sm:$0xff] %v6534_v22  ;;  %2628 = vmatpush.msra.mxu1 %v6532_v19  ;;  %2648 = vmatpush.msra.mxu2 %v6534_v22  ;;  %v6564_v19 = vld [vmem:[#allocation9 + $0x120] sm:$0xff]  ;;  %v6568_v22 = vld [vmem:[#allocation9 + $0x128] sm:$0xff] }
 0x35b   :  { %9175 = vst [vmem:[#allocation41_spill] sm:$0xff] %v6538_v54  ;;  %2668 = vmatpush.msra.mxu3 %v6538_v54  ;;  %2609 = vmatpush.msra.mxu0 %v6540_v4  ;;  %v6570_v54 = vld [vmem:[#allocation9 + $0x130] sm:$0xff] }
 0x35c   :  { %9176 = vst [vmem:[#allocation42_spill] sm:$0xff] %v6540_v4  ;;  %2629 = vmatpush.msra.mxu1 %v6544_v11  ;;  %2649 = vmatpush.msra.mxu2 %v6546_v0  ;;  %v6574_v4 = vld [vmem:[#allocation9 + $0x138] sm:$0xff] }
 0x35d   :  { %9177 = vst [vmem:[#allocation43_spill] sm:$0xff] %v6544_v11  ;;  %2669 = vmatpush.msra.mxu3 %v6550_v31  ;;  %2610 = vmatpush.msra.mxu0 %v6552_v60  ;;  %v6576_v11 = vld [vmem:[#allocation9 + $0x100] sm:$0xff] }
 0x35e   :  { %9178 = vst [vmem:[#allocation44_spill] sm:$0xff] %v6546_v0  ;;  %2630 = vmatpush.msra.mxu1 %v6556_v15  ;;  %2650 = vmatpush.msra.mxu2 %v6558_v16  ;;  %v6580_v0 = vld [vmem:[#allocation9 + $0x108] sm:$0xff] }
 0x35f   :  { %9179 = vst [vmem:[#allocation45_spill] sm:$0xff] %v6550_v31  ;;  %2670 = vmatpush.msra.mxu3 %v6562_v8  ;;  %2611 = vmatpush.msra.mxu0 %v6564_v19  ;;  %v6582_v31 = vld [vmem:[#allocation9 + $0x110] sm:$0xff] }
 0x360   :  { %9180 = vst [vmem:[#allocation46_spill] sm:$0xff] %v6552_v60  ;;  %2631 = vmatpush.msra.mxu1 %v6568_v22  ;;  %2651 = vmatpush.msra.mxu2 %v6570_v54  ;;  %v6586_v60 = vld [vmem:[#allocation9 + $0x118] sm:$0xff] }
 0x361   :  { %9181 = vst [vmem:[#allocation47_spill] sm:$0xff] %v6556_v15  ;;  %2671 = vmatpush.msra.mxu3 %v6574_v4  ;;  %2612 = vmatpush.msra.mxu0 %v6576_v11  ;;  %v6637_v15 = vld [vmem:[#allocation9 + $0x60] sm:$0xff] }
 0x362   :  { %9182 = vst [vmem:[#allocation48_spill] sm:$0xff] %v6558_v16  ;;  %2632 = vmatpush.msra.mxu1 %v6580_v0  ;;  %2652 = vmatpush.msra.mxu2 %v6582_v31  ;;  %v6597_v16 = vld [vmem:[#allocation9 + $0xf0] sm:$0xff] }
 0x363   :  { %9183 = vst [vmem:[#allocation49_spill] sm:$0xff] %v6562_v8  ;;  %2672 = vmatpush.msra.mxu3 %v6586_v60  ;;  %v6595_v8 = vld [vmem:[#allocation9 + $0xe8] sm:$0xff] }
 0x364   :  { %9184 = vst [vmem:[#allocation50_spill] sm:$0xff] %v6564_v19  ;;  %v6593_v19 = vld [vmem:[#allocation9 + $0xe0] sm:$0xff]  ;;  %2633 = vmatpush.msra.mxu1 %v6595_v8  ;;  %2653 = vmatpush.msra.mxu2 %v6597_v16 }
 0x365   :  { %9185 = vst [vmem:[#allocation51_spill] sm:$0xff] %v6568_v22  ;;  %2613 = vmatpush.msra.mxu0 %v6593_v19  ;;  %v6621_v22 = vld [vmem:[#allocation9 + $0xb8] sm:$0xff] }
 0x366   :  { %9186 = vst [vmem:[#allocation52_spill] sm:$0xff] %v6570_v54  ;;  %v6601_v54 = vld [vmem:[#allocation9 + $0xf8] sm:$0xff] }
 0x367   :  { %9187 = vst [vmem:[#allocation53_spill] sm:$0xff] %v6574_v4  ;;  %v6603_v4 = vld [vmem:[#allocation9 + $0xc0] sm:$0xff]  ;;  %2673 = vmatpush.msra.mxu3 %v6601_v54 }
 0x368   :  { %9188 = vst [vmem:[#allocation54_spill] sm:$0xff] %v6576_v11  ;;  %v6605_v11 = vld [vmem:[#allocation9 + $0xc8] sm:$0xff]  ;;  %2614 = vmatpush.msra.mxu0 %v6603_v4 }
 0x369   :  { %9189 = vst [vmem:[#allocation55_spill] sm:$0xff] %v6580_v0  ;;  %v6613_v0 = vld [vmem:[#allocation9 + $0xa0] sm:$0xff]  ;;  %2634 = vmatpush.msra.mxu1 %v6605_v11 }
 0x36a   :  { %9190 = vst [vmem:[#allocation56_spill] sm:$0xff] %v6582_v31  ;;  %v6611_v31 = vld [vmem:[#allocation9 + $0xd8] sm:$0xff]  ;;  %2615 = vmatpush.msra.mxu0 %v6613_v0 }
 0x36b   :  { %9191 = vst [vmem:[#allocation57_spill] sm:$0xff] %v6586_v60  ;;  %v6609_v60 = vld [vmem:[#allocation9 + $0xd0] sm:$0xff]  ;;  %2674 = vmatpush.msra.mxu3 %v6611_v31 }
 0x36c   :  { %9192 = vst [vmem:[#allocation58_spill] sm:$0xff] %v6593_v19  ;;  %v6619_v19 = vld [vmem:[#allocation9 + $0xb0] sm:$0xff]  ;;  %2654 = vmatpush.msra.mxu2 %v6609_v60 }
 0x36d   :  { %9193 = vst [vmem:[#allocation59_spill] sm:$0xff] %v6595_v8  ;;  %v6617_v8 = vld [vmem:[#allocation9 + $0xa8] sm:$0xff]  ;;  %2675 = vmatpush.msra.mxu3 %v6621_v22 }
 0x36e   :  { %9194 = vst [vmem:[#allocation60_spill] sm:$0xff] %v6597_v16  ;;  %v6627_v16 = vld [vmem:[#allocation9 + $0x88] sm:$0xff]  ;;  %2635 = vmatpush.msra.mxu1 %v6617_v8  ;;  %2655 = vmatpush.msra.mxu2 %v6619_v19 }
 0x36f   :  { %9195 = vst [vmem:[#allocation61_spill] sm:$0xff] %v6601_v54  ;;  %v6625_v54 = vld [vmem:[#allocation9 + $0x80] sm:$0xff] }
 0x370   :  { %9196 = vst [vmem:[#allocation62_spill] sm:$0xff] %v6603_v4  ;;  %v6631_v4 = vld [vmem:[#allocation9 + $0x90] sm:$0xff]  ;;  %2616 = vmatpush.msra.mxu0 %v6625_v54  ;;  %2636 = vmatpush.msra.mxu1 %v6627_v16 }
 0x371   :  { %9197 = vst [vmem:[#allocation63_spill] sm:$0xff] %v6605_v11  ;;  %v6633_v11 = vld [vmem:[#allocation9 + $0x98] sm:$0xff]  ;;  %2656 = vmatpush.msra.mxu2 %v6631_v4 }
 0x372   :  { %9198 = vst [vmem:[#allocation64_spill] sm:$0xff] %v6609_v60  ;;  %v6639_v60 = vld [vmem:[#allocation9 + $0x68] sm:$0xff]  ;;  %2676 = vmatpush.msra.mxu3 %v6633_v11  ;;  %2617 = vmatpush.msra.mxu0 %v6637_v15 }
 0x373   :  { %9199 = vst [vmem:[#allocation65_spill] sm:$0xff] %v6611_v31  ;;  %v6643_v31 = vld [vmem:[#allocation9 + $0x70] sm:$0xff]  ;;  %2637 = vmatpush.msra.mxu1 %v6639_v60 }
 0x374   :  { %9200 = vst [vmem:[#allocation66_spill] sm:$0xff] %v6613_v0  ;;  %v6645_v0 = vld [vmem:[#allocation9 + $0x78] sm:$0xff]  ;;  %2657 = vmatpush.msra.mxu2 %v6643_v31 }
 0x375   :  { %9201 = vst [vmem:[#allocation67_spill] sm:$0xff] %v6617_v8  ;;  %v6649_v8 = vld [vmem:[#allocation9 + $0x40] sm:$0xff]  ;;  %2677 = vmatpush.msra.mxu3 %v6645_v0 }
 0x376   :  { %9202 = vst [vmem:[#allocation68_spill] sm:$0xff] %v6619_v19  ;;  %v6651_v19 = vld [vmem:[#allocation9 + $0x48] sm:$0xff]  ;;  %2618 = vmatpush.msra.mxu0 %v6649_v8 }
 0x377   :  { %9203 = vst [vmem:[#allocation69_spill] sm:$0xff] %v6621_v22  ;;  %v6655_v22 = vld [vmem:[#allocation9 + $0x50] sm:$0xff]  ;;  %2638 = vmatpush.msra.mxu1 %v6651_v19 }
 0x378   :  { %9204 = vst [vmem:[#allocation70_spill] sm:$0xff] %v6625_v54  ;;  %v6657_v54 = vld [vmem:[#allocation9 + $0x58] sm:$0xff]  ;;  %2658 = vmatpush.msra.mxu2 %v6655_v22 }
 0x379   :  { %9205 = vst [vmem:[#allocation71_spill] sm:$0xff] %v6627_v16  ;;  %v6661_v16 = vld [vmem:[#allocation9 + $0x20] sm:$0xff]  ;;  %2678 = vmatpush.msra.mxu3 %v6657_v54 }
 0x37a   :  { %9206 = vst [vmem:[#allocation72_spill] sm:$0xff] %v6631_v4  ;;  %v6663_v4 = vld [vmem:[#allocation9 + $0x28] sm:$0xff]  ;;  %2619 = vmatpush.msra.mxu0 %v6661_v16 }
 0x37b   :  { %9207 = vst [vmem:[#allocation73_spill] sm:$0xff] %v6633_v11  ;;  %v6667_v11 = vld [vmem:[#allocation9 + $0x30] sm:$0xff]  ;;  %2639 = vmatpush.msra.mxu1 %v6663_v4 }
 0x37c   :  { %9208 = vst [vmem:[#allocation74_spill] sm:$0xff] %v6637_v15  ;;  %v6669_v15 = vld [vmem:[#allocation9 + $0x38] sm:$0xff]  ;;  %2659 = vmatpush.msra.mxu2 %v6667_v11 }
 0x37d   :  { %9209 = vst [vmem:[#allocation75_spill] sm:$0xff] %v6639_v60  ;;  %v6673_v60 = vld [vmem:[#allocation9] sm:$0xff]  ;;  %2679 = vmatpush.msra.mxu3 %v6669_v15 }
 0x37e   :  { %9210 = vst [vmem:[#allocation76_spill] sm:$0xff] %v6643_v31  ;;  %v6675_v31 = vld [vmem:[#allocation9 + $0x8] sm:$0xff]  ;;  %2620 = vmatpush.msra.mxu0 %v6673_v60 }
 0x37f   :  { %9211 = vst [vmem:[#allocation77_spill] sm:$0xff] %v6645_v0  ;;  %v6679_v0 = vld [vmem:[#allocation9 + $0x10] sm:$0xff]  ;;  %2640 = vmatpush.msra.mxu1 %v6675_v31 }
 0x380   :  { %9212 = vst [vmem:[#allocation78_spill] sm:$0xff] %v6649_v8  ;;  %v6681_v8 = vld [vmem:[#allocation9 + $0x18] sm:$0xff]  ;;  %2660 = vmatpush.msra.mxu2 %v6679_v0 }
 0x381   :  { %9213 = vst [vmem:[#allocation79_spill] sm:$0xff] %v6651_v19  ;;  %v6691_v19 = vld [vmem:[#allocation8 + $0x1f0] sm:$0xff]  ;;  %2680 = vmatpush.msra.mxu3 %v6681_v8 }
 0x382   :  { %9214 = vst [vmem:[#allocation80_spill] sm:$0xff] %v6655_v22  ;;  %v6689_v22 = vld [vmem:[#allocation8 + $0x1e8] sm:$0xff]  ;;  %2725 = vmatpush.msrb.mxu2 %v6691_v19 }
 0x383   :  { %9215 = vst [vmem:[#allocation81_spill] sm:$0xff] %v6657_v54  ;;  %v6687_v54 = vld [vmem:[#allocation8 + $0x1e0] sm:$0xff]  ;;  %2705 = vmatpush.msrb.mxu1 %v6689_v22 }
 0x384   :  { %9216 = vst [vmem:[#allocation84_spill] sm:$0xff] %v6661_v16  ;;  %2685 = vmatpush.msrb.mxu0 %v6687_v54  ;;  %v6777_v16 = vld [vmem:[#allocation3] ss:$0 sm:$0xff] }
 0x385   :  { %9217 = vst [vmem:[#allocation85_spill] sm:$0xff] %v6663_v4  ;;  %v6695_v4 = vld [vmem:[#allocation8 + $0x1f8] sm:$0xff] }
 0x386   :  { %9218 = vst [vmem:[#allocation86_spill] sm:$0xff] %v6667_v11  ;;  %2745 = vmatpush.msrb.mxu3 %v6695_v4  ;;  %v6707_v11 = vld [vmem:[#allocation8 + $0x1d8] sm:$0xff] }
 0x387   :  { %9219 = vst [vmem:[#allocation87_spill] sm:$0xff] %v6669_v15  ;;  %v6699_v15 = vld [vmem:[#allocation8 + $0x1c0] sm:$0xff] }
 0x388   :  { %9220 = vst [vmem:[#allocation88_spill] sm:$0xff] %v6673_v60  ;;  %v6701_v60 = vld [vmem:[#allocation8 + $0x1c8] sm:$0xff]  ;;  %2686 = vmatpush.msrb.mxu0 %v6699_v15  ;;  %2746 = vmatpush.msrb.mxu3 %v6707_v11 }
 0x389   :  { %9221 = vst [vmem:[#allocation89_spill] sm:$0xff] %v6675_v31  ;;  %v6703_v31 = vld [vmem:[#allocation8 + $0x1d0] sm:$0xff]  ;;  %2706 = vmatpush.msrb.mxu1 %v6701_v60 }
 0x38a   :  { %9222 = vst [vmem:[#allocation90_spill] sm:$0xff] %v6679_v0  ;;  %2726 = vmatpush.msrb.mxu2 %v6703_v31  ;;  %v6719_v0 = vld [vmem:[#allocation8 + $0x1b8] sm:$0xff] }
 0x38b   :  { %9223 = vst [vmem:[#allocation91_spill] sm:$0xff] %v6681_v8  ;;  %v6711_v8 = vld [vmem:[#allocation8 + $0x1a0] sm:$0xff]  ;;  %2747 = vmatpush.msrb.mxu3 %v6719_v0 }
 0x38c   :  { %9224 = vst [vmem:[#allocation92_spill] sm:$0xff] %v6687_v54  ;;  %v6713_v54 = vld [vmem:[#allocation8 + $0x1a8] sm:$0xff]  ;;  %2687 = vmatpush.msrb.mxu0 %v6711_v8 }
 0x38d   :  { %9225 = vst [vmem:[#allocation93_spill] sm:$0xff] %v6689_v22  ;;  %v6715_v22 = vld [vmem:[#allocation8 + $0x1b0] sm:$0xff]  ;;  %2707 = vmatpush.msrb.mxu1 %v6713_v54 }
 0x38e   :  { %9226 = vst [vmem:[#allocation94_spill] sm:$0xff] %v6691_v19  ;;  %2727 = vmatpush.msrb.mxu2 %v6715_v22  ;;  %v6731_v19 = vld [vmem:[#allocation8 + $0x198] sm:$0xff] }
 0x38f   :  { %9227 = vst [vmem:[#allocation95_spill] sm:$0xff] %v6695_v4  ;;  %v6723_v4 = vld [vmem:[#allocation8 + $0x180] sm:$0xff]  ;;  %2748 = vmatpush.msrb.mxu3 %v6731_v19 }
 0x390   :  { %9228 = vst [vmem:[#allocation96_spill] sm:$0xff] %v6699_v15  ;;  %v6725_v15 = vld [vmem:[#allocation8 + $0x188] sm:$0xff]  ;;  %2688 = vmatpush.msrb.mxu0 %v6723_v4 }
 0x391   :  { %9229 = vst [vmem:[#allocation97_spill] sm:$0xff] %v6701_v60  ;;  %v6727_v60 = vld [vmem:[#allocation8 + $0x190] sm:$0xff]  ;;  %2708 = vmatpush.msrb.mxu1 %v6725_v15 }
 0x392   :  { %9230 = vst [vmem:[#allocation100_spill] sm:$0xff] %v6703_v31  ;;  %2728 = vmatpush.msrb.mxu2 %v6727_v60  ;;  %v6743_v31 = vld [vmem:[#allocation8 + $0x178] sm:$0xff] }
 0x393   :  { %9231 = vst [vmem:[#allocation101_spill] sm:$0xff] %v6707_v11  ;;  %v6735_v11 = vld [vmem:[#allocation8 + $0x160] sm:$0xff]  ;;  %2749 = vmatpush.msrb.mxu3 %v6743_v31 }
 0x394   :  { %9232 = vst [vmem:[#allocation102_spill] sm:$0xff] %v6711_v8  ;;  %v6737_v8 = vld [vmem:[#allocation8 + $0x168] sm:$0xff]  ;;  %2689 = vmatpush.msrb.mxu0 %v6735_v11 }
 0x395   :  { %9233 = vst [vmem:[#allocation105_spill] sm:$0xff] %v6713_v54  ;;  %v6739_v54 = vld [vmem:[#allocation8 + $0x170] sm:$0xff]  ;;  %2709 = vmatpush.msrb.mxu1 %v6737_v8 }
 0x396   :  { %9234 = vst [vmem:[#allocation106_spill] sm:$0xff] %v6715_v22  ;;  %2729 = vmatpush.msrb.mxu2 %v6739_v54  ;;  %v6755_v22 = vld [vmem:[#allocation8 + $0x158] sm:$0xff] }
 0x397   :  { %9235 = vst [vmem:[#allocation107_spill] sm:$0xff] %v6719_v0  ;;  %v6747_v0 = vld [vmem:[#allocation8 + $0x140] sm:$0xff]  ;;  %2750 = vmatpush.msrb.mxu3 %v6755_v22 }
 0x398   :  { %9236 = vst [vmem:[#allocation108_spill] sm:$0xff] %v6723_v4  ;;  %v6749_v4 = vld [vmem:[#allocation8 + $0x148] sm:$0xff]  ;;  %2690 = vmatpush.msrb.mxu0 %v6747_v0 }
 0x399   :  { %9237 = vst [vmem:[#allocation109_spill] sm:$0xff] %v6725_v15  ;;  %v6751_v15 = vld [vmem:[#allocation8 + $0x150] sm:$0xff]  ;;  %2710 = vmatpush.msrb.mxu1 %v6749_v4 }
 0x39a   :  { %9238 = vst [vmem:[#allocation110_spill] sm:$0xff] %v6727_v60  ;;  %2730 = vmatpush.msrb.mxu2 %v6751_v15  ;;  %v6767_v60 = vld [vmem:[#allocation8 + $0x138] sm:$0xff] }
 0x39b   :  { %9239 = vst [vmem:[#allocation111_spill] sm:$0xff] %v6731_v19  ;;  %v6759_v19 = vld [vmem:[#allocation8 + $0x120] sm:$0xff]  ;;  %2751 = vmatpush.msrb.mxu3 %v6767_v60 }
 0x39c   :  { %9240 = vst [vmem:[#allocation112_spill] sm:$0xff] %v6735_v11  ;;  %v6761_v11 = vld [vmem:[#allocation8 + $0x128] sm:$0xff]  ;;  %2691 = vmatpush.msrb.mxu0 %v6759_v19 }
 0x39d   :  { %9241 = vst [vmem:[#allocation113_spill] sm:$0xff] %v6737_v8  ;;  %v6763_v8 = vld [vmem:[#allocation8 + $0x130] sm:$0xff]  ;;  %2711 = vmatpush.msrb.mxu1 %v6761_v11 }
 0x39e   :  { %9242 = vst [vmem:[#allocation114_spill] sm:$0xff] %v6739_v54  ;;  %2731 = vmatpush.msrb.mxu2 %v6763_v8 }
 0x39f   :  { %9243 = vst [vmem:[#allocation115_spill] sm:$0xff] %v6743_v31  ;;  %v6775_v31 = vld [vmem:[#allocation8 + $0x110] sm:$0xff] }
 0x3a0   :  { %9244 = vst [vmem:[#allocation116_spill] sm:$0xff] %v6747_v0  ;;  %v6771_v0 = vld [vmem:[#allocation8 + $0x100] sm:$0xff]  ;;  %2732 = vmatpush.msrb.mxu2 %v6775_v31 }
 0x3a1   :  { %9245 = vst [vmem:[#allocation117_spill] sm:$0xff] %v6749_v4  ;;  %v6773_v4 = vld [vmem:[#allocation8 + $0x108] sm:$0xff]  ;;  %2692 = vmatpush.msrb.mxu0 %v6771_v0 }
 0x3a2   :  { %9246 = vst [vmem:[#allocation120_spill] sm:$0xff] %v6751_v15  ;;  %2712 = vmatpush.msrb.mxu1 %v6773_v4  ;;  %v6790_v15 = vld [vmem:[#allocation8 + $0xf0] sm:$0xff] }
 0x3a3   :  { %9247 = vst [vmem:[#allocation121_spill] sm:$0xff] %v6755_v22  ;;  %v6782_v22 = vld [vmem:[#allocation8 + $0x118] sm:$0xff]  ;;  %2733 = vmatpush.msrb.mxu2 %v6790_v15 }
 0x3a4   :  { %9248 = vst [vmem:[#allocation122_spill] sm:$0xff] %v6759_v19  ;;  %v6788_v19 = vld [vmem:[#allocation8 + $0xe8] sm:$0xff]  ;;  %2752 = vmatpush.msrb.mxu3 %v6782_v22 }
 0x3a5   :  { %9249 = vst [vmem:[#allocation125_spill] sm:$0xff] %v6761_v11  ;;  %v6786_v11 = vld [vmem:[#allocation8 + $0xe0] sm:$0xff]  ;;  %2713 = vmatpush.msrb.mxu1 %v6788_v19 }
 0x3a6   :  { %9250 = vst [vmem:[#allocation127_spill] sm:$0xff] %v6763_v8  ;;  %v1828_v54 = vpop.xlane.xlu1 %1827  ;;  %2693 = vmatpush.msrb.mxu0 %v6786_v11 }
 0x3a7   :  { %9251 = vst [vmem:[#allocation128_spill] sm:$0xff] %v6767_v60  ;;  %v1829_v18 = vadd.f32 %v6777_v16, %v1828_v54  ;;  %v6798_v54 = vld [vmem:[#allocation8 + $0xf8] sm:$0xff]  ;;  %v6806_v60 = vld [vmem:[#allocation8 + $0xd0] sm:$0xff] }
 0x3a8   :  { %9252 = vst [vmem:[#allocation129_spill] sm:$0xff] %v6771_v0  ;;  %v6804_v0 = vld [vmem:[#allocation8 + $0xc8] sm:$0xff]  ;;  %2753 = vmatpush.msrb.mxu3 %v6798_v54  ;;  %2734 = vmatpush.msrb.mxu2 %v6806_v60 }
 0x3a9   :  { %9253 = vst [vmem:[#allocation130_spill] sm:$0xff] %v6773_v4  ;;  %v6802_v4 = vld [vmem:[#allocation8 + $0xc0] sm:$0xff]  ;;  %2714 = vmatpush.msrb.mxu1 %v6804_v0 }
 0x3aa   :  { %9254 = vst [vmem:[#allocation131_spill] sm:$0xff] %v6775_v31  ;;  %v2163_v8 = vpop.f32.mrf.mxu1  ;;  %2694 = vmatpush.msrb.mxu0 %v6802_v4  ;;  %v6822_v31 = vld [vmem:[#allocation8 + $0xb8] sm:$0xff] }
 0x3ab   :  { %9255 = vst [vmem:[#allocation132_spill] sm:$0xff] %v6777_v16  ;;  %v2143_v16 = vpop.f32.mrf.mxu0 }
 0x3ac   :  { %9256 = vst [vmem:[#allocation133_spill] sm:$0xff] %v6782_v22  ;;  %v6818_v22 = vld [vmem:[#allocation8 + $0xb0] sm:$0xff] }
 0x3ad   :  { %9257 = vst [vmem:[#allocation134_spill] sm:$0xff] %v6786_v11  ;;  %v6814_v11 = vld [vmem:[#allocation8 + $0xa0] sm:$0xff]  ;;  %2735 = vmatpush.msrb.mxu2 %v6818_v22 }
 0x3ae   :  { %9258 = vst [vmem:[#allocation135_spill] sm:$0xff] %v6788_v19  ;;  %v6816_v19 = vld [vmem:[#allocation8 + $0xa8] sm:$0xff]  ;;  %2695 = vmatpush.msrb.mxu0 %v6814_v11 }
 0x3af   :  { %9259 = vst [vmem:[#allocation138_spill] sm:$0xff] %v6790_v15  ;;  %2715 = vmatpush.msrb.mxu1 %v6816_v19  ;;  %v6834_v15 = vld [vmem:[#allocation8 + $0x98] sm:$0xff] }
 0x3b0   :  { %1830 = vst.msk [vmem:[%s7972_s9 + $0x10] sm:$0xff] %vm871_vm0, %v1829_v18  ;;  %v6810_v18 = vld [vmem:[#allocation8 + $0xd8] sm:$0xff] }
 0x3b1   :  { %9260 = vst [vmem:[#allocation139_spill] sm:$0xff] %v6798_v54  ;;  %2754 = vmatpush.msrb.mxu3 %v6810_v18  ;;  %v6826_v54 = vld [vmem:[#allocation8 + $0x80] sm:$0xff] }
 0x3b2   :  { %9261 = vst [vmem:[#allocation140_spill] sm:$0xff] %v6802_v4  ;;  %v6828_v4 = vld [vmem:[#allocation8 + $0x88] sm:$0xff]  ;;  %2696 = vmatpush.msrb.mxu0 %v6826_v54 }
 0x3b3   :  { %9262 = vst [vmem:[#allocation143_spill] sm:$0xff] %v6804_v0  ;;  %v6830_v0 = vld [vmem:[#allocation8 + $0x90] sm:$0xff]  ;;  %2755 = vmatpush.msrb.mxu3 %v6822_v31  ;;  %2716 = vmatpush.msrb.mxu1 %v6828_v4 }
 0x3b4   :  { %9263 = vst [vmem:[#allocation144_spill] sm:$0xff] %v6806_v60  ;;  %v2183_v60 = vpop.f32.mrf.mxu2  ;;  %2736 = vmatpush.msrb.mxu2 %v6830_v0 }
 0x3b5   :  { %9264 = vst [vmem:[#allocation145_spill] sm:$0xff] %v6810_v18  ;;  %v6838_v18 = vld [vmem:[#allocation8 + $0x60] sm:$0xff]  ;;  %2756 = vmatpush.msrb.mxu3 %v6834_v15  ;;  %v2243_v52 = vpop.f32.mrf.mxu1 }
 0x3b6   :  { %9265 = vst [vmem:[#allocation146_spill] sm:$0xff] %v6814_v11  ;;  %v6840_v11 = vld [vmem:[#allocation8 + $0x68] sm:$0xff]  ;;  %2697 = vmatpush.msrb.mxu0 %v6838_v18 }
 0x3b7   :  { %9266 = vst [vmem:[#allocation147_spill] sm:$0xff] %v6816_v19  ;;  %v6842_v19 = vld [vmem:[#allocation8 + $0x70] sm:$0xff]  ;;  %2717 = vmatpush.msrb.mxu1 %v6840_v11 }
 0x3b8   :  { %9267 = vst [vmem:[#allocation148_spill] sm:$0xff] %v6818_v22  ;;  %v6846_v22 = vld [vmem:[#allocation8 + $0x78] sm:$0xff]  ;;  %2737 = vmatpush.msrb.mxu2 %v6842_v19 }
 0x3b9   :  { %9268 = vst [vmem:[#allocation149_spill] sm:$0xff] %v6822_v31  ;;  %v2203_v31 = vpop.f32.mrf.mxu3  ;;  %2757 = vmatpush.msrb.mxu3 %v6846_v22 }
 0x3ba   :  { %9269 = vst [vmem:[#allocation150_spill] sm:$0xff] %v6826_v54  ;;  %v6850_v54 = vld [vmem:[#allocation8 + $0x40] sm:$0xff]  ;;  %2738 = vmatpush.msrb.mxu2 %v6854_v7 }
 0x3bb   :  { %9270 = vst [vmem:[#allocation151_spill] sm:$0xff] %v6828_v4  ;;  %v6852_v4 = vld [vmem:[#allocation8 + $0x48] sm:$0xff]  ;;  %2698 = vmatpush.msrb.mxu0 %v6850_v54 }
 0x3bc   :  { %9271 = vst [vmem:[#allocation152_spill] sm:$0xff] %v6830_v0  ;;  %v6858_v0 = vld [vmem:[#allocation8 + $0x58] sm:$0xff]  ;;  %2718 = vmatpush.msrb.mxu1 %v6852_v4  ;;  %2739 = vmatpush.msrb.mxu2 %v6866_v58 }
 0x3bd   :  { %9272 = vst [vmem:[#allocation153_spill] sm:$0xff] %v6834_v15  ;;  %v2223_v15 = vpop.f32.mrf.mxu0  ;;  %2758 = vmatpush.msrb.mxu3 %v6858_v0 }
 0x3be   :  { %9273 = vst [vmem:[#allocation154_spill] sm:$0xff] %v6838_v18  ;;  %v6862_v18 = vld [vmem:[#allocation8 + $0x20] sm:$0xff]  ;;  %v2224_v57 = vadd.f32 %v2223_v15, %v2143_v16  ;;  %v6883_v15 = vld [vmem:[#allocation8 + $0x18] sm:$0xff]  ;;  %2740 = vmatpush.msrb.mxu2 %v6878_v51 }
 0x3bf   :  { %9274 = vst [vmem:[#allocation155_spill] sm:$0xff] %v6840_v11  ;;  %v6864_v11 = vld [vmem:[#allocation8 + $0x28] sm:$0xff]  ;;  %2699 = vmatpush.msrb.mxu0 %v6862_v18 }
 0x3c0   :  { %9275 = vst [vmem:[#allocation82_spill] sm:$0xff] %v6842_v19  ;;  %v2244_v19 = vadd.f32 %v2243_v52, %v2163_v8  ;;  %2719 = vmatpush.msrb.mxu1 %v6864_v11  ;;  %v2286_v16 = vadd.f32 %v2224_v57, %v9140_v55  ;;  %v2263_v8 = vpop.f32.mrf.mxu2 }
 0x3c1   :  { %9276 = vst [vmem:[#allocation83_spill] sm:$0xff] %v6846_v22  ;;  %v6870_v22 = vld [vmem:[#allocation8 + $0x38] sm:$0xff]  ;;  %v2264_v57 = vadd.f32 %v2263_v8, %v2183_v60  ;;  %v2283_v55 = vpop.f32.mrf.mxu3 }
 0x3c2   :  { %9277 = vst [vmem:[#allocation98_spill] sm:$0xff] %v6850_v54  ;;  %v6876_v54 = vld [vmem:[#allocation8 + $0x8] sm:$0xff]  ;;  %2759 = vmatpush.msrb.mxu3 %v6870_v22  ;;  %v2287_v52 = vadd.f32 %v2244_v19, %v9141_v56  ;;  %4312 = vtanh.f32 %v2286_v16  ;;  %v2284_v58 = vadd.f32 %v2283_v55, %v2203_v31  ;;  %v9288_v31 = vld [vmem:[#allocation141_spill] sm:$0xff] }
 0x3c3   :  { %9278 = vst [vmem:[#allocation99_spill] sm:$0xff] %v6852_v4  ;;  %v6874_v4 = vld [vmem:[#allocation8] sm:$0xff]  ;;  %2720 = vmatpush.msrb.mxu1 %v6876_v54 }
 0x3c4   :  { %9279 = vst [vmem:[#allocation160_spill] sm:$0xff] %v6858_v0  ;;  %2700 = vmatpush.msrb.mxu0 %v6874_v4  ;;  %2760 = vmatpush.msrb.mxu3 %v6883_v15  ;;  %4314 = vtanh.f32 %v2287_v52 }
 0x3c5   :  { %9280 = vst [vmem:[#allocation161_spill] sm:$0xff] %v6862_v18  ;;  %v2289_v18 = vadd.f32 %v2284_v58, %v5465_v45  ;;  %v209_v58 = vadd.f32 %v9288_v31, %v5269_v24 }
 0x3c6   :  { %9281 = vst [vmem:[#allocation162_spill] sm:$0xff] %v6864_v11 }
 0x3c7   :  { %9283 = vst [vmem:[#allocation164_spill] sm:$0xff] %v6870_v22  ;;  %v2288_v22 = vadd.f32 %v2264_v57, %v5461_v41 }
 0x3c8   :  { %9284 = vst [vmem:[#allocation165_spill] sm:$0xff] %v6874_v4  ;;  %v4313_v11 = vpop.eup %4312 }
 0x3c9   :  { %9285 = vst [vmem:[#allocation179_spill] sm:$0xff] %v6876_v54  ;;  %4316 = vtanh.f32 %v2288_v22  ;;  %v2294_v56 = vmul.f32 0.5, %v4313_v11  ;;  %v9289_v22 = vld [vmem:[#allocation142_spill] sm:$0xff] }
 0x3ca   :  { %9287 = vst [vmem:[#allocation181_spill] sm:$0xff] %v6883_v15  ;;  %v4315_v19 = vpop.eup %4314  ;;  %4318 = vtanh.f32 %v2289_v18  ;;  %v250_v11 = vadd.f32 %v9289_v22, %v5271_v25  ;;  %v6912_v22 = vld [vmem:[#allocation6 + $0x1c0] sm:$0xff] }
 0x3cb   :  { %v2296_v4 = vmul.f32 0.5, %v4315_v19  ;;  %v2295_v16 = vadd.f32 0.5, %v2294_v56 }
 0x3cd   :  { %v2297_v54 = vadd.f32 0.5, %v2296_v4 }
 0x3ce   :  { %v2395_v8 = vpop.f32.mrf.mxu0 }
 0x3cf   :  { %v4317_v51 = vpop.eup %4316  ;;  %v2300_v15 = vmul.f32 %v2297_v54, %v6312_v46  ;;  %v2458_v4 = vadd.f32 %v2395_v8, %v209_v58  ;;  %v2415_v18 = vpop.f32.mrf.mxu1  ;;  %v6902_v54 = vld [vmem:[#allocation6 + $0x1e8] sm:$0xff] }
 0x3d0   :  { %v2301_v52 = vmul.f32 %v4317_v51, %v2295_v16  ;;  %v4319_v0 = vpop.eup %4318  ;;  %v2459_v57 = vadd.f32 %v2415_v18, %v250_v11  ;;  %v6900_v51 = vld [vmem:[#allocation6 + $0x1e0] sm:$0xff]  ;;  %9290 = vst [vmem:[#allocation182_spill] sm:$0xff] %v6902_v54  ;;  %v6906_v16 = vld [vmem:[#allocation6 + $0x1f0] sm:$0xff]  ;;  %v6914_v11 = vld [vmem:[#allocation6 + $0x1c8] sm:$0xff] }
 0x3d1   :  { %v2298_v55 = vmul.f32 0.5, %v4319_v0  ;;  %v9291_v0 = vld [vmem:[#allocation156_spill] sm:$0xff] }
 0x3d2   :  { %v6893_v60 = vadd.f32 %v2301_v52, %v2300_v15  ;;  %v291_v15 = vadd.f32 %v9291_v0, %v5295_v35  ;;  %v6908_v52 = vld [vmem:[#allocation6 + $0x1f8] sm:$0xff]  ;;  %v6918_v18 = vld [vmem:[#allocation6 + $0x1d0] sm:$0xff]  ;;  %v6923_v0 = vld [vmem:[#allocation6 + $0x1a0] sm:$0xff] }
 0x3d3   :  { %v2299_v56 = vadd.f32 0.5, %v2298_v55  ;;  %v9292_v55 = vld [vmem:[#allocation157_spill] sm:$0xff] }
 0x3d4   :  { %4320 = vtanh.f32 %v6893_v60  ;;  %v332_v31 = vadd.f32 %v9292_v55, %v5299_v36 }
 0x3d5   :  { %4322 = vtanh.f32 %v2458_v4  ;;  %v2435_v58 = vpop.f32.mrf.mxu2 }
 0x3d6   :  { %4324 = vtanh.f32 %v2459_v57  ;;  %v2460_v8 = vadd.f32 %v2435_v58, %v291_v15  ;;  %v2455_v4 = vpop.f32.mrf.mxu3  ;;  %v6927_v15 = vld [vmem:[#allocation6 + $0x1a8] sm:$0xff]  ;;  %v6929_v58 = vld [vmem:[#allocation6 + $0x1b0] sm:$0xff] }
 0x3d8   :  { %4326 = vtanh.f32 %v2460_v8  ;;  %v6938_v8 = vld [vmem:[#allocation6 + $0x190] sm:$0xff] }
 0x3da   :  { %v4321_v19 = vpop.eup %4320 }
 0x3db   :  { %v2304_v46 = vmul.f32 %v4321_v19, %v2299_v56  ;;  %v4323_v57 = vpop.eup %4322  ;;  %v2461_v19 = vadd.f32 %v2455_v4, %v332_v31  ;;  %v6936_v31 = vld [vmem:[#allocation6 + $0x188] sm:$0xff] }
 0x3dc   :  { %v4325_v55 = vpop.eup %4324 }
 0x3dd   :  { %2621 = vmatmul.f32.vlgmr.msra.gmra.mxu0 %v2304_v46  ;;  %2641 = vmatmul.f32.vlgmr.msra.gmra.mxu1 %v2304_v46  ;;  %v2305_v56 = vmul.f32 %v6326_v30, %v2304_v46  ;;  %v2468_v30 = vmul.f32 0.5, %v4325_v55  ;;  %4328 = vtanh.f32 %v2461_v19  ;;  %v6950_v19 = vld [vmem:[#allocation6 + $0x150] sm:$0xff] }
 0x3de   :  { %2661 = vmatmul.f32.vlgmr.msra.gmra.mxu2 %v2304_v46  ;;  %2681 = vmatmul.f32.vlgmr.msra.gmra.mxu3 %v2304_v46  ;;  %v6933_v46 = vld [vmem:[#allocation6 + $0x180] sm:$0xff] }
 0x3df   :  { %2857 = vmatpush.msra.mxu0 %v6900_v51  ;;  %2877 = vmatpush.msra.mxu1 %v6902_v54  ;;  %v2466_v54 = vmul.f32 0.5, %v4323_v57  ;;  %v2469_v4 = vadd.f32 0.5, %v2468_v30 }
 0x3e0   :  { %2897 = vmatpush.msra.mxu2 %v6906_v16  ;;  %2917 = vmatpush.msra.mxu3 %v6908_v52 }
 0x3e1   :  { %2858 = vmatpush.msra.mxu0 %v6912_v22  ;;  %2878 = vmatpush.msra.mxu1 %v6914_v11  ;;  %v2467_v57 = vadd.f32 0.5, %v2466_v54  ;;  %v2472_v55 = vmul.f32 %v2469_v4, %v6316_v49  ;;  %v9324_v4 = vld [vmem:[#allocation44_spill] sm:$0xff] }
 0x3e2   :  { %2898 = vmatpush.msra.mxu2 %v6918_v18  ;;  %2918 = vmatpush.msra.mxu3 %v6321_v12  ;;  %v6944_v12 = vld [vmem:[#allocation6 + $0x170] sm:$0xff] }
 0x3e3   :  { %2306 = vadd.xlane.f32.xlu1 %v2305_v56  ;;  %2859 = vmatpush.msra.mxu0 %v6923_v0  ;;  %v4327_v56 = vpop.eup %4326 }
 0x3e4   :  { %2879 = vmatpush.msra.mxu1 %v6927_v15  ;;  %2899 = vmatpush.msra.mxu2 %v6929_v58  ;;  %v2473_v30 = vmul.f32 %v4327_v56, %v2467_v57  ;;  %v9325_v57 = vld [vmem:[#allocation45_spill] sm:$0xff]  ;;  %v9326_v56 = vld [vmem:[#allocation46_spill] sm:$0xff] }
 0x3e5   :  { %2919 = vmatpush.msra.mxu3 %v6335_v6  ;;  %2860 = vmatpush.msra.mxu0 %v6933_v46  ;;  %v4329_v6 = vpop.eup %4328 }
 0x3e6   :  { %2880 = vmatpush.msra.mxu1 %v6936_v31  ;;  %2900 = vmatpush.msra.mxu2 %v6938_v8  ;;  %v6957_v54 = vadd.f32 %v2473_v30, %v2472_v55  ;;  %v2470_v49 = vmul.f32 0.5, %v4329_v6  ;;  %v9327_v55 = vld [vmem:[#allocation47_spill] sm:$0xff]  ;;  %v9328_v30 = vld [vmem:[#allocation48_spill] sm:$0xff]  ;;  %v9329_v6 = vld [vmem:[#allocation49_spill] sm:$0xff] }
 0x3e7   :  { %2920 = vmatpush.msra.mxu3 %v6340_v29  ;;  %2861 = vmatpush.msra.mxu0 %v6348_v1 }
 0x3e8   :  { %2881 = vmatpush.msra.mxu1 %v6352_v13  ;;  %2901 = vmatpush.msra.mxu2 %v6944_v12  ;;  %4330 = vtanh.f32 %v6957_v54  ;;  %v2471_v29 = vadd.f32 0.5, %v2470_v49  ;;  %v9330_v49 = vld [vmem:[#allocation50_spill] sm:$0xff] }
 0x3e9   :  { %2921 = vmatpush.msra.mxu3 %v6356_v63  ;;  %2862 = vmatpush.msra.mxu0 %v6358_v21  ;;  %v9293_v63 = vld [vmem:[#allocation104_spill] sm:$0xff]  ;;  %v9294_v21 = vld [vmem:[#allocation118_spill] sm:$0xff] }
 0x3ea   :  { %2882 = vmatpush.msra.mxu1 %v6362_v5  ;;  %2902 = vmatpush.msra.mxu2 %v6950_v19  ;;  %v9295_v5 = vld [vmem:[#allocation119_spill] sm:$0xff] }
 0x3eb   :  { %2922 = vmatpush.msra.mxu3 %v6366_v61  ;;  %2863 = vmatpush.msra.mxu0 %v6368_v37  ;;  %v9296_v61 = vld [vmem:[#allocation16_spill] sm:$0xff]  ;;  %v9297_v37 = vld [vmem:[#allocation17_spill] sm:$0xff] }
 0x3ec   :  { %2883 = vmatpush.msra.mxu1 %v6372_v28  ;;  %2903 = vmatpush.msra.mxu2 %v6374_v3  ;;  %v9298_v28 = vld [vmem:[#allocation18_spill] sm:$0xff]  ;;  %v9299_v3 = vld [vmem:[#allocation19_spill] sm:$0xff] }
 0x3ed   :  { %2923 = vmatpush.msra.mxu3 %v6378_v23  ;;  %2864 = vmatpush.msra.mxu0 %v6380_v53  ;;  %v9300_v23 = vld [vmem:[#allocation20_spill] sm:$0xff]  ;;  %v9301_v53 = vld [vmem:[#allocation21_spill] sm:$0xff] }
 0x3ee   :  { %2884 = vmatpush.msra.mxu1 %v6384_v59  ;;  %2904 = vmatpush.msra.mxu2 %v6386_v10  ;;  %v4331_v1 = vpop.eup %4330  ;;  %v9302_v59 = vld [vmem:[#allocation22_spill] sm:$0xff]  ;;  %v9303_v10 = vld [vmem:[#allocation23_spill] sm:$0xff] }
 0x3ef   :  { %2924 = vmatpush.msra.mxu3 %v6390_v14  ;;  %2865 = vmatpush.msra.mxu0 %v6392_v27  ;;  %v2476_v13 = vmul.f32 %v4331_v1, %v2471_v29  ;;  %v9304_v14 = vld [vmem:[#allocation24_spill] sm:$0xff]  ;;  %v9305_v27 = vld [vmem:[#allocation25_spill] sm:$0xff]  ;;  %v9331_v29 = vld [vmem:[#allocation51_spill] sm:$0xff] }
 0x3f0   :  { %2885 = vmatpush.msra.mxu1 %v6396_v17  ;;  %2905 = vmatpush.msra.mxu2 %v6398_v40  ;;  %v9306_v17 = vld [vmem:[#allocation26_spill] sm:$0xff]  ;;  %v9307_v40 = vld [vmem:[#allocation27_spill] sm:$0xff]  ;;  %v9332_v1 = vld [vmem:[#allocation52_spill] sm:$0xff] }
 0x3f1   :  { %2925 = vmatpush.msra.mxu3 %v6402_v9  ;;  %2866 = vmatpush.msra.mxu0 %v6404_v20  ;;  %v9308_v9 = vld [vmem:[#allocation28_spill] sm:$0xff]  ;;  %v9309_v20 = vld [vmem:[#allocation29_spill] sm:$0xff] }
 0x3f2   :  { %2886 = vmatpush.msra.mxu1 %v6408_v26  ;;  %2906 = vmatpush.msra.mxu2 %v6410_v32  ;;  %v9310_v26 = vld [vmem:[#allocation30_spill] sm:$0xff]  ;;  %v9311_v32 = vld [vmem:[#allocation31_spill] sm:$0xff] }
 0x3f3   :  { %2926 = vmatpush.msra.mxu3 %v6414_v2  ;;  %2867 = vmatpush.msra.mxu0 %v6416_v33  ;;  %v9312_v2 = vld [vmem:[#allocation32_spill] sm:$0xff]  ;;  %v9313_v33 = vld [vmem:[#allocation33_spill] sm:$0xff] }
 0x3f4   :  { %2887 = vmatpush.msra.mxu1 %v6420_v34  ;;  %2907 = vmatpush.msra.mxu2 %v6422_v38  ;;  %v9314_v34 = vld [vmem:[#allocation34_spill] sm:$0xff]  ;;  %v9315_v38 = vld [vmem:[#allocation35_spill] sm:$0xff] }
 0x3f5   :  { %2927 = vmatpush.msra.mxu3 %v6426_v39  ;;  %2701 = vmatmul.f32.vlgmr.msrb.gmra.mxu0 %v2476_v13  ;;  %v9316_v39 = vld [vmem:[#allocation36_spill] sm:$0xff] }
 0x3f6   :  { %2721 = vmatmul.f32.vlgmr.msrb.gmra.mxu1 %v2476_v13  ;;  %2741 = vmatmul.f32.vlgmr.msrb.gmra.mxu2 %v2476_v13 }
 0x3f7   :  { %2761 = vmatmul.f32.vlgmr.msrb.gmra.mxu3 %v2476_v13  ;;  %2868 = vmatpush.msra.mxu0 %v6428_v62  ;;  %v9317_v62 = vld [vmem:[#allocation37_spill] sm:$0xff] }
 0x3f8   :  { %2888 = vmatpush.msra.mxu1 %v6432_v42  ;;  %2908 = vmatpush.msra.mxu2 %v6434_v43  ;;  %v9318_v42 = vld [vmem:[#allocation38_spill] sm:$0xff]  ;;  %v9319_v43 = vld [vmem:[#allocation39_spill] sm:$0xff] }
 0x3f9   :  { %2928 = vmatpush.msra.mxu3 %v6438_v44  ;;  %2869 = vmatpush.msra.mxu0 %v6440_v47  ;;  %v9320_v44 = vld [vmem:[#allocation40_spill] sm:$0xff]  ;;  %v9321_v47 = vld [vmem:[#allocation41_spill] sm:$0xff] }
 0x3fa   :  { %2889 = vmatpush.msra.mxu1 %v6444_v48  ;;  %2909 = vmatpush.msra.mxu2 %v6446_v50  ;;  %v9322_v48 = vld [vmem:[#allocation42_spill] sm:$0xff]  ;;  %v9323_v50 = vld [vmem:[#allocation43_spill] sm:$0xff] }
 0x3fb   :  { %2929 = vmatpush.msra.mxu3 %v9293_v63  ;;  %2870 = vmatpush.msra.mxu0 %v9294_v21  ;;  %v9334_v63 = vld [vmem:[#allocation54_spill] sm:$0xff]  ;;  %v9335_v21 = vld [vmem:[#allocation55_spill] sm:$0xff] }
 0x3fc   :  { %2890 = vmatpush.msra.mxu1 %v9295_v5  ;;  %2910 = vmatpush.msra.mxu2 %v9296_v61  ;;  %v9336_v5 = vld [vmem:[#allocation56_spill] sm:$0xff]  ;;  %v9337_v61 = vld [vmem:[#allocation57_spill] sm:$0xff] }
 0x3fd   :  { %2930 = vmatpush.msra.mxu3 %v9297_v37  ;;  %2871 = vmatpush.msra.mxu0 %v9298_v28  ;;  %v9338_v37 = vld [vmem:[#allocation58_spill] sm:$0xff]  ;;  %v9339_v28 = vld [vmem:[#allocation59_spill] sm:$0xff] }
 0x3fe   :  { %2891 = vmatpush.msra.mxu1 %v9299_v3  ;;  %2911 = vmatpush.msra.mxu2 %v9300_v23  ;;  %v9340_v3 = vld [vmem:[#allocation60_spill] sm:$0xff]  ;;  %v9341_v23 = vld [vmem:[#allocation61_spill] sm:$0xff] }
 0x3ff   :  { %2931 = vmatpush.msra.mxu3 %v9301_v53  ;;  %2872 = vmatpush.msra.mxu0 %v9302_v59  ;;  %v9342_v53 = vld [vmem:[#allocation62_spill] sm:$0xff]  ;;  %v9343_v59 = vld [vmem:[#allocation63_spill] sm:$0xff] }
 0x400   :  { %2892 = vmatpush.msra.mxu1 %v9303_v10  ;;  %2912 = vmatpush.msra.mxu2 %v9304_v14  ;;  %v9344_v10 = vld [vmem:[#allocation64_spill] sm:$0xff]  ;;  %v9345_v14 = vld [vmem:[#allocation65_spill] sm:$0xff] }
 0x401   :  { %2932 = vmatpush.msra.mxu3 %v9305_v27  ;;  %2873 = vmatmul.f32.vlgmr.msra.gmra.mxu0 %v2476_v13  ;;  %v9346_v27 = vld [vmem:[#allocation66_spill] sm:$0xff] }
 0x402   :  { %2893 = vmatmul.f32.vlgmr.msra.gmra.mxu1 %v2476_v13  ;;  %2913 = vmatmul.f32.vlgmr.msra.gmra.mxu2 %v2476_v13 }
 0x403   :  { %2933 = vmatmul.f32.vlgmr.msra.gmra.mxu3 %v2476_v13  ;;  %3084 = vmatpush.msrb.mxu0 %v9306_v17  ;;  %v9333_v13 = vld [vmem:[#allocation53_spill] sm:$0xff]  ;;  %v9347_v17 = vld [vmem:[#allocation67_spill] sm:$0xff] }
 0x404   :  { %3104 = vmatpush.msrb.mxu1 %v9307_v40  ;;  %3124 = vmatpush.msrb.mxu2 %v9308_v9  ;;  %v9348_v40 = vld [vmem:[#allocation68_spill] sm:$0xff]  ;;  %v9349_v9 = vld [vmem:[#allocation69_spill] sm:$0xff] }
 0x405   :  { %3144 = vmatpush.msrb.mxu3 %v9309_v20  ;;  %3085 = vmatpush.msrb.mxu0 %v9310_v26  ;;  %v9350_v20 = vld [vmem:[#allocation70_spill] sm:$0xff]  ;;  %v9351_v26 = vld [vmem:[#allocation71_spill] sm:$0xff] }
 0x406   :  { %3105 = vmatpush.msrb.mxu1 %v9311_v32  ;;  %3125 = vmatpush.msrb.mxu2 %v9312_v2  ;;  %v9352_v32 = vld [vmem:[#allocation72_spill] sm:$0xff]  ;;  %v9353_v2 = vld [vmem:[#allocation73_spill] sm:$0xff] }
 0x407   :  { %3145 = vmatpush.msrb.mxu3 %v9313_v33  ;;  %3086 = vmatpush.msrb.mxu0 %v9314_v34  ;;  %v9354_v33 = vld [vmem:[#allocation74_spill] sm:$0xff]  ;;  %v9355_v34 = vld [vmem:[#allocation75_spill] sm:$0xff] }
 0x408   :  { %3106 = vmatpush.msrb.mxu1 %v9315_v38  ;;  %3126 = vmatpush.msrb.mxu2 %v9316_v39  ;;  %v9356_v38 = vld [vmem:[#allocation76_spill] sm:$0xff]  ;;  %v9357_v39 = vld [vmem:[#allocation77_spill] sm:$0xff] }
 0x409   :  { %3146 = vmatpush.msrb.mxu3 %v9317_v62  ;;  %3087 = vmatpush.msrb.mxu0 %v9318_v42  ;;  %v9358_v62 = vld [vmem:[#allocation78_spill] sm:$0xff]  ;;  %v9359_v42 = vld [vmem:[#allocation79_spill] sm:$0xff] }
 0x40a   :  { %3107 = vmatpush.msrb.mxu1 %v9319_v43  ;;  %3127 = vmatpush.msrb.mxu2 %v9320_v44  ;;  %v9360_v43 = vld [vmem:[#allocation80_spill] sm:$0xff]  ;;  %v9361_v44 = vld [vmem:[#allocation81_spill] sm:$0xff] }
 0x40b   :  { %3147 = vmatpush.msrb.mxu3 %v9321_v47  ;;  %3088 = vmatpush.msrb.mxu0 %v9322_v48  ;;  %v9362_v47 = vld [vmem:[#allocation84_spill] sm:$0xff]  ;;  %v9363_v48 = vld [vmem:[#allocation85_spill] sm:$0xff] }
 0x40c   :  { %3108 = vmatpush.msrb.mxu1 %v9323_v50  ;;  %3128 = vmatpush.msrb.mxu2 %v9324_v4  ;;  %v9364_v50 = vld [vmem:[#allocation86_spill] sm:$0xff]  ;;  %v9365_v4 = vld [vmem:[#allocation87_spill] sm:$0xff] }
 0x40d   :  { %3148 = vmatpush.msrb.mxu3 %v9325_v57  ;;  %3089 = vmatpush.msrb.mxu0 %v9326_v56  ;;  %v9366_v57 = vld [vmem:[#allocation88_spill] sm:$0xff]  ;;  %v9367_v56 = vld [vmem:[#allocation89_spill] sm:$0xff] }
 0x40e   :  { %3109 = vmatpush.msrb.mxu1 %v9327_v55  ;;  %3129 = vmatpush.msrb.mxu2 %v9328_v30  ;;  %v9368_v55 = vld [vmem:[#allocation90_spill] sm:$0xff]  ;;  %v9369_v30 = vld [vmem:[#allocation91_spill] sm:$0xff] }
 0x40f   :  { %3149 = vmatpush.msrb.mxu3 %v9329_v6  ;;  %3090 = vmatpush.msrb.mxu0 %v9330_v49  ;;  %v9370_v6 = vld [vmem:[#allocation92_spill] sm:$0xff]  ;;  %v9371_v49 = vld [vmem:[#allocation93_spill] sm:$0xff] }
 0x410   :  { %3110 = vmatpush.msrb.mxu1 %v9331_v29  ;;  %3130 = vmatpush.msrb.mxu2 %v9332_v1  ;;  %v9372_v29 = vld [vmem:[#allocation94_spill] sm:$0xff]  ;;  %v9373_v1 = vld [vmem:[#allocation95_spill] sm:$0xff] }
 0x411   :  { %3150 = vmatpush.msrb.mxu3 %v9333_v13  ;;  %3091 = vmatpush.msrb.mxu0 %v9334_v63  ;;  %v9374_v13 = vld [vmem:[#allocation96_spill] sm:$0xff]  ;;  %v9375_v63 = vld [vmem:[#allocation97_spill] sm:$0xff] }
 0x412   :  { %3111 = vmatpush.msrb.mxu1 %v9335_v21  ;;  %3131 = vmatpush.msrb.mxu2 %v9336_v5  ;;  %v9376_v21 = vld [vmem:[#allocation100_spill] sm:$0xff]  ;;  %v9377_v5 = vld [vmem:[#allocation101_spill] sm:$0xff] }
 0x413   :  { %3151 = vmatpush.msrb.mxu3 %v9337_v61  ;;  %3092 = vmatpush.msrb.mxu0 %v9338_v37  ;;  %v9378_v61 = vld [vmem:[#allocation102_spill] sm:$0xff]  ;;  %v9379_v37 = vld [vmem:[#allocation105_spill] sm:$0xff] }
 0x414   :  { %3112 = vmatpush.msrb.mxu1 %v9339_v28  ;;  %3132 = vmatpush.msrb.mxu2 %v9340_v3  ;;  %v9380_v28 = vld [vmem:[#allocation106_spill] sm:$0xff]  ;;  %v9381_v3 = vld [vmem:[#allocation107_spill] sm:$0xff] }
 0x415   :  { %3152 = vmatpush.msrb.mxu3 %v9341_v23  ;;  %3093 = vmatpush.msrb.mxu0 %v9342_v53  ;;  %v9382_v23 = vld [vmem:[#allocation108_spill] sm:$0xff]  ;;  %v9383_v53 = vld [vmem:[#allocation109_spill] sm:$0xff] }
 0x416   :  { %3113 = vmatpush.msrb.mxu1 %v9343_v59  ;;  %3133 = vmatpush.msrb.mxu2 %v9344_v10  ;;  %v9384_v59 = vld [vmem:[#allocation110_spill] sm:$0xff]  ;;  %v9385_v10 = vld [vmem:[#allocation111_spill] sm:$0xff] }
 0x417   :  { %3153 = vmatpush.msrb.mxu3 %v9345_v14  ;;  %3094 = vmatpush.msrb.mxu0 %v9346_v27  ;;  %v9386_v14 = vld [vmem:[#allocation112_spill] sm:$0xff]  ;;  %v9387_v27 = vld [vmem:[#allocation113_spill] sm:$0xff] }
 0x418   :  { %3114 = vmatpush.msrb.mxu1 %v9347_v17  ;;  %3134 = vmatpush.msrb.mxu2 %v9348_v40  ;;  %v9388_v17 = vld [vmem:[#allocation114_spill] sm:$0xff]  ;;  %v9389_v40 = vld [vmem:[#allocation115_spill] sm:$0xff] }
 0x419   :  { %3154 = vmatpush.msrb.mxu3 %v9349_v9  ;;  %3095 = vmatpush.msrb.mxu0 %v9350_v20  ;;  %v9390_v9 = vld [vmem:[#allocation116_spill] sm:$0xff]  ;;  %v9391_v20 = vld [vmem:[#allocation117_spill] sm:$0xff] }
 0x41a   :  { %3115 = vmatpush.msrb.mxu1 %v9351_v26  ;;  %3135 = vmatpush.msrb.mxu2 %v9352_v32  ;;  %v9392_v26 = vld [vmem:[#allocation120_spill] sm:$0xff]  ;;  %v9393_v32 = vld [vmem:[#allocation121_spill] sm:$0xff] }
 0x41b   :  { %3155 = vmatpush.msrb.mxu3 %v9353_v2  ;;  %3096 = vmatpush.msrb.mxu0 %v9354_v33  ;;  %v9394_v2 = vld [vmem:[#allocation122_spill] sm:$0xff]  ;;  %v9395_v33 = vld [vmem:[#allocation125_spill] sm:$0xff] }
 0x41c   :  { %3116 = vmatpush.msrb.mxu1 %v9355_v34  ;;  %3136 = vmatpush.msrb.mxu2 %v9356_v38  ;;  %v9396_v34 = vld [vmem:[#allocation127_spill] sm:$0xff]  ;;  %v9397_v38 = vld [vmem:[#allocation128_spill] sm:$0xff] }
 0x41d   :  { %3156 = vmatpush.msrb.mxu3 %v9357_v39  ;;  %3097 = vmatpush.msrb.mxu0 %v9358_v62  ;;  %v9398_v39 = vld [vmem:[#allocation129_spill] sm:$0xff]  ;;  %v9399_v62 = vld [vmem:[#allocation130_spill] sm:$0xff] }
 0x41e   :  { %3117 = vmatpush.msrb.mxu1 %v9359_v42  ;;  %3137 = vmatpush.msrb.mxu2 %v9360_v43  ;;  %v9400_v42 = vld [vmem:[#allocation131_spill] sm:$0xff]  ;;  %v9401_v43 = vld [vmem:[#allocation133_spill] sm:$0xff] }
 0x41f   :  { %3157 = vmatpush.msrb.mxu3 %v9361_v44  ;;  %3098 = vmatpush.msrb.mxu0 %v9362_v47  ;;  %v9402_v44 = vld [vmem:[#allocation134_spill] sm:$0xff]  ;;  %v9403_v47 = vld [vmem:[#allocation135_spill] sm:$0xff] }
 0x420   :  { %3118 = vmatpush.msrb.mxu1 %v9363_v48  ;;  %3138 = vmatpush.msrb.mxu2 %v9364_v50  ;;  %v9404_v48 = vld [vmem:[#allocation138_spill] sm:$0xff]  ;;  %v9405_v50 = vld [vmem:[#allocation139_spill] sm:$0xff] }
 0x421   :  { %3158 = vmatpush.msrb.mxu3 %v9365_v4  ;;  %3099 = vmatpush.msrb.mxu0 %v9366_v57  ;;  %v9406_v4 = vld [vmem:[#allocation140_spill] sm:$0xff]  ;;  %v9407_v57 = vld [vmem:[#allocation143_spill] sm:$0xff] }
 0x422   :  { %3119 = vmatpush.msrb.mxu1 %v9367_v56  ;;  %3139 = vmatpush.msrb.mxu2 %v9368_v55  ;;  %v9408_v56 = vld [vmem:[#allocation144_spill] sm:$0xff]  ;;  %v9409_v55 = vld [vmem:[#allocation145_spill] sm:$0xff] }
 0x423   :  { %3159 = vmatpush.msrb.mxu3 %v9369_v30  ;;  %3164 = vmatpush.msra.mxu0 %v9370_v6  ;;  %v9410_v30 = vld [vmem:[#allocation146_spill] sm:$0xff]  ;;  %v9411_v6 = vld [vmem:[#allocation147_spill] sm:$0xff] }
 0x424   :  { %3184 = vmatpush.msra.mxu1 %v9371_v49  ;;  %3204 = vmatpush.msra.mxu2 %v9372_v29  ;;  %v9412_v49 = vld [vmem:[#allocation148_spill] sm:$0xff]  ;;  %v9413_v29 = vld [vmem:[#allocation149_spill] sm:$0xff] }
 0x425   :  { %3224 = vmatpush.msra.mxu3 %v9373_v1  ;;  %3165 = vmatpush.msra.mxu0 %v9374_v13  ;;  %v9414_v1 = vld [vmem:[#allocation150_spill] sm:$0xff]  ;;  %v9415_v13 = vld [vmem:[#allocation151_spill] sm:$0xff] }
 0x426   :  { %3185 = vmatpush.msra.mxu1 %v9375_v63  ;;  %3205 = vmatpush.msra.mxu2 %v9376_v21  ;;  %v9416_v63 = vld [vmem:[#allocation152_spill] sm:$0xff]  ;;  %v9417_v21 = vld [vmem:[#allocation153_spill] sm:$0xff] }
 0x427   :  { %3225 = vmatpush.msra.mxu3 %v9377_v5  ;;  %3166 = vmatpush.msra.mxu0 %v9378_v61  ;;  %v9418_v5 = vld [vmem:[#allocation154_spill] sm:$0xff]  ;;  %v9419_v61 = vld [vmem:[#allocation155_spill] sm:$0xff] }
 0x428   :  { %3186 = vmatpush.msra.mxu1 %v9379_v37  ;;  %3206 = vmatpush.msra.mxu2 %v9380_v28  ;;  %v9420_v37 = vld [vmem:[#allocation82_spill] sm:$0xff]  ;;  %v9421_v28 = vld [vmem:[#allocation83_spill] sm:$0xff] }
 0x429   :  { %3226 = vmatpush.msra.mxu3 %v9381_v3  ;;  %3167 = vmatpush.msra.mxu0 %v9382_v23  ;;  %v9422_v3 = vld [vmem:[#allocation98_spill] sm:$0xff]  ;;  %v9423_v23 = vld [vmem:[#allocation99_spill] sm:$0xff] }
 0x42a   :  { %3187 = vmatpush.msra.mxu1 %v9383_v53  ;;  %3207 = vmatpush.msra.mxu2 %v9384_v59  ;;  %v9424_v53 = vld [vmem:[#allocation160_spill] sm:$0xff]  ;;  %v9425_v59 = vld [vmem:[#allocation161_spill] sm:$0xff] }
 0x42b   :  { %3227 = vmatpush.msra.mxu3 %v9385_v10  ;;  %3168 = vmatpush.msra.mxu0 %v9386_v14  ;;  %v9426_v10 = vld [vmem:[#allocation162_spill] sm:$0xff]  ;;  %v9427_v14 = vld [vmem:[#allocation163_spill] sm:$0xff] }
 0x42c   :  { %3188 = vmatpush.msra.mxu1 %v9387_v27  ;;  %3208 = vmatpush.msra.mxu2 %v9388_v17  ;;  %v9428_v27 = vld [vmem:[#allocation164_spill] sm:$0xff]  ;;  %v9429_v17 = vld [vmem:[#allocation165_spill] sm:$0xff] }
 0x42d   :  { %3228 = vmatpush.msra.mxu3 %v9389_v40  ;;  %3169 = vmatpush.msra.mxu0 %v9390_v9  ;;  %v9430_v40 = vld [vmem:[#allocation179_spill] sm:$0xff]  ;;  %v9431_v9 = vld [vmem:[#allocation180_spill] sm:$0xff] }
 0x42e   :  { %3189 = vmatpush.msra.mxu1 %v9391_v20  ;;  %3209 = vmatpush.msra.mxu2 %v9392_v26  ;;  %v9432_v20 = vld [vmem:[#allocation181_spill] sm:$0xff] }
 0x42f   :  { %3229 = vmatpush.msra.mxu3 %v9393_v32  ;;  %3170 = vmatpush.msra.mxu0 %v9394_v2 }
 0x430   :  { %3190 = vmatpush.msra.mxu1 %v9395_v33  ;;  %3210 = vmatpush.msra.mxu2 %v9396_v34 }
 0x431   :  { %3230 = vmatpush.msra.mxu3 %v9397_v38  ;;  %3171 = vmatpush.msra.mxu0 %v9398_v39 }
 0x432   :  { %3191 = vmatpush.msra.mxu1 %v9399_v62  ;;  %3211 = vmatpush.msra.mxu2 %v9400_v42 }
 0x433   :  { %3231 = vmatpush.msra.mxu3 %v9401_v43  ;;  %3172 = vmatpush.msra.mxu0 %v9402_v44  ;;  %v9434_v44 = vld [vmem:[#allocation14_spill] sm:$0xff] }
 0x434   :  { %3192 = vmatpush.msra.mxu1 %v9403_v47  ;;  %3212 = vmatpush.msra.mxu2 %v9404_v48  ;;  %v9435_v48 = vld [vmem:[#allocation15_spill] sm:$0xff] }
 0x435   :  { %3232 = vmatpush.msra.mxu3 %v9405_v50  ;;  %3173 = vmatpush.msra.mxu0 %v9406_v4 }
 0x436   :  { %3193 = vmatpush.msra.mxu1 %v9407_v57  ;;  %3213 = vmatpush.msra.mxu2 %v9408_v56 }
 0x437   :  { %3233 = vmatpush.msra.mxu3 %v9409_v55  ;;  %3174 = vmatpush.msra.mxu0 %v9410_v30 }
 0x438   :  { %3194 = vmatpush.msra.mxu1 %v9411_v6  ;;  %3214 = vmatpush.msra.mxu2 %v9412_v49  ;;  %v9436_v49 = vld [vmem:[#allocation158_spill] sm:$0xff] }
 0x439   :  { %3234 = vmatpush.msra.mxu3 %v9413_v29  ;;  %3175 = vmatpush.msra.mxu0 %v9414_v1  ;;  %v212_v29 = vadd.f32 %v9436_v49, %v5269_v24 }
 0x43a   :  { %3195 = vmatpush.msra.mxu1 %v9415_v13  ;;  %3215 = vmatpush.msra.mxu2 %v9416_v63  ;;  %v9437_v63 = vld [vmem:[#allocation159_spill] sm:$0xff] }
 0x43b   :  { %3235 = vmatpush.msra.mxu3 %v9417_v21  ;;  %3176 = vmatpush.msra.mxu0 %v9418_v5  ;;  %v253_v21 = vadd.f32 %v9437_v63, %v5271_v25 }
 0x43c   :  { %3196 = vmatpush.msra.mxu1 %v9419_v61  ;;  %3216 = vmatpush.msra.mxu2 %v9420_v37 }
 0x43d   :  { %3236 = vmatpush.msra.mxu3 %v9421_v28  ;;  %3177 = vmatpush.msra.mxu0 %v9422_v3 }
 0x43e   :  { %3197 = vmatpush.msra.mxu1 %v9423_v23  ;;  %3217 = vmatpush.msra.mxu2 %v6854_v7  ;;  %v9433_v7 = vld [vmem:[#allocation132_spill] sm:$0xff] }
 0x43f   :  { %3237 = vmatpush.msra.mxu3 %v9424_v53  ;;  %3178 = vmatpush.msra.mxu0 %v9425_v59 }
 0x440   :  { %3198 = vmatpush.msra.mxu1 %v9426_v10  ;;  %3218 = vmatpush.msra.mxu2 %v9427_v14  ;;  %v9438_v14 = vld [vmem:[#allocation166_spill] sm:$0xff] }
 0x441   :  { %3238 = vmatpush.msra.mxu3 %v9428_v27  ;;  %3179 = vmatpush.msra.mxu0 %v9429_v17  ;;  %v294_v27 = vadd.f32 %v9438_v14, %v5295_v35  ;;  %v9439_v17 = vld [vmem:[#allocation167_spill] sm:$0xff] }
 0x442   :  { %3199 = vmatpush.msra.mxu1 %v9430_v40  ;;  %3219 = vmatpush.msra.mxu2 %v9431_v9  ;;  %v335_v40 = vadd.f32 %v9439_v17, %v5299_v36  ;;  %v7245_v14 = vld [vmem:[#allocation6 + $0xc8] sm:$0xff]  ;;  %v7251_v17 = vld [vmem:[#allocation6 + $0xd8] sm:$0xff] }
 0x443   :  { %3239 = vmatpush.msra.mxu3 %v9432_v20 }
 0x456   :  { %v2307_v26 = vpop.xlane.xlu1 %2306 }
 0x457   :  { %v2308_v32 = vadd.f32 %v9433_v7, %v2307_v26 }
 0x459   :  { %2309 = vst.msk [vmem:[%s7972_s9 + $0x18] sm:$0xff] %vm871_vm0, %v2308_v32 }
 0x45a   :  { %v2622_v2 = vpop.f32.mrf.mxu0  ;;  %v2642_v33 = vpop.f32.mrf.mxu1 }
 0x461   :  { %v2662_v34 = vpop.f32.mrf.mxu2  ;;  %v2682_v38 = vpop.f32.mrf.mxu3 }
 0x472   :  { %v2702_v39 = vpop.f32.mrf.mxu0 }
 0x473   :  { %v2703_v62 = vadd.f32 %v2702_v39, %v2622_v2  ;;  %v2722_v42 = vpop.f32.mrf.mxu1 }
 0x474   :  { %v2723_v43 = vadd.f32 %v2722_v42, %v2642_v33 }
 0x475   :  { %v2765_v47 = vadd.f32 %v2703_v62, %v9434_v44 }
 0x476   :  { %v2766_v50 = vadd.f32 %v2723_v43, %v9435_v48 }
 0x477   :  { %4332 = vtanh.f32 %v2765_v47 }
 0x478   :  { %4334 = vtanh.f32 %v2766_v50 }
 0x479   :  { %v2742_v4 = vpop.f32.mrf.mxu2 }
 0x47a   :  { %v2743_v57 = vadd.f32 %v2742_v4, %v2662_v34  ;;  %v2762_v56 = vpop.f32.mrf.mxu3 }
 0x47b   :  { %v2763_v55 = vadd.f32 %v2762_v56, %v2682_v38 }
 0x47c   :  { %v2767_v30 = vadd.f32 %v2743_v57, %v5461_v41 }
 0x47d   :  { %v4333_v6 = vpop.eup %4332  ;;  %v2768_v1 = vadd.f32 %v2763_v55, %v5465_v45 }
 0x47e   :  { %v4335_v13 = vpop.eup %4334  ;;  %4336 = vtanh.f32 %v2767_v30  ;;  %v2874_v5 = vpop.f32.mrf.mxu0  ;;  %v2773_v61 = vmul.f32 0.5, %v4333_v6 }
 0x47f   :  { %v2775_v37 = vmul.f32 0.5, %v4335_v13  ;;  %v2937_v28 = vadd.f32 %v2874_v5, %v212_v29  ;;  %v2894_v3 = vpop.f32.mrf.mxu1  ;;  %4338 = vtanh.f32 %v2768_v1  ;;  %v9440_v1 = vld [vmem:[#allocation182_spill] sm:$0xff]  ;;  %v7158_v13 = vld [vmem:[#allocation6 + $0x1d8] sm:$0xff] }
 0x480   :  { %v2938_v23 = vadd.f32 %v2894_v3, %v253_v21  ;;  %v2774_v59 = vadd.f32 0.5, %v2773_v61  ;;  %v7215_v61 = vld [vmem:[#allocation6 + $0x138] sm:$0xff] }
 0x481   :  { %v2776_v53 = vadd.f32 0.5, %v2775_v37  ;;  %4340 = vtanh.f32 %v2937_v28  ;;  %v7217_v37 = vld [vmem:[#allocation6 + $0x100] sm:$0xff]  ;;  %v7223_v28 = vld [vmem:[#allocation6 + $0x110] sm:$0xff]  ;;  %v7227_v3 = vld [vmem:[#allocation6 + $0x118] sm:$0xff] }
 0x482   :  { %4342 = vtanh.f32 %v2938_v23  ;;  %v7229_v23 = vld [vmem:[#allocation6 + $0xe0] sm:$0xff] }
 0x483   :  { %v2779_v9 = vmul.f32 %v2776_v53, %v6893_v60  ;;  %v7235_v53 = vld [vmem:[#allocation6 + $0xf0] sm:$0xff] }
 0x484   :  { %v4337_v10 = vpop.eup %4336 }
 0x485   :  { %v2780_v20 = vmul.f32 %v4337_v10, %v2774_v59  ;;  %v2914_v26 = vpop.f32.mrf.mxu2  ;;  %v4339_v7 = vpop.eup %4338  ;;  %v7239_v59 = vld [vmem:[#allocation6 + $0xf8] sm:$0xff]  ;;  %v7241_v10 = vld [vmem:[#allocation6 + $0xc0] sm:$0xff] }
 0x486   :  { %v2939_v32 = vadd.f32 %v2914_v26, %v294_v27  ;;  %v2934_v2 = vpop.f32.mrf.mxu3  ;;  %v2777_v43 = vmul.f32 0.5, %v4339_v7  ;;  %v7247_v27 = vld [vmem:[#allocation6 + $0xd0] sm:$0xff]  ;;  %v7263_v26 = vld [vmem:[#allocation6 + $0xb8] sm:$0xff]  ;;  %v7265_v7 = vld [vmem:[#allocation6 + $0x80] sm:$0xff] }
 0x487   :  { %v4341_v33 = vpop.eup %4340  ;;  %v7149_v34 = vadd.f32 %v2780_v20, %v2779_v9  ;;  %v2940_v38 = vadd.f32 %v2934_v2, %v335_v40  ;;  %v7253_v40 = vld [vmem:[#allocation6 + $0xa0] sm:$0xff]  ;;  %v7257_v9 = vld [vmem:[#allocation6 + $0xa8] sm:$0xff]  ;;  %v7259_v20 = vld [vmem:[#allocation6 + $0xb0] sm:$0xff] }
 0x488   :  { %v4343_v39 = vpop.eup %4342  ;;  %4344 = vtanh.f32 %v2939_v32  ;;  %v2945_v62 = vmul.f32 0.5, %v4341_v33  ;;  %v2778_v4 = vadd.f32 0.5, %v2777_v43  ;;  %v7269_v32 = vld [vmem:[#allocation6 + $0x88] sm:$0xff]  ;;  %v7271_v2 = vld [vmem:[#allocation6 + $0x90] sm:$0xff]  ;;  %v7275_v33 = vld [vmem:[#allocation6 + $0x98] sm:$0xff] }
 0x489   :  { %4346 = vtanh.f32 %v7149_v34  ;;  %v2947_v42 = vmul.f32 0.5, %v4343_v39  ;;  %v7281_v39 = vld [vmem:[#allocation6 + $0x68] sm:$0xff]  ;;  %v7289_v43 = vld [vmem:[#allocation6 + $0x40] sm:$0xff] }
 0x48a   :  { %4348 = vtanh.f32 %v2940_v38  ;;  %v2946_v50 = vadd.f32 0.5, %v2945_v62  ;;  %v7277_v38 = vld [vmem:[#allocation6 + $0x60] sm:$0xff]  ;;  %v7283_v62 = vld [vmem:[#allocation6 + $0x70] sm:$0xff]  ;;  %9442 = vst [vmem:[#allocation126_spill] sm:$0xff] %v7289_v43 }
 0x48b   :  { %v2948_v47 = vadd.f32 0.5, %v2947_v42  ;;  %v7287_v42 = vld [vmem:[#allocation6 + $0x78] sm:$0xff] }
 0x48c   :  { %9441 = vst [vmem:[#allocation183_spill] sm:$0xff] %v7287_v42 }
 0x48d   :  { %v2951_v56 = vmul.f32 %v2948_v47, %v6957_v54  ;;  %v7163_v54 = vld [vmem:[%s7970_s7] ss:$0 sm:$0xff]  ;;  %v7293_v47 = vld [vmem:[#allocation6 + $0x48] sm:$0xff] }
 0x48e   :  { %v4345_v60 = vpop.eup %4344  ;;  %9443 = vst [vmem:[#allocation123_spill] sm:$0xff] %v7293_v47 }
 0x48f   :  { %v4347_v57 = vpop.eup %4346  ;;  %v2952_v55 = vmul.f32 %v4345_v60, %v2946_v50  ;;  %v7295_v50 = vld [vmem:[#allocation6 + $0x50] sm:$0xff]  ;;  %v7299_v60 = vld [vmem:[#allocation6 + $0x58] sm:$0xff] }
 0x490   :  { %v2783_v30 = vmul.f32 %v4347_v57, %v2778_v4  ;;  %v4349_v6 = vpop.eup %4348  ;;  %9444 = vst [vmem:[#allocation124_spill] sm:$0xff] %v7295_v50  ;;  %v7301_v4 = vld [vmem:[#allocation6 + $0x20] sm:$0xff]  ;;  %v7305_v57 = vld [vmem:[#allocation6 + $0x28] sm:$0xff] }
 0x491   :  { %v7153_v49 = vadd.f32 %v2952_v55, %v2951_v56  ;;  %v2949_v29 = vmul.f32 0.5, %v4349_v6  ;;  %9445 = vst [vmem:[#allocation136_spill] sm:$0xff] %v7299_v60  ;;  %v7307_v56 = vld [vmem:[#allocation6 + $0x30] sm:$0xff]  ;;  %v7311_v55 = vld [vmem:[#allocation6 + $0x38] sm:$0xff]  ;;  %v7317_v6 = vld [vmem:[#allocation6 + $0x8] sm:$0xff] }
 0x492   :  { %3100 = vmatmul.f32.vlgmr.msrb.gmra.mxu0 %v2783_v30  ;;  %3120 = vmatmul.f32.vlgmr.msrb.gmra.mxu1 %v2783_v30  ;;  %v2784_v63 = vmul.f32 %v7163_v54, %v2783_v30  ;;  %9446 = vst [vmem:[#allocation137_spill] sm:$0xff] %v7301_v4 }
 0x493   :  { %4350 = vtanh.f32 %v7153_v49  ;;  %3140 = vmatmul.f32.vlgmr.msrb.gmra.mxu2 %v2783_v30  ;;  %3160 = vmatmul.f32.vlgmr.msrb.gmra.mxu3 %v2783_v30  ;;  %v2950_v21 = vadd.f32 0.5, %v2949_v29  ;;  %9447 = vst [vmem:[#allocation103_spill] sm:$0xff] %v7305_v57  ;;  %v7313_v30 = vld [vmem:[#allocation6] sm:$0xff]  ;;  %v7319_v29 = vld [vmem:[#allocation6 + $0x10] sm:$0xff] }
 0x494   :  { %3336 = vmatpush.msrb.mxu0 %v6900_v51  ;;  %3356 = vmatpush.msrb.mxu1 %v9440_v1  ;;  %v7172_v51 = vld [vmem:[#allocation6 + $0x1b8] sm:$0xff]  ;;  %9448 = vst [vmem:[#allocation141_spill] sm:$0xff] %v7307_v56 }
 0x495   :  { %3376 = vmatpush.msrb.mxu2 %v6906_v16  ;;  %3396 = vmatpush.msrb.mxu3 %v6908_v52  ;;  %v7177_v16 = vld [vmem:[#allocation6 + $0x198] sm:$0xff]  ;;  %9449 = vst [vmem:[#allocation142_spill] sm:$0xff] %v7311_v55 }
 0x496   :  { %3337 = vmatpush.msrb.mxu0 %v6912_v22  ;;  %3357 = vmatpush.msrb.mxu1 %v6914_v11  ;;  %v7185_v22 = vld [vmem:[#allocation6 + $0x160] sm:$0xff]  ;;  %v7189_v11 = vld [vmem:[#allocation6 + $0x168] sm:$0xff]  ;;  %9450 = vst [vmem:[#allocation156_spill] sm:$0xff] %v7313_v30  ;;  %v7323_v1 = vld [vmem:[#allocation6 + $0x18] sm:$0xff] }
 0x497   :  { %3377 = vmatpush.msrb.mxu2 %v6918_v18  ;;  %3397 = vmatpush.msrb.mxu3 %v7158_v13  ;;  %v7193_v18 = vld [vmem:[#allocation6 + $0x178] sm:$0xff]  ;;  %9451 = vst [vmem:[#allocation157_spill] sm:$0xff] %v7317_v6 }
 0x498   :  { %2785 = vadd.xlane.f32.xlu2 %v2784_v63  ;;  %3338 = vmatpush.msrb.mxu0 %v6923_v0  ;;  %v7195_v0 = vld [vmem:[#allocation6 + $0x140] sm:$0xff]  ;;  %9452 = vst [vmem:[#allocation104_spill] sm:$0xff] %v7319_v29 }
 0x499   :  { %v4351_v5 = vpop.eup %4350  ;;  %3358 = vmatpush.msrb.mxu1 %v6927_v15  ;;  %3378 = vmatpush.msrb.mxu2 %v6929_v58  ;;  %v7199_v15 = vld [vmem:[#allocation6 + $0x148] sm:$0xff]  ;;  %v7203_v58 = vld [vmem:[#allocation6 + $0x158] sm:$0xff]  ;;  %9453 = vst [vmem:[#allocation118_spill] sm:$0xff] %v7323_v1  ;;  %v7329_v63 = vld [vmem:[#allocation9 + $0x1e0] sm:$0xff] }
 0x49a   :  { %v7179_v52 = vmul.f32 %v4351_v5, %v2950_v21  ;;  %3398 = vmatpush.msrb.mxu3 %v7172_v51  ;;  %3339 = vmatpush.msrb.mxu0 %v6933_v46  ;;  %v7205_v46 = vld [vmem:[#allocation6 + $0x120] sm:$0xff]  ;;  %9454 = vst [vmem:[#allocation119_spill] sm:$0xff] %v7329_v63  ;;  %v7333_v21 = vld [vmem:[#allocation9 + $0x1e8] sm:$0xff]  ;;  %v7335_v5 = vld [vmem:[#allocation9 + $0x1f0] sm:$0xff] }
 0x49b   :  { %3359 = vmatpush.msrb.mxu1 %v6936_v31  ;;  %3379 = vmatpush.msrb.mxu2 %v6938_v8  ;;  %v7209_v31 = vld [vmem:[#allocation6 + $0x128] sm:$0xff]  ;;  %v7211_v8 = vld [vmem:[#allocation6 + $0x130] sm:$0xff]  ;;  %9455 = vst [vmem:[#allocation16_spill] sm:$0xff] %v7333_v21 }
 0x49c   :  { %3399 = vmatpush.msrb.mxu3 %v7177_v16  ;;  %3180 = vmatmul.f32.vlgmr.msra.gmra.mxu0 %v7179_v52  ;;  %9456 = vst [vmem:[#allocation17_spill] sm:$0xff] %v7335_v5 }
 0x49d   :  { %3200 = vmatmul.f32.vlgmr.msra.gmra.mxu1 %v7179_v52  ;;  %3220 = vmatmul.f32.vlgmr.msra.gmra.mxu2 %v7179_v52 }
 0x49e   :  { %3240 = vmatmul.f32.vlgmr.msra.gmra.mxu3 %v7179_v52  ;;  %3340 = vmatpush.msrb.mxu0 %v7185_v22 }
 0x49f   :  { %3360 = vmatpush.msrb.mxu1 %v7189_v11  ;;  %3380 = vmatpush.msrb.mxu2 %v6944_v12  ;;  %v7221_v12 = vld [vmem:[#allocation6 + $0x108] sm:$0xff] }
 0x4a0   :  { %3400 = vmatpush.msrb.mxu3 %v7193_v18  ;;  %3341 = vmatpush.msrb.mxu0 %v7195_v0 }
 0x4a1   :  { %3361 = vmatpush.msrb.mxu1 %v7199_v15  ;;  %3381 = vmatpush.msrb.mxu2 %v6950_v19  ;;  %v7233_v19 = vld [vmem:[#allocation6 + $0xe8] sm:$0xff] }
 0x4a2   :  { %3401 = vmatpush.msrb.mxu3 %v7203_v58  ;;  %3342 = vmatpush.msrb.mxu0 %v7205_v46 }
 0x4a3   :  { %3362 = vmatpush.msrb.mxu1 %v7209_v31  ;;  %3382 = vmatpush.msrb.mxu2 %v7211_v8 }
 0x4a4   :  { %3402 = vmatpush.msrb.mxu3 %v7215_v61  ;;  %3343 = vmatpush.msrb.mxu0 %v7217_v37 }
 0x4a5   :  { %3363 = vmatpush.msrb.mxu1 %v7221_v12  ;;  %3383 = vmatpush.msrb.mxu2 %v7223_v28 }
 0x4a6   :  { %3403 = vmatpush.msrb.mxu3 %v7227_v3  ;;  %3344 = vmatpush.msrb.mxu0 %v7229_v23 }
 0x4a7   :  { %3364 = vmatpush.msrb.mxu1 %v7233_v19  ;;  %3384 = vmatpush.msrb.mxu2 %v7235_v53 }
 0x4a8   :  { %3404 = vmatpush.msrb.mxu3 %v7239_v59  ;;  %3345 = vmatpush.msrb.mxu0 %v7241_v10 }
 0x4a9   :  { %3365 = vmatpush.msrb.mxu1 %v7245_v14  ;;  %3385 = vmatpush.msrb.mxu2 %v7247_v27 }
 0x4aa   :  { %3405 = vmatpush.msrb.mxu3 %v7251_v17  ;;  %3346 = vmatpush.msrb.mxu0 %v7253_v40 }
 0x4ab   :  { %3366 = vmatpush.msrb.mxu1 %v7257_v9  ;;  %3386 = vmatpush.msrb.mxu2 %v7259_v20 }
 0x4ac   :  { %3406 = vmatpush.msrb.mxu3 %v7263_v26  ;;  %3347 = vmatpush.msrb.mxu0 %v7265_v7 }
 0x4ad   :  { %3367 = vmatpush.msrb.mxu1 %v7269_v32  ;;  %3387 = vmatpush.msrb.mxu2 %v7271_v2 }
 0x4ae   :  { %3407 = vmatpush.msrb.mxu3 %v7275_v33  ;;  %3348 = vmatpush.msrb.mxu0 %v7277_v38 }
 0x4af   :  { %3368 = vmatpush.msrb.mxu1 %v7281_v39  ;;  %3388 = vmatpush.msrb.mxu2 %v7283_v62 }
 0x4b0   :  { %3408 = vmatpush.msrb.mxu3 %v7287_v42  ;;  %3349 = vmatpush.msrb.mxu0 %v7289_v43  ;;  %v7715_v42 = vld [vmem:[#allocation8 + $0x10] sm:$0xff] }
 0x4b1   :  { %3369 = vmatpush.msrb.mxu1 %v7293_v47  ;;  %3389 = vmatpush.msrb.mxu2 %v7295_v50  ;;  %v7703_v50 = vld [vmem:[#allocation8 + $0x30] sm:$0xff]  ;;  %9580 = vst [vmem:[#allocation83_spill] sm:$0xff] %v7715_v42 }
 0x4b2   :  { %3409 = vmatpush.msrb.mxu3 %v7299_v60  ;;  %3350 = vmatpush.msrb.mxu0 %v7301_v4  ;;  %v7691_v60 = vld [vmem:[#allocation8 + $0x50] sm:$0xff]  ;;  %9576 = vst [vmem:[#allocation153_spill] sm:$0xff] %v7703_v50 }
 0x4b3   :  { %3370 = vmatpush.msrb.mxu1 %v7305_v57  ;;  %3390 = vmatpush.msrb.mxu2 %v7307_v56  ;;  %v7353_v56 = vld [vmem:[#allocation9 + $0x1a0] sm:$0xff]  ;;  %v7357_v57 = vld [vmem:[#allocation9 + $0x1a8] sm:$0xff] }
 0x4b4   :  { %3410 = vmatpush.msrb.mxu3 %v7311_v55  ;;  %3351 = vmatpush.msrb.mxu0 %v7313_v30  ;;  %v7339_v55 = vld [vmem:[#allocation9 + $0x1f8] sm:$0xff]  ;;  %v7341_v30 = vld [vmem:[#allocation9 + $0x1c0] sm:$0xff]  ;;  %9462 = vst [vmem:[#allocation23_spill] sm:$0xff] %v7353_v56 }
 0x4b5   :  { %3371 = vmatpush.msrb.mxu1 %v7317_v6  ;;  %3391 = vmatpush.msrb.mxu2 %v7319_v29  ;;  %9457 = vst [vmem:[#allocation18_spill] sm:$0xff] %v7339_v55  ;;  %v7345_v29 = vld [vmem:[#allocation9 + $0x1c8] sm:$0xff]  ;;  %v7351_v6 = vld [vmem:[#allocation9 + $0x1d8] sm:$0xff] }
 0x4b6   :  { %3411 = vmatpush.msrb.mxu3 %v7323_v1  ;;  %3352 = vmatmul.f32.vlgmr.msrb.gmra.mxu0 %v7179_v52  ;;  %9458 = vst [vmem:[#allocation19_spill] sm:$0xff] %v7341_v30  ;;  %v7347_v1 = vld [vmem:[#allocation9 + $0x1d0] sm:$0xff] }
 0x4b7   :  { %3372 = vmatmul.f32.vlgmr.msrb.gmra.mxu1 %v7179_v52  ;;  %3392 = vmatmul.f32.vlgmr.msrb.gmra.mxu2 %v7179_v52  ;;  %9459 = vst [vmem:[#allocation20_spill] sm:$0xff] %v7345_v29 }
 0x4b8   :  { %3412 = vmatmul.f32.vlgmr.msrb.gmra.mxu3 %v7179_v52  ;;  %3563 = vmatpush.msra.mxu0 %v7329_v63  ;;  %9460 = vst [vmem:[#allocation21_spill] sm:$0xff] %v7347_v1  ;;  %v7359_v52 = vld [vmem:[#allocation9 + $0x1b0] sm:$0xff]  ;;  %v7363_v63 = vld [vmem:[#allocation9 + $0x1b8] sm:$0xff] }
 0x4b9   :  { %3583 = vmatpush.msra.mxu1 %v7333_v21  ;;  %3603 = vmatpush.msra.mxu2 %v7335_v5  ;;  %9461 = vst [vmem:[#allocation22_spill] sm:$0xff] %v7351_v6  ;;  %v7365_v21 = vld [vmem:[#allocation9 + $0x180] sm:$0xff]  ;;  %v7369_v5 = vld [vmem:[#allocation9 + $0x188] sm:$0xff] }
 0x4ba   :  { %3623 = vmatpush.msra.mxu3 %v7339_v55  ;;  %3564 = vmatpush.msra.mxu0 %v7341_v30  ;;  %9463 = vst [vmem:[#allocation24_spill] sm:$0xff] %v7357_v57  ;;  %v7371_v55 = vld [vmem:[#allocation9 + $0x190] sm:$0xff]  ;;  %v7375_v30 = vld [vmem:[#allocation9 + $0x198] sm:$0xff] }
 0x4bb   :  { %9464 = vst [vmem:[#allocation25_spill] sm:$0xff] %v7359_v52  ;;  %3584 = vmatpush.msra.mxu1 %v7345_v29  ;;  %3604 = vmatpush.msra.mxu2 %v7347_v1  ;;  %v7377_v29 = vld [vmem:[#allocation9 + $0x160] sm:$0xff]  ;;  %v7381_v1 = vld [vmem:[#allocation9 + $0x168] sm:$0xff] }
 0x4bc   :  { %9465 = vst [vmem:[#allocation26_spill] sm:$0xff] %v7363_v63  ;;  %3624 = vmatpush.msra.mxu3 %v7351_v6  ;;  %3565 = vmatpush.msra.mxu0 %v7353_v56  ;;  %v7383_v6 = vld [vmem:[#allocation9 + $0x170] sm:$0xff]  ;;  %v7387_v56 = vld [vmem:[#allocation9 + $0x178] sm:$0xff] }
 0x4bd   :  { %9466 = vst [vmem:[#allocation27_spill] sm:$0xff] %v7365_v21  ;;  %3585 = vmatpush.msra.mxu1 %v7357_v57  ;;  %3605 = vmatpush.msra.mxu2 %v7359_v52  ;;  %v7389_v57 = vld [vmem:[#allocation9 + $0x140] sm:$0xff]  ;;  %v7393_v52 = vld [vmem:[#allocation9 + $0x148] sm:$0xff] }
 0x4be   :  { %9467 = vst [vmem:[#allocation28_spill] sm:$0xff] %v7369_v5  ;;  %3625 = vmatpush.msra.mxu3 %v7363_v63  ;;  %3566 = vmatpush.msra.mxu0 %v7365_v21  ;;  %v7395_v63 = vld [vmem:[#allocation9 + $0x150] sm:$0xff]  ;;  %v7399_v21 = vld [vmem:[#allocation9 + $0x158] sm:$0xff] }
 0x4bf   :  { %9468 = vst [vmem:[#allocation29_spill] sm:$0xff] %v7371_v55  ;;  %3586 = vmatpush.msra.mxu1 %v7369_v5  ;;  %3606 = vmatpush.msra.mxu2 %v7371_v55  ;;  %v7401_v5 = vld [vmem:[#allocation9 + $0x120] sm:$0xff]  ;;  %v7405_v55 = vld [vmem:[#allocation9 + $0x128] sm:$0xff] }
 0x4c0   :  { %9469 = vst [vmem:[#allocation30_spill] sm:$0xff] %v7375_v30  ;;  %3626 = vmatpush.msra.mxu3 %v7375_v30  ;;  %3567 = vmatpush.msra.mxu0 %v7377_v29  ;;  %v7407_v30 = vld [vmem:[#allocation9 + $0x130] sm:$0xff] }
 0x4c1   :  { %9470 = vst [vmem:[#allocation31_spill] sm:$0xff] %v7377_v29  ;;  %3587 = vmatpush.msra.mxu1 %v7381_v1  ;;  %3607 = vmatpush.msra.mxu2 %v7383_v6  ;;  %v7411_v29 = vld [vmem:[#allocation9 + $0x138] sm:$0xff] }
 0x4c2   :  { %9471 = vst [vmem:[#allocation32_spill] sm:$0xff] %v7381_v1  ;;  %3627 = vmatpush.msra.mxu3 %v7387_v56  ;;  %3568 = vmatpush.msra.mxu0 %v7389_v57  ;;  %v7413_v1 = vld [vmem:[#allocation9 + $0x100] sm:$0xff] }
 0x4c3   :  { %9472 = vst [vmem:[#allocation33_spill] sm:$0xff] %v7383_v6  ;;  %3588 = vmatpush.msra.mxu1 %v7393_v52  ;;  %3608 = vmatpush.msra.mxu2 %v7395_v63  ;;  %v7417_v6 = vld [vmem:[#allocation9 + $0x108] sm:$0xff] }
 0x4c4   :  { %9473 = vst [vmem:[#allocation34_spill] sm:$0xff] %v7387_v56  ;;  %3628 = vmatpush.msra.mxu3 %v7399_v21  ;;  %3569 = vmatpush.msra.mxu0 %v7401_v5  ;;  %v7419_v56 = vld [vmem:[#allocation9 + $0x110] sm:$0xff] }
 0x4c5   :  { %9474 = vst [vmem:[#allocation35_spill] sm:$0xff] %v7389_v57  ;;  %3589 = vmatpush.msra.mxu1 %v7405_v55  ;;  %3609 = vmatpush.msra.mxu2 %v7407_v30  ;;  %v7423_v57 = vld [vmem:[#allocation9 + $0x118] sm:$0xff] }
 0x4c6   :  { %9475 = vst [vmem:[#allocation36_spill] sm:$0xff] %v7393_v52  ;;  %3629 = vmatpush.msra.mxu3 %v7411_v29  ;;  %3570 = vmatpush.msra.mxu0 %v7413_v1  ;;  %v7474_v52 = vld [vmem:[#allocation9 + $0x60] sm:$0xff] }
 0x4c7   :  { %9476 = vst [vmem:[#allocation37_spill] sm:$0xff] %v7395_v63  ;;  %3590 = vmatpush.msra.mxu1 %v7417_v6  ;;  %3610 = vmatpush.msra.mxu2 %v7419_v56  ;;  %v7434_v63 = vld [vmem:[#allocation9 + $0xf0] sm:$0xff] }
 0x4c8   :  { %9477 = vst [vmem:[#allocation38_spill] sm:$0xff] %v7399_v21  ;;  %3630 = vmatpush.msra.mxu3 %v7423_v57  ;;  %v7432_v21 = vld [vmem:[#allocation9 + $0xe8] sm:$0xff] }
 0x4c9   :  { %9478 = vst [vmem:[#allocation39_spill] sm:$0xff] %v7401_v5  ;;  %v7430_v5 = vld [vmem:[#allocation9 + $0xe0] sm:$0xff]  ;;  %3591 = vmatpush.msra.mxu1 %v7432_v21  ;;  %3611 = vmatpush.msra.mxu2 %v7434_v63 }
 0x4ca   :  { %9479 = vst [vmem:[#allocation40_spill] sm:$0xff] %v7405_v55  ;;  %3571 = vmatpush.msra.mxu0 %v7430_v5  ;;  %v7458_v55 = vld [vmem:[#allocation9 + $0xb8] sm:$0xff] }
 0x4cb   :  { %9480 = vst [vmem:[#allocation41_spill] sm:$0xff] %v7407_v30  ;;  %v7438_v30 = vld [vmem:[#allocation9 + $0xf8] sm:$0xff] }
 0x4cc   :  { %9481 = vst [vmem:[#allocation42_spill] sm:$0xff] %v7411_v29  ;;  %v7440_v29 = vld [vmem:[#allocation9 + $0xc0] sm:$0xff]  ;;  %3631 = vmatpush.msra.mxu3 %v7438_v30 }
 0x4cd   :  { %9482 = vst [vmem:[#allocation43_spill] sm:$0xff] %v7413_v1  ;;  %v7442_v1 = vld [vmem:[#allocation9 + $0xc8] sm:$0xff]  ;;  %3572 = vmatpush.msra.mxu0 %v7440_v29 }
 0x4ce   :  { %9483 = vst [vmem:[#allocation44_spill] sm:$0xff] %v7417_v6  ;;  %v7450_v6 = vld [vmem:[#allocation9 + $0xa0] sm:$0xff]  ;;  %3592 = vmatpush.msra.mxu1 %v7442_v1 }
 0x4cf   :  { %9484 = vst [vmem:[#allocation45_spill] sm:$0xff] %v7419_v56  ;;  %v7448_v56 = vld [vmem:[#allocation9 + $0xd8] sm:$0xff]  ;;  %3573 = vmatpush.msra.mxu0 %v7450_v6 }
 0x4d0   :  { %9485 = vst [vmem:[#allocation46_spill] sm:$0xff] %v7423_v57  ;;  %v7446_v57 = vld [vmem:[#allocation9 + $0xd0] sm:$0xff]  ;;  %3632 = vmatpush.msra.mxu3 %v7448_v56 }
 0x4d1   :  { %9486 = vst [vmem:[#allocation47_spill] sm:$0xff] %v7430_v5  ;;  %v7456_v5 = vld [vmem:[#allocation9 + $0xb0] sm:$0xff]  ;;  %3612 = vmatpush.msra.mxu2 %v7446_v57 }
 0x4d2   :  { %9487 = vst [vmem:[#allocation48_spill] sm:$0xff] %v7432_v21  ;;  %v7454_v21 = vld [vmem:[#allocation9 + $0xa8] sm:$0xff]  ;;  %3633 = vmatpush.msra.mxu3 %v7458_v55 }
 0x4d3   :  { %9488 = vst [vmem:[#allocation49_spill] sm:$0xff] %v7434_v63  ;;  %v7464_v63 = vld [vmem:[#allocation9 + $0x88] sm:$0xff]  ;;  %3593 = vmatpush.msra.mxu1 %v7454_v21  ;;  %3613 = vmatpush.msra.mxu2 %v7456_v5 }
 0x4d4   :  { %9489 = vst [vmem:[#allocation50_spill] sm:$0xff] %v7438_v30  ;;  %v7462_v30 = vld [vmem:[#allocation9 + $0x80] sm:$0xff] }
 0x4d5   :  { %9490 = vst [vmem:[#allocation51_spill] sm:$0xff] %v7440_v29  ;;  %v7468_v29 = vld [vmem:[#allocation9 + $0x90] sm:$0xff]  ;;  %3574 = vmatpush.msra.mxu0 %v7462_v30  ;;  %3594 = vmatpush.msra.mxu1 %v7464_v63 }
 0x4d6   :  { %9491 = vst [vmem:[#allocation52_spill] sm:$0xff] %v7442_v1  ;;  %v7470_v1 = vld [vmem:[#allocation9 + $0x98] sm:$0xff]  ;;  %3614 = vmatpush.msra.mxu2 %v7468_v29 }
 0x4d7   :  { %9492 = vst [vmem:[#allocation53_spill] sm:$0xff] %v7446_v57  ;;  %v7476_v57 = vld [vmem:[#allocation9 + $0x68] sm:$0xff]  ;;  %3634 = vmatpush.msra.mxu3 %v7470_v1  ;;  %3575 = vmatpush.msra.mxu0 %v7474_v52 }
 0x4d8   :  { %9493 = vst [vmem:[#allocation54_spill] sm:$0xff] %v7448_v56  ;;  %v7480_v56 = vld [vmem:[#allocation9 + $0x70] sm:$0xff]  ;;  %3595 = vmatpush.msra.mxu1 %v7476_v57 }
 0x4d9   :  { %9494 = vst [vmem:[#allocation55_spill] sm:$0xff] %v7450_v6  ;;  %v7482_v6 = vld [vmem:[#allocation9 + $0x78] sm:$0xff]  ;;  %3615 = vmatpush.msra.mxu2 %v7480_v56 }
 0x4da   :  { %9495 = vst [vmem:[#allocation56_spill] sm:$0xff] %v7454_v21  ;;  %v7486_v21 = vld [vmem:[#allocation9 + $0x40] sm:$0xff]  ;;  %3635 = vmatpush.msra.mxu3 %v7482_v6 }
 0x4db   :  { %9496 = vst [vmem:[#allocation57_spill] sm:$0xff] %v7456_v5  ;;  %v7488_v5 = vld [vmem:[#allocation9 + $0x48] sm:$0xff]  ;;  %3576 = vmatpush.msra.mxu0 %v7486_v21 }
 0x4dc   :  { %9497 = vst [vmem:[#allocation58_spill] sm:$0xff] %v7458_v55  ;;  %v7492_v55 = vld [vmem:[#allocation9 + $0x50] sm:$0xff]  ;;  %3596 = vmatpush.msra.mxu1 %v7488_v5 }
 0x4dd   :  { %9498 = vst [vmem:[#allocation59_spill] sm:$0xff] %v7462_v30  ;;  %v7494_v30 = vld [vmem:[#allocation9 + $0x58] sm:$0xff]  ;;  %3616 = vmatpush.msra.mxu2 %v7492_v55 }
 0x4de   :  { %9499 = vst [vmem:[#allocation60_spill] sm:$0xff] %v7464_v63  ;;  %v7498_v63 = vld [vmem:[#allocation9 + $0x20] sm:$0xff]  ;;  %3636 = vmatpush.msra.mxu3 %v7494_v30 }
 0x4df   :  { %9500 = vst [vmem:[#allocation61_spill] sm:$0xff] %v7468_v29  ;;  %v7500_v29 = vld [vmem:[#allocation9 + $0x28] sm:$0xff]  ;;  %3577 = vmatpush.msra.mxu0 %v7498_v63 }
 0x4e0   :  { %9501 = vst [vmem:[#allocation62_spill] sm:$0xff] %v7470_v1  ;;  %v7504_v1 = vld [vmem:[#allocation9 + $0x30] sm:$0xff]  ;;  %3597 = vmatpush.msra.mxu1 %v7500_v29 }
 0x4e1   :  { %9502 = vst [vmem:[#allocation63_spill] sm:$0xff] %v7474_v52  ;;  %v7506_v52 = vld [vmem:[#allocation9 + $0x38] sm:$0xff]  ;;  %3617 = vmatpush.msra.mxu2 %v7504_v1 }
 0x4e2   :  { %9503 = vst [vmem:[#allocation64_spill] sm:$0xff] %v7476_v57  ;;  %v7510_v57 = vld [vmem:[#allocation9] sm:$0xff]  ;;  %3637 = vmatpush.msra.mxu3 %v7506_v52 }
 0x4e3   :  { %9504 = vst [vmem:[#allocation65_spill] sm:$0xff] %v7480_v56  ;;  %v7512_v56 = vld [vmem:[#allocation9 + $0x8] sm:$0xff]  ;;  %3578 = vmatpush.msra.mxu0 %v7510_v57 }
 0x4e4   :  { %9505 = vst [vmem:[#allocation66_spill] sm:$0xff] %v7482_v6  ;;  %v7516_v6 = vld [vmem:[#allocation9 + $0x10] sm:$0xff]  ;;  %3598 = vmatpush.msra.mxu1 %v7512_v56 }
 0x4e5   :  { %9506 = vst [vmem:[#allocation67_spill] sm:$0xff] %v7486_v21  ;;  %v7518_v21 = vld [vmem:[#allocation9 + $0x18] sm:$0xff]  ;;  %3618 = vmatpush.msra.mxu2 %v7516_v6 }
 0x4e6   :  { %9507 = vst [vmem:[#allocation68_spill] sm:$0xff] %v7488_v5  ;;  %v7528_v5 = vld [vmem:[#allocation8 + $0x1f0] sm:$0xff]  ;;  %3638 = vmatpush.msra.mxu3 %v7518_v21 }
 0x4e7   :  { %9508 = vst [vmem:[#allocation69_spill] sm:$0xff] %v7492_v55  ;;  %v7526_v55 = vld [vmem:[#allocation8 + $0x1e8] sm:$0xff]  ;;  %3683 = vmatpush.msrb.mxu2 %v7528_v5 }
 0x4e8   :  { %9509 = vst [vmem:[#allocation70_spill] sm:$0xff] %v7494_v30  ;;  %v7524_v30 = vld [vmem:[#allocation8 + $0x1e0] sm:$0xff]  ;;  %3663 = vmatpush.msrb.mxu1 %v7526_v55 }
 0x4e9   :  { %9510 = vst [vmem:[#allocation71_spill] sm:$0xff] %v7498_v63  ;;  %3643 = vmatpush.msrb.mxu0 %v7524_v30  ;;  %v7614_v63 = vld [vmem:[#allocation3] ss:$0 sm:$0xff] }
 0x4ea   :  { %9511 = vst [vmem:[#allocation72_spill] sm:$0xff] %v7500_v29  ;;  %v7532_v29 = vld [vmem:[#allocation8 + $0x1f8] sm:$0xff] }
 0x4eb   :  { %9512 = vst [vmem:[#allocation73_spill] sm:$0xff] %v7504_v1  ;;  %3703 = vmatpush.msrb.mxu3 %v7532_v29  ;;  %v7544_v1 = vld [vmem:[#allocation8 + $0x1d8] sm:$0xff] }
 0x4ec   :  { %9513 = vst [vmem:[#allocation74_spill] sm:$0xff] %v7506_v52  ;;  %v7536_v52 = vld [vmem:[#allocation8 + $0x1c0] sm:$0xff] }
 0x4ed   :  { %9514 = vst [vmem:[#allocation75_spill] sm:$0xff] %v7510_v57  ;;  %v7538_v57 = vld [vmem:[#allocation8 + $0x1c8] sm:$0xff]  ;;  %3644 = vmatpush.msrb.mxu0 %v7536_v52  ;;  %3704 = vmatpush.msrb.mxu3 %v7544_v1 }
 0x4ee   :  { %9515 = vst [vmem:[#allocation76_spill] sm:$0xff] %v7512_v56  ;;  %v7540_v56 = vld [vmem:[#allocation8 + $0x1d0] sm:$0xff]  ;;  %3664 = vmatpush.msrb.mxu1 %v7538_v57 }
 0x4ef   :  { %9516 = vst [vmem:[#allocation77_spill] sm:$0xff] %v7516_v6  ;;  %3684 = vmatpush.msrb.mxu2 %v7540_v56  ;;  %v7556_v6 = vld [vmem:[#allocation8 + $0x1b8] sm:$0xff] }
 0x4f0   :  { %9517 = vst [vmem:[#allocation78_spill] sm:$0xff] %v7518_v21  ;;  %v7548_v21 = vld [vmem:[#allocation8 + $0x1a0] sm:$0xff]  ;;  %3705 = vmatpush.msrb.mxu3 %v7556_v6 }
 0x4f1   :  { %9518 = vst [vmem:[#allocation79_spill] sm:$0xff] %v7524_v30  ;;  %v7550_v30 = vld [vmem:[#allocation8 + $0x1a8] sm:$0xff]  ;;  %3645 = vmatpush.msrb.mxu0 %v7548_v21 }
 0x4f2   :  { %9519 = vst [vmem:[#allocation80_spill] sm:$0xff] %v7526_v55  ;;  %v7552_v55 = vld [vmem:[#allocation8 + $0x1b0] sm:$0xff]  ;;  %3665 = vmatpush.msrb.mxu1 %v7550_v30 }
 0x4f3   :  { %9520 = vst [vmem:[#allocation81_spill] sm:$0xff] %v7528_v5  ;;  %3685 = vmatpush.msrb.mxu2 %v7552_v55  ;;  %v7568_v5 = vld [vmem:[#allocation8 + $0x198] sm:$0xff] }
 0x4f4   :  { %9521 = vst [vmem:[#allocation84_spill] sm:$0xff] %v7532_v29  ;;  %v7560_v29 = vld [vmem:[#allocation8 + $0x180] sm:$0xff]  ;;  %3706 = vmatpush.msrb.mxu3 %v7568_v5 }
 0x4f5   :  { %9522 = vst [vmem:[#allocation85_spill] sm:$0xff] %v7536_v52  ;;  %v7562_v52 = vld [vmem:[#allocation8 + $0x188] sm:$0xff]  ;;  %3646 = vmatpush.msrb.mxu0 %v7560_v29 }
 0x4f6   :  { %9523 = vst [vmem:[#allocation86_spill] sm:$0xff] %v7538_v57  ;;  %v7564_v57 = vld [vmem:[#allocation8 + $0x190] sm:$0xff]  ;;  %3666 = vmatpush.msrb.mxu1 %v7562_v52 }
 0x4f7   :  { %9524 = vst [vmem:[#allocation87_spill] sm:$0xff] %v7540_v56  ;;  %3686 = vmatpush.msrb.mxu2 %v7564_v57  ;;  %v7580_v56 = vld [vmem:[#allocation8 + $0x178] sm:$0xff] }
 0x4f8   :  { %9525 = vst [vmem:[#allocation88_spill] sm:$0xff] %v7544_v1  ;;  %v7572_v1 = vld [vmem:[#allocation8 + $0x160] sm:$0xff]  ;;  %3707 = vmatpush.msrb.mxu3 %v7580_v56 }
 0x4f9   :  { %9526 = vst [vmem:[#allocation89_spill] sm:$0xff] %v7548_v21  ;;  %v7574_v21 = vld [vmem:[#allocation8 + $0x168] sm:$0xff]  ;;  %3647 = vmatpush.msrb.mxu0 %v7572_v1 }
 0x4fa   :  { %9527 = vst [vmem:[#allocation90_spill] sm:$0xff] %v7550_v30  ;;  %v7576_v30 = vld [vmem:[#allocation8 + $0x170] sm:$0xff]  ;;  %3667 = vmatpush.msrb.mxu1 %v7574_v21 }
 0x4fb   :  { %9528 = vst [vmem:[#allocation91_spill] sm:$0xff] %v7552_v55  ;;  %3687 = vmatpush.msrb.mxu2 %v7576_v30  ;;  %v7592_v55 = vld [vmem:[#allocation8 + $0x158] sm:$0xff] }
 0x4fc   :  { %9529 = vst [vmem:[#allocation92_spill] sm:$0xff] %v7556_v6  ;;  %v7584_v6 = vld [vmem:[#allocation8 + $0x140] sm:$0xff]  ;;  %3708 = vmatpush.msrb.mxu3 %v7592_v55 }
 0x4fd   :  { %9530 = vst [vmem:[#allocation93_spill] sm:$0xff] %v7560_v29  ;;  %v7586_v29 = vld [vmem:[#allocation8 + $0x148] sm:$0xff]  ;;  %3648 = vmatpush.msrb.mxu0 %v7584_v6 }
 0x4fe   :  { %9531 = vst [vmem:[#allocation94_spill] sm:$0xff] %v7562_v52  ;;  %v7588_v52 = vld [vmem:[#allocation8 + $0x150] sm:$0xff]  ;;  %3668 = vmatpush.msrb.mxu1 %v7586_v29 }
 0x4ff   :  { %9532 = vst [vmem:[#allocation95_spill] sm:$0xff] %v7564_v57  ;;  %3688 = vmatpush.msrb.mxu2 %v7588_v52  ;;  %v7604_v57 = vld [vmem:[#allocation8 + $0x138] sm:$0xff] }
 0x500   :  { %9533 = vst [vmem:[#allocation96_spill] sm:$0xff] %v7568_v5  ;;  %v7596_v5 = vld [vmem:[#allocation8 + $0x120] sm:$0xff]  ;;  %3709 = vmatpush.msrb.mxu3 %v7604_v57 }
 0x501   :  { %9534 = vst [vmem:[#allocation97_spill] sm:$0xff] %v7572_v1  ;;  %v7598_v1 = vld [vmem:[#allocation8 + $0x128] sm:$0xff]  ;;  %3649 = vmatpush.msrb.mxu0 %v7596_v5 }
 0x502   :  { %9535 = vst [vmem:[#allocation100_spill] sm:$0xff] %v7574_v21  ;;  %v7600_v21 = vld [vmem:[#allocation8 + $0x130] sm:$0xff]  ;;  %3669 = vmatpush.msrb.mxu1 %v7598_v1 }
 0x503   :  { %9536 = vst [vmem:[#allocation101_spill] sm:$0xff] %v7576_v30  ;;  %3689 = vmatpush.msrb.mxu2 %v7600_v21 }
 0x504   :  { %9537 = vst [vmem:[#allocation102_spill] sm:$0xff] %v7580_v56  ;;  %v7612_v56 = vld [vmem:[#allocation8 + $0x110] sm:$0xff] }
 0x505   :  { %9538 = vst [vmem:[#allocation105_spill] sm:$0xff] %v7584_v6  ;;  %v7608_v6 = vld [vmem:[#allocation8 + $0x100] sm:$0xff]  ;;  %3690 = vmatpush.msrb.mxu2 %v7612_v56 }
 0x506   :  { %9539 = vst [vmem:[#allocation106_spill] sm:$0xff] %v7586_v29  ;;  %v7610_v29 = vld [vmem:[#allocation8 + $0x108] sm:$0xff]  ;;  %3650 = vmatpush.msrb.mxu0 %v7608_v6 }
 0x507   :  { %9540 = vst [vmem:[#allocation107_spill] sm:$0xff] %v7588_v52  ;;  %3670 = vmatpush.msrb.mxu1 %v7610_v29  ;;  %v7627_v52 = vld [vmem:[#allocation8 + $0xf0] sm:$0xff] }
 0x508   :  { %9541 = vst [vmem:[#allocation108_spill] sm:$0xff] %v7592_v55  ;;  %v7619_v55 = vld [vmem:[#allocation8 + $0x118] sm:$0xff]  ;;  %3691 = vmatpush.msrb.mxu2 %v7627_v52 }
 0x509   :  { %9542 = vst [vmem:[#allocation109_spill] sm:$0xff] %v7596_v5  ;;  %v7625_v5 = vld [vmem:[#allocation8 + $0xe8] sm:$0xff]  ;;  %3710 = vmatpush.msrb.mxu3 %v7619_v55 }
 0x50a   :  { %9543 = vst [vmem:[#allocation110_spill] sm:$0xff] %v7598_v1  ;;  %v7623_v1 = vld [vmem:[#allocation8 + $0xe0] sm:$0xff]  ;;  %3671 = vmatpush.msrb.mxu1 %v7625_v5 }
 0x50b   :  { %9544 = vst [vmem:[#allocation111_spill] sm:$0xff] %v7600_v21  ;;  %v2786_v30 = vpop.xlane.xlu2 %2785  ;;  %3651 = vmatpush.msrb.mxu0 %v7623_v1 }
 0x50c   :  { %9545 = vst [vmem:[#allocation112_spill] sm:$0xff] %v7604_v57  ;;  %v2787_v4 = vadd.f32 %v7614_v63, %v2786_v30  ;;  %v7635_v30 = vld [vmem:[#allocation8 + $0xf8] sm:$0xff]  ;;  %v7643_v57 = vld [vmem:[#allocation8 + $0xd0] sm:$0xff] }
 0x50d   :  { %9546 = vst [vmem:[#allocation113_spill] sm:$0xff] %v7608_v6  ;;  %v7641_v6 = vld [vmem:[#allocation8 + $0xc8] sm:$0xff]  ;;  %3711 = vmatpush.msrb.mxu3 %v7635_v30  ;;  %3692 = vmatpush.msrb.mxu2 %v7643_v57 }
 0x50e   :  { %9547 = vst [vmem:[#allocation114_spill] sm:$0xff] %v7610_v29  ;;  %v7639_v29 = vld [vmem:[#allocation8 + $0xc0] sm:$0xff]  ;;  %3672 = vmatpush.msrb.mxu1 %v7641_v6 }
 0x50f   :  { %9548 = vst [vmem:[#allocation115_spill] sm:$0xff] %v7612_v56  ;;  %v3121_v21 = vpop.f32.mrf.mxu1  ;;  %3652 = vmatpush.msrb.mxu0 %v7639_v29  ;;  %v7659_v56 = vld [vmem:[#allocation8 + $0xb8] sm:$0xff] }
 0x510   :  { %9549 = vst [vmem:[#allocation116_spill] sm:$0xff] %v7614_v63  ;;  %v3101_v63 = vpop.f32.mrf.mxu0 }
 0x511   :  { %9550 = vst [vmem:[#allocation117_spill] sm:$0xff] %v7619_v55  ;;  %v7655_v55 = vld [vmem:[#allocation8 + $0xb0] sm:$0xff] }
 0x512   :  { %9551 = vst [vmem:[#allocation120_spill] sm:$0xff] %v7623_v1  ;;  %v7651_v1 = vld [vmem:[#allocation8 + $0xa0] sm:$0xff]  ;;  %3693 = vmatpush.msrb.mxu2 %v7655_v55 }
 0x513   :  { %9552 = vst [vmem:[#allocation121_spill] sm:$0xff] %v7625_v5  ;;  %v7653_v5 = vld [vmem:[#allocation8 + $0xa8] sm:$0xff]  ;;  %3653 = vmatpush.msrb.mxu0 %v7651_v1 }
 0x514   :  { %9553 = vst [vmem:[#allocation122_spill] sm:$0xff] %v7627_v52  ;;  %3673 = vmatpush.msrb.mxu1 %v7653_v5  ;;  %v7671_v52 = vld [vmem:[#allocation8 + $0x98] sm:$0xff] }
 0x515   :  { %2788 = vst.msk [vmem:[%s7972_s9 + $0x20] sm:$0xff] %vm871_vm0, %v2787_v4  ;;  %v7647_v4 = vld [vmem:[#allocation8 + $0xd8] sm:$0xff] }
 0x516   :  { %9554 = vst [vmem:[#allocation125_spill] sm:$0xff] %v7635_v30  ;;  %3712 = vmatpush.msrb.mxu3 %v7647_v4  ;;  %v7663_v30 = vld [vmem:[#allocation8 + $0x80] sm:$0xff] }
 0x517   :  { %9555 = vst [vmem:[#allocation127_spill] sm:$0xff] %v7639_v29  ;;  %v7665_v29 = vld [vmem:[#allocation8 + $0x88] sm:$0xff]  ;;  %3654 = vmatpush.msrb.mxu0 %v7663_v30 }
 0x518   :  { %9556 = vst [vmem:[#allocation128_spill] sm:$0xff] %v7641_v6  ;;  %v7667_v6 = vld [vmem:[#allocation8 + $0x90] sm:$0xff]  ;;  %3713 = vmatpush.msrb.mxu3 %v7659_v56  ;;  %3674 = vmatpush.msrb.mxu1 %v7665_v29 }
 0x519   :  { %9557 = vst [vmem:[#allocation129_spill] sm:$0xff] %v7643_v57  ;;  %v3141_v57 = vpop.f32.mrf.mxu2  ;;  %3694 = vmatpush.msrb.mxu2 %v7667_v6 }
 0x51a   :  { %9558 = vst [vmem:[#allocation130_spill] sm:$0xff] %v7647_v4  ;;  %v7675_v4 = vld [vmem:[#allocation8 + $0x60] sm:$0xff]  ;;  %3714 = vmatpush.msrb.mxu3 %v7671_v52  ;;  %v3201_v43 = vpop.f32.mrf.mxu1 }
 0x51b   :  { %9559 = vst [vmem:[#allocation131_spill] sm:$0xff] %v7651_v1  ;;  %v7677_v1 = vld [vmem:[#allocation8 + $0x68] sm:$0xff]  ;;  %3655 = vmatpush.msrb.mxu0 %v7675_v4 }
 0x51c   :  { %9560 = vst [vmem:[#allocation133_spill] sm:$0xff] %v7653_v5  ;;  %v7679_v5 = vld [vmem:[#allocation8 + $0x70] sm:$0xff]  ;;  %3675 = vmatpush.msrb.mxu1 %v7677_v1 }
 0x51d   :  { %9561 = vst [vmem:[#allocation134_spill] sm:$0xff] %v7655_v55  ;;  %v7683_v55 = vld [vmem:[#allocation8 + $0x78] sm:$0xff]  ;;  %3695 = vmatpush.msrb.mxu2 %v7679_v5 }
 0x51e   :  { %9562 = vst [vmem:[#allocation135_spill] sm:$0xff] %v7659_v56  ;;  %v3161_v56 = vpop.f32.mrf.mxu3  ;;  %3715 = vmatpush.msrb.mxu3 %v7683_v55 }
 0x51f   :  { %9563 = vst [vmem:[#allocation138_spill] sm:$0xff] %v7663_v30  ;;  %v7687_v30 = vld [vmem:[#allocation8 + $0x40] sm:$0xff]  ;;  %3696 = vmatpush.msrb.mxu2 %v7691_v60 }
 0x520   :  { %9564 = vst [vmem:[#allocation139_spill] sm:$0xff] %v7665_v29  ;;  %v7689_v29 = vld [vmem:[#allocation8 + $0x48] sm:$0xff]  ;;  %3656 = vmatpush.msrb.mxu0 %v7687_v30 }
 0x521   :  { %9565 = vst [vmem:[#allocation140_spill] sm:$0xff] %v7667_v6  ;;  %v7695_v6 = vld [vmem:[#allocation8 + $0x58] sm:$0xff]  ;;  %3676 = vmatpush.msrb.mxu1 %v7689_v29  ;;  %3697 = vmatpush.msrb.mxu2 %v7703_v50 }
 0x522   :  { %9566 = vst [vmem:[#allocation143_spill] sm:$0xff] %v7671_v52  ;;  %v3181_v52 = vpop.f32.mrf.mxu0  ;;  %3716 = vmatpush.msrb.mxu3 %v7695_v6 }
 0x523   :  { %9567 = vst [vmem:[#allocation144_spill] sm:$0xff] %v7675_v4  ;;  %v7699_v4 = vld [vmem:[#allocation8 + $0x20] sm:$0xff]  ;;  %v3182_v47 = vadd.f32 %v3181_v52, %v3101_v63  ;;  %v7720_v52 = vld [vmem:[#allocation8 + $0x18] sm:$0xff]  ;;  %3698 = vmatpush.msrb.mxu2 %v7715_v42 }
 0x524   :  { %9568 = vst [vmem:[#allocation145_spill] sm:$0xff] %v7677_v1  ;;  %v7701_v1 = vld [vmem:[#allocation8 + $0x28] sm:$0xff]  ;;  %3657 = vmatpush.msrb.mxu0 %v7699_v4 }
 0x525   :  { %9569 = vst [vmem:[#allocation146_spill] sm:$0xff] %v7679_v5  ;;  %v3202_v5 = vadd.f32 %v3201_v43, %v3121_v21  ;;  %3677 = vmatpush.msrb.mxu1 %v7701_v1  ;;  %v3244_v63 = vadd.f32 %v3182_v47, %v9434_v44  ;;  %v3221_v21 = vpop.f32.mrf.mxu2 }
 0x526   :  { %9570 = vst [vmem:[#allocation147_spill] sm:$0xff] %v7683_v55  ;;  %v7707_v55 = vld [vmem:[#allocation8 + $0x38] sm:$0xff]  ;;  %v3222_v47 = vadd.f32 %v3221_v21, %v3141_v57  ;;  %v3241_v44 = vpop.f32.mrf.mxu3 }
 0x527   :  { %9571 = vst [vmem:[#allocation148_spill] sm:$0xff] %v7687_v30  ;;  %v7713_v30 = vld [vmem:[#allocation8 + $0x8] sm:$0xff]  ;;  %3717 = vmatpush.msrb.mxu3 %v7707_v55  ;;  %v3245_v43 = vadd.f32 %v3202_v5, %v9435_v48  ;;  %4352 = vtanh.f32 %v3244_v63  ;;  %v3242_v50 = vadd.f32 %v3241_v44, %v3161_v56  ;;  %v9583_v56 = vld [vmem:[#allocation168_spill] sm:$0xff] }
 0x528   :  { %9572 = vst [vmem:[#allocation149_spill] sm:$0xff] %v7689_v29  ;;  %v7711_v29 = vld [vmem:[#allocation8] sm:$0xff]  ;;  %3678 = vmatpush.msrb.mxu1 %v7713_v30 }
 0x529   :  { %9573 = vst [vmem:[#allocation150_spill] sm:$0xff] %v7695_v6  ;;  %3658 = vmatpush.msrb.mxu0 %v7711_v29  ;;  %3718 = vmatpush.msrb.mxu3 %v7720_v52  ;;  %4354 = vtanh.f32 %v3245_v43 }
 0x52a   :  { %9574 = vst [vmem:[#allocation151_spill] sm:$0xff] %v7699_v4  ;;  %v3247_v4 = vadd.f32 %v3242_v50, %v5465_v45  ;;  %v215_v50 = vadd.f32 %v9583_v56, %v5269_v24  ;;  %v9586_v56 = vld [vmem:[#allocation171_spill] sm:$0xff] }
 0x52b   :  { %9575 = vst [vmem:[#allocation152_spill] sm:$0xff] %v7701_v1 }
 0x52c   :  { %9577 = vst [vmem:[#allocation154_spill] sm:$0xff] %v7707_v55  ;;  %v3246_v55 = vadd.f32 %v3222_v47, %v5461_v41 }
 0x52d   :  { %9578 = vst [vmem:[#allocation155_spill] sm:$0xff] %v7711_v29  ;;  %v4353_v1 = vpop.eup %4352 }
 0x52e   :  { %9579 = vst [vmem:[#allocation82_spill] sm:$0xff] %v7713_v30  ;;  %4356 = vtanh.f32 %v3246_v55  ;;  %v3252_v48 = vmul.f32 0.5, %v4353_v1  ;;  %v9584_v55 = vld [vmem:[#allocation169_spill] sm:$0xff] }
 0x52f   :  { %9581 = vst [vmem:[#allocation98_spill] sm:$0xff] %v7720_v52  ;;  %v4355_v5 = vpop.eup %4354  ;;  %4358 = vtanh.f32 %v3247_v4  ;;  %v256_v1 = vadd.f32 %v9584_v55, %v5271_v25  ;;  %v338_v55 = vadd.f32 %v9586_v56, %v5299_v36  ;;  %v3804_v56 = vld [vmem:[#allocation6 + $0x1a8] sm:$0xff]  ;;  %v3805_v36 = vld [vmem:[#allocation6 + $0x1b0] sm:$0xff] }
 0x530   :  { %v3254_v29 = vmul.f32 0.5, %v4355_v5  ;;  %v3253_v63 = vadd.f32 0.5, %v3252_v48 }
 0x532   :  { %v3255_v30 = vadd.f32 0.5, %v3254_v29 }
 0x533   :  { %v3353_v21 = vpop.f32.mrf.mxu0 }
 0x534   :  { %v4357_v42 = vpop.eup %4356  ;;  %v3258_v52 = vmul.f32 %v3255_v30, %v7149_v34  ;;  %v3416_v29 = vadd.f32 %v3353_v21, %v215_v50  ;;  %v3373_v4 = vpop.f32.mrf.mxu1  ;;  %v3812_v30 = vld [vmem:[#allocation6 + $0x1e8] sm:$0xff] }
 0x535   :  { %v3259_v43 = vmul.f32 %v4357_v42, %v3253_v63  ;;  %v4359_v6 = vpop.eup %4358  ;;  %v3417_v47 = vadd.f32 %v3373_v4, %v256_v1  ;;  %v3811_v42 = vld [vmem:[#allocation6 + $0x1e0] sm:$0xff]  ;;  %v3813_v63 = vld [vmem:[#allocation6 + $0x1f0] sm:$0xff]  ;;  %v3808_v1 = vld [vmem:[#allocation6 + $0x1c8] sm:$0xff] }
 0x536   :  { %v3256_v44 = vmul.f32 0.5, %v4359_v6  ;;  %v3809_v4 = vld [vmem:[#allocation6 + $0x1d0] sm:$0xff] }
 0x537   :  { %v7730_v57 = vadd.f32 %v3259_v43, %v3258_v52  ;;  %v9585_v52 = vld [vmem:[#allocation170_spill] sm:$0xff]  ;;  %v3814_v43 = vld [vmem:[#allocation6 + $0x1f8] sm:$0xff] }
 0x538   :  { %v3257_v48 = vadd.f32 0.5, %v3256_v44  ;;  %v297_v6 = vadd.f32 %v9585_v52, %v5295_v35  ;;  %v3807_v44 = vld [vmem:[#allocation6 + $0x1c0] sm:$0xff] }
 0x539   :  { %9582 = vst [vmem:[#allocation99_spill] sm:$0xff] %v7730_v57  ;;  %4360 = vtanh.f32 %v7730_v57  ;;  %v3803_v52 = vld [vmem:[#allocation6 + $0x1a0] sm:$0xff] }
 0x53a   :  { %4362 = vtanh.f32 %v3416_v29  ;;  %v3393_v50 = vpop.f32.mrf.mxu2 }
 0x53b   :  { %4364 = vtanh.f32 %v3417_v47  ;;  %v3418_v21 = vadd.f32 %v3393_v50, %v297_v6  ;;  %v3413_v29 = vpop.f32.mrf.mxu3  ;;  %v3797_v6 = vld [vmem:[#allocation6 + $0x170] sm:$0xff]  ;;  %v9620_v50 = vld [vmem:[#allocation35_spill] sm:$0xff] }
 0x53d   :  { %4366 = vtanh.f32 %v3418_v21  ;;  %v9623_v21 = vld [vmem:[#allocation38_spill] sm:$0xff] }
 0x53f   :  { %v4361_v5 = vpop.eup %4360 }
 0x540   :  { %v3262_v34 = vmul.f32 %v4361_v5, %v3257_v48  ;;  %v4363_v47 = vpop.eup %4362  ;;  %v3419_v5 = vadd.f32 %v3413_v29, %v338_v55  ;;  %v9624_v29 = vld [vmem:[#allocation39_spill] sm:$0xff] }
 0x541   :  { %v4365_v57 = vpop.eup %4364  ;;  %v3424_v35 = vmul.f32 0.5, %v4363_v47  ;;  %v9627_v47 = vld [vmem:[#allocation42_spill] sm:$0xff] }
 0x542   :  { %3579 = vmatmul.f32.vlgmr.msra.gmra.mxu0 %v3262_v34  ;;  %3599 = vmatmul.f32.vlgmr.msra.gmra.mxu1 %v3262_v34  ;;  %v3263_v48 = vmul.f32 %v7163_v54, %v3262_v34  ;;  %v3426_v25 = vmul.f32 0.5, %v4365_v57  ;;  %v3800_v54 = vld [vmem:[#allocation6 + $0x188] sm:$0xff]  ;;  %4368 = vtanh.f32 %v3419_v5 }
 0x543   :  { %3619 = vmatmul.f32.vlgmr.msra.gmra.mxu2 %v3262_v34  ;;  %3639 = vmatmul.f32.vlgmr.msra.gmra.mxu3 %v3262_v34  ;;  %v3801_v34 = vld [vmem:[#allocation6 + $0x190] sm:$0xff]  ;;  %v4367_v57 = vpop.eup %4366  ;;  %v9628_v5 = vld [vmem:[#allocation43_spill] sm:$0xff] }
 0x544   :  { %3815 = vmatpush.msra.mxu0 %v3811_v42  ;;  %3835 = vmatpush.msra.mxu1 %v3812_v30  ;;  %v3799_v42 = vld [vmem:[#allocation6 + $0x180] sm:$0xff]  ;;  %v3427_v30 = vadd.f32 0.5, %v3426_v25 }
 0x545   :  { %3855 = vmatpush.msra.mxu2 %v3813_v63  ;;  %3875 = vmatpush.msra.mxu3 %v3814_v43  ;;  %v3425_v63 = vadd.f32 0.5, %v3424_v35 }
 0x546   :  { %3816 = vmatpush.msra.mxu0 %v3807_v44  ;;  %3836 = vmatpush.msra.mxu1 %v3808_v1  ;;  %v3430_v43 = vmul.f32 %v3427_v30, %v7153_v49  ;;  %v9621_v44 = vld [vmem:[#allocation36_spill] sm:$0xff]  ;;  %v9622_v1 = vld [vmem:[#allocation37_spill] sm:$0xff] }
 0x547   :  { %3856 = vmatpush.msra.mxu2 %v3809_v4  ;;  %3876 = vmatpush.msra.mxu3 %v7158_v13  ;;  %v3793_v13 = vld [vmem:[#allocation6 + $0x150] sm:$0xff]  ;;  %v3431_v55 = vmul.f32 %v4367_v57, %v3425_v63  ;;  %v9634_v30 = vld [vmem:[#allocation49_spill] sm:$0xff]  ;;  %v9636_v63 = vld [vmem:[#allocation51_spill] sm:$0xff] }
 0x548   :  { %3264 = vadd.xlane.f32.xlu2 %v3263_v48  ;;  %3817 = vmatpush.msra.mxu0 %v3803_v52  ;;  %v4369_v25 = vpop.eup %4368  ;;  %v9625_v4 = vld [vmem:[#allocation40_spill] sm:$0xff]  ;;  %v9626_v48 = vld [vmem:[#allocation41_spill] sm:$0xff] }
 0x549   :  { %3837 = vmatpush.msra.mxu1 %v3804_v56  ;;  %3857 = vmatpush.msra.mxu2 %v3805_v36  ;;  %v7750_v35 = vadd.f32 %v3431_v55, %v3430_v43  ;;  %v3428_v36 = vmul.f32 0.5, %v4369_v25  ;;  %v9629_v52 = vld [vmem:[#allocation44_spill] sm:$0xff]  ;;  %v9630_v56 = vld [vmem:[#allocation45_spill] sm:$0xff]  ;;  %v9639_v43 = vld [vmem:[#allocation54_spill] sm:$0xff] }
 0x54a   :  { %3877 = vmatpush.msra.mxu3 %v7172_v51  ;;  %3818 = vmatpush.msra.mxu0 %v3799_v42  ;;  %v9631_v42 = vld [vmem:[#allocation46_spill] sm:$0xff]  ;;  %v9637_v57 = vld [vmem:[#allocation52_spill] sm:$0xff]  ;;  %v9640_v55 = vld [vmem:[#allocation55_spill] sm:$0xff] }
 0x54b   :  { %3838 = vmatpush.msra.mxu1 %v3800_v54  ;;  %3858 = vmatpush.msra.mxu2 %v3801_v34  ;;  %4370 = vtanh.f32 %v7750_v35  ;;  %v3429_v49 = vadd.f32 0.5, %v3428_v36  ;;  %v9632_v54 = vld [vmem:[#allocation47_spill] sm:$0xff]  ;;  %v9633_v34 = vld [vmem:[#allocation48_spill] sm:$0xff]  ;;  %v9642_v36 = vld [vmem:[#allocation57_spill] sm:$0xff] }
 0x54c   :  { %3878 = vmatpush.msra.mxu3 %v7177_v16  ;;  %3819 = vmatpush.msra.mxu0 %v7185_v22  ;;  %v9587_v22 = vld [vmem:[#allocation183_spill] sm:$0xff]  ;;  %v9641_v25 = vld [vmem:[#allocation56_spill] sm:$0xff] }
 0x54d   :  { %3839 = vmatpush.msra.mxu1 %v7189_v11  ;;  %3859 = vmatpush.msra.mxu2 %v3797_v6  ;;  %v9588_v11 = vld [vmem:[#allocation126_spill] sm:$0xff] }
 0x54e   :  { %3879 = vmatpush.msra.mxu3 %v7193_v18  ;;  %3820 = vmatpush.msra.mxu0 %v7195_v0  ;;  %v9589_v18 = vld [vmem:[#allocation123_spill] sm:$0xff]  ;;  %v9590_v0 = vld [vmem:[#allocation124_spill] sm:$0xff]  ;;  %v9635_v6 = vld [vmem:[#allocation50_spill] sm:$0xff] }
 0x54f   :  { %3840 = vmatpush.msra.mxu1 %v7199_v15  ;;  %3860 = vmatpush.msra.mxu2 %v3793_v13  ;;  %v9591_v15 = vld [vmem:[#allocation136_spill] sm:$0xff]  ;;  %v9638_v13 = vld [vmem:[#allocation53_spill] sm:$0xff] }
 0x550   :  { %3880 = vmatpush.msra.mxu3 %v7203_v58  ;;  %3821 = vmatpush.msra.mxu0 %v7205_v46  ;;  %v9592_v58 = vld [vmem:[#allocation137_spill] sm:$0xff]  ;;  %v9593_v46 = vld [vmem:[#allocation103_spill] sm:$0xff] }
 0x551   :  { %3841 = vmatpush.msra.mxu1 %v7209_v31  ;;  %3861 = vmatpush.msra.mxu2 %v7211_v8  ;;  %v4371_v51 = vpop.eup %4370  ;;  %v9594_v31 = vld [vmem:[#allocation141_spill] sm:$0xff]  ;;  %v9595_v8 = vld [vmem:[#allocation142_spill] sm:$0xff] }
 0x552   :  { %3881 = vmatpush.msra.mxu3 %v7215_v61  ;;  %3822 = vmatpush.msra.mxu0 %v7217_v37  ;;  %v3434_v16 = vmul.f32 %v4371_v51, %v3429_v49  ;;  %v9596_v61 = vld [vmem:[#allocation156_spill] sm:$0xff]  ;;  %v9597_v37 = vld [vmem:[#allocation157_spill] sm:$0xff]  ;;  %v9643_v49 = vld [vmem:[#allocation58_spill] sm:$0xff] }
 0x553   :  { %3842 = vmatpush.msra.mxu1 %v7221_v12  ;;  %3862 = vmatpush.msra.mxu2 %v7223_v28  ;;  %v9598_v12 = vld [vmem:[#allocation104_spill] sm:$0xff]  ;;  %v9599_v28 = vld [vmem:[#allocation118_spill] sm:$0xff]  ;;  %v9644_v51 = vld [vmem:[#allocation59_spill] sm:$0xff] }
 0x554   :  { %3882 = vmatpush.msra.mxu3 %v7227_v3  ;;  %3823 = vmatpush.msra.mxu0 %v7229_v23  ;;  %v9600_v3 = vld [vmem:[#allocation119_spill] sm:$0xff]  ;;  %v9601_v23 = vld [vmem:[#allocation16_spill] sm:$0xff] }
 0x555   :  { %3843 = vmatpush.msra.mxu1 %v7233_v19  ;;  %3863 = vmatpush.msra.mxu2 %v7235_v53  ;;  %v9602_v19 = vld [vmem:[#allocation17_spill] sm:$0xff]  ;;  %v9603_v53 = vld [vmem:[#allocation18_spill] sm:$0xff] }
 0x556   :  { %3883 = vmatpush.msra.mxu3 %v7239_v59  ;;  %3824 = vmatpush.msra.mxu0 %v7241_v10  ;;  %v9604_v59 = vld [vmem:[#allocation19_spill] sm:$0xff]  ;;  %v9605_v10 = vld [vmem:[#allocation20_spill] sm:$0xff] }
 0x557   :  { %3844 = vmatpush.msra.mxu1 %v7245_v14  ;;  %3864 = vmatpush.msra.mxu2 %v7247_v27  ;;  %v9606_v14 = vld [vmem:[#allocation21_spill] sm:$0xff]  ;;  %v9607_v27 = vld [vmem:[#allocation22_spill] sm:$0xff] }
 0x558   :  { %3884 = vmatpush.msra.mxu3 %v7251_v17  ;;  %3825 = vmatpush.msra.mxu0 %v7253_v40  ;;  %v9608_v17 = vld [vmem:[#allocation23_spill] sm:$0xff]  ;;  %v9609_v40 = vld [vmem:[#allocation24_spill] sm:$0xff] }
 0x559   :  { %3845 = vmatpush.msra.mxu1 %v7257_v9  ;;  %3865 = vmatpush.msra.mxu2 %v7259_v20  ;;  %v9610_v9 = vld [vmem:[#allocation25_spill] sm:$0xff]  ;;  %v9611_v20 = vld [vmem:[#allocation26_spill] sm:$0xff] }
 0x55a   :  { %3885 = vmatpush.msra.mxu3 %v7263_v26  ;;  %3659 = vmatmul.f32.vlgmr.msrb.gmra.mxu0 %v3434_v16  ;;  %v9612_v26 = vld [vmem:[#allocation27_spill] sm:$0xff] }
 0x55b   :  { %3679 = vmatmul.f32.vlgmr.msrb.gmra.mxu1 %v3434_v16  ;;  %3699 = vmatmul.f32.vlgmr.msrb.gmra.mxu2 %v3434_v16 }
 0x55c   :  { %3719 = vmatmul.f32.vlgmr.msrb.gmra.mxu3 %v3434_v16  ;;  %3826 = vmatpush.msra.mxu0 %v7265_v7  ;;  %v9613_v7 = vld [vmem:[#allocation28_spill] sm:$0xff] }
 0x55d   :  { %3846 = vmatpush.msra.mxu1 %v7269_v32  ;;  %3866 = vmatpush.msra.mxu2 %v7271_v2  ;;  %v9614_v32 = vld [vmem:[#allocation29_spill] sm:$0xff]  ;;  %v9615_v2 = vld [vmem:[#allocation30_spill] sm:$0xff] }
 0x55e   :  { %3886 = vmatpush.msra.mxu3 %v7275_v33  ;;  %3827 = vmatpush.msra.mxu0 %v7277_v38  ;;  %v9616_v33 = vld [vmem:[#allocation31_spill] sm:$0xff]  ;;  %v9617_v38 = vld [vmem:[#allocation32_spill] sm:$0xff] }
 0x55f   :  { %3847 = vmatpush.msra.mxu1 %v7281_v39  ;;  %3867 = vmatpush.msra.mxu2 %v7283_v62  ;;  %v9618_v39 = vld [vmem:[#allocation33_spill] sm:$0xff]  ;;  %v9619_v62 = vld [vmem:[#allocation34_spill] sm:$0xff] }
 0x560   :  { %3887 = vmatpush.msra.mxu3 %v9587_v22  ;;  %3828 = vmatpush.msra.mxu0 %v9588_v11  ;;  %v9646_v22 = vld [vmem:[#allocation61_spill] sm:$0xff]  ;;  %v9647_v11 = vld [vmem:[#allocation62_spill] sm:$0xff] }
 0x561   :  { %3848 = vmatpush.msra.mxu1 %v9589_v18  ;;  %3868 = vmatpush.msra.mxu2 %v9590_v0  ;;  %v9648_v18 = vld [vmem:[#allocation63_spill] sm:$0xff]  ;;  %v9649_v0 = vld [vmem:[#allocation64_spill] sm:$0xff] }
 0x562   :  { %3888 = vmatpush.msra.mxu3 %v9591_v15  ;;  %3829 = vmatpush.msra.mxu0 %v9592_v58  ;;  %v9650_v15 = vld [vmem:[#allocation65_spill] sm:$0xff]  ;;  %v9651_v58 = vld [vmem:[#allocation66_spill] sm:$0xff] }
 0x563   :  { %3849 = vmatpush.msra.mxu1 %v9593_v46  ;;  %3869 = vmatpush.msra.mxu2 %v9594_v31  ;;  %v9652_v46 = vld [vmem:[#allocation67_spill] sm:$0xff]  ;;  %v9653_v31 = vld [vmem:[#allocation68_spill] sm:$0xff] }
 0x564   :  { %3889 = vmatpush.msra.mxu3 %v9595_v8  ;;  %3830 = vmatpush.msra.mxu0 %v9596_v61  ;;  %v9654_v8 = vld [vmem:[#allocation69_spill] sm:$0xff]  ;;  %v9655_v61 = vld [vmem:[#allocation70_spill] sm:$0xff] }
 0x565   :  { %3850 = vmatpush.msra.mxu1 %v9597_v37  ;;  %3870 = vmatpush.msra.mxu2 %v9598_v12  ;;  %v9656_v37 = vld [vmem:[#allocation71_spill] sm:$0xff]  ;;  %v9657_v12 = vld [vmem:[#allocation72_spill] sm:$0xff] }
 0x566   :  { %3890 = vmatpush.msra.mxu3 %v9599_v28  ;;  %3831 = vmatmul.f32.vlgmr.msra.gmra.mxu0 %v3434_v16  ;;  %v9658_v28 = vld [vmem:[#allocation73_spill] sm:$0xff] }
 0x567   :  { %3851 = vmatmul.f32.vlgmr.msra.gmra.mxu1 %v3434_v16  ;;  %3871 = vmatmul.f32.vlgmr.msra.gmra.mxu2 %v3434_v16 }
 0x568   :  { %3891 = vmatmul.f32.vlgmr.msra.gmra.mxu3 %v3434_v16  ;;  %4042 = vmatpush.msrb.mxu0 %v9600_v3  ;;  %v9645_v16 = vld [vmem:[#allocation60_spill] sm:$0xff]  ;;  %v9659_v3 = vld [vmem:[#allocation74_spill] sm:$0xff] }
 0x569   :  { %4062 = vmatpush.msrb.mxu1 %v9601_v23  ;;  %4082 = vmatpush.msrb.mxu2 %v9602_v19  ;;  %v9660_v23 = vld [vmem:[#allocation75_spill] sm:$0xff]  ;;  %v9661_v19 = vld [vmem:[#allocation76_spill] sm:$0xff] }
 0x56a   :  { %4102 = vmatpush.msrb.mxu3 %v9603_v53  ;;  %4043 = vmatpush.msrb.mxu0 %v9604_v59  ;;  %v9662_v53 = vld [vmem:[#allocation77_spill] sm:$0xff]  ;;  %v9663_v59 = vld [vmem:[#allocation78_spill] sm:$0xff] }
 0x56b   :  { %4063 = vmatpush.msrb.mxu1 %v9605_v10  ;;  %4083 = vmatpush.msrb.mxu2 %v9606_v14  ;;  %v9664_v10 = vld [vmem:[#allocation79_spill] sm:$0xff]  ;;  %v9665_v14 = vld [vmem:[#allocation80_spill] sm:$0xff] }
 0x56c   :  { %4103 = vmatpush.msrb.mxu3 %v9607_v27  ;;  %4044 = vmatpush.msrb.mxu0 %v9608_v17  ;;  %v9666_v27 = vld [vmem:[#allocation81_spill] sm:$0xff]  ;;  %v9667_v17 = vld [vmem:[#allocation84_spill] sm:$0xff] }
 0x56d   :  { %4064 = vmatpush.msrb.mxu1 %v9609_v40  ;;  %4084 = vmatpush.msrb.mxu2 %v9610_v9  ;;  %v9668_v40 = vld [vmem:[#allocation85_spill] sm:$0xff]  ;;  %v9669_v9 = vld [vmem:[#allocation86_spill] sm:$0xff] }
 0x56e   :  { %4104 = vmatpush.msrb.mxu3 %v9611_v20  ;;  %4045 = vmatpush.msrb.mxu0 %v9612_v26  ;;  %v9670_v20 = vld [vmem:[#allocation87_spill] sm:$0xff]  ;;  %v9671_v26 = vld [vmem:[#allocation88_spill] sm:$0xff] }
 0x56f   :  { %4065 = vmatpush.msrb.mxu1 %v9613_v7  ;;  %4085 = vmatpush.msrb.mxu2 %v9614_v32  ;;  %v9672_v7 = vld [vmem:[#allocation89_spill] sm:$0xff]  ;;  %v9673_v32 = vld [vmem:[#allocation90_spill] sm:$0xff] }
 0x570   :  { %4105 = vmatpush.msrb.mxu3 %v9615_v2  ;;  %4046 = vmatpush.msrb.mxu0 %v9616_v33  ;;  %v9674_v2 = vld [vmem:[#allocation91_spill] sm:$0xff]  ;;  %v9675_v33 = vld [vmem:[#allocation92_spill] sm:$0xff] }
 0x571   :  { %4066 = vmatpush.msrb.mxu1 %v9617_v38  ;;  %4086 = vmatpush.msrb.mxu2 %v9618_v39  ;;  %v9676_v38 = vld [vmem:[#allocation93_spill] sm:$0xff]  ;;  %v9677_v39 = vld [vmem:[#allocation94_spill] sm:$0xff] }
 0x572   :  { %4106 = vmatpush.msrb.mxu3 %v9619_v62  ;;  %4047 = vmatpush.msrb.mxu0 %v9620_v50  ;;  %v9678_v62 = vld [vmem:[#allocation95_spill] sm:$0xff]  ;;  %v9679_v50 = vld [vmem:[#allocation96_spill] sm:$0xff] }
 0x573   :  { %4067 = vmatpush.msrb.mxu1 %v9621_v44  ;;  %4087 = vmatpush.msrb.mxu2 %v9622_v1  ;;  %v9680_v44 = vld [vmem:[#allocation97_spill] sm:$0xff]  ;;  %v9681_v1 = vld [vmem:[#allocation100_spill] sm:$0xff] }
 0x574   :  { %4107 = vmatpush.msrb.mxu3 %v9623_v21  ;;  %4048 = vmatpush.msrb.mxu0 %v9624_v29  ;;  %v9682_v21 = vld [vmem:[#allocation101_spill] sm:$0xff]  ;;  %v9683_v29 = vld [vmem:[#allocation102_spill] sm:$0xff] }
 0x575   :  { %4068 = vmatpush.msrb.mxu1 %v9625_v4  ;;  %4088 = vmatpush.msrb.mxu2 %v9626_v48  ;;  %v9684_v4 = vld [vmem:[#allocation105_spill] sm:$0xff]  ;;  %v9685_v48 = vld [vmem:[#allocation106_spill] sm:$0xff] }
 0x576   :  { %4108 = vmatpush.msrb.mxu3 %v9627_v47  ;;  %4049 = vmatpush.msrb.mxu0 %v9628_v5  ;;  %v9686_v47 = vld [vmem:[#allocation107_spill] sm:$0xff]  ;;  %v9687_v5 = vld [vmem:[#allocation108_spill] sm:$0xff] }
 0x577   :  { %4069 = vmatpush.msrb.mxu1 %v9629_v52  ;;  %4089 = vmatpush.msrb.mxu2 %v9630_v56  ;;  %v9688_v52 = vld [vmem:[#allocation109_spill] sm:$0xff]  ;;  %v9689_v56 = vld [vmem:[#allocation110_spill] sm:$0xff] }
 0x578   :  { %4109 = vmatpush.msrb.mxu3 %v9631_v42  ;;  %4050 = vmatpush.msrb.mxu0 %v9632_v54  ;;  %v9690_v42 = vld [vmem:[#allocation111_spill] sm:$0xff]  ;;  %v9691_v54 = vld [vmem:[#allocation112_spill] sm:$0xff] }
 0x579   :  { %4070 = vmatpush.msrb.mxu1 %v9633_v34  ;;  %4090 = vmatpush.msrb.mxu2 %v9634_v30  ;;  %v9692_v34 = vld [vmem:[#allocation113_spill] sm:$0xff]  ;;  %v9693_v30 = vld [vmem:[#allocation114_spill] sm:$0xff] }
 0x57a   :  { %4110 = vmatpush.msrb.mxu3 %v9635_v6  ;;  %4051 = vmatpush.msrb.mxu0 %v9636_v63  ;;  %v9694_v6 = vld [vmem:[#allocation115_spill] sm:$0xff]  ;;  %v9695_v63 = vld [vmem:[#allocation117_spill] sm:$0xff] }
 0x57b   :  { %4071 = vmatpush.msrb.mxu1 %v9637_v57  ;;  %4091 = vmatpush.msrb.mxu2 %v9638_v13  ;;  %v9696_v57 = vld [vmem:[#allocation120_spill] sm:$0xff]  ;;  %v9697_v13 = vld [vmem:[#allocation121_spill] sm:$0xff] }
 0x57c   :  { %4111 = vmatpush.msrb.mxu3 %v9639_v43  ;;  %4052 = vmatpush.msrb.mxu0 %v9640_v55  ;;  %v9698_v43 = vld [vmem:[#allocation122_spill] sm:$0xff]  ;;  %v9699_v55 = vld [vmem:[#allocation125_spill] sm:$0xff] }
 0x57d   :  { %4072 = vmatpush.msrb.mxu1 %v9641_v25  ;;  %4092 = vmatpush.msrb.mxu2 %v9642_v36  ;;  %v9700_v25 = vld [vmem:[#allocation127_spill] sm:$0xff]  ;;  %v9701_v36 = vld [vmem:[#allocation128_spill] sm:$0xff] }
 0x57e   :  { %4112 = vmatpush.msrb.mxu3 %v9643_v49  ;;  %4053 = vmatpush.msrb.mxu0 %v9644_v51  ;;  %v9702_v49 = vld [vmem:[#allocation129_spill] sm:$0xff]  ;;  %v9703_v51 = vld [vmem:[#allocation130_spill] sm:$0xff] }
 0x57f   :  { %4073 = vmatpush.msrb.mxu1 %v9645_v16  ;;  %4093 = vmatpush.msrb.mxu2 %v9646_v22  ;;  %v9704_v16 = vld [vmem:[#allocation131_spill] sm:$0xff]  ;;  %v9705_v22 = vld [vmem:[#allocation133_spill] sm:$0xff] }
 0x580   :  { %4113 = vmatpush.msrb.mxu3 %v9647_v11  ;;  %4054 = vmatpush.msrb.mxu0 %v9648_v18  ;;  %v9706_v11 = vld [vmem:[#allocation134_spill] sm:$0xff]  ;;  %v9707_v18 = vld [vmem:[#allocation135_spill] sm:$0xff] }
 0x581   :  { %4074 = vmatpush.msrb.mxu1 %v9649_v0  ;;  %4094 = vmatpush.msrb.mxu2 %v9650_v15  ;;  %v9708_v0 = vld [vmem:[#allocation138_spill] sm:$0xff]  ;;  %v9709_v15 = vld [vmem:[#allocation139_spill] sm:$0xff] }
 0x582   :  { %4114 = vmatpush.msrb.mxu3 %v9651_v58  ;;  %4055 = vmatpush.msrb.mxu0 %v9652_v46  ;;  %v9710_v58 = vld [vmem:[#allocation140_spill] sm:$0xff]  ;;  %v9711_v46 = vld [vmem:[#allocation143_spill] sm:$0xff] }
 0x583   :  { %4075 = vmatpush.msrb.mxu1 %v9653_v31  ;;  %4095 = vmatpush.msrb.mxu2 %v9654_v8  ;;  %v9712_v31 = vld [vmem:[#allocation144_spill] sm:$0xff]  ;;  %v9713_v8 = vld [vmem:[#allocation145_spill] sm:$0xff] }
 0x584   :  { %4115 = vmatpush.msrb.mxu3 %v9655_v61  ;;  %4056 = vmatpush.msrb.mxu0 %v9656_v37  ;;  %v9714_v61 = vld [vmem:[#allocation146_spill] sm:$0xff]  ;;  %v9715_v37 = vld [vmem:[#allocation147_spill] sm:$0xff] }
 0x585   :  { %4076 = vmatpush.msrb.mxu1 %v9657_v12  ;;  %4096 = vmatpush.msrb.mxu2 %v9658_v28  ;;  %v9716_v12 = vld [vmem:[#allocation148_spill] sm:$0xff]  ;;  %v9717_v28 = vld [vmem:[#allocation149_spill] sm:$0xff] }
 0x586   :  { %4116 = vmatpush.msrb.mxu3 %v9659_v3  ;;  %4057 = vmatpush.msrb.mxu0 %v9660_v23  ;;  %v9718_v3 = vld [vmem:[#allocation150_spill] sm:$0xff]  ;;  %v9719_v23 = vld [vmem:[#allocation151_spill] sm:$0xff] }
 0x587   :  { %4077 = vmatpush.msrb.mxu1 %v9661_v19  ;;  %4097 = vmatpush.msrb.mxu2 %v9662_v53  ;;  %v9720_v19 = vld [vmem:[#allocation152_spill] sm:$0xff]  ;;  %v9721_v53 = vld [vmem:[#allocation153_spill] sm:$0xff] }
 0x588   :  { %4117 = vmatpush.msrb.mxu3 %v9663_v59  ;;  %4122 = vmatpush.msra.mxu0 %v9664_v10  ;;  %v9722_v59 = vld [vmem:[#allocation154_spill] sm:$0xff]  ;;  %v9723_v10 = vld [vmem:[#allocation155_spill] sm:$0xff] }
 0x589   :  { %4142 = vmatpush.msra.mxu1 %v9665_v14  ;;  %4162 = vmatpush.msra.mxu2 %v9666_v27  ;;  %v9724_v14 = vld [vmem:[#allocation82_spill] sm:$0xff]  ;;  %v9725_v27 = vld [vmem:[#allocation83_spill] sm:$0xff] }
 0x58a   :  { %4182 = vmatpush.msra.mxu3 %v9667_v17  ;;  %4123 = vmatpush.msra.mxu0 %v9668_v40  ;;  %v9726_v17 = vld [vmem:[#allocation98_spill] sm:$0xff] }
 0x58b   :  { %4143 = vmatpush.msra.mxu1 %v9669_v9  ;;  %4163 = vmatpush.msra.mxu2 %v9670_v20 }
 0x58c   :  { %4183 = vmatpush.msra.mxu3 %v9671_v26  ;;  %4124 = vmatpush.msra.mxu0 %v9672_v7 }
 0x58d   :  { %4144 = vmatpush.msra.mxu1 %v9673_v32  ;;  %4164 = vmatpush.msra.mxu2 %v9674_v2 }
 0x58e   :  { %4184 = vmatpush.msra.mxu3 %v9675_v33  ;;  %4125 = vmatpush.msra.mxu0 %v9676_v38 }
 0x58f   :  { %4145 = vmatpush.msra.mxu1 %v9677_v39  ;;  %4165 = vmatpush.msra.mxu2 %v9678_v62  ;;  %v9728_v62 = vld [vmem:[#allocation14_spill] sm:$0xff] }
 0x590   :  { %4185 = vmatpush.msra.mxu3 %v9679_v50  ;;  %4126 = vmatpush.msra.mxu0 %v9680_v44  ;;  %v9729_v44 = vld [vmem:[#allocation15_spill] sm:$0xff] }
 0x591   :  { %4146 = vmatpush.msra.mxu1 %v9681_v1  ;;  %4166 = vmatpush.msra.mxu2 %v9682_v21 }
 0x592   :  { %4186 = vmatpush.msra.mxu3 %v9683_v29  ;;  %4127 = vmatpush.msra.mxu0 %v9684_v4 }
 0x593   :  { %4147 = vmatpush.msra.mxu1 %v9685_v48  ;;  %4167 = vmatpush.msra.mxu2 %v9686_v47 }
 0x594   :  { %4187 = vmatpush.msra.mxu3 %v9687_v5  ;;  %4128 = vmatpush.msra.mxu0 %v9688_v52  ;;  %v9730_v52 = vld [vmem:[#allocation172_spill] sm:$0xff] }
 0x595   :  { %4148 = vmatpush.msra.mxu1 %v9689_v56  ;;  %4168 = vmatpush.msra.mxu2 %v9690_v42  ;;  %v218_v56 = vadd.f32 %v9730_v52, %v5269_v24  ;;  %v9733_v24 = vld [vmem:[#allocation177_spill] sm:$0xff] }
 0x596   :  { %4188 = vmatpush.msra.mxu3 %v9691_v54  ;;  %4129 = vmatpush.msra.mxu0 %v9692_v34  ;;  %v9731_v34 = vld [vmem:[#allocation174_spill] sm:$0xff] }
 0x597   :  { %4149 = vmatpush.msra.mxu1 %v9693_v30  ;;  %4169 = vmatpush.msra.mxu2 %v9694_v6  ;;  %v9732_v30 = vld [vmem:[#allocation173_spill] sm:$0xff] }
 0x598   :  { %4189 = vmatpush.msra.mxu3 %v9695_v63  ;;  %4130 = vmatpush.msra.mxu0 %v9696_v57  ;;  %v259_v6 = vadd.f32 %v9732_v30, %v9731_v34 }
 0x599   :  { %4150 = vmatpush.msra.mxu1 %v9697_v13  ;;  %4170 = vmatpush.msra.mxu2 %v9698_v43 }
 0x59a   :  { %4190 = vmatpush.msra.mxu3 %v9699_v55  ;;  %4131 = vmatpush.msra.mxu0 %v9700_v25 }
 0x59b   :  { %4151 = vmatpush.msra.mxu1 %v9701_v36  ;;  %4171 = vmatpush.msra.mxu2 %v9702_v49 }
 0x59c   :  { %4191 = vmatpush.msra.mxu3 %v9703_v51  ;;  %4132 = vmatpush.msra.mxu0 %v9704_v16  ;;  %v9734_v16 = vld [vmem:[#allocation175_spill] sm:$0xff] }
 0x59d   :  { %4152 = vmatpush.msra.mxu1 %v9705_v22  ;;  %4172 = vmatpush.msra.mxu2 %v9706_v11  ;;  %v300_v22 = vadd.f32 %v9734_v16, %v9733_v24  ;;  %v9735_v11 = vld [vmem:[#allocation178_spill] sm:$0xff] }
 0x59e   :  { %4192 = vmatpush.msra.mxu3 %v9707_v18  ;;  %4133 = vmatpush.msra.mxu0 %v9708_v0  ;;  %v9736_v18 = vld [vmem:[#allocation176_spill] sm:$0xff] }
 0x59f   :  { %4153 = vmatpush.msra.mxu1 %v9709_v15  ;;  %4173 = vmatpush.msra.mxu2 %v9710_v58  ;;  %v341_v0 = vadd.f32 %v9736_v18, %v9735_v11  ;;  %v9737_v15 = vld [vmem:[#allocation99_spill] sm:$0xff] }
 0x5a0   :  { %4193 = vmatpush.msra.mxu3 %v9711_v46  ;;  %4134 = vmatpush.msra.mxu0 %v9712_v31 }
 0x5a1   :  { %4154 = vmatpush.msra.mxu1 %v9713_v8  ;;  %4174 = vmatpush.msra.mxu2 %v9714_v61 }
 0x5a2   :  { %4194 = vmatpush.msra.mxu3 %v9715_v37  ;;  %4135 = vmatpush.msra.mxu0 %v9716_v12 }
 0x5a3   :  { %4155 = vmatpush.msra.mxu1 %v9717_v28  ;;  %4175 = vmatpush.msra.mxu2 %v7691_v60  ;;  %v9727_v60 = vld [vmem:[#allocation116_spill] sm:$0xff] }
 0x5a4   :  { %4195 = vmatpush.msra.mxu3 %v9718_v3  ;;  %4136 = vmatpush.msra.mxu0 %v9719_v23 }
 0x5a5   :  { %4156 = vmatpush.msra.mxu1 %v9720_v19  ;;  %4176 = vmatpush.msra.mxu2 %v9721_v53 }
 0x5a6   :  { %4196 = vmatpush.msra.mxu3 %v9722_v59  ;;  %4137 = vmatpush.msra.mxu0 %v9723_v10 }
 0x5a7   :  { %4157 = vmatpush.msra.mxu1 %v9724_v14  ;;  %4177 = vmatpush.msra.mxu2 %v9725_v27 }
 0x5a8   :  { %4197 = vmatpush.msra.mxu3 %v9726_v17 }
 0x5bb   :  { %v3265_v40 = vpop.xlane.xlu2 %3264 }
 0x5bc   :  { %v3266_v9 = vadd.f32 %v9727_v60, %v3265_v40 }
 0x5be   :  { %3267 = vst.msk [vmem:[%s7972_s9 + $0x28] sm:$0xff] %vm871_vm0, %v3266_v9 }
 0x5bf   :  { %v3580_v20 = vpop.f32.mrf.mxu0  ;;  %v3600_v26 = vpop.f32.mrf.mxu1 }
 0x5c6   :  { %v3620_v7 = vpop.f32.mrf.mxu2  ;;  %v3640_v32 = vpop.f32.mrf.mxu3 }
 0x5d7   :  { %v3660_v2 = vpop.f32.mrf.mxu0 }
 0x5d8   :  { %v3661_v33 = vadd.f32 %v3660_v2, %v3580_v20  ;;  %v3680_v38 = vpop.f32.mrf.mxu1  ;;  %v4406_v2 = vld [vmem:[%s7970_s7] ss:$0 sm:$0xff] }
 0x5d9   :  { %v3681_v39 = vadd.f32 %v3680_v38, %v3600_v26 }
 0x5da   :  { %v3723_v50 = vadd.f32 %v3661_v33, %v9728_v62 }
 0x5db   :  { %v3724_v1 = vadd.f32 %v3681_v39, %v9729_v44 }
 0x5dc   :  { %4372 = vtanh.f32 %v3723_v50 }
 0x5dd   :  { %4374 = vtanh.f32 %v3724_v1 }
 0x5de   :  { %v3700_v21 = vpop.f32.mrf.mxu2 }
 0x5df   :  { %v3701_v29 = vadd.f32 %v3700_v21, %v3620_v7  ;;  %v3720_v4 = vpop.f32.mrf.mxu3 }
 0x5e0   :  { %v3721_v48 = vadd.f32 %v3720_v4, %v3640_v32 }
 0x5e1   :  { %v3725_v47 = vadd.f32 %v3701_v29, %v5461_v41 }
 0x5e2   :  { %v4373_v5 = vpop.eup %4372  ;;  %v3726_v42 = vadd.f32 %v3721_v48, %v5465_v45 }
 0x5e3   :  { %v4375_v54 = vpop.eup %4374  ;;  %4376 = vtanh.f32 %v3725_v47  ;;  %v3832_v63 = vpop.f32.mrf.mxu0  ;;  %v3731_v57 = vmul.f32 0.5, %v4373_v5 }
 0x5e4   :  { %v3733_v13 = vmul.f32 0.5, %v4375_v54  ;;  %v3895_v43 = vadd.f32 %v3832_v63, %v218_v56  ;;  %v3852_v55 = vpop.f32.mrf.mxu1  ;;  %4378 = vtanh.f32 %v3726_v42 }
 0x5e5   :  { %v3896_v25 = vadd.f32 %v3852_v55, %v259_v6  ;;  %v3732_v49 = vadd.f32 0.5, %v3731_v57 }
 0x5e6   :  { %v3734_v36 = vadd.f32 0.5, %v3733_v13  ;;  %4380 = vtanh.f32 %v3895_v43 }
 0x5e7   :  { %4382 = vtanh.f32 %v3896_v25 }
 0x5e8   :  { %v3737_v58 = vmul.f32 %v3734_v36, %v9737_v15 }
 0x5e9   :  { %v4377_v51 = vpop.eup %4376 }
 0x5ea   :  { %v3738_v46 = vmul.f32 %v4377_v51, %v3732_v49  ;;  %v3872_v31 = vpop.f32.mrf.mxu2  ;;  %v4379_v8 = vpop.eup %4378 }
 0x5eb   :  { %v3897_v61 = vadd.f32 %v3872_v31, %v300_v22  ;;  %v3892_v37 = vpop.f32.mrf.mxu3  ;;  %v3735_v59 = vmul.f32 0.5, %v4379_v8 }
 0x5ec   :  { %v4381_v12 = vpop.eup %4380  ;;  %v7941_v28 = vadd.f32 %v3738_v46, %v3737_v58  ;;  %v3898_v3 = vadd.f32 %v3892_v37, %v341_v0 }
 0x5ed   :  { %v4383_v23 = vpop.eup %4382  ;;  %4384 = vtanh.f32 %v3897_v61  ;;  %v3903_v19 = vmul.f32 0.5, %v4381_v12  ;;  %v3736_v17 = vadd.f32 0.5, %v3735_v59 }
 0x5ee   :  { %4386 = vtanh.f32 %v7941_v28  ;;  %v3905_v53 = vmul.f32 0.5, %v4383_v23 }
 0x5ef   :  { %4388 = vtanh.f32 %v3898_v3  ;;  %v3904_v14 = vadd.f32 0.5, %v3903_v19 }
 0x5f0   :  { %v3906_v10 = vadd.f32 0.5, %v3905_v53 }
 0x5f2   :  { %v3909_v9 = vmul.f32 %v3906_v10, %v7750_v35 }
 0x5f3   :  { %v4385_v27 = vpop.eup %4384 }
 0x5f4   :  { %v4387_v40 = vpop.eup %4386  ;;  %v3910_v20 = vmul.f32 %v4385_v27, %v3904_v14 }
 0x5f5   :  { %v3741_v26 = vmul.f32 %v4387_v40, %v3736_v17  ;;  %v4389_v7 = vpop.eup %4388 }
 0x5f6   :  { %v3911_v32 = vadd.f32 %v3910_v20, %v3909_v9  ;;  %v3907_v38 = vmul.f32 0.5, %v4389_v7 }
 0x5f7   :  { %4058 = vmatmul.f32.vlgmr.msrb.gmra.mxu0 %v3741_v26  ;;  %4078 = vmatmul.f32.vlgmr.msrb.gmra.mxu1 %v3741_v26  ;;  %v3742_v33 = vmul.f32 %v4406_v2, %v3741_v26 }
 0x5f8   :  { %4390 = vtanh.f32 %v3911_v32  ;;  %4098 = vmatmul.f32.vlgmr.msrb.gmra.mxu2 %v3741_v26  ;;  %4118 = vmatmul.f32.vlgmr.msrb.gmra.mxu3 %v3741_v26  ;;  %v3908_v39 = vadd.f32 0.5, %v3907_v38 }
 0x5f9   :  { %3743 = vadd.xlane.f32.xlu0 %v3742_v33 }
 0x5fe   :  { %v4391_v50 = vpop.eup %4390 }
 0x5ff   :  { %v3913_v1 = vmul.f32 %v4391_v50, %v3908_v39 }
 0x601   :  { %4138 = vmatmul.f32.vlgmr.msra.gmra.mxu0 %v3913_v1  ;;  %4158 = vmatmul.f32.vlgmr.msra.gmra.mxu1 %v3913_v1 }
 0x602   :  { %4178 = vmatmul.f32.vlgmr.msra.gmra.mxu2 %v3913_v1  ;;  %4198 = vmatmul.f32.vlgmr.msra.gmra.mxu3 %v3913_v1 }
 0x66c   :  { %v3744_v35 = vpop.xlane.xlu0 %3743 }
 0x66d   :  { %v3745_v21 = vadd.f32 %v9727_v60, %v3744_v35 }
 0x66f   :  { %3746 = vst.msk [vmem:[%s7972_s9 + $0x30] sm:$0xff] %vm871_vm0, %v3745_v21 }
 0x674   :  { %v4059_v29 = vpop.f32.mrf.mxu0  ;;  %v4079_v4 = vpop.f32.mrf.mxu1 }
 0x67b   :  { %v4099_v48 = vpop.f32.mrf.mxu2  ;;  %v4119_v47 = vpop.f32.mrf.mxu3 }
 0x67e   :  { %v4139_v5 = vpop.f32.mrf.mxu0  ;;  %v4159_v52 = vpop.f32.mrf.mxu1 }
 0x67f   :  { %v4140_v56 = vadd.f32 %v4139_v5, %v4059_v29  ;;  %v4160_v42 = vadd.f32 %v4159_v52, %v4079_v4 }
 0x681   :  { %v4202_v54 = vadd.f32 %v4140_v56, %v9728_v62  ;;  %v4203_v34 = vadd.f32 %v4160_v42, %v9729_v44 }
 0x683   :  { %4392 = vtanh.f32 %v4202_v54 }
 0x684   :  { %4394 = vtanh.f32 %v4203_v34 }
 0x685   :  { %v4179_v30 = vpop.f32.mrf.mxu2  ;;  %v4199_v6 = vpop.f32.mrf.mxu3 }
 0x686   :  { %v4180_v63 = vadd.f32 %v4179_v30, %v4099_v48  ;;  %v4200_v57 = vadd.f32 %v4199_v6, %v4119_v47 }
 0x688   :  { %v4204_v13 = vadd.f32 %v4180_v63, %v5461_v41  ;;  %v4205_v55 = vadd.f32 %v4200_v57, %v5465_v45 }
 0x689   :  { %v4393_v43 = vpop.eup %4392 }
 0x68a   :  { %v4395_v25 = vpop.eup %4394  ;;  %4396 = vtanh.f32 %v4204_v13  ;;  %v4210_v36 = vmul.f32 0.5, %v4393_v43 }
 0x68b   :  { %v4212_v49 = vmul.f32 0.5, %v4395_v25  ;;  %4398 = vtanh.f32 %v4205_v55 }
 0x68c   :  { %v4211_v62 = vadd.f32 0.5, %v4210_v36 }
 0x68d   :  { %v4213_v51 = vadd.f32 0.5, %v4212_v49 }
 0x68f   :  { %v4216_v44 = vmul.f32 %v4213_v51, %v7941_v28 }
 0x690   :  { %v4397_v24 = vpop.eup %4396 }
 0x691   :  { %v4217_v16 = vmul.f32 %v4397_v24, %v4211_v62  ;;  %v4399_v22 = vpop.eup %4398 }
 0x692   :  { %v4214_v18 = vmul.f32 0.5, %v4399_v22 }
 0x693   :  { %v4218_v11 = vadd.f32 %v4217_v16, %v4216_v44 }
 0x694   :  { %v4215_v0 = vadd.f32 0.5, %v4214_v18 }
 0x695   :  { %4400 = vtanh.f32 %v4218_v11 }
 0x69b   :  { %v4401_v41 = vpop.eup %4400 }
 0x69c   :  { %v4220_v15 = vmul.f32 %v4401_v41, %v4215_v0 }
 0x69e   :  { %v4221_v58 = vmul.f32 %v4406_v2, %v4220_v15 }
 0x6a0   :  { %4222 = vadd.xlane.f32.xlu1 %v4221_v58 }
 0x713   :  { %v4223_v45 = vpop.xlane.xlu1 %4222 }
 0x714   :  { %v4224_v46 = vadd.f32 %v9727_v60, %v4223_v45 }
 0x716   :  { %4225 = vst.msk [vmem:[%s7972_s9 + $0x38] sm:$0xff] %vm871_vm0, %v4224_v46 }
 0x717   :  { %4230 = vsyncpa [#allocation5], 1 }
 0x718   :  { %4231 = vsyncpa [#allocation7], 1 }
 0x719   :  { %4232 = vsyncpa [#allocation10], 1 }

</bundles_post_ra>
